<compile_context>
chip_gen: v5e
topology: v5e:2x2
jax: 0.10.0
libtpu: 0.0.40
codegen_flags: <defaults>
</compile_context>

<pallas_src>
import math

import jax
import jax.numpy as jnp
from jax import lax
from jax.experimental import pallas as pl
from jax.experimental.pallas import tpu as pltpu

D = 640          # emb_features (fixed in Demo.__init__)
LN_EPS = 1e-5    # torch.nn.LayerNorm default
LANE = 128       # logits padded to one lane tile for dense stores
NEG_INF = -1e30  # block-mask fill for the fused two-direction attention


# ---------------------------------------------------------------------------
# Fused kernel (one grid step == one episode):
#   QKV projection -> block-masked attention (both directions at once) ->
#   fc + bias + residual + LayerNorm -> prototype cross term -> -euclidean^2.
# ---------------------------------------------------------------------------
def _make_fused_kernel(way, shot, query):
    n_sup = way * shot
    n_qry = way * query
    n_total = n_sup + n_qry
    inv_shot = 1.0 / shot

    def kernel(x_ref, wqkv_ref, fcw_ref, fcb_ref, gamma_ref, beta_ref, o_ref):
        x = x_ref[...]                                        # [n_total, D] f32

        # Fused QKV projection for every row of the episode (bf16 in, f32 acc).
        # NOTE: 1/sqrt(D) is pre-folded into the Wq columns host-side.
        qkv = jnp.dot(x.astype(jnp.bfloat16), wqkv_ref[...],
                      preferred_element_type=jnp.float32)     # [n_total, 3D]
        Q = qkv[:, 0:D]
        K = qkv[:, D:2 * D]
        V = qkv[:, 2 * D:3 * D]

        # Both attention directions fused under one block mask:
        # support rows attend only to query keys; query rows only to support keys.
        s = lax.dot_general(Q, K, (((1,), (1,)), ((), ())),
                            preferred_element_type=jnp.float32)   # [n_total, n_total]
        row = lax.broadcasted_iota(jnp.int32, (n_total, n_total), 0)
        col = lax.broadcasted_iota(jnp.int32, (n_total, n_total), 1)
        allowed = jnp.logical_xor(row < n_sup, col < n_sup)
        s = jnp.where(allowed, s, NEG_INF)
        m = jnp.max(s, axis=-1, keepdims=True)
        p = jnp.exp(s - m)
        denom = jnp.sum(p, axis=-1, keepdims=True)
        attn = p * pl.reciprocal(denom, approx=True)
        # dropout(attn): identity in eval mode
        ctx = jnp.dot(attn, V, preferred_element_type=jnp.float32)  # [n_total, D]

        # fc + bias (dropout identity) + residual + LayerNorm (one-pass stats).
        proj = jnp.dot(ctx.astype(jnp.bfloat16), fcw_ref[...],
                       preferred_element_type=jnp.float32)
        y = proj + fcb_ref[...] + x
        mu = jnp.mean(y, axis=-1, keepdims=True)
        msq = jnp.mean(y * y, axis=-1, keepdims=True)
        var = msq - mu * mu
        adapted = (y - mu) * lax.rsqrt(var + LN_EPS) * gamma_ref[...] + beta_ref[...]

        sup = adapted[:n_sup]                                  # adapted_support
        qry = adapted[n_sup:]                                  # adapted_query

        # prototype[w] = mean_s sup[s*way + w]  (shot-major support layout).
        # Cross term with a constant lane-padded averaging matrix so the output
        # store stays lane-dense and no [128, D] intermediate is ever built:
        #   cross = (qry @ sup^T) @ AvgPad,  AvgPad[r, c] = inv_shot iff r%way == c.
        r_s = lax.broadcasted_iota(jnp.int32, (n_sup, LANE), 0)
        c_s = lax.broadcasted_iota(jnp.int32, (n_sup, LANE), 1)
        avg_pad = jnp.where(r_s % way == c_s,
                            jnp.float32(inv_shot), jnp.float32(0.0))

        scores_qs = lax.dot_general(qry, sup, (((1,), (1,)), ((), ())),
                                    preferred_element_type=jnp.float32)  # [n_qry, n_sup]
        cross = jnp.dot(scores_qs, avg_pad,
                        preferred_element_type=jnp.float32)              # [n_qry, 128]

        # ||prototype||^2 via one tiny [way, n_sup] averaging matmul, then
        # scattered into lane positions [0, way) of a dense 128-lane row.
        r_w = lax.broadcasted_iota(jnp.int32, (way, n_sup), 0)
        c_w = lax.broadcasted_iota(jnp.int32, (way, n_sup), 1)
        avg_small = jnp.where(c_w % way == r_w,
                              jnp.float32(inv_shot), jnp.float32(0.0))
        proto = jnp.dot(avg_small, sup,
                        preferred_element_type=jnp.float32)              # [way, D]
        p_sq = jnp.sum(proto * proto, axis=-1, keepdims=True)            # [way, 1]
        r_e = lax.broadcasted_iota(jnp.int32, (way, LANE), 0)
        c_e = lax.broadcasted_iota(jnp.int32, (way, LANE), 1)
        eye_pad = jnp.where(r_e == c_e, jnp.float32(1.0), jnp.float32(0.0))
        p_sq_pad = jnp.sum(p_sq * eye_pad, axis=0, keepdims=True)        # [1, 128]

        q_sq = jnp.sum(qry * qry, axis=-1, keepdims=True)                # [n_qry, 1]

        # -||q - p||^2 = 2*q.p - ||q||^2 - ||p||^2  (valid lanes are [0, way))
        o_ref[...] = 2.0 * cross - q_sq - p_sq_pad

    return kernel


# ---------------------------------------------------------------------------
# Demo.base_forward (post-encoder part) — single fused pallas_call with an
# episode grid so weights stay VMEM-resident across episodes.
# batch_emb: [E, n_total, 640] (or [n_total, 640] for a single episode).
# ---------------------------------------------------------------------------
def demo_base_forward(batch_emb, params, way, shot, query):
    n_sup = way * shot
    n_qry = way * query
    n_total = n_sup + n_qry

    squeeze = batch_emb.ndim == 2
    if squeeze:
        batch_emb = batch_emb[None]
    E = batch_emb.shape[0]
    x = batch_emb[:, :n_total, :].astype(jnp.float32)

    const = lambda e: (0, 0)   # weight blocks: resident across grid steps
    in_specs = [
        pl.BlockSpec((None, n_total, D), lambda e: (e, 0, 0)),   # x (per-episode)
        pl.BlockSpec((D, 3 * D), const),                          # wqkv (bf16)
        pl.BlockSpec((D, D), const),                              # fcw  (bf16)
        pl.BlockSpec((1, D), const),                              # fcb
        pl.BlockSpec((1, D), const),                              # ln_gamma
        pl.BlockSpec((1, D), const),                              # ln_beta
    ]
    out_specs = pl.BlockSpec((None, n_qry, LANE), lambda e: (e, 0, 0))

    flops_per_ep = (2 * n_total * D * 3 * D            # fused QKV projection
                    + 2 * 2 * n_total * n_total * D    # QK^T + attn @ V
                    + 2 * n_total * D * D              # fc
                    + 12 * n_total * D)                # LN / elementwise (rough)
    bytes_weights = (D * 3 * D + D * D) * 2 + 3 * D * 4
    bytes_per_ep = n_total * D * 4 + n_qry * LANE * 4
    cost = pl.CostEstimate(
        flops=int(E * flops_per_ep),
        transcendentals=int(E * (n_total * n_total + n_total)),
        bytes_accessed=int(bytes_weights + E * bytes_per_ep))

    logits_pad = pl.pallas_call(
        _make_fused_kernel(way, shot, query),
        out_shape=jax.ShapeDtypeStruct((E, n_qry, LANE), jnp.float32),
        grid=(E,),
        in_specs=in_specs,
        out_specs=out_specs,
        compiler_params=pltpu.CompilerParams(
            dimension_semantics=("parallel",)),
        cost_estimate=cost,
    )(x, params["wqkv"], params["fcw"], params["fcb"],
      params["ln_gamma"], params["ln_beta"])

    logits = logits_pad[:, :, :way]
    return logits[0] if squeeze else logits


# ---------------------------------------------------------------------------
# Deterministic parameter initialization (mirrors MultiHeadAttention.__init__).
# f32 reference copies plus fused/bf16 kernel copies (1/sqrt(D) folded into Wq).
# ---------------------------------------------------------------------------
def init_params(key):
    k1, k2, k3, k4, k5 = jax.random.split(key, 5)
    std_qk = math.sqrt(2.0 / (D + D))     # input_dim + k_dim
    std_v = math.sqrt(2.0 / (D + D))      # input_dim + v_dim
    std_fc = math.sqrt(2.0 / (D + D))     # xavier_normal_
    bound = 1.0 / math.sqrt(D)            # torch Linear default bias init

    wq_t = jax.random.normal(k1, (D, D), jnp.float32) * std_qk
    wk_t = jax.random.normal(k2, (D, D), jnp.float32) * std_qk
    wv_t = jax.random.normal(k3, (D, D), jnp.float32) * std_v
    fcw_t = jax.random.normal(k4, (D, D), jnp.float32) * std_fc
    fcb = jax.random.uniform(k5, (1, D), jnp.float32, -bound, bound)

    inv_sqrt_d = 1.0 / math.sqrt(D)
    wqkv = jnp.concatenate(
        [wq_t * inv_sqrt_d, wk_t, wv_t], axis=1).astype(jnp.bfloat16)

    return {
        # f32 reference copies
        "wq_t": wq_t, "wk_t": wk_t, "wv_t": wv_t, "fcw_t": fcw_t,
        "fcb": fcb,
        "ln_gamma": jnp.ones((1, D), jnp.float32),
        "ln_beta": jnp.zeros((1, D), jnp.float32),
        # kernel copies: fused QKV weight (Wq pre-scaled) and fc weight in bf16
        "wqkv": wqkv,
        "fcw": fcw_t.astype(jnp.bfloat16),
    }


# ---------------------------------------------------------------------------
# Pure-JAX f32 reference of Demo.base_forward (post-encoder) for validation.
# ---------------------------------------------------------------------------
def reference_base_forward(batch_emb, params, way, shot, query):
    def mha(q, k, v):
        Q = q @ params["wq_t"]
        K = k @ params["wk_t"]
        V = v @ params["wv_t"]
        s = (Q @ K.T) / math.sqrt(D)
        a = jax.nn.softmax(s, axis=-1)
        ctx = a @ V
        y = ctx @ params["fcw_t"] + params["fcb"] + q
        mu = y.mean(-1, keepdims=True)
        var = ((y - mu) ** 2).mean(-1, keepdims=True)
        return (y - mu) / jnp.sqrt(var + LN_EPS) * params["ln_gamma"] + params["ln_beta"]

    n_sup = way * shot
    sup = batch_emb[:n_sup]
    qry = batch_emb[n_sup:way * (shot + query)]
    a_sup = mha(sup, qry, qry)
    a_qry = mha(qry, sup, sup)
    proto = a_sup.reshape(shot, way, D).mean(axis=0)
    diff = a_qry[:, None, :] - proto[None, :, :]
    return -jnp.sum(diff * diff, axis=-1)


if __name__ == "__main__":
    way, shot, query = 2, 2, 2
    n_total = way * (shot + query)       # 8 embeddings per episode
    num_episodes = 3

    key = jax.random.PRNGKey(0)
    k_emb, k_params = jax.random.split(key)
    # Pre-encoded embeddings standing in for ResNet(x) output, batched episodes.
    batch_emb = jax.random.normal(
        k_emb, (num_episodes, n_total, D), jnp.float32)
    params = init_params(k_params)

    logits = demo_base_forward(batch_emb, params, way, shot, query)
    logits = jax.block_until_ready(logits)

    assert logits.shape == (num_episodes, way * query, way), logits.shape
    assert bool(jnp.all(jnp.isfinite(logits)))

    for e in range(num_episodes):
        ref = reference_base_forward(batch_emb[e], params, way, shot, query)
        assert bool(jnp.allclose(logits[e], ref, rtol=0.1, atol=1.0)), (
            "episode %d max abs err = %f"
            % (e, float(jnp.max(jnp.abs(logits[e] - ref)))))

    print("KERNEL_OK")
</pallas_src>

<mosaic_0001>
module attributes {stable_mosaic.version = 11 : i64} {
  func.func @kernel(%arg0: i32, %arg1: memref<1x8x640xf32, #tpu.memory_space<vmem>>, %arg2: memref<640x1920xbf16, #tpu.memory_space<vmem>>, %arg3: memref<640x640xbf16, #tpu.memory_space<vmem>>, %arg4: memref<1x640xf32, #tpu.memory_space<vmem>>, %arg5: memref<1x640xf32, #tpu.memory_space<vmem>>, %arg6: memref<1x640xf32, #tpu.memory_space<vmem>>, %arg7: memref<1x4x128xf32, #tpu.memory_space<vmem>>) attributes {dimension_semantics = [#tpu.dimension_semantics<parallel>], iteration_bounds = array<i64: 3>, scalar_prefetch = 0 : i64, scratch_operands = 0 : i64, tpu.core_type = #tpu.core_type<tc>, window_params = [{transform_indices = @transform_0, window_bounds = array<i64: 1, 8, 640>}, {pipeline_mode = #tpu.pipeline_mode<synchronous>, transform_indices = @transform_1, window_bounds = array<i64: 640, 1920>}, {pipeline_mode = #tpu.pipeline_mode<synchronous>, transform_indices = @transform_2, window_bounds = array<i64: 640, 640>}, {pipeline_mode = #tpu.pipeline_mode<synchronous>, transform_indices = @transform_3, window_bounds = array<i64: 1, 640>}, {pipeline_mode = #tpu.pipeline_mode<synchronous>, transform_indices = @transform_4, window_bounds = array<i64: 1, 640>}, {pipeline_mode = #tpu.pipeline_mode<synchronous>, transform_indices = @transform_5, window_bounds = array<i64: 1, 640>}, {transform_indices = @transform_6, window_bounds = array<i64: 1, 4, 128>}]} {
    %c0 = arith.constant 0 : index
    %c0_0 = arith.constant 0 : index
    %c0_1 = arith.constant 0 : index
    %0 = vector.load %arg1[%c0, %c0_0, %c0_1] : memref<1x8x640xf32, #tpu.memory_space<vmem>>, vector<1x8x640xf32>
    %1 = vector.shape_cast %0 : vector<1x8x640xf32> to vector<8x640xf32>
    %2 = arith.truncf %1 : vector<8x640xf32> to vector<8x640xbf16>
    %c0_2 = arith.constant 0 : index
    %c0_3 = arith.constant 0 : index
    %3 = vector.load %arg2[%c0_2, %c0_3] : memref<640x1920xbf16, #tpu.memory_space<vmem>>, vector<640x1920xbf16>
    %cst = arith.constant dense<0.000000e+00> : vector<8x1920xf32>
    %4 = tpu.matmul %2, %3, %cst {dimension_numbers = #tpu.dot_dimension_numbers<[1], [0], [0], [1], [0, 0, 1, 1], [], []>} : vector<8x640xbf16>, vector<640x1920xbf16>, vector<8x1920xf32> -> vector<8x1920xf32>
    %5 = vector.extract_strided_slice %4 {offsets = [0, 0], sizes = [8, 640], strides = [1, 1]} : vector<8x1920xf32> to vector<8x640xf32>
    %6 = vector.extract_strided_slice %4 {offsets = [0, 640], sizes = [8, 640], strides = [1, 1]} : vector<8x1920xf32> to vector<8x640xf32>
    %7 = vector.extract_strided_slice %4 {offsets = [0, 1280], sizes = [8, 640], strides = [1, 1]} : vector<8x1920xf32> to vector<8x640xf32>
    %cst_4 = arith.constant dense<0.000000e+00> : vector<8x8xf32>
    %8 = tpu.matmul %5, %6, %cst_4 {dimension_numbers = #tpu.dot_dimension_numbers<[1], [1], [0], [0], [0, 0, 1, 0], [], []>} : vector<8x640xf32>, vector<8x640xf32>, vector<8x8xf32> -> vector<8x8xf32>
    %9 = tpu.iota {dimensions = array<i32: 0>} : vector<8x8xi32>
    %10 = tpu.iota {dimensions = array<i32: 1>} : vector<8x8xi32>
    %c4_i32 = arith.constant 4 : i32
    %11 = vector.broadcast %c4_i32 : i32 to vector<8x8xi32>
    %12 = arith.cmpi slt, %9, %11 : vector<8x8xi32>
    %c4_i32_5 = arith.constant 4 : i32
    %13 = vector.broadcast %c4_i32_5 : i32 to vector<8x8xi32>
    %14 = arith.cmpi slt, %10, %13 : vector<8x8xi32>
    %15 = arith.xori %12, %14 : vector<8x8xi1>
    %cst_6 = arith.constant -1.000000e+30 : f32
    %16 = vector.broadcast %cst_6 : f32 to vector<8x8xf32>
    %17 = arith.select %15, %8, %16 : vector<8x8xi1>, vector<8x8xf32>
    %cst_7 = arith.constant dense<0xFF800000> : vector<8xf32>
    %18 = vector.multi_reduction <maximumf>, %17, %cst_7 [1] : vector<8x8xf32> to vector<8xf32>
    %19 = vector.shape_cast %18 : vector<8xf32> to vector<8x1xf32>
    %20 = vector.broadcast %19 : vector<8x1xf32> to vector<8x8xf32>
    %21 = arith.subf %17, %20 : vector<8x8xf32>
    %22 = math.exp %21 : vector<8x8xf32>
    %cst_8 = arith.constant dense<0.000000e+00> : vector<8xf32>
    %23 = vector.multi_reduction <add>, %22, %cst_8 [1] : vector<8x8xf32> to vector<8xf32>
    %24 = vector.shape_cast %23 : vector<8xf32> to vector<8x1xf32>
    %25 = tpu.reciprocal %24 {approx = true} : vector<8x1xf32> -> vector<8x1xf32>
    %26 = vector.broadcast %25 : vector<8x1xf32> to vector<8x8xf32>
    %27 = arith.mulf %22, %26 : vector<8x8xf32>
    %cst_9 = arith.constant dense<0.000000e+00> : vector<8x640xf32>
    %28 = tpu.matmul %27, %7, %cst_9 {dimension_numbers = #tpu.dot_dimension_numbers<[1], [0], [0], [1], [0, 0, 1, 1], [], []>} : vector<8x8xf32>, vector<8x640xf32>, vector<8x640xf32> -> vector<8x640xf32>
    %29 = arith.truncf %28 : vector<8x640xf32> to vector<8x640xbf16>
    %c0_10 = arith.constant 0 : index
    %c0_11 = arith.constant 0 : index
    %30 = vector.load %arg3[%c0_10, %c0_11] : memref<640x640xbf16, #tpu.memory_space<vmem>>, vector<640x640xbf16>
    %cst_12 = arith.constant dense<0.000000e+00> : vector<8x640xf32>
    %31 = tpu.matmul %29, %30, %cst_12 {dimension_numbers = #tpu.dot_dimension_numbers<[1], [0], [0], [1], [0, 0, 1, 1], [], []>} : vector<8x640xbf16>, vector<640x640xbf16>, vector<8x640xf32> -> vector<8x640xf32>
    %c0_13 = arith.constant 0 : index
    %c0_14 = arith.constant 0 : index
    %32 = vector.load %arg4[%c0_13, %c0_14] : memref<1x640xf32, #tpu.memory_space<vmem>>, vector<1x640xf32>
    %33 = vector.broadcast %32 : vector<1x640xf32> to vector<8x640xf32>
    %34 = arith.addf %31, %33 : vector<8x640xf32>
    %35 = arith.addf %34, %1 : vector<8x640xf32>
    %cst_15 = arith.constant dense<0.000000e+00> : vector<8xf32>
    %36 = vector.multi_reduction <add>, %35, %cst_15 [1] : vector<8x640xf32> to vector<8xf32>
    %37 = vector.shape_cast %36 : vector<8xf32> to vector<8x1xf32>
    %cst_16 = arith.constant 6.400000e+02 : f32
    %38 = vector.broadcast %cst_16 : f32 to vector<8x1xf32>
    %39 = arith.divf %37, %38 : vector<8x1xf32>
    %40 = arith.mulf %35, %35 : vector<8x640xf32>
    %cst_17 = arith.constant dense<0.000000e+00> : vector<8xf32>
    %41 = vector.multi_reduction <add>, %40, %cst_17 [1] : vector<8x640xf32> to vector<8xf32>
    %42 = vector.shape_cast %41 : vector<8xf32> to vector<8x1xf32>
    %cst_18 = arith.constant 6.400000e+02 : f32
    %43 = vector.broadcast %cst_18 : f32 to vector<8x1xf32>
    %44 = arith.divf %42, %43 : vector<8x1xf32>
    %45 = arith.mulf %39, %39 : vector<8x1xf32>
    %46 = arith.subf %44, %45 : vector<8x1xf32>
    %47 = vector.broadcast %39 : vector<8x1xf32> to vector<8x640xf32>
    %48 = arith.subf %35, %47 : vector<8x640xf32>
    %cst_19 = arith.constant 9.99999974E-6 : f32
    %49 = vector.broadcast %cst_19 : f32 to vector<8x1xf32>
    %50 = arith.addf %46, %49 : vector<8x1xf32>
    %51 = math.rsqrt %50 : vector<8x1xf32>
    %52 = vector.broadcast %51 : vector<8x1xf32> to vector<8x640xf32>
    %53 = arith.mulf %48, %52 : vector<8x640xf32>
    %c0_20 = arith.constant 0 : index
    %c0_21 = arith.constant 0 : index
    %54 = vector.load %arg5[%c0_20, %c0_21] : memref<1x640xf32, #tpu.memory_space<vmem>>, vector<1x640xf32>
    %55 = vector.broadcast %54 : vector<1x640xf32> to vector<8x640xf32>
    %56 = arith.mulf %53, %55 : vector<8x640xf32>
    %c0_22 = arith.constant 0 : index
    %c0_23 = arith.constant 0 : index
    %57 = vector.load %arg6[%c0_22, %c0_23] : memref<1x640xf32, #tpu.memory_space<vmem>>, vector<1x640xf32>
    %58 = vector.broadcast %57 : vector<1x640xf32> to vector<8x640xf32>
    %59 = arith.addf %56, %58 : vector<8x640xf32>
    %60 = vector.extract_strided_slice %59 {offsets = [0, 0], sizes = [4, 640], strides = [1, 1]} : vector<8x640xf32> to vector<4x640xf32>
    %61 = vector.extract_strided_slice %59 {offsets = [4, 0], sizes = [4, 640], strides = [1, 1]} : vector<8x640xf32> to vector<4x640xf32>
    %62 = tpu.iota {dimensions = array<i32: 0>} : vector<4x128xi32>
    %63 = tpu.iota {dimensions = array<i32: 1>} : vector<4x128xi32>
    %c2_i32 = arith.constant 2 : i32
    %c0_i32 = arith.constant 0 : i32
    %64 = arith.cmpi eq, %c2_i32, %c0_i32 : i32
    %c1_i32 = arith.constant 1 : i32
    %65 = arith.select %64, %c1_i32, %c2_i32 : i32
    %66 = vector.broadcast %65 : i32 to vector<4x128xi32>
    %67 = arith.remsi %62, %66 : vector<4x128xi32>
    %c0_i32_24 = arith.constant 0 : i32
    %68 = vector.broadcast %c0_i32_24 : i32 to vector<4x128xi32>
    %69 = arith.cmpi ne, %67, %68 : vector<4x128xi32>
    %c0_i32_25 = arith.constant 0 : i32
    %70 = vector.broadcast %c0_i32_25 : i32 to vector<4x128xi32>
    %71 = arith.cmpi slt, %67, %70 : vector<4x128xi32>
    %c0_i32_26 = arith.constant 0 : i32
    %72 = arith.cmpi slt, %65, %c0_i32_26 : i32
    %73 = vector.broadcast %72 : i1 to vector<4x128xi1>
    %74 = vector.broadcast %73 : vector<4x128xi1> to vector<4x128xi1>
    %75 = arith.xori %71, %74 : vector<4x128xi1>
    %76 = arith.andi %75, %69 : vector<4x128xi1>
    %77 = vector.broadcast %65 : i32 to vector<4x128xi32>
    %78 = arith.addi %67, %77 : vector<4x128xi32>
    %79 = arith.select %76, %78, %67 : vector<4x128xi1>, vector<4x128xi32>
    %80 = arith.cmpi eq, %79, %63 : vector<4x128xi32>
    %cst_27 = arith.constant 5.000000e-01 : f32
    %cst_28 = arith.constant 0.000000e+00 : f32
    %81 = vector.broadcast %cst_27 : f32 to vector<4x128xf32>
    %82 = vector.broadcast %cst_28 : f32 to vector<4x128xf32>
    %83 = arith.select %80, %81, %82 : vector<4x128xi1>, vector<4x128xf32>
    %cst_29 = arith.constant dense<0.000000e+00> : vector<4x4xf32>
    %84 = tpu.matmul %61, %60, %cst_29 {dimension_numbers = #tpu.dot_dimension_numbers<[1], [1], [0], [0], [0, 0, 1, 0], [], []>} : vector<4x640xf32>, vector<4x640xf32>, vector<4x4xf32> -> vector<4x4xf32>
    %cst_30 = arith.constant dense<0.000000e+00> : vector<4x128xf32>
    %85 = tpu.matmul %84, %83, %cst_30 {dimension_numbers = #tpu.dot_dimension_numbers<[1], [0], [0], [1], [0, 0, 1, 1], [], []>} : vector<4x4xf32>, vector<4x128xf32>, vector<4x128xf32> -> vector<4x128xf32>
    %86 = tpu.iota {dimensions = array<i32: 0>} : vector<2x4xi32>
    %87 = tpu.iota {dimensions = array<i32: 1>} : vector<2x4xi32>
    %c2_i32_31 = arith.constant 2 : i32
    %c0_i32_32 = arith.constant 0 : i32
    %88 = arith.cmpi eq, %c2_i32_31, %c0_i32_32 : i32
    %c1_i32_33 = arith.constant 1 : i32
    %89 = arith.select %88, %c1_i32_33, %c2_i32_31 : i32
    %90 = vector.broadcast %89 : i32 to vector<2x4xi32>
    %91 = arith.remsi %87, %90 : vector<2x4xi32>
    %c0_i32_34 = arith.constant 0 : i32
    %92 = vector.broadcast %c0_i32_34 : i32 to vector<2x4xi32>
    %93 = arith.cmpi ne, %91, %92 : vector<2x4xi32>
    %c0_i32_35 = arith.constant 0 : i32
    %94 = vector.broadcast %c0_i32_35 : i32 to vector<2x4xi32>
    %95 = arith.cmpi slt, %91, %94 : vector<2x4xi32>
    %c0_i32_36 = arith.constant 0 : i32
    %96 = arith.cmpi slt, %89, %c0_i32_36 : i32
    %97 = vector.broadcast %96 : i1 to vector<2x4xi1>
    %98 = vector.broadcast %97 : vector<2x4xi1> to vector<2x4xi1>
    %99 = arith.xori %95, %98 : vector<2x4xi1>
    %100 = arith.andi %99, %93 : vector<2x4xi1>
    %101 = vector.broadcast %89 : i32 to vector<2x4xi32>
    %102 = arith.addi %91, %101 : vector<2x4xi32>
    %103 = arith.select %100, %102, %91 : vector<2x4xi1>, vector<2x4xi32>
    %104 = arith.cmpi eq, %103, %86 : vector<2x4xi32>
    %cst_37 = arith.constant 5.000000e-01 : f32
    %cst_38 = arith.constant 0.000000e+00 : f32
    %105 = vector.broadcast %cst_37 : f32 to vector<2x4xf32>
    %106 = vector.broadcast %cst_38 : f32 to vector<2x4xf32>
    %107 = arith.select %104, %105, %106 : vector<2x4xi1>, vector<2x4xf32>
    %cst_39 = arith.constant dense<0.000000e+00> : vector<2x640xf32>
    %108 = tpu.matmul %107, %60, %cst_39 {dimension_numbers = #tpu.dot_dimension_numbers<[1], [0], [0], [1], [0, 0, 1, 1], [], []>} : vector<2x4xf32>, vector<4x640xf32>, vector<2x640xf32> -> vector<2x640xf32>
    %109 = arith.mulf %108, %108 : vector<2x640xf32>
    %cst_40 = arith.constant dense<0.000000e+00> : vector<2xf32>
    %110 = vector.multi_reduction <add>, %109, %cst_40 [1] : vector<2x640xf32> to vector<2xf32>
    %111 = vector.shape_cast %110 : vector<2xf32> to vector<2x1xf32>
    %112 = tpu.iota {dimensions = array<i32: 0>} : vector<2x128xi32>
    %113 = tpu.iota {dimensions = array<i32: 1>} : vector<2x128xi32>
    %114 = arith.cmpi eq, %112, %113 : vector<2x128xi32>
    %cst_41 = arith.constant 1.000000e+00 : f32
    %cst_42 = arith.constant 0.000000e+00 : f32
    %115 = vector.broadcast %cst_41 : f32 to vector<2x128xf32>
    %116 = vector.broadcast %cst_42 : f32 to vector<2x128xf32>
    %117 = arith.select %114, %115, %116 : vector<2x128xi1>, vector<2x128xf32>
    %118 = vector.broadcast %111 : vector<2x1xf32> to vector<2x128xf32>
    %119 = arith.mulf %118, %117 : vector<2x128xf32>
    %cst_43 = arith.constant dense<0.000000e+00> : vector<128xf32>
    %120 = vector.multi_reduction <add>, %119, %cst_43 [0] : vector<2x128xf32> to vector<128xf32>
    %121 = vector.shape_cast %120 : vector<128xf32> to vector<1x128xf32>
    %122 = arith.mulf %61, %61 : vector<4x640xf32>
    %cst_44 = arith.constant dense<0.000000e+00> : vector<4xf32>
    %123 = vector.multi_reduction <add>, %122, %cst_44 [1] : vector<4x640xf32> to vector<4xf32>
    %124 = vector.shape_cast %123 : vector<4xf32> to vector<4x1xf32>
    %cst_45 = arith.constant 2.000000e+00 : f32
    %125 = vector.broadcast %cst_45 : f32 to vector<4x128xf32>
    %126 = arith.mulf %125, %85 : vector<4x128xf32>
    %127 = vector.broadcast %124 : vector<4x1xf32> to vector<4x128xf32>
    %128 = arith.subf %126, %127 : vector<4x128xf32>
    %129 = vector.broadcast %121 : vector<1x128xf32> to vector<4x128xf32>
    %130 = arith.subf %128, %129 : vector<4x128xf32>
    %c0_46 = arith.constant 0 : index
    %c0_47 = arith.constant 0 : index
    %c0_48 = arith.constant 0 : index
    %131 = vector.load %arg7[%c0_46, %c0_47, %c0_48] : memref<1x4x128xf32, #tpu.memory_space<vmem>>, vector<1x4x128xf32>
    %132 = vector.shape_cast %131 : vector<1x4x128xf32> to vector<4x128xf32>
    %133 = vector.shape_cast %130 : vector<4x128xf32> to vector<1x4x128xf32>
    tpu.vector_store %arg7[%c0_46, %c0_47, %c0_48], %133 {strides = array<i32>} : memref<1x4x128xf32, #tpu.memory_space<vmem>>, vector<1x4x128xf32>,
    return
  }
  func.func @transform_0(%arg0: i32) -> (i32, i32, i32) {
    %c0_i32 = arith.constant 0 : i32
    %c0_i32_0 = arith.constant 0 : i32
    %c0_i32_1 = arith.constant 0 : i32
    return %arg0, %c0_i32, %c0_i32_0 : i32, i32, i32
  }
  func.func @transform_1(%arg0: i32) -> (i32, i32) {
    %c0_i32 = arith.constant 0 : i32
    %c0_i32_0 = arith.constant 0 : i32
    %c0_i32_1 = arith.constant 0 : i32
    return %c0_i32, %c0_i32_0 : i32, i32
  }
  func.func @transform_2(%arg0: i32) -> (i32, i32) {
    %c0_i32 = arith.constant 0 : i32
    %c0_i32_0 = arith.constant 0 : i32
    %c0_i32_1 = arith.constant 0 : i32
    return %c0_i32, %c0_i32_0 : i32, i32
  }
  func.func @transform_3(%arg0: i32) -> (i32, i32) {
    %c0_i32 = arith.constant 0 : i32
    %c0_i32_0 = arith.constant 0 : i32
    %c0_i32_1 = arith.constant 0 : i32
    return %c0_i32, %c0_i32_0 : i32, i32
  }
  func.func @transform_4(%arg0: i32) -> (i32, i32) {
    %c0_i32 = arith.constant 0 : i32
    %c0_i32_0 = arith.constant 0 : i32
    %c0_i32_1 = arith.constant 0 : i32
    return %c0_i32, %c0_i32_0 : i32, i32
  }
  func.func @transform_5(%arg0: i32) -> (i32, i32) {
    %c0_i32 = arith.constant 0 : i32
    %c0_i32_0 = arith.constant 0 : i32
    %c0_i32_1 = arith.constant 0 : i32
    return %c0_i32, %c0_i32_0 : i32, i32
  }
  func.func @transform_6(%arg0: i32) -> (i32, i32, i32) {
    %c0_i32 = arith.constant 0 : i32
    %c0_i32_0 = arith.constant 0 : i32
    %c0_i32_1 = arith.constant 0 : i32
    return %arg0, %c0_i32, %c0_i32_0 : i32, i32, i32
  }
}

</mosaic_0001>

<bundles_post_ra>
// kernel: tpu_custom_call.1
= control target key start
LH: loop header
LB: loop body
LE: loop exit
PB: predicated region body
PF: predicated region fallthrough
CT: control target
= control target key end

     0   :  { %s12368_s0 = inlined_call_operand.hbm [shape: f32[3,8,640], index: 0, kind: input, shape index: {}]   ;;  %s12369_s1 = inlined_call_operand.hbm [shape: bf16[640,1920], index: 1, kind: input, shape index: {}]   ;;  %s12370_s2 = inlined_call_operand.hbm [shape: bf16[640,640], index: 2, kind: input, shape index: {}]   ;;  %s12371_s3 = inlined_call_operand.hbm [shape: f32[1,640], index: 3, kind: input, shape index: {}]   ;;  %s12372_s4 = inlined_call_operand.hbm [shape: f32[1,640], index: 4, kind: input, shape index: {}]   ;;  %s12373_s5 = inlined_call_operand.hbm [shape: f32[1,640], index: 5, kind: input, shape index: {}]   ;;  %s12374_s6 = inlined_call_operand.hbm [shape: f32[3,4,128], index: 6, kind: output, shape index: {}]  }
   0x1   :  { %12375 = sst [smem:[#allocation19_spill]] %s12369_s1 }
   0x2   :  { %12376 = sst [smem:[#allocation20_spill]] %s12370_s2 }
   0x3   :  { %12377 = sst [smem:[#allocation21_spill]] %s12371_s3 }
   0x4   :  { %11 = vsyncpa [#allocation3], 0 }
   0x5   :  { %13 = vsyncpa [#allocation3 + $0x1], 0 }
   0x6   :  { %14 = vsyncpa [#allocation6], 0 }
   0x7   :  { %15 = vsyncpa [#allocation9], 0 }
   0x8   :  { %16 = vsyncpa [#allocation12], 0 }
   0x9   :  { %17 = vsyncpa [#allocation4], 0 }
   0xa   :  { %19 = vsyncpa [#allocation4 + $0x1], 0  ;;  %s11876_s21 = smov 0   ;;  %s11878_s22 = smov 0  }
   0xb   :  { %s11880_s23 = smov 0   ;;  %s11882_s24 = smov 0  }
   0xc LB: > { %s12378_s1 = sld [smem:[#allocation19_spill]]  ;;  %s11900_s28 = sadd.s32 4294967295, %s11828_s24   ;;  %s11828_s24 = sphi %s11882_s24, %s12390_s24   ;;  %s11824_s23 = sphi %s11880_s23, %s12389_s23   ;;  %s11820_s22 = sphi %s11878_s22, %s12388_s22   ;;  %s11816_s21 = sphi %s11876_s21, %s12387_s21  }
   0xd   : > { %p7415_p0 = scmp.ge.s32.totalorder %s11828_s24, 1  ;;  %p46_p1 = scmp.eq.s32.totalorder %s11900_s28, 0 }
   0xe   : > { %p187_p2 = scmp.lt.s32.totalorder %s11828_s24, 4  ;;  %s11830_s30 = smov [#allocation5]  }
   0xf   : > { %s200_s7 = sshll.u32 %s11830_s30, 4  ;;  %s12380_s3 = sld [smem:[#allocation21_spill]]  ;;  %s201_s7 = int_to_ptr.vmem [resolvable:$true] %s200_s7 }
  0x10   : > { %p11905_p3 = pnand %p7415_p0, %p187_p2  ;;  %s12382_s2 = sld [smem:[#allocation20_spill]] }
  0x11   : > { %s11831_s15 = smov [#allocation8]   ;;  %s11832_s17 = smov 960  }
  0x12   : > { %s198_s27 = sshll.u32 %s12378_s1, 4  ;;  %p11478_p4 = pneg %p11905_p3  ;;  %s199_s27 = int_to_ptr.hbm [resolvable:$true] %s198_s27 }
  0x13   : > { %s229_s16 = sshll.u32 %s11831_s15, 4  ;;  %s11833_s18 = smov 60   ;;  %s230_s16 = int_to_ptr.vmem [resolvable:$true] %s229_s16 }
  0x14   : > { %p11916_p5 = pnand %p11478_p4, %p46_p1  ;;  %s11834_s19 = smov [#allocation7]  }
  0x15   : > { %s227_s10 = sshll.u32 %s12380_s3, 4  ;;  %s214_s20 = sshll.u32 %s11834_s19, 4  ;;  %s228_s10 = int_to_ptr.hbm [resolvable:$true] %s227_s10  ;;  %s215_s20 = int_to_ptr.vmem [resolvable:$true] %s214_s20 }
  0x16   : > { %s212_s14 = sshll.u32 %s12382_s2, 4  ;;  %s239_s30 = sshll.u32 %s12372_s4, 4  ;;  %s213_s14 = int_to_ptr.hbm [resolvable:$true] %s212_s14  ;;  %s240_s30 = int_to_ptr.hbm [resolvable:$true] %s239_s30 }
  0x17   : > { %11481 = dma.hbm_to_vmem [thread:$0]  (!%p11916_p5), %s199_s27, 76800, %s201_s7, [#allocation6], %s11832_s17, %s11832_s17, %s11833_s18  }
  0x18   : > { %11487 = dma.hbm_to_vmem [thread:$0]  (!%p11916_p5), %s228_s10, 80, %s230_s16, [#allocation9]  }
  0x19   : > { %s11835_s8 = smov 320   ;;  %s11836_s9 = smov 20  }
  0x1a   : > { %11484 = dma.hbm_to_vmem [thread:$0]  (!%p11916_p5), %s213_s14, 25600, %s215_s20, [#allocation6], %s11835_s8, %s11835_s8, %s11836_s9  }
  0x1b   : > { %s11837_s27 = smov [#allocation10]   ;;  %s251_s13 = sshll.u32 %s12373_s5, 4  ;;  %s252_s13 = int_to_ptr.hbm [resolvable:$true] %s251_s13 }
  0x1c   : > { %s241_s7 = sshll.u32 %s11837_s27, 4  ;;  %s11838_s14 = smov [#allocation11]   ;;  %s242_s7 = int_to_ptr.vmem [resolvable:$true] %s241_s7 }
  0x1d   : > { %11490 = dma.hbm_to_vmem [thread:$0]  (!%p11916_p5), %s240_s30, 80, %s242_s7, [#allocation9]  }
  0x1e   : > { %s253_s15 = sshll.u32 %s11838_s14, 4  ;;  %s7414_s16 = sadd.s32 4294967294, %s11828_s24   ;;  %s254_s15 = int_to_ptr.vmem [resolvable:$true] %s253_s15 }
  0x1f   : > { %11493 = dma.hbm_to_vmem [thread:$0]  (!%p11916_p5), %s252_s13, 80, %s254_s15, [#allocation12]  }
  0x20   : > { %s11941_s17 = sadd.s32 1, %s11828_s24   ;;  %s32_s18 = sadd.s32 1, %s11824_s23 }
  0x21   : > { %s29_s19 = ssub.s32 %s11828_s24, %s11941_s17  ;;  %p39_p6 = scmp.ne.s32.totalorder %s11824_s23, %s11820_s22 }
  0x22   : > { %p30_p7 = scmp.eq.s32.totalorder %s29_s19, 0  ;;  %p40_p8 = scmp.eq.s32.totalorder %s11828_s24, 0 }
  0x23   : > { %p45_p9 = scmp.ne.s32.totalorder %s11820_s22, %s11816_s21  ;;  %p174_p10 = scmp.eq.s32.totalorder %s11900_s28, 2 }
  0x24   : > { %s11953_s20 = scalar_select %p30_p7, %s11824_s23, %s32_s18  }
  0x25   : > { %p41_p11 = por %p40_p8, %p39_p6  ;;  %p11957_p12 = por %p46_p1, %p45_p9 }
  0x26   : > { %p11961_p13 = por %p174_p10, %p39_p6  ;;  %p180_p0 = scmp.eq.s32.totalorder %s7414_s16, 2 }
  0x27   : > { %p11507_p2 = scmp.lt.s32.totalorder %s11828_s24, 3  ;;  %s264_s26 = sand.u32 1, %s11824_s23  }
  0x28   : > { %p11967_p4 = por %p180_p0, %p45_p9  ;;  %s11451_s8 = smul.u32 40, %s264_s26 }
  0x29   : > { %p11971_p5 = pnand %p11507_p2, %p41_p11  ;;  %s11452_s27 = smul.u32 40, %s11828_s24 }
  0x2a   : > { %s268_s13 = scalar_lea.vmem [#allocation2], %s11451_s8  ;;  %s265_s16 = scalar_lea.sflag [#allocation3], %s264_s26 }
  0x2b   : > { %s273_s12 = scalar_lea.hbm %s12368_s0, %s11452_s27  ;;  %s277_s14 = sshll.u32 %s268_s13, 4  ;;  %s278_s14 = int_to_ptr.vmem [resolvable:$true] %s277_s14 }
  0x2c   : > { %s275_s15 = sshll.u32 %s273_s12, 4  ;;  %p11724_p7 = pneg %p11971_p5  ;;  %s276_s15 = int_to_ptr.hbm [resolvable:$true] %s275_s15 }
  0x2d   : > { %s11720_s18 = sshra.s32 %s276_s15, 4  ;;  %s11727_s3 = scalar_lea.hbm %s12368_s0, 120  ;;  %s11721_s18 = int_to_ptr.hbm [resolvable:$true] %s11720_s18 }
  0x2e   : > { %s11722_s19 = scalar_lea.hbm %s11721_s18, 40  ;;  %p11728_p10 = scmp.lt.s32.totalorder %s11721_s18, %s12368_s0 }
  0x2f   : > { %p11723_p6 = scmp.ne.s32.totalorder %s11721_s18, %s11722_s19  ;;  %p11729_p11 = scmp.lt.s32.totalorder %s11727_s3, %s11722_s19 }
  0x31   : > { %p11725_p8 = pnand %p11724_p7, %p11723_p6  ;;  %p11730_p0 = por %p11729_p11, %p11728_p10 }
  0x33   : > { %p11726_p9 = pneg %p11725_p8 }
  0x35   : > { %p11731_p2 = pnand %p11730_p0, %p11726_p9 }
  0x37   : > { %11734 = shalt.err (!%p11731_p2)
}
  0x38   : > { %11497 = dma.hbm_to_vmem [thread:$0]  (!%p11971_p5), %s276_s15, 640, %s278_s14, %s265_s16  }
  0x39   : > { %286 = sbr.rel (%p11905_p3) target bundleno = 2087 (0x827), region = 44  ;;  %s11992_s26 = sand.u32 (!%p11905_p3), 1, %s11820_s22  }
  0x3a   : > { %s11453_s1 = smul.u32 (!%p11905_p3), 40, %s11992_s26  ;;  %s289_s2 = scalar_lea.sflag (!%p11905_p3), [#allocation3], %s11992_s26 }
  0x3c   : > { %s11996_s8 = scalar_lea.vmem (!%p11905_p3), [#allocation2], %s11453_s1 }
  0x3e   : > { %11795 = dma.done.wait (%p11957_p12), %s289_s2, 640  }
  0x3f   : > { %11797 = vsyncadd (%p11957_p12), %s289_s2, 4294966656 }
  0x40   : > { %11799 = dma.done.wait (%p46_p1), [#allocation6], 102400  }
  0x41   : > { %11801 = vsyncadd (%p46_p1), [#allocation6], 4294864896 }
  0x42   : > { %11803 = dma.done.wait (%p46_p1), [#allocation9], 160  }
  0x43   : > { %11805 = vsyncadd (%p46_p1), [#allocation9], 4294967136 }
  0x44   : > { %11807 = dma.done.wait (%p46_p1), [#allocation12], 80  }
  0x45   : > { %11809 = vsyncadd (%p46_p1), [#allocation12], 4294967216  ;;  %v7852_v0 = vld [vmem:[#allocation5 + $0x348] sm:$0xf]  ;;  %v10763_v1 = vld [vmem:[#allocation5 + $0x380] sm:$0xf0] }
  0x46   : > { %v8332_v2 = vld [vmem:[#allocation5 + $0x708] sm:$0xf]  ;;  %v7853_v3 = vor.u32 %v10763_v1, %v7852_v0  ;;  %v10883_v4 = vld [vmem:[#allocation5 + $0x740] sm:$0xf0]  ;;  %v7792_v11 = vld [vmem:[#allocation5 + $0x2d0] sm:$0xf] }
  0x47   : > { %v8812_v5 = vld [vmem:[#allocation5 + $0xac8] sm:$0xf]  ;;  %v11003_v6 = vld [vmem:[#allocation5 + $0xb00] sm:$0xf0]  ;;  %v8333_v7 = vor.u32 %v10883_v4, %v8332_v2  ;;  %v10748_v13 = vld [vmem:[#allocation5 + $0x308] sm:$0xf0] }
  0x48   : > { %v8813_v8 = vor.u32 %v11003_v6, %v8812_v5  ;;  %v9292_v9 = vld [vmem:[#allocation5 + $0xe88] sm:$0xf]  ;;  %v11123_v10 = vld [vmem:[#allocation5 + $0xec0] sm:$0xf0]  ;;  %4037 = vmatpush.bf16.msra.mxu0 %v7853_v3  ;;  %v8272_v14 = vld [vmem:[#allocation5 + $0x690] sm:$0xf]  ;;  %v7793_v16 = vor.u32 %v10748_v13, %v7792_v11 }
  0x49   : > { %v9293_v12 = vor.u32 %v11123_v10, %v9292_v9  ;;  %v10868_v15 = vld [vmem:[#allocation5 + $0x6c8] sm:$0xf0]  ;;  %4050 = vmatpush.bf16.msra.mxu1 %v8333_v7  ;;  %v8752_v18 = vld [vmem:[#allocation5 + $0xa50] sm:$0xf]  ;;  %v7732_v23 = vld [vmem:[#allocation5 + $0x258] sm:$0xf] }
  0x4a   : > { %4063 = vmatpush.bf16.msra.mxu2 %v8813_v8  ;;  %v8273_v17 = vor.u32 %v10868_v15, %v8272_v14  ;;  %v10988_v19 = vld [vmem:[#allocation5 + $0xa88] sm:$0xf0]  ;;  %v9232_v20 = vld [vmem:[#allocation5 + $0xe10] sm:$0xf]  ;;  %v10733_v24 = vld [vmem:[#allocation5 + $0x290] sm:$0xf0] }
  0x4b   : > { %4076 = vmatpush.bf16.msra.mxu3 %v9293_v12  ;;  %v8753_v21 = vor.u32 %v10988_v19, %v8752_v18  ;;  %v11108_v22 = vld [vmem:[#allocation5 + $0xe48] sm:$0xf0]  ;;  %v8212_v26 = vld [vmem:[#allocation5 + $0x618] sm:$0xf]  ;;  %v10853_v27 = vld [vmem:[#allocation5 + $0x650] sm:$0xf0]  ;;  %v7733_v29 = vor.u32 %v10733_v24, %v7732_v23 }
  0x4c   : > { %v9233_v25 = vor.u32 %v11108_v22, %v9232_v20  ;;  %v8692_v28 = vld [vmem:[#allocation5 + $0x9d8] sm:$0xf]  ;;  %4038 = vmatpush.bf16.msra.mxu0 %v7793_v16  ;;  %v10973_v30 = vld [vmem:[#allocation5 + $0xa10] sm:$0xf0]  ;;  %v8213_v33 = vor.u32 %v10853_v27, %v8212_v26  ;;  %v7672_v35 = vld [vmem:[#allocation5 + $0x1e0] sm:$0xf] }
  0x4d   : > { %v9172_v31 = vld [vmem:[#allocation5 + $0xd98] sm:$0xf]  ;;  %v11093_v32 = vld [vmem:[#allocation5 + $0xdd0] sm:$0xf0]  ;;  %4051 = vmatpush.bf16.msra.mxu1 %v8273_v17  ;;  %v8693_v34 = vor.u32 %v10973_v30, %v8692_v28  ;;  %v10718_v36 = vld [vmem:[#allocation5 + $0x218] sm:$0xf0] }
  0x4e   : > { %4064 = vmatpush.bf16.msra.mxu2 %v8753_v21  ;;  %v8152_v37 = vld [vmem:[#allocation5 + $0x5a0] sm:$0xf]  ;;  %v9173_v38 = vor.u32 %v11093_v32, %v9172_v31  ;;  %v10838_v39 = vld [vmem:[#allocation5 + $0x5d8] sm:$0xf0]  ;;  %v7673_v44 = vor.u32 %v10718_v36, %v7672_v35  ;;  %v7612_v47 = vld [vmem:[#allocation5 + $0x168] sm:$0xf] }
  0x4f   : > { %4077 = vmatpush.bf16.msra.mxu3 %v9233_v25  ;;  %v8632_v40 = vld [vmem:[#allocation5 + $0x960] sm:$0xf]  ;;  %v10958_v41 = vld [vmem:[#allocation5 + $0x998] sm:$0xf0]  ;;  %v8153_v45 = vor.u32 %v10838_v39, %v8152_v37  ;;  %v10703_v48 = vld [vmem:[#allocation5 + $0x1a0] sm:$0xf0] }
  0x50   : > { %v9112_v42 = vld [vmem:[#allocation5 + $0xd20] sm:$0xf]  ;;  %v11078_v43 = vld [vmem:[#allocation5 + $0xd58] sm:$0xf0]  ;;  %4039 = vmatpush.bf16.msra.mxu0 %v7733_v29  ;;  %v8633_v46 = vor.u32 %v10958_v41, %v8632_v40  ;;  %v8092_v49 = vld [vmem:[#allocation5 + $0x528] sm:$0xf]  ;;  %v7613_v56 = vor.u32 %v10703_v48, %v7612_v47 }
  0x51   : > { %4052 = vmatpush.bf16.msra.mxu1 %v8213_v33  ;;  %v9113_v50 = vor.u32 %v11078_v43, %v9112_v42  ;;  %v10823_v51 = vld [vmem:[#allocation5 + $0x560] sm:$0xf0]  ;;  %v8572_v52 = vld [vmem:[#allocation5 + $0x8e8] sm:$0xf]  ;;  %v7552_v59 = vld [vmem:[#allocation5 + $0xf0] sm:$0xf] }
  0x52   : > { %4065 = vmatpush.bf16.msra.mxu2 %v8693_v34  ;;  %v10943_v53 = vld [vmem:[#allocation5 + $0x920] sm:$0xf0]  ;;  %v9052_v54 = vld [vmem:[#allocation5 + $0xca8] sm:$0xf]  ;;  %v8093_v57 = vor.u32 %v10823_v51, %v8092_v49  ;;  %v10688_v60 = vld [vmem:[#allocation5 + $0x128] sm:$0xf0] }
  0x53   : > { %4078 = vmatpush.bf16.msra.mxu3 %v9173_v38  ;;  %v11063_v55 = vld [vmem:[#allocation5 + $0xce0] sm:$0xf0]  ;;  %v8573_v58 = vor.u32 %v10943_v53, %v8572_v52  ;;  %v8032_v61 = vld [vmem:[#allocation5 + $0x4b0] sm:$0xf]  ;;  %v10808_v63 = vld [vmem:[#allocation5 + $0x4e8] sm:$0xf0]  ;;  %v7553_v4 = vor.u32 %v10688_v60, %v7552_v59 }
  0x54   : > { %4040 = vmatpush.bf16.msra.mxu0 %v7673_v44  ;;  %v9053_v62 = vor.u32 %v11063_v55, %v9052_v54  ;;  %v8512_v0 = vld [vmem:[#allocation5 + $0x870] sm:$0xf]  ;;  %v10928_v1 = vld [vmem:[#allocation5 + $0x8a8] sm:$0xf0]  ;;  %v8033_v5 = vor.u32 %v10808_v63, %v8032_v61  ;;  %v7492_v7 = vld [vmem:[#allocation5 + $0x78] sm:$0xf] }
  0x55   : > { %4053 = vmatpush.bf16.msra.mxu1 %v8153_v45  ;;  %v8992_v2 = vld [vmem:[#allocation5 + $0xc30] sm:$0xf]  ;;  %v11048_v3 = vld [vmem:[#allocation5 + $0xc68] sm:$0xf0]  ;;  %v8513_v6 = vor.u32 %v10928_v1, %v8512_v0  ;;  %v10673_v8 = vld [vmem:[#allocation5 + $0xb0] sm:$0xf0] }
  0x56   : > { %4066 = vmatpush.bf16.msra.mxu2 %v8633_v46  ;;  %v7972_v9 = vld [vmem:[#allocation5 + $0x438] sm:$0xf]  ;;  %v8993_v10 = vor.u32 %v11048_v3, %v8992_v2  ;;  %v10793_v11 = vld [vmem:[#allocation5 + $0x470] sm:$0xf0]  ;;  %v7493_v16 = vor.u32 %v10673_v8, %v7492_v7  ;;  %v7432_v17 = vld [vmem:[#allocation5] sm:$0xf] }
  0x57   : > { %4079 = vmatpush.bf16.msra.mxu3 %v9113_v50  ;;  %v8452_v12 = vld [vmem:[#allocation5 + $0x7f8] sm:$0xf]  ;;  %v10913_v13 = vld [vmem:[#allocation5 + $0x830] sm:$0xf0]  ;;  %v10658_v18 = vld [vmem:[#allocation5 + $0x38] sm:$0xf0]  ;;  %v7973_v19 = vor.u32 %v10793_v11, %v7972_v9 }
  0x58   : > { %4041 = vmatpush.bf16.msra.mxu0 %v7613_v56  ;;  %v8932_v14 = vld [vmem:[#allocation5 + $0xbb8] sm:$0xf]  ;;  %v11033_v15 = vld [vmem:[#allocation5 + $0xbf0] sm:$0xf0]  ;;  %v8453_v20 = vor.u32 %v10913_v13, %v8452_v12  ;;  %v7912_v21 = vld [vmem:[#allocation5 + $0x3c0] sm:$0xf]  ;;  %v7433_v31 = vor.u32 %v10658_v18, %v7432_v17 }
  0x59   : > { %4054 = vmatpush.bf16.msra.mxu1 %v8093_v57  ;;  %v10778_v22 = vld [vmem:[#allocation5 + $0x3f8] sm:$0xf0]  ;;  %v8392_v23 = vld [vmem:[#allocation5 + $0x780] sm:$0xf]  ;;  %v8933_v24 = vor.u32 %v11033_v15, %v8932_v14  ;;  %v9772_v28 = vld [vmem:[#allocation5 + $0x1248] sm:$0xf] }
  0x5a   : > { %4067 = vmatpush.bf16.msra.mxu2 %v8573_v58  ;;  %v10898_v25 = vld [vmem:[#allocation5 + $0x7b8] sm:$0xf0]  ;;  %v8872_v26 = vld [vmem:[#allocation5 + $0xb40] sm:$0xf]  ;;  %v11243_v29 = vld [vmem:[#allocation5 + $0x1280] sm:$0xf0]  ;;  %v7913_v35 = vor.u32 %v10778_v22, %v7912_v21 }
  0x5b   : > { %4080 = vmatpush.bf16.msra.mxu3 %v9053_v62  ;;  %v11018_v27 = vld [vmem:[#allocation5 + $0xb78] sm:$0xf0]  ;;  %v10756_v30 = vld [vmem:[#allocation5 + $0x34c] sm:$0xf]  ;;  %v7854_v32 = vld [vmem:[#allocation5 + $0x384] sm:$0xf0]  ;;  %v8393_v36 = vor.u32 %v10898_v25, %v8392_v23  ;;  %v9773_v40 = vor.u32 %v11243_v29, %v9772_v28 }
  0x5c   : > { %4042 = vmatpush.bf16.msra.mxu0 %v7553_v4  ;;  %v10876_v33 = vld [vmem:[#allocation5 + $0x70c] sm:$0xf]  ;;  %v8334_v34 = vld [vmem:[#allocation5 + $0x744] sm:$0xf0]  ;;  %v8873_v39 = vor.u32 %v11018_v27, %v8872_v26  ;;  %v7857_v41 = vor.u32 %v10756_v30, %v7854_v32  ;;  %v9712_v43 = vld [vmem:[#allocation5 + $0x11d0] sm:$0xf] }
  0x5d   : > { %4055 = vmatpush.bf16.msra.mxu1 %v8033_v5  ;;  %v10996_v37 = vld [vmem:[#allocation5 + $0xacc] sm:$0xf]  ;;  %v8814_v38 = vld [vmem:[#allocation5 + $0xb04] sm:$0xf0]  ;;  %v8337_v42 = vor.u32 %v10876_v33, %v8334_v34  ;;  %v10741_v45 = vld [vmem:[#allocation5 + $0x2d4] sm:$0xf] }
  0x5e   : > { %4068 = vmatpush.bf16.msra.mxu2 %v8513_v6  ;;  %v11228_v44 = vld [vmem:[#allocation5 + $0x1208] sm:$0xf0]  ;;  %v8817_v46 = vor.u32 %v10996_v37, %v8814_v38  ;;  %v7794_v47 = vld [vmem:[#allocation5 + $0x30c] sm:$0xf0]  ;;  %v10861_v48 = vld [vmem:[#allocation5 + $0x694] sm:$0xf] }
  0x5f   : > { %4081 = vmatpush.bf16.msra.mxu3 %v8993_v10  ;;  %v8274_v49 = vld [vmem:[#allocation5 + $0x6cc] sm:$0xf0]  ;;  %v10981_v50 = vld [vmem:[#allocation5 + $0xa54] sm:$0xf]  ;;  %v9713_v52 = vor.u32 %v11228_v44, %v9712_v43  ;;  %v9652_v53 = vld [vmem:[#allocation5 + $0x1158] sm:$0xf]  ;;  %v7797_v54 = vor.u32 %v10741_v45, %v7794_v47 }
  0x60   : > { %4043 = vmatpush.bf16.msra.mxu0 %v7493_v16  ;;  %v8754_v51 = vld [vmem:[#allocation5 + $0xa8c] sm:$0xf0]  ;;  %v8277_v55 = vor.u32 %v10861_v48, %v8274_v49  ;;  %v11213_v56 = vld [vmem:[#allocation5 + $0x1190] sm:$0xf0]  ;;  %v10726_v57 = vld [vmem:[#allocation5 + $0x25c] sm:$0xf] }
  0x61   : > { %4056 = vmatpush.bf16.msra.mxu1 %v7973_v19  ;;  %v7734_v58 = vld [vmem:[#allocation5 + $0x294] sm:$0xf0]  ;;  %v8757_v59 = vor.u32 %v10981_v50, %v8754_v51  ;;  %v10846_v60 = vld [vmem:[#allocation5 + $0x61c] sm:$0xf]  ;;  %v9653_v0 = vor.u32 %v11213_v56, %v9652_v53  ;;  %v350_v3 = vld [vmem:[%s11996_s8 + $0x18] sm:$0xff]  ;;  %vm5120_vm3 = vcmask 64512  }
  0x62   : > { %4069 = vmatpush.bf16.msra.mxu2 %v8453_v20  ;;  %v8214_v61 = vld [vmem:[#allocation5 + $0x654] sm:$0xf0]  ;;  %v10966_v62 = vld [vmem:[#allocation5 + $0x9dc] sm:$0xf]  ;;  %v7737_v1 = vor.u32 %v10726_v57, %v7734_v58  ;;  %v9592_v5 = vld [vmem:[#allocation5 + $0x10e0] sm:$0xf]  ;;  %v12018_v9 = vpack.c.bf16 %v350_v3, %v350_v3 }
  0x63   : > { %4082 = vmatpush.bf16.msra.mxu3 %v8933_v24  ;;  %v8694_v63 = vld [vmem:[#allocation5 + $0xa14] sm:$0xf0]  ;;  %v8217_v4 = vor.u32 %v10846_v60, %v8214_v61  ;;  %v11198_v6 = vld [vmem:[#allocation5 + $0x1118] sm:$0xf0]  ;;  %v10711_v7 = vld [vmem:[#allocation5 + $0x1e4] sm:$0xf] }
  0x64   : > { %4044 = vmatpush.bf16.msra.mxu0 %v7433_v31  ;;  %v347_v2 = vld [vmem:[%s11996_s8] sm:$0xff]  ;;  %v8697_v10 = vor.u32 %v10966_v62, %v8694_v63  ;;  %v7674_v11 = vld [vmem:[#allocation5 + $0x21c] sm:$0xf0]  ;;  %v10831_v12 = vld [vmem:[#allocation5 + $0x5a4] sm:$0xf]  ;;  %v9593_v17 = vor.u32 %v11198_v6, %v9592_v5  ;;  %vm7078_vm9 = vcmask 1043456  }
  0x65   : > { %4057 = vmatpush.bf16.msra.mxu1 %v7913_v35  ;;  %v12016_v8 = vpack.c.bf16 %v347_v2, %v347_v2  ;;  %v8154_v13 = vld [vmem:[#allocation5 + $0x5dc] sm:$0xf0]  ;;  %v10951_v14 = vld [vmem:[#allocation5 + $0x964] sm:$0xf]  ;;  %v9532_v18 = vld [vmem:[#allocation5 + $0x1068] sm:$0xf]  ;;  %v7677_v20 = vor.u32 %v10711_v7, %v7674_v11 }
  0x66   : > { %4070 = vmatpush.bf16.msra.mxu2 %v8393_v36  ;;  %v8634_v15 = vld [vmem:[#allocation5 + $0x99c] sm:$0xf0]  ;;  %v8157_v21 = vor.u32 %v10831_v12, %v8154_v13  ;;  %v11183_v22 = vld [vmem:[#allocation5 + $0x10a0] sm:$0xf0]  ;;  %v10696_v23 = vld [vmem:[#allocation5 + $0x16c] sm:$0xf] }
  0x67   : > { %4083 = vmatpush.bf16.msra.mxu3 %v8873_v39  ;;  %4045 = vmatmul.bf16.vlgmr.msra.gmra.mxu0 %v12016_v8  ;;  %v349_v16 = vld [vmem:[%s11996_s8 + $0x10] sm:$0xff]  ;;  %v8637_v25 = vor.u32 %v10951_v14, %v8634_v15  ;;  %v348_v28 = vld [vmem:[%s11996_s8 + $0x8] sm:$0xff]  ;;  %v9533_v32 = vor.u32 %v11183_v22, %v9532_v18  ;;  %v9472_v35 = vld [vmem:[#allocation5 + $0xff0] sm:$0xf]  ;;  %vm7261_vm10 = vcmask 1047556   ;;  %vm7074_vm12 = vcmask 31744  }
  0x68   : > { %4089 = vmatpush.bf16.msrb.mxu0 %v9773_v40  ;;  %v12023_v19 = vpack.c.bf16 %v349_v16, %v349_v16  ;;  %v7614_v24 = vld [vmem:[#allocation5 + $0x1a4] sm:$0xf0]  ;;  %v10816_v26 = vld [vmem:[#allocation5 + $0x52c] sm:$0xf]  ;;  %v12027_v31 = vpack.c.bf16 %v348_v28, %v348_v28  ;;  %v10681_v37 = vld [vmem:[#allocation5 + $0xf4] sm:$0xf] }
  0x69   : > { %4102 = vmatpush.bf16.msrb.mxu1 %v7857_v41  ;;  %v8094_v27 = vld [vmem:[#allocation5 + $0x564] sm:$0xf0]  ;;  %v10936_v29 = vld [vmem:[#allocation5 + $0x8ec] sm:$0xf]  ;;  %v7617_v33 = vor.u32 %v10696_v23, %v7614_v24  ;;  %v7554_v39 = vld [vmem:[#allocation5 + $0x12c] sm:$0xf0] }
  0x6a   : > { %4115 = vmatpush.bf16.msrb.mxu2 %v8337_v42  ;;  %4084 = vmatmul.bf16.vlgmr.msra.gmra.mxu3 %v12018_v9  ;;  %v8574_v30 = vld [vmem:[#allocation5 + $0x924] sm:$0xf0]  ;;  %v8097_v34 = vor.u32 %v10816_v26, %v8094_v27  ;;  %v11168_v36 = vld [vmem:[#allocation5 + $0x1028] sm:$0xf0]  ;;  %v10801_v40 = vld [vmem:[#allocation5 + $0x4b4] sm:$0xf]  ;;  %v7557_v45 = vor.u32 %v10681_v37, %v7554_v39 }
  0x6b   : > { %4128 = vmatpush.bf16.msrb.mxu3 %v8817_v46  ;;  %4071 = vmatmul.bf16.vlgmr.msra.gmra.mxu2 %v12023_v19  ;;  %v8577_v38 = vor.u32 %v10936_v29, %v8574_v30  ;;  %v8034_v41 = vld [vmem:[#allocation5 + $0x4ec] sm:$0xf0]  ;;  %v10921_v42 = vld [vmem:[#allocation5 + $0x874] sm:$0xf]  ;;  %v9473_v44 = vor.u32 %v11168_v36, %v9472_v35  ;;  %v9412_v47 = vld [vmem:[#allocation5 + $0xf78] sm:$0xf] }
  0x6c   : > { %4090 = vmatpush.bf16.msrb.mxu0 %v9713_v52  ;;  %4058 = vmatmul.bf16.vlgmr.msra.gmra.mxu1 %v12027_v31  ;;  %v8514_v43 = vld [vmem:[#allocation5 + $0x8ac] sm:$0xf0]  ;;  %v8037_v46 = vor.u32 %v10801_v40, %v8034_v41  ;;  %v11153_v48 = vld [vmem:[#allocation5 + $0xfb0] sm:$0xf0]  ;;  %v10666_v49 = vld [vmem:[#allocation5 + $0x7c] sm:$0xf] }
  0x6d   : > { %4103 = vmatpush.bf16.msrb.mxu1 %v7797_v54  ;;  %v8517_v50 = vor.u32 %v10921_v42, %v8514_v43  ;;  %v7494_v51 = vld [vmem:[#allocation5 + $0xb4] sm:$0xf0]  ;;  %v10786_v52 = vld [vmem:[#allocation5 + $0x43c] sm:$0xf]  ;;  %v9413_v56 = vor.u32 %v11153_v48, %v9412_v47  ;;  %v9352_v57 = vld [vmem:[#allocation5 + $0xf00] sm:$0xf] }
  0x6e   : > { %4116 = vmatpush.bf16.msrb.mxu2 %v8277_v55  ;;  %v7974_v53 = vld [vmem:[#allocation5 + $0x474] sm:$0xf0]  ;;  %v10906_v54 = vld [vmem:[#allocation5 + $0x7fc] sm:$0xf]  ;;  %v10651_v61 = vld [vmem:[#allocation5 + $0x4] sm:$0xf] }
  0x6f   : > { %4129 = vmatpush.bf16.msrb.mxu3 %v8757_v59  ;;  %v8454_v55 = vld [vmem:[#allocation5 + $0x834] sm:$0xf0]  ;;  %v11138_v58 = vld [vmem:[#allocation5 + $0xf38] sm:$0xf0]  ;;  %v7497_v59 = vor.u32 %v10666_v49, %v7494_v51  ;;  %v7977_v60 = vor.u32 %v10786_v52, %v7974_v53  ;;  %v7434_v62 = vld [vmem:[#allocation5 + $0x3c] sm:$0xf0] }
  0x70   : > { %4091 = vmatpush.bf16.msrb.mxu0 %v9653_v0  ;;  %v10771_v63 = vld [vmem:[#allocation5 + $0x3c4] sm:$0xf]  ;;  %v8457_v0 = vor.u32 %v10906_v54, %v8454_v55  ;;  %v8394_v3 = vld [vmem:[#allocation5 + $0x7bc] sm:$0xf0]  ;;  %v9294_v5 = vld [vmem:[#allocation5 + $0xec4] sm:$0xf0]  ;;  %v9353_v7 = vor.u32 %v11138_v58, %v9352_v57  ;;  %v7437_v13 = vor.u32 %v10651_v61, %v7434_v62 }
  0x71   : > { %4104 = vmatpush.bf16.msrb.mxu1 %v7737_v1  ;;  %v7914_v1 = vld [vmem:[#allocation5 + $0x3fc] sm:$0xf0]  ;;  %v10891_v2 = vld [vmem:[#allocation5 + $0x784] sm:$0xf]  ;;  %v11236_v6 = vld [vmem:[#allocation5 + $0x124c] sm:$0xf] }
  0x72   : > { %4117 = vmatpush.bf16.msrb.mxu2 %v8217_v4  ;;  %v11116_v4 = vld [vmem:[#allocation5 + $0xe8c] sm:$0xf]  ;;  %v7860_v11 = vld [vmem:[#allocation5 + $0x350] sm:$0xf]  ;;  %v7917_v14 = vor.u32 %v10771_v63, %v7914_v1  ;;  %v8397_v18 = vor.u32 %v10891_v2, %v8394_v3  ;;  %v11101_v23 = vld [vmem:[#allocation5 + $0xe14] sm:$0xf] }
  0x73   : > { %4130 = vmatpush.bf16.msrb.mxu3 %v8697_v10  ;;  %v9774_v10 = vld [vmem:[#allocation5 + $0x1284] sm:$0xf0]  ;;  %v10764_v12 = vld [vmem:[#allocation5 + $0x388] sm:$0xf0]  ;;  %v8340_v15 = vld [vmem:[#allocation5 + $0x710] sm:$0xf] }
  0x74   : > { %4092 = vmatpush.bf16.msrb.mxu0 %v9593_v17  ;;  %v10884_v16 = vld [vmem:[#allocation5 + $0x748] sm:$0xf0]  ;;  %v351_v17 = vld [vmem:[%s11996_s8 + $0x20] sm:$0xff]  ;;  %v7861_v22 = vor.u32 %v10764_v12, %v7860_v11  ;;  %v7740_v42 = vld [vmem:[#allocation5 + $0x260] sm:$0xf]  ;;  %vm7234_vm13 = vcmask 1041408  }
  0x75   : > { %4105 = vmatpush.bf16.msrb.mxu1 %v7677_v20  ;;  %v9297_v20 = vor.u32 %v11116_v4, %v9294_v5  ;;  %v9234_v24 = vld [vmem:[#allocation5 + $0xe4c] sm:$0xf0]  ;;  %v8341_v26 = vor.u32 %v10884_v16, %v8340_v15  ;;  %v7800_v28 = vld [vmem:[#allocation5 + $0x2d8] sm:$0xf]  ;;  %v10749_v29 = vld [vmem:[#allocation5 + $0x310] sm:$0xf0]  ;;  %v12031_v30 = vpack.c.bf16 %v351_v17, %v351_v17 }
  0x76   : > { %4118 = vmatpush.bf16.msrb.mxu2 %v8157_v21  ;;  %v9777_v21 = vor.u32 %v11236_v6, %v9774_v10  ;;  %v9714_v27 = vld [vmem:[#allocation5 + $0x120c] sm:$0xf0]  ;;  %v7801_v36 = vor.u32 %v10749_v29, %v7800_v28  ;;  %v11086_v37 = vld [vmem:[#allocation5 + $0xd9c] sm:$0xf]  ;;  %v9654_v41 = vld [vmem:[#allocation5 + $0x1194] sm:$0xf0] }
  0x77   : > { %4131 = vmatpush.bf16.msrb.mxu3 %v8637_v25  ;;  %v11221_v25 = vld [vmem:[#allocation5 + $0x11d4] sm:$0xf]  ;;  %v11206_v39 = vld [vmem:[#allocation5 + $0x115c] sm:$0xf]  ;;  %v11071_v49 = vld [vmem:[#allocation5 + $0xd24] sm:$0xf] }
  0x78   : > { %4093 = vmatpush.bf16.msrb.mxu0 %v9533_v32  ;;  %v8280_v32 = vld [vmem:[#allocation5 + $0x698] sm:$0xf]  ;;  %v9717_v35 = vor.u32 %v11221_v25, %v9714_v27  ;;  %v10734_v43 = vld [vmem:[#allocation5 + $0x298] sm:$0xf0]  ;;  %v9657_v47 = vor.u32 %v11206_v39, %v9654_v41  ;;  %v11191_v51 = vld [vmem:[#allocation5 + $0x10e4] sm:$0xf] }
  0x79   : > { %4106 = vmatpush.bf16.msrb.mxu1 %v7617_v33  ;;  %v10869_v33 = vld [vmem:[#allocation5 + $0x6d0] sm:$0xf0]  ;;  %v7741_v48 = vor.u32 %v10734_v43, %v7740_v42  ;;  %v9594_v53 = vld [vmem:[#allocation5 + $0x111c] sm:$0xf0]  ;;  %v7680_v54 = vld [vmem:[#allocation5 + $0x1e8] sm:$0xf] }
  0x7a   : > { %4119 = vmatpush.bf16.msrb.mxu2 %v8097_v34  ;;  %v9237_v34 = vor.u32 %v11101_v23, %v9234_v24  ;;  %v8281_v40 = vor.u32 %v10869_v33, %v8280_v32  ;;  %v10719_v55 = vld [vmem:[#allocation5 + $0x220] sm:$0xf0]  ;;  %v11056_v61 = vld [vmem:[#allocation5 + $0xcac] sm:$0xf]  ;;  %v9054_v62 = vld [vmem:[#allocation5 + $0xce4] sm:$0xf0] }
  0x7b   : > { %4132 = vmatpush.bf16.msrb.mxu3 %v8577_v38  ;;  %v9174_v38 = vld [vmem:[#allocation5 + $0xdd4] sm:$0xf0]  ;;  %v10839_v57 = vld [vmem:[#allocation5 + $0x5e0] sm:$0xf0]  ;;  %v11176_v63 = vld [vmem:[#allocation5 + $0x106c] sm:$0xf]  ;;  %v9057_v6 = vor.u32 %v11056_v61, %v9054_v62 }
  0x7c   : > { %4094 = vmatpush.bf16.msrb.mxu0 %v9473_v44  ;;  %v8220_v44 = vld [vmem:[#allocation5 + $0x620] sm:$0xf]  ;;  %v9534_v1 = vld [vmem:[#allocation5 + $0x10a4] sm:$0xf0]  ;;  %v7620_v2 = vld [vmem:[#allocation5 + $0x170] sm:$0xf] }
  0x7d   : > { %4107 = vmatpush.bf16.msrb.mxu1 %v7557_v45  ;;  %v10854_v45 = vld [vmem:[#allocation5 + $0x658] sm:$0xf0]  ;;  %v10704_v3 = vld [vmem:[#allocation5 + $0x1a8] sm:$0xf0]  ;;  %v8100_v4 = vld [vmem:[#allocation5 + $0x530] sm:$0xf] }
  0x7e   : > { %4120 = vmatpush.bf16.msrb.mxu2 %v8037_v46  ;;  %v9177_v46 = vor.u32 %v11086_v37, %v9174_v38  ;;  %v8221_v52 = vor.u32 %v10854_v45, %v8220_v44  ;;  %v10824_v5 = vld [vmem:[#allocation5 + $0x568] sm:$0xf0]  ;;  %v7621_v10 = vor.u32 %v10704_v3, %v7620_v2  ;;  %v11041_v11 = vld [vmem:[#allocation5 + $0xc34] sm:$0xf]  ;;  %v8994_v12 = vld [vmem:[#allocation5 + $0xc6c] sm:$0xf0] }
  0x7f   : > { %4133 = vmatpush.bf16.msrb.mxu3 %v8517_v50  ;;  %v9114_v50 = vld [vmem:[#allocation5 + $0xd5c] sm:$0xf0]  ;;  %v9474_v15 = vld [vmem:[#allocation5 + $0x102c] sm:$0xf0]  ;;  %v7560_v16 = vld [vmem:[#allocation5 + $0xf8] sm:$0xf] }
  0x80   : > { %4095 = vmatpush.bf16.msrb.mxu0 %v9413_v56  ;;  %v8160_v56 = vld [vmem:[#allocation5 + $0x5a8] sm:$0xf]  ;;  %v9117_v58 = vor.u32 %v11071_v49, %v9114_v50  ;;  %v10689_v17 = vld [vmem:[#allocation5 + $0x130] sm:$0xf0]  ;;  %v11026_v24 = vld [vmem:[#allocation5 + $0xbbc] sm:$0xf] }
  0x81   : > { %4108 = vmatpush.bf16.msrb.mxu1 %v7497_v59  ;;  %v9597_v59 = vor.u32 %v11191_v51, %v9594_v53  ;;  %v7561_v23 = vor.u32 %v10689_v17, %v7560_v16  ;;  %v8934_v25 = vld [vmem:[#allocation5 + $0xbf4] sm:$0xf0]  ;;  %v7500_v29 = vld [vmem:[#allocation5 + $0x80] sm:$0xf]  ;;  %v10674_v32 = vld [vmem:[#allocation5 + $0xb8] sm:$0xf0] }
  0x82   : > { %4121 = vmatpush.bf16.msrb.mxu2 %v7977_v60  ;;  %v7681_v60 = vor.u32 %v10719_v55, %v7680_v54  ;;  %v9414_v28 = vld [vmem:[#allocation5 + $0xfb4] sm:$0xf0]  ;;  %v7980_v33 = vld [vmem:[#allocation5 + $0x440] sm:$0xf]  ;;  %v7501_v39 = vor.u32 %v10674_v32, %v7500_v29  ;;  %v7440_v42 = vld [vmem:[#allocation5 + $0x8] sm:$0xf] }
  0x83   : > { %4134 = vmatpush.bf16.msrb.mxu3 %v8457_v0  ;;  %v8161_v0 = vor.u32 %v10839_v57, %v8160_v56  ;;  %v8874_v37 = vld [vmem:[#allocation5 + $0xb7c] sm:$0xf0]  ;;  %v10659_v44 = vld [vmem:[#allocation5 + $0x40] sm:$0xf0]  ;;  %v7920_v45 = vld [vmem:[#allocation5 + $0x3c8] sm:$0xf] }
  0x84   : > { %4096 = vmatpush.bf16.msrb.mxu0 %v9353_v7  ;;  %v9537_v7 = vor.u32 %v11176_v63, %v9534_v1  ;;  %v9354_v41 = vld [vmem:[#allocation5 + $0xf3c] sm:$0xf0]  ;;  %v9300_v49 = vld [vmem:[#allocation5 + $0xe90] sm:$0xf]  ;;  %v11124_v51 = vld [vmem:[#allocation5 + $0xec8] sm:$0xf0]  ;;  %v7441_v55 = vor.u32 %v10659_v44, %v7440_v42 }
  0x85   : > { %4109 = vmatpush.bf16.msrb.mxu1 %v7437_v13  ;;  %v11161_v13 = vld [vmem:[#allocation5 + $0xff4] sm:$0xf]  ;;  %v11244_v53 = vld [vmem:[#allocation5 + $0x1288] sm:$0xf0]  ;;  %v7862_v57 = vld [vmem:[#allocation5 + $0x38c] sm:$0xf0] }
  0x86   : > { %4122 = vmatpush.bf16.msrb.mxu2 %v7917_v14  ;;  %v8101_v14 = vor.u32 %v10824_v5, %v8100_v4  ;;  %v10757_v56 = vld [vmem:[#allocation5 + $0x354] sm:$0xf]  ;;  %v8760_v62 = vld [vmem:[#allocation5 + $0xa58] sm:$0xf]  ;;  %v10742_v5 = vld [vmem:[#allocation5 + $0x2dc] sm:$0xf] }
  0x87   : > { %4135 = vmatpush.bf16.msrb.mxu3 %v8397_v18  ;;  %4097 = vmatmul.bf16.vlgmr.msrb.gmra.mxu0 %v12031_v30  ;;  %v8040_v18 = vld [vmem:[#allocation5 + $0x4b8] sm:$0xf]  ;;  %v10989_v63 = vld [vmem:[#allocation5 + $0xa90] sm:$0xf0]  ;;  %v7865_v1 = vor.u32 %v10757_v56, %v7862_v57  ;;  %v11094_v16 = vld [vmem:[#allocation5 + $0xdd8] sm:$0xf0] }
  0x88   : > { %4141 = vmatpush.bf16.msra.mxu0 %v9297_v20  ;;  %4110 = vmatmul.bf16.vlgmr.msrb.gmra.mxu1 %v12016_v8  ;;  %v10809_v20 = vld [vmem:[#allocation5 + $0x4f0] sm:$0xf0]  ;;  %v9720_v3 = vld [vmem:[#allocation5 + $0x11d8] sm:$0xf]  ;;  %v9660_v17 = vld [vmem:[#allocation5 + $0x1160] sm:$0xf] }
  0x89   : > { %4154 = vmatpush.bf16.msra.mxu1 %v9777_v21  ;;  %4123 = vmatmul.bf16.vlgmr.msrb.gmra.mxu2 %v12027_v31  ;;  %v8997_v21 = vor.u32 %v11041_v11, %v8994_v12  ;;  %v8041_v27 = vor.u32 %v10809_v20, %v8040_v18  ;;  %v11109_v2 = vld [vmem:[#allocation5 + $0xe50] sm:$0xf0]  ;;  %v8700_v12 = vld [vmem:[#allocation5 + $0x9e0] sm:$0xf]  ;;  %v11214_v18 = vld [vmem:[#allocation5 + $0x1198] sm:$0xf0] }
  0x8a   : > { %4167 = vmatpush.bf16.msra.mxu2 %v7861_v22  ;;  %4136 = vmatmul.bf16.vlgmr.msrb.gmra.mxu3 %v12023_v19  ;;  %v9477_v22 = vor.u32 %v11161_v13, %v9474_v15  ;;  %v11229_v4 = vld [vmem:[#allocation5 + $0x1210] sm:$0xf0]  ;;  %v10974_v13 = vld [vmem:[#allocation5 + $0xa18] sm:$0xf0]  ;;  %v10727_v20 = vld [vmem:[#allocation5 + $0x264] sm:$0xf] }
  0x8b   : > { %4180 = vmatpush.bf16.msra.mxu3 %v8341_v26  ;;  %v11146_v26 = vld [vmem:[#allocation5 + $0xf7c] sm:$0xf]  ;;  %v9721_v11 = vor.u32 %v11229_v4, %v9720_v3  ;;  %v11079_v29 = vld [vmem:[#allocation5 + $0xd60] sm:$0xf0]  ;;  %v9600_v32 = vld [vmem:[#allocation5 + $0x10e8] sm:$0xf] }
  0x8c   : > { %4142 = vmatpush.bf16.msra.mxu0 %v9237_v34  ;;  %v10794_v34 = vld [vmem:[#allocation5 + $0x478] sm:$0xf0]  ;;  %v9417_v38 = vor.u32 %v11146_v26, %v9414_v28  ;;  %v10959_v26 = vld [vmem:[#allocation5 + $0x9a0] sm:$0xf0]  ;;  %v9540_v44 = vld [vmem:[#allocation5 + $0x1070] sm:$0xf] }
  0x8d   : > { %4155 = vmatpush.bf16.msra.mxu1 %v9717_v35  ;;  %v8937_v35 = vor.u32 %v11026_v24, %v8934_v25  ;;  %v7981_v43 = vor.u32 %v10794_v34, %v7980_v33  ;;  %v9661_v24 = vor.u32 %v11214_v18, %v9660_v17  ;;  %v8640_v25 = vld [vmem:[#allocation5 + $0x968] sm:$0xf]  ;;  %v11199_v33 = vld [vmem:[#allocation5 + $0x1120] sm:$0xf0]  ;;  %v10712_v34 = vld [vmem:[#allocation5 + $0x1ec] sm:$0xf] }
  0x8e   : > { %4168 = vmatpush.bf16.msra.mxu2 %v7801_v36  ;;  %v11011_v36 = vld [vmem:[#allocation5 + $0xb44] sm:$0xf]  ;;  %v9480_v56 = vld [vmem:[#allocation5 + $0xff8] sm:$0xf]  ;;  %v11169_v57 = vld [vmem:[#allocation5 + $0x1030] sm:$0xf0] }
  0x8f   : > { %4181 = vmatpush.bf16.msra.mxu3 %v8281_v40  ;;  %v11131_v40 = vld [vmem:[#allocation5 + $0xf04] sm:$0xf]  ;;  %v8877_v50 = vor.u32 %v11011_v36, %v8874_v37  ;;  %v8641_v36 = vor.u32 %v10959_v26, %v8640_v25  ;;  %v11034_v3 = vld [vmem:[#allocation5 + $0xbf8] sm:$0xf0]  ;;  %v9420_v4 = vld [vmem:[#allocation5 + $0xf80] sm:$0xf] }
  0x90   : > { %4143 = vmatpush.bf16.msra.mxu0 %v9177_v46  ;;  %v10779_v46 = vld [vmem:[#allocation5 + $0x400] sm:$0xf0]  ;;  %v9357_v54 = vor.u32 %v11131_v40, %v9354_v41  ;;  %v10944_v40 = vld [vmem:[#allocation5 + $0x928] sm:$0xf0]  ;;  %v9060_v41 = vld [vmem:[#allocation5 + $0xcb0] sm:$0xf] }
  0x91   : > { %4156 = vmatpush.bf16.msra.mxu1 %v9657_v47  ;;  %v8820_v47 = vld [vmem:[#allocation5 + $0xad0] sm:$0xf]  ;;  %v9360_v17 = vld [vmem:[#allocation5 + $0xf08] sm:$0xf]  ;;  %v10997_v25 = vld [vmem:[#allocation5 + $0xad4] sm:$0xf] }
  0x92   : > { %4169 = vmatpush.bf16.msra.mxu2 %v7741_v48  ;;  %v11004_v48 = vld [vmem:[#allocation5 + $0xb08] sm:$0xf0]  ;;  %s7429_s3 = sshll.u32 %s11992_s26, 2  ;;  %s10648_s29 = sshll.u32 %s11900_s28, 2 }
  0x93   : > { %4182 = vmatpush.bf16.msra.mxu3 %v8221_v52  ;;  %v9780_v52 = vld [vmem:[#allocation5 + $0x1250] sm:$0xf]  ;;  %s7291_s10 = scalar_lea.hbm %s12374_s6, %s10648_s29  ;;  %s346_s12 = scalar_lea.vmem [#allocation13], %s7429_s3 }
  0x94   : > { %4144 = vmatpush.bf16.msra.mxu0 %v9117_v58  ;;  %v7921_v58 = vor.u32 %v10779_v46, %v7920_v45  ;;  %v9781_v61 = vor.u32 %v11244_v53, %v9780_v52  ;;  %v11184_v45 = vld [vmem:[#allocation5 + $0x10a8] sm:$0xf0]  ;;  %v10697_v46 = vld [vmem:[#allocation5 + $0x174] sm:$0xf]  ;;  %v9000_v53 = vld [vmem:[#allocation5 + $0xc38] sm:$0xf] }
  0x95   : > { %4157 = vmatpush.bf16.msra.mxu1 %v9597_v59  ;;  %v8821_v59 = vor.u32 %v11004_v48, %v8820_v47  ;;  %v7622_v47 = vld [vmem:[#allocation5 + $0x1ac] sm:$0xf0]  ;;  %v10929_v52 = vld [vmem:[#allocation5 + $0x8b0] sm:$0xf0]  ;;  %s7293_s13 = sshll.u32 %s346_s12, 4  ;;  %s7295_s14 = sshll.u32 %s7291_s10, 4  ;;  %s7294_s13 = int_to_ptr.vmem [resolvable:$true] %s7293_s13  ;;  %s7296_s14 = int_to_ptr.hbm [resolvable:$true] %s7295_s14 }
  0x96   : > { %4170 = vmatpush.bf16.msra.mxu2 %v7681_v60  ;;  %v9301_v60 = vor.u32 %v11124_v51, %v9300_v49  ;;  %v8520_v51 = vld [vmem:[#allocation5 + $0x878] sm:$0xf]  ;;  %s7281_s28 = scalar_lea.sflag [#allocation4], %s11992_s26  ;;  %s11764_s15 = sshra.s32 %s7296_s14, 4  ;;  %s11765_s15 = int_to_ptr.hbm [resolvable:$true] %s11764_s15 }
  0x97   : > { %4183 = vmatpush.bf16.msra.mxu3 %v8161_v0  ;;  %v9240_v0 = vld [vmem:[#allocation5 + $0xe18] sm:$0xf]  ;;  %s11766_s16 = scalar_lea.hbm %s11765_s15, 4  ;;  %s11770_s7 = scalar_lea.hbm %s12374_s6, 12 }
  0x98   : > { %4145 = vmatpush.bf16.msra.mxu0 %v9057_v6  ;;  %v7802_v6 = vld [vmem:[#allocation5 + $0x314] sm:$0xf0]  ;;  %p11767_p1 = scmp.ne.s32.totalorder %s11765_s15, %s11766_s16  ;;  %p11771_p5 = scmp.lt.s32.totalorder %s11765_s15, %s12374_s6 }
  0x99   : > { %4158 = vmatpush.bf16.msra.mxu1 %v9537_v7  ;;  %v8761_v7 = vor.u32 %v10989_v63, %v8760_v62  ;;  %v7805_v15 = vor.u32 %v10742_v5, %v7802_v6  ;;  %v9481_v62 = vor.u32 %v11169_v57, %v9480_v56  ;;  %v8460_v63 = vld [vmem:[#allocation5 + $0x800] sm:$0xf]  ;;  %v11154_v5 = vld [vmem:[#allocation5 + $0xfb8] sm:$0xf0]  ;;  %v10667_v6 = vld [vmem:[#allocation5 + $0x84] sm:$0xf]  ;;  %p11772_p6 = scmp.lt.s32.totalorder %s11770_s7, %s11766_s16 }
  0x9a   : > { %4171 = vmatpush.bf16.msra.mxu2 %v7621_v10  ;;  %v9241_v10 = vor.u32 %v11109_v2, %v9240_v0  ;;  %v10914_v0 = vld [vmem:[#allocation5 + $0x838] sm:$0xf0]  ;;  %v8702_v56 = vld [vmem:[#allocation5 + $0xa1c] sm:$0xf0]  ;;  %v11087_v57 = vld [vmem:[#allocation5 + $0xda4] sm:$0xf]  ;;  %p11768_p3 = pnand %p11767_p1, %p11961_p13 }
  0x9b   : > { %4184 = vmatpush.bf16.msra.mxu3 %v8101_v14  ;;  %v9180_v14 = vld [vmem:[#allocation5 + $0xda0] sm:$0xf]  ;;  %p11773_p7 = por %p11772_p6, %p11771_p5 }
  0x9c   : > { %4146 = vmatpush.bf16.msra.mxu0 %v8997_v21  ;;  %v7742_v21 = vld [vmem:[#allocation5 + $0x29c] sm:$0xf0]  ;;  %p11769_p12 = pneg %p11768_p3 }
  0x9d   : > { %4159 = vmatpush.bf16.msra.mxu1 %v9477_v22  ;;  %v8701_v22 = vor.u32 %v10974_v13, %v8700_v12  ;;  %v7745_v28 = vor.u32 %v10727_v20, %v7742_v21  ;;  %v10899_v12 = vld [vmem:[#allocation5 + $0x7c0] sm:$0xf0]  ;;  %v10652_v21 = vld [vmem:[#allocation5 + $0xc] sm:$0xf] }
  0x9e   : > { %4172 = vmatpush.bf16.msra.mxu2 %v7561_v23  ;;  %v9181_v23 = vor.u32 %v11094_v16, %v9180_v14  ;;  %v9421_v14 = vor.u32 %v11154_v5, %v9420_v4  ;;  %v11019_v16 = vld [vmem:[#allocation5 + $0xb80] sm:$0xf0]  ;;  %v8642_v4 = vld [vmem:[#allocation5 + $0x9a4] sm:$0xf0]  ;;  %v11072_v5 = vld [vmem:[#allocation5 + $0xd2c] sm:$0xf]  ;;  %p11774_p8 = pnand %p11773_p7, %p11769_p12 }
  0x9f   : > { %4185 = vmatpush.bf16.msra.mxu3 %v8041_v27  ;;  %v9120_v27 = vld [vmem:[#allocation5 + $0xd28] sm:$0xf]  ;;  %v11139_v20 = vld [vmem:[#allocation5 + $0xf40] sm:$0xf0] }
  0xa0   : > { %4147 = vmatpush.bf16.msra.mxu0 %v8937_v35  ;;  %v7682_v35 = vld [vmem:[#allocation5 + $0x224] sm:$0xf0]  ;;  %v9121_v37 = vor.u32 %v11079_v29, %v9120_v27  ;;  %v8822_v27 = vld [vmem:[#allocation5 + $0xb0c] sm:$0xf0] }
  0xa1   : > { %4160 = vmatpush.bf16.msra.mxu1 %v9417_v38  ;;  %v9601_v38 = vor.u32 %v11199_v33, %v9600_v32  ;;  %v7685_v42 = vor.u32 %v10712_v34, %v7682_v35  ;;  %v9302_v29 = vld [vmem:[#allocation5 + $0xecc] sm:$0xf0]  ;;  %v9361_v33 = vor.u32 %v11139_v20, %v9360_v17  ;;  %v11237_v34 = vld [vmem:[#allocation5 + $0x1254] sm:$0xf] }
  0xa2   : > { %4173 = vmatpush.bf16.msra.mxu2 %v7501_v39  ;;  %v8580_v39 = vld [vmem:[#allocation5 + $0x8f0] sm:$0xf]  ;;  %v11057_v20 = vld [vmem:[#allocation5 + $0xcb4] sm:$0xf] }
  0xa3   : > { %4186 = vmatpush.bf16.msra.mxu3 %v7981_v43  ;;  %v11064_v43 = vld [vmem:[#allocation5 + $0xce8] sm:$0xf0]  ;;  %v8581_v48 = vor.u32 %v10944_v40, %v8580_v39  ;;  %v9782_v35 = vld [vmem:[#allocation5 + $0x128c] sm:$0xf0]  ;;  %v10862_v40 = vld [vmem:[#allocation5 + $0x69c] sm:$0xf] }
  0xa4   : > { %4148 = vmatpush.bf16.msra.mxu0 %v8877_v50  ;;  %v9061_v49 = vor.u32 %v11064_v43, %v9060_v41  ;;  %v9541_v50 = vor.u32 %v11184_v45, %v9540_v44  ;;  %v8282_v41 = vld [vmem:[#allocation5 + $0x6d4] sm:$0xf0]  ;;  %v9785_v43 = vor.u32 %v11237_v34, %v9782_v35  ;;  %v11102_v45 = vld [vmem:[#allocation5 + $0xe1c] sm:$0xf] }
  0xa5   : > { %4161 = vmatpush.bf16.msra.mxu1 %v9357_v54  ;;  %v7625_v54 = vor.u32 %v10697_v46, %v7622_v47  ;;  %v8762_v44 = vld [vmem:[#allocation5 + $0xa94] sm:$0xf0]  ;;  %v11222_v47 = vld [vmem:[#allocation5 + $0x11dc] sm:$0xf] }
  0xa6   : > { %4174 = vmatpush.bf16.msra.mxu2 %v7441_v55  ;;  %v11049_v55 = vld [vmem:[#allocation5 + $0xc70] sm:$0xf0]  ;;  %v9242_v46 = vld [vmem:[#allocation5 + $0xe54] sm:$0xf0]  ;;  %v11042_v34 = vld [vmem:[#allocation5 + $0xc3c] sm:$0xf] }
  0xa7   : > { %4187 = vmatpush.bf16.msra.mxu3 %v7921_v58  ;;  %4149 = vmatmul.bf16.vlgmr.msra.gmra.mxu0 %v12018_v9  ;;  %v10682_v58 = vld [vmem:[#allocation5 + $0xfc] sm:$0xf]  ;;  %v9002_v35 = vld [vmem:[#allocation5 + $0xc74] sm:$0xf0] }
  0xa8   : > { %4193 = vmatpush.bf16.msrb.mxu0 %v8821_v59  ;;  %4162 = vmatmul.bf16.vlgmr.msra.gmra.mxu1 %v12031_v30  ;;  %v7562_v59 = vld [vmem:[#allocation5 + $0x134] sm:$0xf0] }
  0xa9   : > { %4206 = vmatpush.bf16.msrb.mxu1 %v9301_v60  ;;  %4175 = vmatmul.bf16.vlgmr.msra.gmra.mxu2 %v12016_v8  ;;  %v8521_v60 = vor.u32 %v10929_v52, %v8520_v51  ;;  %v7565_v2 = vor.u32 %v10682_v58, %v7562_v59  ;;  %v9245_v51 = vor.u32 %v11102_v45, %v9242_v46  ;;  %v10847_v52 = vld [vmem:[#allocation5 + $0x624] sm:$0xf]  ;;  %v9182_v58 = vld [vmem:[#allocation5 + $0xddc] sm:$0xf0] }
  0xaa   : > { %4219 = vmatpush.bf16.msrb.mxu2 %v9781_v61  ;;  %4188 = vmatmul.bf16.vlgmr.msra.gmra.mxu3 %v12027_v31  ;;  %v9001_v61 = vor.u32 %v11049_v55, %v9000_v53  ;;  %v8222_v53 = vld [vmem:[#allocation5 + $0x65c] sm:$0xf0]  ;;  %v11207_v59 = vld [vmem:[#allocation5 + $0x1164] sm:$0xf] }
  0xab   : > { %4232 = vmatpush.bf16.msrb.mxu3 %v7865_v1  ;;  %v8940_v1 = vld [vmem:[#allocation5 + $0xbc0] sm:$0xf]  ;;  %v11027_v46 = vld [vmem:[#allocation5 + $0xbc4] sm:$0xf] }
  0xac   : > { %4194 = vmatpush.bf16.msrb.mxu0 %v8761_v7  ;;  %v7502_v7 = vld [vmem:[#allocation5 + $0xbc] sm:$0xf0]  ;;  %v8941_v13 = vor.u32 %v11034_v3, %v8940_v1  ;;  %v8162_v1 = vld [vmem:[#allocation5 + $0x5e4] sm:$0xf0] }
  0xad   : > { %4207 = vmatpush.bf16.msrb.mxu1 %v9241_v10  ;;  %v8461_v10 = vor.u32 %v10914_v0, %v8460_v63  ;;  %v7505_v18 = vor.u32 %v10667_v6, %v7502_v7  ;;  %v9185_v63 = vor.u32 %v11087_v57, %v9182_v58  ;;  %v10832_v0 = vld [vmem:[#allocation5 + $0x5ac] sm:$0xf]  ;;  %v9122_v6 = vld [vmem:[#allocation5 + $0xd64] sm:$0xf0]  ;;  %v8462_v45 = vld [vmem:[#allocation5 + $0x83c] sm:$0xf0] }
  0xae   : > { %4220 = vmatpush.bf16.msrb.mxu2 %v9721_v11  ;;  %v8400_v11 = vld [vmem:[#allocation5 + $0x788] sm:$0xf]  ;;  %v11192_v7 = vld [vmem:[#allocation5 + $0x10ec] sm:$0xf] }
  0xaf   : > { %4233 = vmatpush.bf16.msrb.mxu3 %v7805_v15  ;;  %v8880_v15 = vld [vmem:[#allocation5 + $0xb48] sm:$0xf]  ;;  %v8401_v26 = vor.u32 %v10899_v12, %v8400_v11  ;;  %v8165_v11 = vor.u32 %v10832_v0, %v8162_v1  ;;  %v11012_v57 = vld [vmem:[#allocation5 + $0xb4c] sm:$0xf]  ;;  %v8348_v0 = vld [vmem:[#allocation5 + $0x718] sm:$0xf] }
  0xb0   : > { %4195 = vmatpush.bf16.msrb.mxu0 %v8701_v22  ;;  %v7442_v22 = vld [vmem:[#allocation5 + $0x44] sm:$0xf0]  ;;  %v8881_v32 = vor.u32 %v11019_v16, %v8880_v15  ;;  %v8102_v15 = vld [vmem:[#allocation5 + $0x56c] sm:$0xf0]  ;;  %v10937_v16 = vld [vmem:[#allocation5 + $0x8f4] sm:$0xf] }
  0xb1   : > { %4208 = vmatpush.bf16.msrb.mxu1 %v9181_v23  ;;  %v10877_v23 = vld [vmem:[#allocation5 + $0x714] sm:$0xf] }
  0xb2   : > { %4221 = vmatpush.bf16.msrb.mxu2 %v9661_v24  ;;  %v8342_v24 = vld [vmem:[#allocation5 + $0x74c] sm:$0xf0] }
  0xb3   : > { %4234 = vmatpush.bf16.msrb.mxu3 %v7745_v28  ;;  %v11117_v28 = vld [vmem:[#allocation5 + $0xe94] sm:$0xf] }
  0xb4   : > { %4196 = vmatpush.bf16.msrb.mxu0 %v8641_v36  ;;  %v7445_v36 = vor.u32 %v10652_v21, %v7442_v22  ;;  %v9305_v39 = vor.u32 %v11117_v28, %v9302_v29  ;;  %v9062_v21 = vld [vmem:[#allocation5 + $0xcec] sm:$0xf0]  ;;  %v11177_v22 = vld [vmem:[#allocation5 + $0x1074] sm:$0xf]  ;;  %v8042_v28 = vld [vmem:[#allocation5 + $0x4f4] sm:$0xf0] }
  0xb5   : > { %4209 = vmatpush.bf16.msrb.mxu1 %v9121_v37  ;;  %v8345_v37 = vor.u32 %v10877_v23, %v8342_v24  ;;  %v9542_v23 = vld [vmem:[#allocation5 + $0x10ac] sm:$0xf0]  ;;  %v10922_v29 = vld [vmem:[#allocation5 + $0x87c] sm:$0xf] }
  0xb6   : > { %4222 = vmatpush.bf16.msrb.mxu2 %v9601_v38  ;;  %v8825_v38 = vor.u32 %v10997_v25, %v8822_v27  ;;  %v10802_v27 = vld [vmem:[#allocation5 + $0x4bc] sm:$0xf] }
  0xb7   : > { %4235 = vmatpush.bf16.msrb.mxu3 %v7685_v42  ;;  %v10982_v42 = vld [vmem:[#allocation5 + $0xa5c] sm:$0xf] }
  0xb8   : > { %4197 = vmatpush.bf16.msrb.mxu0 %v8581_v48  ;;  %v9722_v48 = vld [vmem:[#allocation5 + $0x1214] sm:$0xf0] }
  0xb9   : > { %4210 = vmatpush.bf16.msrb.mxu1 %v9061_v49  ;;  %v8285_v49 = vor.u32 %v10862_v40, %v8282_v41  ;;  %v9725_v55 = vor.u32 %v11222_v47, %v9722_v48  ;;  %v9005_v40 = vor.u32 %v11042_v34, %v9002_v35  ;;  %v10787_v41 = vld [vmem:[#allocation5 + $0x444] sm:$0xf]  ;;  %v8942_v47 = vld [vmem:[#allocation5 + $0xbfc] sm:$0xf0]  ;;  %v8708_v35 = vld [vmem:[#allocation5 + $0x9e8] sm:$0xf] }
  0xba   : > { %4223 = vmatpush.bf16.msrb.mxu2 %v9541_v50  ;;  %v8765_v50 = vor.u32 %v10982_v42, %v8762_v44  ;;  %v7982_v42 = vld [vmem:[#allocation5 + $0x47c] sm:$0xf0]  ;;  %v11147_v48 = vld [vmem:[#allocation5 + $0xf84] sm:$0xf] }
  0xbb   : > { %4236 = vmatpush.bf16.msrb.mxu3 %v7625_v54  ;;  %v10967_v54 = vld [vmem:[#allocation5 + $0x9e4] sm:$0xf] }
  0xbc   : > { %4198 = vmatpush.bf16.msrb.mxu0 %v8521_v60  ;;  %v9662_v60 = vld [vmem:[#allocation5 + $0x119c] sm:$0xf0]  ;;  %v10855_v34 = vld [vmem:[#allocation5 + $0x660] sm:$0xf0] }
  0xbd   : > { %4211 = vmatpush.bf16.msrb.mxu1 %v9001_v61  ;;  %v8225_v61 = vor.u32 %v10847_v52, %v8222_v53  ;;  %v9665_v3 = vor.u32 %v11207_v59, %v9662_v60  ;;  %v7922_v52 = vld [vmem:[#allocation5 + $0x404] sm:$0xf0]  ;;  %v11132_v60 = vld [vmem:[#allocation5 + $0xf0c] sm:$0xf] }
  0xbe   : > { %4224 = vmatpush.bf16.msrb.mxu2 %v9481_v62  ;;  %v8705_v62 = vor.u32 %v10967_v54, %v8702_v56  ;;  %v8945_v54 = vor.u32 %v11027_v46, %v8942_v47  ;;  %v8402_v56 = vld [vmem:[#allocation5 + $0x7c4] sm:$0xf0]  ;;  %v10840_v46 = vld [vmem:[#allocation5 + $0x5e8] sm:$0xf0]  ;;  %v8648_v47 = vld [vmem:[#allocation5 + $0x970] sm:$0xf] }
  0xbf   : > { %4237 = vmatpush.bf16.msrb.mxu3 %v7565_v2  ;;  %v10952_v2 = vld [vmem:[#allocation5 + $0x96c] sm:$0xf]  ;;  %v8882_v59 = vld [vmem:[#allocation5 + $0xb84] sm:$0xf0] }
  0xc0   : > { %4199 = vmatpush.bf16.msrb.mxu0 %v8461_v10  ;;  %v9602_v10 = vld [vmem:[#allocation5 + $0x1124] sm:$0xf0]  ;;  %v8645_v12 = vor.u32 %v10952_v2, %v8642_v4  ;;  %v10885_v2 = vld [vmem:[#allocation5 + $0x750] sm:$0xf0] }
  0xc1   : > { %4212 = vmatpush.bf16.msrb.mxu1 %v8941_v13  ;;  %v9125_v13 = vor.u32 %v11072_v5, %v9122_v6  ;;  %v9605_v17 = vor.u32 %v11192_v7, %v9602_v10  ;;  %v11005_v4 = vld [vmem:[#allocation5 + $0xb10] sm:$0xf0]  ;;  %v8885_v6 = vor.u32 %v11012_v57, %v8882_v59  ;;  %v9308_v7 = vld [vmem:[#allocation5 + $0xe98] sm:$0xf] }
  0xc2   : > { %4225 = vmatpush.bf16.msrb.mxu2 %v9421_v14  ;;  %v10817_v14 = vld [vmem:[#allocation5 + $0x534] sm:$0xf]  ;;  %v8588_v59 = vld [vmem:[#allocation5 + $0x8f8] sm:$0xf] }
  0xc3   : > { %4238 = vmatpush.bf16.msrb.mxu3 %v7505_v18  ;;  %v8582_v18 = vld [vmem:[#allocation5 + $0x92c] sm:$0xf0]  ;;  %v8105_v24 = vor.u32 %v10817_v14, %v8102_v15  ;;  %v11125_v10 = vld [vmem:[#allocation5 + $0xed0] sm:$0xf0]  ;;  %v7808_v15 = vld [vmem:[#allocation5 + $0x2e0] sm:$0xf] }
  0xc4   : > { %4200 = vmatpush.bf16.msrb.mxu0 %v8401_v26  ;;  %v8585_v25 = vor.u32 %v10937_v16, %v8582_v18  ;;  %v9065_v26 = vor.u32 %v11057_v20, %v9062_v21  ;;  %v10750_v16 = vld [vmem:[#allocation5 + $0x318] sm:$0xf0]  ;;  %v9309_v18 = vor.u32 %v11125_v10, %v9308_v7  ;;  %v8768_v21 = vld [vmem:[#allocation5 + $0xa60] sm:$0xf] }
  0xc5   : > { %4213 = vmatpush.bf16.msrb.mxu1 %v8881_v32  ;;  %v9545_v32 = vor.u32 %v11177_v22, %v9542_v23  ;;  %v10870_v20 = vld [vmem:[#allocation5 + $0x6d8] sm:$0xf0]  ;;  %v9248_v23 = vld [vmem:[#allocation5 + $0xe20] sm:$0xf] }
  0xc6   : > { %4226 = vmatpush.bf16.msrb.mxu2 %v9361_v33  ;;  %v8522_v33 = vld [vmem:[#allocation5 + $0x8b4] sm:$0xf0]  ;;  %v10990_v22 = vld [vmem:[#allocation5 + $0xa98] sm:$0xf0]  ;;  %v8528_v10 = vld [vmem:[#allocation5 + $0x880] sm:$0xf] }
  0xc7   : > { %4239 = vmatpush.bf16.msrb.mxu3 %v7445_v36  ;;  %4201 = vmatmul.bf16.vlgmr.msrb.gmra.mxu0 %v12023_v19  ;;  %v11162_v36 = vld [vmem:[#allocation5 + $0xffc] sm:$0xf] }
  0xc8   : > { %4245 = vmatpush.bf16.msra.mxu0 %v8345_v37  ;;  %4214 = vmatmul.bf16.vlgmr.msrb.gmra.mxu1 %v12018_v9  ;;  %v9482_v37 = vld [vmem:[#allocation5 + $0x1034] sm:$0xf0]  ;;  %v10810_v7 = vld [vmem:[#allocation5 + $0x4f8] sm:$0xf0] }
  0xc9   : > { %4258 = vmatpush.bf16.msra.mxu1 %v8825_v38  ;;  %4227 = vmatmul.bf16.vlgmr.msrb.gmra.mxu2 %v12031_v30  ;;  %v8045_v38 = vor.u32 %v10802_v27, %v8042_v28  ;;  %v9485_v44 = vor.u32 %v11162_v36, %v9482_v37  ;;  %v8769_v27 = vor.u32 %v10990_v22, %v8768_v21  ;;  %v7748_v28 = vld [vmem:[#allocation5 + $0x268] sm:$0xf]  ;;  %v10975_v36 = vld [vmem:[#allocation5 + $0xa20] sm:$0xf0] }
  0xca   : > { %4271 = vmatpush.bf16.msra.mxu2 %v9305_v39  ;;  %4240 = vmatmul.bf16.vlgmr.msrb.gmra.mxu3 %v12016_v8  ;;  %v8525_v39 = vor.u32 %v10922_v29, %v8522_v33  ;;  %v10735_v29 = vld [vmem:[#allocation5 + $0x2a0] sm:$0xf0]  ;;  %v9188_v37 = vld [vmem:[#allocation5 + $0xda8] sm:$0xf] }
  0xcb   : > { %4284 = vmatpush.bf16.msra.mxu3 %v9785_v43  ;;  %v10907_v43 = vld [vmem:[#allocation5 + $0x804] sm:$0xf] }
  0xcc   : > { %4246 = vmatpush.bf16.msra.mxu0 %v8285_v49  ;;  %v9422_v49 = vld [vmem:[#allocation5 + $0xfbc] sm:$0xf0]  ;;  %v8465_v53 = vor.u32 %v10907_v43, %v8462_v45  ;;  %v10720_v43 = vld [vmem:[#allocation5 + $0x228] sm:$0xf0]  ;;  %v10795_v22 = vld [vmem:[#allocation5 + $0x480] sm:$0xf0] }
  0xcd   : > { %4259 = vmatpush.bf16.msra.mxu1 %v8765_v50  ;;  %v7985_v50 = vor.u32 %v10787_v41, %v7982_v42  ;;  %v9425_v58 = vor.u32 %v11147_v48, %v9422_v49  ;;  %v8709_v41 = vor.u32 %v10975_v36, %v8708_v35  ;;  %v7688_v42 = vld [vmem:[#allocation5 + $0x1f0] sm:$0xf]  ;;  %v10960_v48 = vld [vmem:[#allocation5 + $0x9a8] sm:$0xf0] }
  0xce   : > { %4272 = vmatpush.bf16.msra.mxu2 %v9245_v51  ;;  %v10772_v51 = vld [vmem:[#allocation5 + $0x3cc] sm:$0xf]  ;;  %v9128_v49 = vld [vmem:[#allocation5 + $0xd30] sm:$0xf] }
  0xcf   : > { %4285 = vmatpush.bf16.msra.mxu3 %v9725_v55  ;;  %v10892_v55 = vld [vmem:[#allocation5 + $0x78c] sm:$0xf]  ;;  %v7925_v1 = vor.u32 %v10772_v51, %v7922_v52  ;;  %v7689_v51 = vor.u32 %v10720_v43, %v7688_v42 }
  0xd0   : > { %4247 = vmatpush.bf16.msra.mxu0 %v8225_v61  ;;  %v9362_v61 = vld [vmem:[#allocation5 + $0xf44] sm:$0xf0]  ;;  %v8405_v5 = vor.u32 %v10892_v55, %v8402_v56  ;;  %v10705_v55 = vld [vmem:[#allocation5 + $0x1b0] sm:$0xf0]  ;;  %v8108_v56 = vld [vmem:[#allocation5 + $0x538] sm:$0xf] }
  0xd1   : > { %4260 = vmatpush.bf16.msra.mxu1 %v8705_v62  ;;  %v7868_v62 = vld [vmem:[#allocation5 + $0x358] sm:$0xf]  ;;  %v10900_v43 = vld [vmem:[#allocation5 + $0x7c8] sm:$0xf0] }
  0xd2   : > { %4273 = vmatpush.bf16.msra.mxu2 %v9185_v63  ;;  %v10765_v63 = vld [vmem:[#allocation5 + $0x390] sm:$0xf0] }
  0xd3   : > { %4286 = vmatpush.bf16.msra.mxu3 %v9665_v3  ;;  %v8828_v3 = vld [vmem:[#allocation5 + $0xad8] sm:$0xf] }
  0xd4   : > { %4248 = vmatpush.bf16.msra.mxu0 %v8165_v11  ;;  %v9365_v11 = vor.u32 %v11132_v60, %v9362_v61  ;;  %v8829_v14 = vor.u32 %v11005_v4, %v8828_v3  ;;  %v10945_v60 = vld [vmem:[#allocation5 + $0x930] sm:$0xf0]  ;;  %v9068_v61 = vld [vmem:[#allocation5 + $0xcb8] sm:$0xf]  ;;  %v7568_v3 = vld [vmem:[#allocation5 + $0x100] sm:$0xf] }
  0xd5   : > { %4261 = vmatpush.bf16.msra.mxu1 %v8645_v12  ;;  %v7869_v12 = vor.u32 %v10765_v63, %v7868_v62  ;;  %v11065_v62 = vld [vmem:[#allocation5 + $0xcf0] sm:$0xf0]  ;;  %v10690_v4 = vld [vmem:[#allocation5 + $0x138] sm:$0xf0] }
  0xd6   : > { %4274 = vmatpush.bf16.msra.mxu2 %v9125_v13  ;;  %v8349_v13 = vor.u32 %v10885_v2, %v8348_v0  ;;  %v8589_v2 = vor.u32 %v10945_v60, %v8588_v59 }
  0xd7   : > { %4287 = vmatpush.bf16.msra.mxu3 %v9605_v17  ;;  %v8288_v17 = vld [vmem:[#allocation5 + $0x6a0] sm:$0xf] }
  0xd8   : > { %4249 = vmatpush.bf16.msra.mxu0 %v8105_v24  ;;  %v11110_v24 = vld [vmem:[#allocation5 + $0xe58] sm:$0xf0] }
  0xd9   : > { %4262 = vmatpush.bf16.msra.mxu1 %v8585_v25  ;;  %v7809_v25 = vor.u32 %v10750_v16, %v7808_v15  ;;  %v9249_v33 = vor.u32 %v11110_v24, %v9248_v23  ;;  %v8468_v23 = vld [vmem:[#allocation5 + $0x808] sm:$0xf]  ;;  %v10915_v24 = vld [vmem:[#allocation5 + $0x840] sm:$0xf0] }
  0xda   : > { %4275 = vmatpush.bf16.msra.mxu2 %v9065_v26  ;;  %v8289_v26 = vor.u32 %v10870_v20, %v8288_v17  ;;  %v7508_v17 = vld [vmem:[#allocation5 + $0x88] sm:$0xf] }
  0xdb   : > { %4288 = vmatpush.bf16.msra.mxu3 %v9545_v32  ;;  %v8228_v32 = vld [vmem:[#allocation5 + $0x628] sm:$0xf] }
  0xdc   : > { %4250 = vmatpush.bf16.msra.mxu0 %v8045_v38  ;;  %v11095_v38 = vld [vmem:[#allocation5 + $0xde0] sm:$0xf0]  ;;  %v7988_v20 = vld [vmem:[#allocation5 + $0x448] sm:$0xf] }
  0xdd   : > { %4263 = vmatpush.bf16.msra.mxu1 %v8525_v39  ;;  %v7749_v39 = vor.u32 %v10735_v29, %v7748_v28  ;;  %v9189_v45 = vor.u32 %v11095_v38, %v9188_v37  ;;  %v7989_v36 = vor.u32 %v10795_v22, %v7988_v20  ;;  %v8469_v37 = vor.u32 %v10915_v24, %v8468_v23  ;;  %v7928_v38 = vld [vmem:[#allocation5 + $0x3d0] sm:$0xf]  ;;  %v10848_v22 = vld [vmem:[#allocation5 + $0x62c] sm:$0xf]  ;;  %v8230_v23 = vld [vmem:[#allocation5 + $0x664] sm:$0xf0] }
  0xde   : > { %4276 = vmatpush.bf16.msra.mxu2 %v9005_v40  ;;  %v8229_v40 = vor.u32 %v10855_v34, %v8228_v32  ;;  %v7448_v32 = vld [vmem:[#allocation5 + $0x10] sm:$0xf]  ;;  %v10968_v24 = vld [vmem:[#allocation5 + $0x9ec] sm:$0xf] }
  0xdf   : > { %4289 = vmatpush.bf16.msra.mxu3 %v9485_v44  ;;  %v8168_v44 = vld [vmem:[#allocation5 + $0x5b0] sm:$0xf] }
  0xe0   : > { %4251 = vmatpush.bf16.msra.mxu0 %v7985_v50  ;;  %v11080_v50 = vld [vmem:[#allocation5 + $0xd68] sm:$0xf0]  ;;  %v8169_v52 = vor.u32 %v10840_v46, %v8168_v44  ;;  %v8888_v44 = vld [vmem:[#allocation5 + $0xb50] sm:$0xf] }
  0xe1   : > { %4264 = vmatpush.bf16.msra.mxu1 %v8465_v53  ;;  %v8649_v53 = vor.u32 %v10960_v48, %v8648_v47  ;;  %v9129_v57 = vor.u32 %v11080_v50, %v9128_v49  ;;  %v9788_v47 = vld [vmem:[#allocation5 + $0x1258] sm:$0xf]  ;;  %v11245_v48 = vld [vmem:[#allocation5 + $0x1290] sm:$0xf0]  ;;  %v10758_v49 = vld [vmem:[#allocation5 + $0x35c] sm:$0xf] }
  0xe2   : > { %4277 = vmatpush.bf16.msra.mxu2 %v8945_v54  ;;  %v7628_v54 = vld [vmem:[#allocation5 + $0x178] sm:$0xf]  ;;  %v9789_v60 = vor.u32 %v11245_v48, %v9788_v47  ;;  %v11185_v47 = vld [vmem:[#allocation5 + $0x10b0] sm:$0xf0]  ;;  %v10698_v48 = vld [vmem:[#allocation5 + $0x17c] sm:$0xf] }
  0xe3   : > { %4290 = vmatpush.bf16.msra.mxu3 %v9425_v58  ;;  %v10825_v58 = vld [vmem:[#allocation5 + $0x570] sm:$0xf0]  ;;  %v7629_v63 = vor.u32 %v10705_v55, %v7628_v54 }
  0xe4   : > { %4252 = vmatpush.bf16.msra.mxu0 %v7925_v1  ;;  %v4046_v0 = vpop.f32.mrf.mxu0  ;;  %v8109_v1 = vor.u32 %v10825_v58, %v8108_v56  ;;  %v8830_v58 = vld [vmem:[#allocation5 + $0xb14] sm:$0xf0] }
  0xe5   : > { %4265 = vmatpush.bf16.msra.mxu1 %v8405_v5  ;;  %v8048_v5 = vld [vmem:[#allocation5 + $0x4c0] sm:$0xf] }
  0xe6   : > { %4278 = vmatpush.bf16.msra.mxu2 %v8885_v6  ;;  %v9069_v6 = vor.u32 %v11065_v62, %v9068_v61  ;;  %v8049_v15 = vor.u32 %v10810_v7, %v8048_v5  ;;  %v7810_v5 = vld [vmem:[#allocation5 + $0x31c] sm:$0xf0] }
  0xe7   : > { %4291 = vmatpush.bf16.msra.mxu3 %v9365_v11  ;;  %4253 = vmatmul.bf16.vlgmr.msra.gmra.mxu0 %v12027_v31  ;;  %v10930_v11 = vld [vmem:[#allocation5 + $0x8b8] sm:$0xf0]  ;;  %v8290_v7 = vld [vmem:[#allocation5 + $0x6dc] sm:$0xf0] }
  0xe8   : > { %4297 = vmatpush.bf16.msrb.mxu0 %v7869_v12  ;;  %4266 = vmatmul.bf16.vlgmr.msra.gmra.mxu1 %v12023_v19  ;;  %v9008_v12 = vld [vmem:[#allocation5 + $0xc40] sm:$0xf]  ;;  %v8529_v16 = vor.u32 %v10930_v11, %v8528_v10  ;;  %v10983_v10 = vld [vmem:[#allocation5 + $0xa64] sm:$0xf] }
  0xe9   : > { %4310 = vmatpush.bf16.msrb.mxu1 %v8349_v13  ;;  %4279 = vmatmul.bf16.vlgmr.msra.gmra.mxu2 %v12018_v9  ;;  %v11050_v13 = vld [vmem:[#allocation5 + $0xc78] sm:$0xf0]  ;;  %v4059_v28 = vpop.f32.mrf.mxu1  ;;  %v8770_v11 = vld [vmem:[#allocation5 + $0xa9c] sm:$0xf0] }
  0xea   : > { %4323 = vmatpush.bf16.msrb.mxu2 %v8829_v14  ;;  %4292 = vmatmul.bf16.vlgmr.msra.gmra.mxu3 %v12031_v30  ;;  %v7569_v14 = vor.u32 %v10690_v4, %v7568_v3  ;;  %v9009_v21 = vor.u32 %v11050_v13, %v9008_v12  ;;  %v4060_v35 = vadd.f32 %v4059_v28, %v4046_v0  ;;  %v9728_v0 = vld [vmem:[#allocation5 + $0x11e0] sm:$0xf] }
  0xeb   : > { %4336 = vmatpush.bf16.msrb.mxu3 %v9309_v18  ;;  %v10675_v18 = vld [vmem:[#allocation5 + $0xc0] sm:$0xf0]  ;;  %v8773_v20 = vor.u32 %v10983_v10, %v8770_v11  ;;  %v8233_v28 = vor.u32 %v10848_v22, %v8230_v23  ;;  %v10908_v22 = vld [vmem:[#allocation5 + $0x80c] sm:$0xf]  ;;  %v8470_v23 = vld [vmem:[#allocation5 + $0x844] sm:$0xf0] }
  0xec   : > { %4298 = vmatpush.bf16.msrb.mxu0 %v7809_v25  ;;  %v7509_v29 = vor.u32 %v10675_v18, %v7508_v17  ;;  %v4048_v34 = vpop.f32.mrf.mxu0  ;;  %v11215_v17 = vld [vmem:[#allocation5 + $0x11a0] sm:$0xf0]  ;;  %v10728_v18 = vld [vmem:[#allocation5 + $0x26c] sm:$0xf] }
  0xed   : > { %4311 = vmatpush.bf16.msrb.mxu1 %v8289_v26  ;;  %v4085_v25 = vpop.f32.mrf.mxu3  ;;  %v8948_v26 = vld [vmem:[#allocation5 + $0xbc8] sm:$0xf] }
  0xee   : > { %4324 = vmatpush.bf16.msrb.mxu2 %v8769_v27  ;;  %v11035_v27 = vld [vmem:[#allocation5 + $0xc00] sm:$0xf0] }
  0xef   : > { %4337 = vmatpush.bf16.msrb.mxu3 %v9249_v33  ;;  %v10660_v33 = vld [vmem:[#allocation5 + $0x48] sm:$0xf0]  ;;  %v8949_v42 = vor.u32 %v11035_v27, %v8948_v26 }
  0xf0   : > { %4299 = vmatpush.bf16.msrb.mxu0 %v7749_v39  ;;  %v10780_v39 = vld [vmem:[#allocation5 + $0x408] sm:$0xf0]  ;;  %v7449_v50 = vor.u32 %v10660_v33, %v7448_v32  ;;  %v10713_v33 = vld [vmem:[#allocation5 + $0x1f4] sm:$0xf] }
  0xf1   : > { %4312 = vmatpush.bf16.msrb.mxu1 %v8229_v40  ;;  %v8408_v40 = vld [vmem:[#allocation5 + $0x790] sm:$0xf]  ;;  %v7929_v55 = vor.u32 %v10780_v39, %v7928_v38  ;;  %v4061_v3 = vpop.f32.mrf.mxu1  ;;  %v11200_v32 = vld [vmem:[#allocation5 + $0x1128] sm:$0xf0]  ;;  %v10953_v38 = vld [vmem:[#allocation5 + $0x974] sm:$0xf] }
  0xf2   : > { %4325 = vmatpush.bf16.msrb.mxu2 %v8709_v41  ;;  %v4072_v41 = vpop.f32.mrf.mxu2  ;;  %v8409_v56 = vor.u32 %v10900_v43, %v8408_v40  ;;  %v8650_v39 = vld [vmem:[#allocation5 + $0x9ac] sm:$0xf0]  ;;  %v8530_v3 = vld [vmem:[#allocation5 + $0x8bc] sm:$0xf0] }
  0xf3   : > { %4338 = vmatpush.bf16.msrb.mxu3 %v9189_v45  ;;  %v11020_v45 = vld [vmem:[#allocation5 + $0xb88] sm:$0xf0]  ;;  %v4073_v46 = vadd.f32 %v4072_v41, %v4060_v35  ;;  %v7690_v35 = vld [vmem:[#allocation5 + $0x22c] sm:$0xf0] }
  0xf4   : > { %4300 = vmatpush.bf16.msrb.mxu0 %v7689_v51  ;;  %v7870_v51 = vld [vmem:[#allocation5 + $0x394] sm:$0xf0]  ;;  %v8889_v59 = vor.u32 %v11020_v45, %v8888_v44  ;;  %v7693_v44 = vor.u32 %v10713_v33, %v7690_v35  ;;  %v10773_v33 = vld [vmem:[#allocation5 + $0x3d4] sm:$0xf]  ;;  %v7930_v35 = vld [vmem:[#allocation5 + $0x40c] sm:$0xf0] }
  0xf5   : > { %4313 = vmatpush.bf16.msrb.mxu1 %v8169_v52  ;;  %v10878_v52 = vld [vmem:[#allocation5 + $0x71c] sm:$0xf]  ;;  %v12049_v54 = vadd.f32 %v4085_v25, %v4073_v46  ;;  %v4087_v61 = vpop.f32.mrf.mxu3  ;;  %v7873_v62 = vor.u32 %v10758_v49, %v7870_v51  ;;  %v8710_v25 = vld [vmem:[#allocation5 + $0xa24] sm:$0xf0]  ;;  %v9548_v46 = vld [vmem:[#allocation5 + $0x1078] sm:$0xf]  ;;  %v8653_v49 = vor.u32 %v10953_v38, %v8650_v39 }
  0xf6   : > { %4326 = vmatpush.bf16.msrb.mxu2 %v8649_v53  ;;  %v8350_v53 = vld [vmem:[#allocation5 + $0x754] sm:$0xf0]  ;;  %v8713_v34 = vor.u32 %v10968_v24, %v8710_v25  ;;  %v10818_v51 = vld [vmem:[#allocation5 + $0x53c] sm:$0xf]  ;;  %v9368_v25 = vld [vmem:[#allocation5 + $0xf10] sm:$0xf] }
  0xf7   : > { %4339 = vmatpush.bf16.msrb.mxu3 %v9129_v57  ;;  %v10998_v57 = vld [vmem:[#allocation5 + $0xadc] sm:$0xf] }
  0xf8   : > { %4301 = vmatpush.bf16.msrb.mxu0 %v7629_v63  ;;  %v8353_v63 = vor.u32 %v10878_v52, %v8350_v53  ;;  %v8833_v4 = vor.u32 %v10998_v57, %v8830_v58  ;;  %v8110_v52 = vld [vmem:[#allocation5 + $0x574] sm:$0xf0]  ;;  %v10938_v53 = vld [vmem:[#allocation5 + $0x8fc] sm:$0xf]  ;;  %v9488_v58 = vld [vmem:[#allocation5 + $0x1000] sm:$0xf] }
  0xf9   : > { %4314 = vmatpush.bf16.msrb.mxu1 %v8109_v1  ;;  %v11230_v1 = vld [vmem:[#allocation5 + $0x1218] sm:$0xf0]  ;;  %v8113_v57 = vor.u32 %v10818_v51, %v8110_v52 }
  0xfa   : > { %4327 = vmatpush.bf16.msrb.mxu2 %v8589_v2  ;;  %v10743_v2 = vld [vmem:[#allocation5 + $0x2e4] sm:$0xf]  ;;  %v4074_v12 = vpop.f32.mrf.mxu2  ;;  %v9729_v13 = vor.u32 %v11230_v1, %v9728_v0  ;;  %v8050_v0 = vld [vmem:[#allocation5 + $0x4fc] sm:$0xf0]  ;;  %v11118_v39 = vld [vmem:[#allocation5 + $0xe9c] sm:$0xf] }
  0xfb   : > { %4340 = vmatpush.bf16.msrb.mxu3 %v9069_v6  ;;  %v10863_v6 = vld [vmem:[#allocation5 + $0x6a4] sm:$0xf]  ;;  %v10886_v51 = vld [vmem:[#allocation5 + $0x758] sm:$0xf0] }
  0xfc   : > { %4302 = vmatpush.bf16.msrb.mxu0 %v7569_v14  ;;  %v7813_v14 = vor.u32 %v10743_v2, %v7810_v5  ;;  %v10923_v2 = vld [vmem:[#allocation5 + $0x884] sm:$0xf] }
  0xfd   : > { %4315 = vmatpush.bf16.msrb.mxu1 %v8049_v15  ;;  %v8293_v15 = vor.u32 %v10863_v6, %v8290_v7 }
  0xfe   : > { %4328 = vmatpush.bf16.msrb.mxu2 %v8529_v16  ;;  %v9668_v16 = vld [vmem:[#allocation5 + $0x1168] sm:$0xf] }
  0xff   : > { %4341 = vmatpush.bf16.msrb.mxu3 %v9009_v21  ;;  %v7750_v21 = vld [vmem:[#allocation5 + $0x2a4] sm:$0xf0]  ;;  %v9669_v26 = vor.u32 %v11215_v17, %v9668_v16  ;;  %v8533_v16 = vor.u32 %v10923_v2, %v8530_v3 }
 0x100   : > { %4303 = vmatpush.bf16.msrb.mxu0 %v7509_v29  ;;  %v7753_v27 = vor.u32 %v10728_v18, %v7750_v21  ;;  %v9608_v29 = vld [vmem:[#allocation5 + $0x10f0] sm:$0xf]  ;;  %v7510_v17 = vld [vmem:[#allocation5 + $0xc4] sm:$0xf0]  ;;  %v10788_v18 = vld [vmem:[#allocation5 + $0x44c] sm:$0xf] }
 0x101   : > { %4316 = vmatpush.bf16.msrb.mxu1 %v7989_v36  ;;  %v10833_v36 = vld [vmem:[#allocation5 + $0x5b4] sm:$0xf]  ;;  %v9609_v41 = vor.u32 %v11200_v32, %v9608_v29  ;;  %v7450_v32 = vld [vmem:[#allocation5 + $0x4c] sm:$0xf0] }
 0x102   : > { %4329 = vmatpush.bf16.msrb.mxu2 %v8469_v37  ;;  %v8170_v37 = vld [vmem:[#allocation5 + $0x5ec] sm:$0xf0]  ;;  %v10653_v29 = vld [vmem:[#allocation5 + $0x14] sm:$0xf] }
 0x103   : > { %4342 = vmatpush.bf16.msrb.mxu3 %v8949_v42  ;;  %v8173_v45 = vor.u32 %v10833_v36, %v8170_v37  ;;  %v10893_v36 = vld [vmem:[#allocation5 + $0x794] sm:$0xf]  ;;  %v8410_v37 = vld [vmem:[#allocation5 + $0x7cc] sm:$0xf0] }
 0x104   : > { %4304 = vmatpush.bf16.msrb.mxu0 %v7449_v50  ;;  %v4098_v40 = vpop.f32.mrf.mxu0  ;;  %v7630_v50 = vld [vmem:[#allocation5 + $0x1b4] sm:$0xf0]  ;;  %v8413_v52 = vor.u32 %v10893_v36, %v8410_v37  ;;  %v11058_v37 = vld [vmem:[#allocation5 + $0xcbc] sm:$0xf] }
 0x105   : > { %4317 = vmatpush.bf16.msrb.mxu1 %v7929_v55  ;;  %v12056_v42 = vadd.f32 %v4098_v40, %v12049_v54  ;;  %v4111_v43 = vpop.f32.mrf.mxu1  ;;  %v8590_v55 = vld [vmem:[#allocation5 + $0x934] sm:$0xf0]  ;;  %v7633_v54 = vor.u32 %v10698_v48, %v7630_v50  ;;  %v7453_v48 = vor.u32 %v10653_v29, %v7450_v32  ;;  %v8356_v50 = vld [vmem:[#allocation5 + $0x720] sm:$0xf] }
 0x106   : > { %4330 = vmatpush.bf16.msrb.mxu2 %v8409_v56  ;;  %v9549_v56 = vor.u32 %v11185_v47, %v9548_v46  ;;  %v8593_v61 = vor.u32 %v10938_v53, %v8590_v55  ;;  %v9310_v40 = vld [vmem:[#allocation5 + $0xed4] sm:$0xf0]  ;;  %v7876_v46 = vld [vmem:[#allocation5 + $0x360] sm:$0xf]  ;;  %v10766_v47 = vld [vmem:[#allocation5 + $0x398] sm:$0xf0] }
 0x107   : > { %4343 = vmatpush.bf16.msrb.mxu3 %v8889_v59  ;;  %4305 = vmatmul.bf16.vlgmr.msrb.gmra.mxu0 %v12016_v8  ;;  %v11170_v59 = vld [vmem:[#allocation5 + $0x1038] sm:$0xf0]  ;;  %v9313_v53 = vor.u32 %v11118_v39, %v9310_v40 }
 0x108   : > { %4349 = vmatpush.bf16.msra.mxu0 %v9789_v60  ;;  %4318 = vmatmul.bf16.vlgmr.msrb.gmra.mxu1 %v12027_v31  ;;  %v10683_v60 = vld [vmem:[#allocation5 + $0x104] sm:$0xf]  ;;  %v9489_v6 = vor.u32 %v11170_v59, %v9488_v58  ;;  %v8357_v59 = vor.u32 %v10886_v51, %v8356_v50  ;;  %v11178_v39 = vld [vmem:[#allocation5 + $0x107c] sm:$0xf]  ;;  %v9010_v51 = vld [vmem:[#allocation5 + $0xc7c] sm:$0xf0] }
 0x109   : > { %4362 = vmatpush.bf16.msra.mxu1 %v7873_v62  ;;  %4331 = vmatmul.bf16.vlgmr.msrb.gmra.mxu2 %v12023_v19  ;;  %v7570_v62 = vld [vmem:[#allocation5 + $0x13c] sm:$0xf0]  ;;  %v11223_v58 = vld [vmem:[#allocation5 + $0x11e4] sm:$0xf] }
 0x10a   : > { %4375 = vmatpush.bf16.msra.mxu2 %v8353_v63  ;;  %4344 = vmatmul.bf16.vlgmr.msrb.gmra.mxu3 %v12018_v9  ;;  %v10803_v63 = vld [vmem:[#allocation5 + $0x4c4] sm:$0xf]  ;;  %v7573_v11 = vor.u32 %v10683_v60, %v7570_v62  ;;  %v9730_v60 = vld [vmem:[#allocation5 + $0x121c] sm:$0xf0] }
 0x10b   : > { %4388 = vmatpush.bf16.msra.mxu3 %v8833_v4  ;;  %v8053_v12 = vor.u32 %v10803_v63, %v8050_v0  ;;  %v10751_v62 = vld [vmem:[#allocation5 + $0x320] sm:$0xf0]  ;;  %v8296_v63 = vld [vmem:[#allocation5 + $0x6a8] sm:$0xf]  ;;  %v9733_v2 = vor.u32 %v11223_v58, %v9730_v60 }
 0x10c   : > { %4350 = vmatpush.bf16.msra.mxu0 %v9729_v13  ;;  %v4100_v4 = vpop.f32.mrf.mxu0  ;;  %v4124_v5 = vpop.f32.mrf.mxu2  ;;  %v9428_v13 = vld [vmem:[#allocation5 + $0xf88] sm:$0xf]  ;;  %v10871_v0 = vld [vmem:[#allocation5 + $0x6e0] sm:$0xf0] }
 0x10d   : > { %4363 = vmatpush.bf16.msra.mxu1 %v7813_v14  ;;  %v4137_v1 = vpop.f32.mrf.mxu3  ;;  %v4113_v7 = vpop.f32.mrf.mxu1  ;;  %v4125_v10 = vadd.f32 %v4124_v5, %v4111_v43  ;;  %v11155_v14 = vld [vmem:[#allocation5 + $0xfc0] sm:$0xf0]  ;;  %v11088_v4 = vld [vmem:[#allocation5 + $0xdac] sm:$0xf]  ;;  %v9190_v5 = vld [vmem:[#allocation5 + $0xde4] sm:$0xf0] }
 0x10e   : > { %4376 = vmatpush.bf16.msra.mxu2 %v8293_v15  ;;  %v10668_v15 = vld [vmem:[#allocation5 + $0x8c] sm:$0xf]  ;;  %v9429_v24 = vor.u32 %v11155_v14, %v9428_v13  ;;  %v8297_v7 = vor.u32 %v10871_v0, %v8296_v63  ;;  %v8236_v13 = vld [vmem:[#allocation5 + $0x630] sm:$0xf]  ;;  %v11043_v50 = vld [vmem:[#allocation5 + $0xc44] sm:$0xf] }
 0x10f   : > { %4389 = vmatpush.bf16.msra.mxu3 %v8773_v20  ;;  %v7990_v20 = vld [vmem:[#allocation5 + $0x484] sm:$0xf0]  ;;  %v12058_v21 = vadd.f32 %v4137_v1, %v4125_v10  ;;  %v10856_v14 = vld [vmem:[#allocation5 + $0x668] sm:$0xf0] }
 0x110   : > { %4351 = vmatpush.bf16.msra.mxu0 %v9669_v26  ;;  %v11140_v26 = vld [vmem:[#allocation5 + $0xf48] sm:$0xf0]  ;;  %v9670_v10 = vld [vmem:[#allocation5 + $0x11a4] sm:$0xf0] }
 0x111   : > { %4364 = vmatpush.bf16.msra.mxu1 %v7753_v27  ;;  %v7513_v27 = vor.u32 %v10668_v15, %v7510_v17  ;;  %v9193_v15 = vor.u32 %v11088_v4, %v9190_v5  ;;  %v8056_v58 = vld [vmem:[#allocation5 + $0x4c8] sm:$0xf]  ;;  %v11148_v5 = vld [vmem:[#allocation5 + $0xf8c] sm:$0xf] }
 0x112   : > { %4377 = vmatpush.bf16.msra.mxu2 %v8233_v28  ;;  %v7993_v28 = vor.u32 %v10788_v18, %v7990_v20  ;;  %v11073_v18 = vld [vmem:[#allocation5 + $0xd34] sm:$0xf]  ;;  %v9130_v20 = vld [vmem:[#allocation5 + $0xd6c] sm:$0xf0]  ;;  %v8950_v4 = vld [vmem:[#allocation5 + $0xc04] sm:$0xf0] }
 0x113   : > { %4390 = vmatpush.bf16.msra.mxu3 %v8713_v34  ;;  %v8473_v34 = vor.u32 %v10908_v22, %v8470_v23  ;;  %v11193_v22 = vld [vmem:[#allocation5 + $0x10f4] sm:$0xf]  ;;  %v8237_v23 = vor.u32 %v10856_v14, %v8236_v13  ;;  %v9133_v32 = vor.u32 %v11073_v18, %v9130_v20  ;;  %v10796_v13 = vld [vmem:[#allocation5 + $0x488] sm:$0xf0] }
 0x114   : > { %4352 = vmatpush.bf16.msra.mxu0 %v9609_v41  ;;  %v11238_v41 = vld [vmem:[#allocation5 + $0x125c] sm:$0xf]  ;;  %v4126_v43 = vpop.f32.mrf.mxu2  ;;  %v11133_v20 = vld [vmem:[#allocation5 + $0xf14] sm:$0xf] }
 0x115   : > { %4365 = vmatpush.bf16.msra.mxu1 %v7693_v44  ;;  %v4139_v38 = vpop.f32.mrf.mxu3  ;;  %v9369_v44 = vor.u32 %v11140_v26, %v9368_v25  ;;  %v7696_v25 = vld [vmem:[#allocation5 + $0x1f8] sm:$0xf]  ;;  %v10721_v26 = vld [vmem:[#allocation5 + $0x230] sm:$0xf0]  ;;  %v7636_v43 = vld [vmem:[#allocation5 + $0x180] sm:$0xf] }
 0x116   : > { %4378 = vmatpush.bf16.msra.mxu2 %v8173_v45  ;;  %v9790_v45 = vld [vmem:[#allocation5 + $0x1294] sm:$0xf0]  ;;  %v7697_v36 = vor.u32 %v10721_v26, %v7696_v25  ;;  %v10661_v25 = vld [vmem:[#allocation5 + $0x50] sm:$0xf0] }
 0x117   : > { %4391 = vmatpush.bf16.msra.mxu3 %v8653_v49  ;;  %v7933_v49 = vor.u32 %v10773_v33, %v7930_v35  ;;  %v9793_v55 = vor.u32 %v11238_v41, %v9790_v45  ;;  %v9070_v38 = vld [vmem:[#allocation5 + $0xcf4] sm:$0xf0] }
 0x118   : > { %4353 = vmatpush.bf16.msra.mxu0 %v9549_v56  ;;  %v7877_v56 = vor.u32 %v10766_v47, %v7876_v46  ;;  %v9550_v41 = vld [vmem:[#allocation5 + $0x10b4] sm:$0xf0]  ;;  %v8116_v46 = vld [vmem:[#allocation5 + $0x540] sm:$0xf]  ;;  %v10826_v47 = vld [vmem:[#allocation5 + $0x578] sm:$0xf0] }
 0x119   : > { %4366 = vmatpush.bf16.msra.mxu1 %v7633_v54  ;;  %v11103_v54 = vld [vmem:[#allocation5 + $0xe24] sm:$0xf]  ;;  %v7936_v26 = vld [vmem:[#allocation5 + $0x3d8] sm:$0xf] }
 0x11a   : > { %4379 = vmatpush.bf16.msra.mxu2 %v8113_v57  ;;  %v9250_v57 = vld [vmem:[#allocation5 + $0xe5c] sm:$0xf0] }
 0x11b   : > { %4392 = vmatpush.bf16.msra.mxu3 %v8593_v61  ;;  %v7816_v61 = vld [vmem:[#allocation5 + $0x2e8] sm:$0xf]  ;;  %v9253_v1 = vor.u32 %v11103_v54, %v9250_v57  ;;  %v10691_v54 = vld [vmem:[#allocation5 + $0x140] sm:$0xf0] }
 0x11c   : > { %4354 = vmatpush.bf16.msra.mxu0 %v9489_v6  ;;  %v7817_v3 = vor.u32 %v10751_v62, %v7816_v61  ;;  %v11208_v6 = vld [vmem:[#allocation5 + $0x116c] sm:$0xf]  ;;  %v9013_v62 = vor.u32 %v11043_v50, %v9010_v51  ;;  %v9256_v50 = vld [vmem:[#allocation5 + $0xe28] sm:$0xf] }
 0x11d   : > { %4367 = vmatpush.bf16.msra.mxu1 %v7573_v11  ;;  %v7756_v11 = vld [vmem:[#allocation5 + $0x270] sm:$0xf] }
 0x11e   : > { %4380 = vmatpush.bf16.msra.mxu2 %v8053_v12  ;;  %v10736_v12 = vld [vmem:[#allocation5 + $0x2a8] sm:$0xf0] }
 0x11f   : > { %4393 = vmatpush.bf16.msra.mxu3 %v8533_v16  ;;  %v9673_v16 = vor.u32 %v11208_v6, %v9670_v10  ;;  %v7757_v17 = vor.u32 %v10736_v12, %v7756_v11  ;;  %v7516_v10 = vld [vmem:[#allocation5 + $0x90] sm:$0xf]  ;;  %v10676_v11 = vld [vmem:[#allocation5 + $0xc8] sm:$0xf0] }
 0x120   : > { %4355 = vmatpush.bf16.msra.mxu0 %v9429_v24  ;;  %v9610_v24 = vld [vmem:[#allocation5 + $0x112c] sm:$0xf0]  ;;  %v7517_v18 = vor.u32 %v10676_v11, %v7516_v10  ;;  %v8656_v11 = vld [vmem:[#allocation5 + $0x978] sm:$0xf] }
 0x121   : > { %4368 = vmatpush.bf16.msra.mxu1 %v7513_v27  ;;  %v8176_v27 = vld [vmem:[#allocation5 + $0x5b8] sm:$0xf]  ;;  %v9613_v35 = vor.u32 %v11193_v22, %v9610_v24  ;;  %v7996_v12 = vld [vmem:[#allocation5 + $0x450] sm:$0xf] }
 0x122   : > { %4381 = vmatpush.bf16.msra.mxu2 %v7993_v28  ;;  %v10841_v28 = vld [vmem:[#allocation5 + $0x5f0] sm:$0xf0]  ;;  %v9370_v22 = vld [vmem:[#allocation5 + $0xf4c] sm:$0xf0]  ;;  %v7997_v24 = vor.u32 %v10796_v13, %v7996_v12  ;;  %v9136_v13 = vld [vmem:[#allocation5 + $0xd38] sm:$0xf] }
 0x123   : > { %4394 = vmatpush.bf16.msra.mxu3 %v8473_v34  ;;  %v8177_v40 = vor.u32 %v10841_v28, %v8176_v27  ;;  %v10781_v27 = vld [vmem:[#allocation5 + $0x410] sm:$0xf0] }
 0x124   : > { %4356 = vmatpush.bf16.msra.mxu0 %v9369_v44  ;;  %v4150_v29 = vpop.f32.mrf.mxu0  ;;  %v10706_v44 = vld [vmem:[#allocation5 + $0x1b8] sm:$0xf0]  ;;  %v10961_v12 = vld [vmem:[#allocation5 + $0x9b0] sm:$0xf0] }
 0x125   : > { %4369 = vmatpush.bf16.msra.mxu1 %v7453_v48  ;;  %v4151_v33 = vadd.f32 %v4150_v29, %v12058_v21  ;;  %v4163_v34 = vpop.f32.mrf.mxu1  ;;  %v9073_v48 = vor.u32 %v11058_v37, %v9070_v38  ;;  %v9553_v21 = vor.u32 %v11178_v39, %v9550_v41  ;;  %v8836_v29 = vld [vmem:[#allocation5 + $0xae0] sm:$0xf]  ;;  %v11246_v38 = vld [vmem:[#allocation5 + $0x1298] sm:$0xf0]  ;;  %v9373_v39 = vor.u32 %v11133_v20, %v9370_v22  ;;  %v10759_v41 = vld [vmem:[#allocation5 + $0x364] sm:$0xf] }
 0x126   : > { %4382 = vmatpush.bf16.msra.mxu2 %v7933_v49  ;;  %v7637_v49 = vor.u32 %v10706_v44, %v7636_v43  ;;  %v9796_v37 = vld [vmem:[#allocation5 + $0x1260] sm:$0xf]  ;;  %v7937_v44 = vor.u32 %v10781_v27, %v7936_v26  ;;  %v7698_v20 = vld [vmem:[#allocation5 + $0x234] sm:$0xf0]  ;;  %v8657_v22 = vor.u32 %v10961_v12, %v8656_v11 }
 0x127   : > { %4395 = vmatpush.bf16.msra.mxu3 %v8413_v52  ;;  %4357 = vmatmul.bf16.vlgmr.msra.gmra.mxu0 %v12031_v30  ;;  %v12065_v45 = vadd.f32 %v4163_v34, %v4151_v33  ;;  %v11163_v52 = vld [vmem:[#allocation5 + $0x1004] sm:$0xf]  ;;  %v9316_v33 = vld [vmem:[#allocation5 + $0xea0] sm:$0xf] }
 0x128   : > { %4401 = vmatpush.bf16.msrb.mxu0 %v9313_v53  ;;  %4370 = vmatmul.bf16.vlgmr.msra.gmra.mxu1 %v12016_v8  ;;  %v8117_v53 = vor.u32 %v10826_v47, %v8116_v46  ;;  %v7878_v43 = vld [vmem:[#allocation5 + $0x39c] sm:$0xf0] }
 0x129   : > { %4414 = vmatpush.bf16.msrb.mxu1 %v9793_v55  ;;  %4383 = vmatmul.bf16.vlgmr.msra.gmra.mxu2 %v12027_v31  ;;  %v9490_v55 = vld [vmem:[#allocation5 + $0x103c] sm:$0xf0]  ;;  %v7881_v51 = vor.u32 %v10759_v41, %v7878_v43 }
 0x12a   : > { %4427 = vmatpush.bf16.msrb.mxu2 %v7877_v56  ;;  %4396 = vmatmul.bf16.vlgmr.msra.gmra.mxu3 %v12023_v19  ;;  %v7576_v56 = vld [vmem:[#allocation5 + $0x108] sm:$0xf]  ;;  %v8596_v27 = vld [vmem:[#allocation5 + $0x900] sm:$0xf] }
 0x12b   : > { %4440 = vmatpush.bf16.msrb.mxu3 %v8357_v59  ;;  %v10811_v59 = vld [vmem:[#allocation5 + $0x500] sm:$0xf0] }
 0x12c   : > { %4402 = vmatpush.bf16.msrb.mxu0 %v9253_v1  ;;  %v4176_v57 = vpop.f32.mrf.mxu2  ;;  %v4152_v61 = vpop.f32.mrf.mxu0  ;;  %v9493_v1 = vor.u32 %v11163_v52, %v9490_v55  ;;  %v8057_v6 = vor.u32 %v10811_v59, %v8056_v58  ;;  %v11111_v52 = vld [vmem:[#allocation5 + $0xe60] sm:$0xf0] }
 0x12d   : > { %4415 = vmatpush.bf16.msrb.mxu1 %v9733_v2  ;;  %v4189_v60 = vpop.f32.mrf.mxu3  ;;  %v4165_v0 = vpop.f32.mrf.mxu1  ;;  %v7577_v2 = vor.u32 %v10691_v54, %v7576_v56  ;;  %v11231_v55 = vld [vmem:[#allocation5 + $0x1220] sm:$0xf0]  ;;  %v10744_v56 = vld [vmem:[#allocation5 + $0x2ec] sm:$0xf]  ;;  %v7818_v54 = vld [vmem:[#allocation5 + $0x324] sm:$0xf0]  ;;  %v9257_v58 = vor.u32 %v11111_v52, %v9256_v50 }
 0x12e   : > { %4428 = vmatpush.bf16.msrb.mxu2 %v7817_v3  ;;  %v12067_v63 = vadd.f32 %v4189_v60, %v4176_v57  ;;  %v11028_v3 = vld [vmem:[#allocation5 + $0xbcc] sm:$0xf]  ;;  %v8716_v60 = vld [vmem:[#allocation5 + $0x9f0] sm:$0xf]  ;;  %v7821_v0 = vor.u32 %v10744_v56, %v7818_v54  ;;  %v11171_v50 = vld [vmem:[#allocation5 + $0x1040] sm:$0xf0] }
 0x12f   : > { %4441 = vmatpush.bf16.msrb.mxu3 %v8297_v7  ;;  %v9430_v7 = vld [vmem:[#allocation5 + $0xfc4] sm:$0xf0]  ;;  %v8953_v14 = vor.u32 %v11028_v3, %v8950_v4  ;;  %v10976_v61 = vld [vmem:[#allocation5 + $0xa28] sm:$0xf0]  ;;  %v10729_v4 = vld [vmem:[#allocation5 + $0x274] sm:$0xf] }
 0x130   : > { %4403 = vmatpush.bf16.msrb.mxu0 %v9193_v15  ;;  %v11013_v15 = vld [vmem:[#allocation5 + $0xb54] sm:$0xf]  ;;  %v11216_v3 = vld [vmem:[#allocation5 + $0x11a8] sm:$0xf0] }
 0x131   : > { %4416 = vmatpush.bf16.msrb.mxu1 %v9673_v16  ;;  %v8890_v16 = vld [vmem:[#allocation5 + $0xb8c] sm:$0xf0]  ;;  %v10684_v52 = vld [vmem:[#allocation5 + $0x10c] sm:$0xf] }
 0x132   : > { %4429 = vmatpush.bf16.msrb.mxu2 %v7757_v17  ;;  %v9433_v17 = vor.u32 %v11148_v5, %v9430_v7  ;;  %v7758_v5 = vld [vmem:[#allocation5 + $0x2ac] sm:$0xf0] }
 0x133   : > { %4442 = vmatpush.bf16.msrb.mxu3 %v8237_v23  ;;  %v7456_v23 = vld [vmem:[#allocation5 + $0x18] sm:$0xf] }
 0x134   : > { %4404 = vmatpush.bf16.msrb.mxu0 %v9133_v32  ;;  %v4178_v28 = vpop.f32.mrf.mxu2  ;;  %v11006_v32 = vld [vmem:[#allocation5 + $0xb18] sm:$0xf0] }
 0x135   : > { %4417 = vmatpush.bf16.msrb.mxu1 %v9613_v35  ;;  %v4191_v34 = vpop.f32.mrf.mxu3  ;;  %v8893_v35 = vor.u32 %v11013_v15, %v8890_v16  ;;  %v8837_v46 = vor.u32 %v11006_v32, %v8836_v29  ;;  %v11081_v15 = vld [vmem:[#allocation5 + $0xd70] sm:$0xf0]  ;;  %v9616_v16 = vld [vmem:[#allocation5 + $0x10f8] sm:$0xf]  ;;  %v10946_v28 = vld [vmem:[#allocation5 + $0x938] sm:$0xf0] }
 0x136   : > { %4430 = vmatpush.bf16.msrb.mxu2 %v7697_v36  ;;  %v11126_v36 = vld [vmem:[#allocation5 + $0xed8] sm:$0xf0]  ;;  %v9076_v29 = vld [vmem:[#allocation5 + $0xcc0] sm:$0xf] }
 0x137   : > { %4443 = vmatpush.bf16.msrb.mxu3 %v8177_v40  ;;  %v7457_v40 = vor.u32 %v10661_v25, %v7456_v23  ;;  %v9317_v47 = vor.u32 %v11126_v36, %v9316_v33  ;;  %v9137_v25 = vor.u32 %v11081_v15, %v9136_v13  ;;  %v11066_v34 = vld [vmem:[#allocation5 + $0xcf8] sm:$0xf0]  ;;  %v8896_v13 = vld [vmem:[#allocation5 + $0xb58] sm:$0xf] }
 0x138   : > { %4405 = vmatpush.bf16.msrb.mxu0 %v9073_v48  ;;  %v9797_v48 = vor.u32 %v11246_v38, %v9796_v37  ;;  %v11186_v36 = vld [vmem:[#allocation5 + $0x10b8] sm:$0xf0]  ;;  %v10699_v37 = vld [vmem:[#allocation5 + $0x184] sm:$0xf]  ;;  %v7638_v38 = vld [vmem:[#allocation5 + $0x1bc] sm:$0xf0]  ;;  %v9077_v41 = vor.u32 %v11066_v34, %v9076_v29 }
 0x139   : > { %4418 = vmatpush.bf16.msrb.mxu1 %v9553_v21  ;;  %v8776_v21 = vld [vmem:[#allocation5 + $0xa68] sm:$0xf]  ;;  %v9376_v15 = vld [vmem:[#allocation5 + $0xf18] sm:$0xf]  ;;  %v11119_v29 = vld [vmem:[#allocation5 + $0xea4] sm:$0xf] }
 0x13a   : > { %4431 = vmatpush.bf16.msrb.mxu2 %v7637_v49  ;;  %v10991_v49 = vld [vmem:[#allocation5 + $0xaa0] sm:$0xf0] }
 0x13b   : > { %4444 = vmatpush.bf16.msrb.mxu3 %v8117_v53  ;;  %v9736_v53 = vld [vmem:[#allocation5 + $0x11e8] sm:$0xf]  ;;  %v8777_v57 = vor.u32 %v10991_v49, %v8776_v21  ;;  %v11051_v21 = vld [vmem:[#allocation5 + $0xc80] sm:$0xf0] }
 0x13c   : > { %4406 = vmatpush.bf16.msrb.mxu0 %v9013_v62  ;;  %v9737_v59 = vor.u32 %v11231_v55, %v9736_v53  ;;  %v9196_v62 = vld [vmem:[#allocation5 + $0xdb0] sm:$0xf]  ;;  %v9496_v49 = vld [vmem:[#allocation5 + $0x1008] sm:$0xf] }
 0x13d   : > { %4419 = vmatpush.bf16.msrb.mxu1 %v9493_v1  ;;  %v11096_v1 = vld [vmem:[#allocation5 + $0xde8] sm:$0xf0]  ;;  %v7578_v53 = vld [vmem:[#allocation5 + $0x144] sm:$0xf0] }
 0x13e   : > { %4432 = vmatpush.bf16.msrb.mxu2 %v7577_v2  ;;  %v9676_v2 = vld [vmem:[#allocation5 + $0x1170] sm:$0xf]  ;;  %v9197_v7 = vor.u32 %v11096_v1, %v9196_v62  ;;  %v11036_v1 = vld [vmem:[#allocation5 + $0xc08] sm:$0xf0] }
 0x13f   : > { %4445 = vmatpush.bf16.msrb.mxu3 %v8057_v6  ;;  %v8717_v6 = vor.u32 %v10976_v61, %v8716_v60  ;;  %v9677_v10 = vor.u32 %v11216_v3, %v9676_v2  ;;  %v8476_v60 = vld [vmem:[#allocation5 + $0x810] sm:$0xf]  ;;  %v10916_v61 = vld [vmem:[#allocation5 + $0x848] sm:$0xf0] }
 0x140   : > { %4407 = vmatpush.bf16.msrb.mxu0 %v8953_v14  ;;  %v7761_v14 = vor.u32 %v10729_v4, %v7758_v5  ;;  %v8956_v62 = vld [vmem:[#allocation5 + $0xbd0] sm:$0xf]  ;;  %v11156_v3 = vld [vmem:[#allocation5 + $0xfc8] sm:$0xf0]  ;;  %v10669_v4 = vld [vmem:[#allocation5 + $0x94] sm:$0xf] }
 0x141   : > { %4420 = vmatpush.bf16.msrb.mxu1 %v9433_v17  ;;  %v11201_v17 = vld [vmem:[#allocation5 + $0x1130] sm:$0xf0]  ;;  %v9436_v2 = vld [vmem:[#allocation5 + $0xf90] sm:$0xf]  ;;  %v8957_v11 = vor.u32 %v11036_v1, %v8956_v62 }
 0x142   : > { %4433 = vmatpush.bf16.msrb.mxu2 %v7517_v18  ;;  %v10714_v18 = vld [vmem:[#allocation5 + $0x1fc] sm:$0xf]  ;;  %v9617_v26 = vor.u32 %v11201_v17, %v9616_v16  ;;  %v7518_v5 = vld [vmem:[#allocation5 + $0xcc] sm:$0xf0]  ;;  %v9437_v12 = vor.u32 %v11156_v3, %v9436_v2  ;;  %v11209_v62 = vld [vmem:[#allocation5 + $0x1174] sm:$0xf] }
 0x143   : > { %4446 = vmatpush.bf16.msrb.mxu3 %v7997_v24  ;;  %v7701_v33 = vor.u32 %v10714_v18, %v7698_v20  ;;  %v7521_v17 = vor.u32 %v10669_v4, %v7518_v5  ;;  %v11141_v18 = vld [vmem:[#allocation5 + $0xf50] sm:$0xf0]  ;;  %v10654_v20 = vld [vmem:[#allocation5 + $0x1c] sm:$0xf]  ;;  %v8178_v5 = vld [vmem:[#allocation5 + $0x5f4] sm:$0xf0] }
 0x144   : > { %4408 = vmatpush.bf16.msrb.mxu0 %v8893_v35  ;;  %v4202_v23 = vpop.f32.mrf.mxu0  ;;  %v9556_v35 = vld [vmem:[#allocation5 + $0x1080] sm:$0xf]  ;;  %v9377_v34 = vor.u32 %v11141_v18, %v9376_v15  ;;  %v10834_v4 = vld [vmem:[#allocation5 + $0x5bc] sm:$0xf] }
 0x145   : > { %4421 = vmatpush.bf16.msrb.mxu1 %v9373_v39  ;;  %v4215_v24 = vpop.f32.mrf.mxu1  ;;  %v4203_v32 = vadd.f32 %v4202_v23, %v12067_v63  ;;  %v9557_v43 = vor.u32 %v11186_v36, %v9556_v35  ;;  %v7641_v63 = vor.u32 %v10699_v37, %v7638_v38  ;;  %v10879_v23 = vld [vmem:[#allocation5 + $0x724] sm:$0xf]  ;;  %v9798_v36 = vld [vmem:[#allocation5 + $0x129c] sm:$0xf0]  ;;  %v8181_v15 = vor.u32 %v10834_v4, %v8178_v5  ;;  %v10774_v4 = vld [vmem:[#allocation5 + $0x3dc] sm:$0xf] }
 0x146   : > { %4434 = vmatpush.bf16.msrb.mxu2 %v7457_v40  ;;  %v8597_v40 = vor.u32 %v10946_v28, %v8596_v27  ;;  %v8838_v28 = vld [vmem:[#allocation5 + $0xb1c] sm:$0xf0]  ;;  %v11239_v35 = vld [vmem:[#allocation5 + $0x1264] sm:$0xf]  ;;  %v7938_v5 = vld [vmem:[#allocation5 + $0x414] sm:$0xf0] }
 0x147   : > { %4447 = vmatpush.bf16.msrb.mxu3 %v7937_v44  ;;  %4409 = vmatmul.bf16.vlgmr.msrb.gmra.mxu0 %v12018_v9  ;;  %v4216_v39 = vadd.f32 %v4215_v24, %v4203_v32  ;;  %v8536_v44 = vld [vmem:[#allocation5 + $0x888] sm:$0xf]  ;;  %v8358_v24 = vld [vmem:[#allocation5 + $0x75c] sm:$0xf0] }
 0x148   : > { %4453 = vmatpush.bf16.msra.mxu0 %v8837_v46  ;;  %4422 = vmatmul.bf16.vlgmr.msrb.gmra.mxu1 %v12031_v30  ;;  %v10931_v46 = vld [vmem:[#allocation5 + $0x8c0] sm:$0xf0]  ;;  %v9318_v32 = vld [vmem:[#allocation5 + $0xedc] sm:$0xf0]  ;;  %v8361_v38 = vor.u32 %v10879_v23, %v8358_v24 }
 0x149   : > { %4466 = vmatpush.bf16.msra.mxu1 %v9317_v47  ;;  %4435 = vmatmul.bf16.vlgmr.msrb.gmra.mxu2 %v12016_v8  ;;  %v9016_v47 = vld [vmem:[#allocation5 + $0xc48] sm:$0xf]  ;;  %v8537_v56 = vor.u32 %v10931_v46, %v8536_v44  ;;  %v10984_v44 = vld [vmem:[#allocation5 + $0xa6c] sm:$0xf]  ;;  %v9801_v46 = vor.u32 %v11239_v35, %v9798_v36  ;;  %v8118_v23 = vld [vmem:[#allocation5 + $0x57c] sm:$0xf0] }
 0x14a   : > { %4479 = vmatpush.bf16.msra.mxu2 %v9797_v48  ;;  %4448 = vmatmul.bf16.vlgmr.msrb.gmra.mxu3 %v12027_v31  ;;  %v10939_v24 = vld [vmem:[#allocation5 + $0x904] sm:$0xf] }
 0x14b   : > { %4492 = vmatpush.bf16.msra.mxu3 %v7881_v51 }
 0x14c   : > { %4454 = vmatpush.bf16.msra.mxu0 %v8777_v57  ;;  %v4228_v48 = vpop.f32.mrf.mxu2  ;;  %v4204_v54 = vpop.f32.mrf.mxu0 }
 0x14d   : > { %4467 = vmatpush.bf16.msra.mxu1 %v9257_v58  ;;  %v12074_v51 = vadd.f32 %v4228_v48, %v4216_v39  ;;  %v12076_v55 = vpop.f32.mrf.mxu3  ;;  %v4217_v57 = vpop.f32.mrf.mxu1  ;;  %v9017_v58 = vor.u32 %v11051_v21, %v9016_v47  ;;  %v8778_v47 = vld [vmem:[#allocation5 + $0xaa4] sm:$0xf0]  ;;  %v11104_v48 = vld [vmem:[#allocation5 + $0xe2c] sm:$0xf]  ;;  %v8238_v54 = vld [vmem:[#allocation5 + $0x66c] sm:$0xf0] }
 0x14e   : > { %4480 = vmatpush.bf16.msra.mxu2 %v9737_v59  ;;  %v9497_v59 = vor.u32 %v11171_v50, %v9496_v49  ;;  %v11224_v21 = vld [vmem:[#allocation5 + $0x11ec] sm:$0xf]  ;;  %v9738_v49 = vld [vmem:[#allocation5 + $0x1224] sm:$0xf0]  ;;  %v10969_v57 = vld [vmem:[#allocation5 + $0x9f4] sm:$0xf] }
 0x14f   : > { %4493 = vmatpush.bf16.msra.mxu3 %v7821_v0  ;;  %v7581_v0 = vor.u32 %v10684_v52, %v7578_v53  ;;  %v8781_v52 = vor.u32 %v10984_v44, %v8778_v47  ;;  %v8538_v44 = vld [vmem:[#allocation5 + $0x8c4] sm:$0xf0] }
 0x150   : > { %4455 = vmatpush.bf16.msra.mxu0 %v8717_v6  ;;  %v8477_v6 = vor.u32 %v10916_v61, %v8476_v60  ;;  %v11089_v60 = vld [vmem:[#allocation5 + $0xdb4] sm:$0xf]  ;;  %v9198_v61 = vld [vmem:[#allocation5 + $0xdec] sm:$0xf0]  ;;  %v9018_v47 = vld [vmem:[#allocation5 + $0xc84] sm:$0xf0] }
 0x151   : > { %4468 = vmatpush.bf16.msra.mxu1 %v9197_v7  ;;  %v8416_v7 = vld [vmem:[#allocation5 + $0x798] sm:$0xf]  ;;  %v9201_v3 = vor.u32 %v11089_v60, %v9198_v61  ;;  %v8478_v61 = vld [vmem:[#allocation5 + $0x84c] sm:$0xf0] }
 0x152   : > { %4481 = vmatpush.bf16.msra.mxu2 %v9677_v10  ;;  %v10901_v10 = vld [vmem:[#allocation5 + $0x7d0] sm:$0xf0] }
 0x153   : > { %4494 = vmatpush.bf16.msra.mxu3 %v7761_v14  ;;  %v11021_v14 = vld [vmem:[#allocation5 + $0xb90] sm:$0xf0]  ;;  %v8417_v27 = vor.u32 %v10901_v10, %v8416_v7  ;;  %v8658_v10 = vld [vmem:[#allocation5 + $0x9b4] sm:$0xf0] }
 0x154   : > { %4456 = vmatpush.bf16.msra.mxu0 %v8657_v22  ;;  %v4230_v16 = vpop.f32.mrf.mxu2  ;;  %v7458_v22 = vld [vmem:[#allocation5 + $0x54] sm:$0xf0] }
 0x155   : > { %4469 = vmatpush.bf16.msra.mxu1 %v9137_v25  ;;  %v10999_v25 = vld [vmem:[#allocation5 + $0xae4] sm:$0xf]  ;;  %v7461_v37 = vor.u32 %v10654_v20, %v7458_v22 }
 0x156   : > { %4482 = vmatpush.bf16.msra.mxu2 %v9617_v26  ;;  %v4243_v26 = vpop.f32.mrf.mxu3  ;;  %v8841_v39 = vor.u32 %v10999_v25, %v8838_v28  ;;  %v10819_v22 = vld [vmem:[#allocation5 + $0x544] sm:$0xf] }
 0x157   : > { %4495 = vmatpush.bf16.msra.mxu3 %v7701_v33  ;;  %v8897_v33 = vor.u32 %v11021_v14, %v8896_v13  ;;  %v11194_v13 = vld [vmem:[#allocation5 + $0x10fc] sm:$0xf]  ;;  %v9618_v14 = vld [vmem:[#allocation5 + $0x1134] sm:$0xf0]  ;;  %v11059_v28 = vld [vmem:[#allocation5 + $0xcc4] sm:$0xf]  ;;  %v8121_v35 = vor.u32 %v10819_v22, %v8118_v23 }
 0x158   : > { %4457 = vmatpush.bf16.msra.mxu0 %v8597_v40  ;;  %v9321_v40 = vor.u32 %v11119_v29, %v9318_v32  ;;  %v9621_v26 = vor.u32 %v11194_v13, %v9618_v14  ;;  %v9078_v29 = vld [vmem:[#allocation5 + $0xcfc] sm:$0xf0]  ;;  %v11179_v32 = vld [vmem:[#allocation5 + $0x1084] sm:$0xf]  ;;  %v8364_v23 = vld [vmem:[#allocation5 + $0x728] sm:$0xf] }
 0x159   : > { %4470 = vmatpush.bf16.msra.mxu1 %v9077_v41  ;;  %v10864_v41 = vld [vmem:[#allocation5 + $0x6ac] sm:$0xf]  ;;  %v10767_v22 = vld [vmem:[#allocation5 + $0x3a0] sm:$0xf0] }
 0x15a   : > { %4483 = vmatpush.bf16.msra.mxu2 %v9557_v43  ;;  %v8298_v43 = vld [vmem:[#allocation5 + $0x6e4] sm:$0xf0] }
 0x15b   : > { %4496 = vmatpush.bf16.msra.mxu3 %v7641_v63  ;;  %v9258_v63 = vld [vmem:[#allocation5 + $0xe64] sm:$0xf0]  ;;  %v8301_v50 = vor.u32 %v10864_v41, %v8298_v43 }
 0x15c   : > { %4458 = vmatpush.bf16.msra.mxu0 %v8537_v56  ;;  %v9261_v53 = vor.u32 %v11104_v48, %v9258_v63  ;;  %v10849_v56 = vld [vmem:[#allocation5 + $0x634] sm:$0xf]  ;;  %v11164_v63 = vld [vmem:[#allocation5 + $0x100c] sm:$0xf] }
 0x15d   : > { %4471 = vmatpush.bf16.msra.mxu1 %v9017_v58  ;;  %v9741_v58 = vor.u32 %v11224_v21, %v9738_v49  ;;  %v8241_v1 = vor.u32 %v10849_v56, %v8238_v54  ;;  %v9498_v21 = vld [vmem:[#allocation5 + $0x1044] sm:$0xf0]  ;;  %v10789_v54 = vld [vmem:[#allocation5 + $0x454] sm:$0xf] }
 0x15e   : > { %4484 = vmatpush.bf16.msra.mxu2 %v9497_v59  ;;  %v8718_v59 = vld [vmem:[#allocation5 + $0xa2c] sm:$0xf0]  ;;  %v9501_v60 = vor.u32 %v11164_v63, %v9498_v21 }
 0x15f   : > { %4497 = vmatpush.bf16.msra.mxu3 %v7581_v0  ;;  %v9678_v0 = vld [vmem:[#allocation5 + $0x11ac] sm:$0xf0]  ;;  %v8721_v2 = vor.u32 %v10969_v57, %v8718_v59 }
 0x160   : > { %4459 = vmatpush.bf16.msra.mxu0 %v8477_v6  ;;  %v10954_v6 = vld [vmem:[#allocation5 + $0x97c] sm:$0xf]  ;;  %v9681_v7 = vor.u32 %v11209_v62, %v9678_v0  ;;  %v7998_v57 = vld [vmem:[#allocation5 + $0x48c] sm:$0xf0]  ;;  %v11029_v62 = vld [vmem:[#allocation5 + $0xbd4] sm:$0xf] }
 0x161   : > { %4472 = vmatpush.bf16.msra.mxu1 %v8957_v11  ;;  %v11074_v11 = vld [vmem:[#allocation5 + $0xd3c] sm:$0xf]  ;;  %v8958_v0 = vld [vmem:[#allocation5 + $0xc0c] sm:$0xf0] }
 0x162   : > { %4485 = vmatpush.bf16.msra.mxu2 %v9437_v12  ;;  %v9138_v12 = vld [vmem:[#allocation5 + $0xd74] sm:$0xf0] }
 0x163   : > { %4498 = vmatpush.bf16.msra.mxu3 %v7521_v17  ;;  %v8661_v17 = vor.u32 %v10954_v6, %v8658_v10  ;;  %v9141_v18 = vor.u32 %v11074_v11, %v9138_v12  ;;  %v10894_v10 = vld [vmem:[#allocation5 + $0x79c] sm:$0xf]  ;;  %v8418_v11 = vld [vmem:[#allocation5 + $0x7d4] sm:$0xf0] }
 0x164   : > { %4460 = vmatpush.bf16.msra.mxu0 %v8417_v27  ;;  %v4254_v16 = vpop.f32.mrf.mxu0  ;;  %v8598_v27 = vld [vmem:[#allocation5 + $0x93c] sm:$0xf0]  ;;  %v11014_v12 = vld [vmem:[#allocation5 + $0xb5c] sm:$0xf] }
 0x165   : > { %4473 = vmatpush.bf16.msra.mxu1 %v8897_v33  ;;  %v4255_v20 = vadd.f32 %v4254_v16, %v12076_v55  ;;  %v4267_v25 = vpop.f32.mrf.mxu1  ;;  %v9558_v33 = vld [vmem:[#allocation5 + $0x10bc] sm:$0xf0]  ;;  %v8601_v36 = vor.u32 %v10939_v24, %v8598_v27  ;;  %v10804_v55 = vld [vmem:[#allocation5 + $0x4cc] sm:$0xf]  ;;  %v11134_v16 = vld [vmem:[#allocation5 + $0xf1c] sm:$0xf]  ;;  %v7941_v24 = vor.u32 %v10774_v4, %v7938_v5 }
 0x166   : > { %4486 = vmatpush.bf16.msra.mxu2 %v9377_v34  ;;  %v9561_v41 = vor.u32 %v11179_v32, %v9558_v33  ;;  %v11007_v27 = vld [vmem:[#allocation5 + $0xb20] sm:$0xf0]  ;;  %v9324_v32 = vld [vmem:[#allocation5 + $0xea8] sm:$0xf]  ;;  %v10842_v5 = vld [vmem:[#allocation5 + $0x5f8] sm:$0xf0] }
 0x167   : > { %4499 = vmatpush.bf16.msra.mxu3 %v7461_v37  ;;  %4461 = vmatmul.bf16.vlgmr.msra.gmra.mxu0 %v12023_v19  ;;  %v4268_v34 = vadd.f32 %v4267_v25, %v4255_v20  ;;  %v9081_v37 = vor.u32 %v11059_v28, %v9078_v29  ;;  %v7884_v20 = vld [vmem:[#allocation5 + $0x368] sm:$0xf]  ;;  %v10887_v25 = vld [vmem:[#allocation5 + $0x760] sm:$0xf0]  ;;  %v8421_v28 = vor.u32 %v10894_v10, %v8418_v11  ;;  %v9144_v10 = vld [vmem:[#allocation5 + $0xd40] sm:$0xf] }
 0x168   : > { %4505 = vmatpush.bf16.msrb.mxu0 %v8361_v38  ;;  %4474 = vmatmul.bf16.vlgmr.msra.gmra.mxu1 %v12018_v9  ;;  %v11127_v33 = vld [vmem:[#allocation5 + $0xee0] sm:$0xf0]  ;;  %v11082_v11 = vld [vmem:[#allocation5 + $0xd78] sm:$0xf0] }
 0x169   : > { %4518 = vmatpush.bf16.msrb.mxu1 %v8841_v39  ;;  %4487 = vmatmul.bf16.vlgmr.msra.gmra.mxu2 %v12031_v30  ;;  %v8058_v39 = vld [vmem:[#allocation5 + $0x504] sm:$0xf0] }
 0x16a   : > { %4531 = vmatpush.bf16.msrb.mxu2 %v9321_v40  ;;  %4500 = vmatmul.bf16.vlgmr.msra.gmra.mxu3 %v12016_v8  ;;  %v10924_v40 = vld [vmem:[#allocation5 + $0x88c] sm:$0xf]  ;;  %v8061_v49 = vor.u32 %v10804_v55, %v8058_v39  ;;  %v8304_v39 = vld [vmem:[#allocation5 + $0x6b0] sm:$0xf] }
 0x16b   : > { %4544 = vmatpush.bf16.msrb.mxu3 %v9801_v46  ;;  %v11044_v46 = vld [vmem:[#allocation5 + $0xc4c] sm:$0xf] }
 0x16c   : > { %4506 = vmatpush.bf16.msrb.mxu0 %v8301_v50  ;;  %v4280_v38 = vpop.f32.mrf.mxu2  ;;  %v9021_v56 = vor.u32 %v11044_v46, %v9018_v47  ;;  %v10752_v55 = vld [vmem:[#allocation5 + $0x328] sm:$0xf0]  ;;  %v9264_v46 = vld [vmem:[#allocation5 + $0xe30] sm:$0xf] }
 0x16d   : > { %4519 = vmatpush.bf16.msrb.mxu1 %v8781_v52  ;;  %v4281_v43 = vadd.f32 %v4280_v38, %v4268_v34  ;;  %v4293_v48 = vpop.f32.mrf.mxu3  ;;  %v4256_v52 = vpop.f32.mrf.mxu0  ;;  %v7824_v38 = vld [vmem:[#allocation5 + $0x2f0] sm:$0xf]  ;;  %v11112_v47 = vld [vmem:[#allocation5 + $0xe68] sm:$0xf0] }
 0x16e   : > { %4532 = vmatpush.bf16.msrb.mxu2 %v9261_v53  ;;  %v8541_v53 = vor.u32 %v10924_v40, %v8538_v44  ;;  %v4269_v59 = vpop.f32.mrf.mxu1  ;;  %v9325_v40 = vor.u32 %v11127_v33, %v9324_v32  ;;  %v10992_v44 = vld [vmem:[#allocation5 + $0xaa8] sm:$0xf0]  ;;  %v10737_v52 = vld [vmem:[#allocation5 + $0x2b0] sm:$0xf0] }
 0x16f   : > { %4545 = vmatpush.bf16.msrb.mxu3 %v9741_v58  ;;  %v12083_v50 = vadd.f32 %v4293_v48, %v4281_v43  ;;  %v10909_v58 = vld [vmem:[#allocation5 + $0x814] sm:$0xf]  ;;  %v8784_v43 = vld [vmem:[#allocation5 + $0xa70] sm:$0xf]  ;;  %v7825_v48 = vor.u32 %v10752_v55, %v7824_v38  ;;  %v9204_v59 = vld [vmem:[#allocation5 + $0xdb8] sm:$0xf] }
 0x170   : > { %4507 = vmatpush.bf16.msrb.mxu0 %v8241_v1  ;;  %v11149_v1 = vld [vmem:[#allocation5 + $0xf94] sm:$0xf]  ;;  %v8481_v6 = vor.u32 %v10909_v58, %v8478_v61  ;;  %v8785_v21 = vor.u32 %v10992_v44, %v8784_v43  ;;  %v10812_v38 = vld [vmem:[#allocation5 + $0x508] sm:$0xf0]  ;;  %v8544_v55 = vld [vmem:[#allocation5 + $0x890] sm:$0xf] }
 0x171   : > { %4520 = vmatpush.bf16.msrb.mxu1 %v8721_v2  ;;  %v9438_v2 = vld [vmem:[#allocation5 + $0xfcc] sm:$0xf0]  ;;  %v10977_v58 = vld [vmem:[#allocation5 + $0xa30] sm:$0xf0]  ;;  %v11052_v44 = vld [vmem:[#allocation5 + $0xc88] sm:$0xf0] }
 0x172   : > { %4533 = vmatpush.bf16.msrb.mxu2 %v9201_v3  ;;  %v8001_v3 = vor.u32 %v10789_v54, %v7998_v57  ;;  %v9441_v14 = vor.u32 %v11149_v1, %v9438_v2  ;;  %v10857_v54 = vld [vmem:[#allocation5 + $0x670] sm:$0xf0]  ;;  %v8724_v57 = vld [vmem:[#allocation5 + $0x9f8] sm:$0xf]  ;;  %v7704_v1 = vld [vmem:[#allocation5 + $0x200] sm:$0xf] }
 0x173   : > { %4546 = vmatpush.bf16.msrb.mxu3 %v9681_v7  ;;  %v8961_v7 = vor.u32 %v11029_v62, %v8958_v0  ;;  %v8725_v0 = vor.u32 %v10977_v58, %v8724_v57  ;;  %v10722_v2 = vld [vmem:[#allocation5 + $0x238] sm:$0xf0]  ;;  %v9024_v43 = vld [vmem:[#allocation5 + $0xc50] sm:$0xf]  ;;  %v10797_v58 = vld [vmem:[#allocation5 + $0x490] sm:$0xf0] }
 0x174   : > { %4508 = vmatpush.bf16.msrb.mxu0 %v8181_v15  ;;  %v4282_v13 = vpop.f32.mrf.mxu2  ;;  %v8898_v15 = vld [vmem:[#allocation5 + $0xb94] sm:$0xf0]  ;;  %v9025_v57 = vor.u32 %v11052_v44, %v9024_v43  ;;  %v8786_v43 = vld [vmem:[#allocation5 + $0xaac] sm:$0xf0] }
 0x175   : > { %4521 = vmatpush.bf16.msrb.mxu1 %v8661_v17  ;;  %v9378_v17 = vld [vmem:[#allocation5 + $0xf54] sm:$0xf0]  ;;  %v8901_v29 = vor.u32 %v11014_v12, %v8898_v15  ;;  %v7705_v13 = vor.u32 %v10722_v2, %v7704_v1  ;;  %v7464_v1 = vld [vmem:[#allocation5 + $0x20] sm:$0xf]  ;;  %v10662_v2 = vld [vmem:[#allocation5 + $0x58] sm:$0xf0] }
 0x176   : > { %4534 = vmatpush.bf16.msrb.mxu2 %v9141_v18  ;;  %v4295_v18 = vpop.f32.mrf.mxu3  ;;  %v9381_v34 = vor.u32 %v11134_v16, %v9378_v17  ;;  %v7644_v16 = vld [vmem:[#allocation5 + $0x188] sm:$0xf]  ;;  %v10707_v17 = vld [vmem:[#allocation5 + $0x1c0] sm:$0xf0] }
 0x177   : > { %4547 = vmatpush.bf16.msrb.mxu3 %v9621_v26  ;;  %v8844_v26 = vld [vmem:[#allocation5 + $0xae8] sm:$0xf] }
 0x178   : > { %4509 = vmatpush.bf16.msrb.mxu0 %v8121_v35  ;;  %v7885_v35 = vor.u32 %v10767_v22, %v7884_v20  ;;  %v8124_v18 = vld [vmem:[#allocation5 + $0x548] sm:$0xf]  ;;  %v9145_v22 = vor.u32 %v11082_v11, %v9144_v10  ;;  %v10902_v11 = vld [vmem:[#allocation5 + $0x7d8] sm:$0xf0] }
 0x179   : > { %4522 = vmatpush.bf16.msrb.mxu1 %v8601_v36  ;;  %v8365_v36 = vor.u32 %v10887_v25, %v8364_v23  ;;  %v10827_v23 = vld [vmem:[#allocation5 + $0x580] sm:$0xf0] }
 0x17a   : > { %4535 = vmatpush.bf16.msrb.mxu2 %v9081_v37  ;;  %v8845_v37 = vor.u32 %v11007_v27, %v8844_v26  ;;  %v10947_v25 = vld [vmem:[#allocation5 + $0x940] sm:$0xf0]  ;;  %v9084_v27 = vld [vmem:[#allocation5 + $0xcc8] sm:$0xf]  ;;  %v8125_v32 = vor.u32 %v10827_v23, %v8124_v18  ;;  %v10760_v18 = vld [vmem:[#allocation5 + $0x36c] sm:$0xf] }
 0x17b   : > { %4548 = vmatpush.bf16.msrb.mxu3 %v9561_v41  ;;  %v10872_v41 = vld [vmem:[#allocation5 + $0x6e8] sm:$0xf0] }
 0x17c   : > { %4510 = vmatpush.bf16.msrb.mxu0 %v8061_v49  ;;  %v8305_v63 = vor.u32 %v10872_v41, %v8304_v39  ;;  %v7764_v49 = vld [vmem:[#allocation5 + $0x278] sm:$0xf]  ;;  %v10932_v39 = vld [vmem:[#allocation5 + $0x8c8] sm:$0xf0] }
 0x17d   : > { %4523 = vmatpush.bf16.msrb.mxu1 %v8541_v53  ;;  %v8244_v53 = vld [vmem:[#allocation5 + $0x638] sm:$0xf]  ;;  %v7765_v61 = vor.u32 %v10737_v52, %v7764_v49  ;;  %v10677_v52 = vld [vmem:[#allocation5 + $0xd0] sm:$0xf0]  ;;  %v10880_v23 = vld [vmem:[#allocation5 + $0x72c] sm:$0xf] }
 0x17e   : > { %4536 = vmatpush.bf16.msrb.mxu2 %v9021_v56  ;;  %v9265_v56 = vor.u32 %v11112_v47, %v9264_v46  ;;  %v8245_v62 = vor.u32 %v10857_v54, %v8244_v53  ;;  %v7524_v49 = vld [vmem:[#allocation5 + $0x98] sm:$0xf] }
 0x17f   : > { %4549 = vmatpush.bf16.msrb.mxu3 %v9501_v60  ;;  %v11097_v60 = vld [vmem:[#allocation5 + $0xdf0] sm:$0xf0]  ;;  %v8004_v53 = vld [vmem:[#allocation5 + $0x458] sm:$0xf] }
 0x180   : > { %4511 = vmatpush.bf16.msrb.mxu0 %v8001_v3  ;;  %v8184_v3 = vld [vmem:[#allocation5 + $0x5c0] sm:$0xf]  ;;  %v9205_v4 = vor.u32 %v11097_v60, %v9204_v59  ;;  %v8484_v59 = vld [vmem:[#allocation5 + $0x818] sm:$0xf]  ;;  %v10917_v60 = vld [vmem:[#allocation5 + $0x850] sm:$0xf0] }
 0x181   : > { %4524 = vmatpush.bf16.msrb.mxu1 %v8481_v6  ;;  %v8664_v6 = vld [vmem:[#allocation5 + $0x980] sm:$0xf] }
 0x182   : > { %4537 = vmatpush.bf16.msrb.mxu2 %v8961_v7  ;;  %v10962_v7 = vld [vmem:[#allocation5 + $0x9b8] sm:$0xf0] }
 0x183   : > { %4550 = vmatpush.bf16.msrb.mxu3 %v9441_v14  ;;  %v8185_v14 = vor.u32 %v10842_v5, %v8184_v3  ;;  %v8665_v15 = vor.u32 %v10962_v7, %v8664_v6  ;;  %v8005_v3 = vor.u32 %v10797_v58, %v8004_v53  ;;  %v7944_v5 = vld [vmem:[#allocation5 + $0x3e0] sm:$0xf]  ;;  %v10782_v6 = vld [vmem:[#allocation5 + $0x418] sm:$0xf0]  ;;  %v8726_v58 = vld [vmem:[#allocation5 + $0xa34] sm:$0xf0] }
 0x184   : > { %4512 = vmatpush.bf16.msrb.mxu0 %v7941_v24  ;;  %v4306_v12 = vpop.f32.mrf.mxu0  ;;  %v8604_v24 = vld [vmem:[#allocation5 + $0x908] sm:$0xf]  ;;  %v8424_v7 = vld [vmem:[#allocation5 + $0x7a0] sm:$0xf]  ;;  %v10850_v53 = vld [vmem:[#allocation5 + $0x63c] sm:$0xf] }
 0x185   : > { %4525 = vmatpush.bf16.msrb.mxu1 %v8421_v28  ;;  %v4319_v20 = vpop.f32.mrf.mxu1  ;;  %v11067_v28 = vld [vmem:[#allocation5 + $0xd00] sm:$0xf0]  ;;  %v8605_v33 = vor.u32 %v10947_v25, %v8604_v24  ;;  %v8366_v24 = vld [vmem:[#allocation5 + $0x764] sm:$0xf0]  ;;  %v7945_v25 = vor.u32 %v10782_v6, %v7944_v5  ;;  %v8186_v5 = vld [vmem:[#allocation5 + $0x5fc] sm:$0xf0] }
 0x186   : > { %4538 = vmatpush.bf16.msrb.mxu2 %v8901_v29  ;;  %v4320_v26 = vadd.f32 %v4319_v20, %v4306_v12  ;;  %v7645_v29 = vor.u32 %v10707_v17, %v7644_v16  ;;  %v8904_v12 = vld [vmem:[#allocation5 + $0xb60] sm:$0xf]  ;;  %v9804_v16 = vld [vmem:[#allocation5 + $0x1268] sm:$0xf]  ;;  %v11247_v17 = vld [vmem:[#allocation5 + $0x12a0] sm:$0xf0]  ;;  %v7465_v20 = vor.u32 %v10662_v2, %v7464_v1 }
 0x187   : > { %4551 = vmatpush.bf16.msrb.mxu3 %v9381_v34  ;;  %4513 = vmatmul.bf16.vlgmr.msrb.gmra.mxu0 %v12027_v31  ;;  %v7584_v34 = vld [vmem:[#allocation5 + $0x110] sm:$0xf]  ;;  %v10715_v1 = vld [vmem:[#allocation5 + $0x204] sm:$0xf] }
 0x188   : > { %4557 = vmatpush.bf16.msra.mxu0 %v7885_v35  ;;  %4526 = vmatmul.bf16.vlgmr.msrb.gmra.mxu1 %v12023_v19  ;;  %v10692_v35 = vld [vmem:[#allocation5 + $0x148] sm:$0xf0]  ;;  %v10955_v6 = vld [vmem:[#allocation5 + $0x984] sm:$0xf] }
 0x189   : > { %4570 = vmatpush.bf16.msra.mxu1 %v8365_v36  ;;  %4539 = vmatmul.bf16.vlgmr.msrb.gmra.mxu2 %v12018_v9  ;;  %v8064_v36 = vld [vmem:[#allocation5 + $0x4d0] sm:$0xf] }
 0x18a   : > { %4583 = vmatpush.bf16.msra.mxu2 %v8845_v37  ;;  %4552 = vmatmul.bf16.vlgmr.msrb.gmra.mxu3 %v12031_v30  ;;  %v9085_v37 = vor.u32 %v11067_v28, %v9084_v27  ;;  %v11000_v27 = vld [vmem:[#allocation5 + $0xaec] sm:$0xf]  ;;  %v8846_v28 = vld [vmem:[#allocation5 + $0xb24] sm:$0xf0] }
 0x18b   : > { %4596 = vmatpush.bf16.msra.mxu3 %v9325_v40 }
 0x18c   : > { %4558 = vmatpush.bf16.msra.mxu0 %v7825_v48  ;;  %v4332_v41 = vpop.f32.mrf.mxu2  ;;  %v4308_v46 = vpop.f32.mrf.mxu0  ;;  %v7585_v48 = vor.u32 %v10692_v35, %v7584_v34  ;;  %v8369_v34 = vor.u32 %v10880_v23, %v8366_v24  ;;  %v9744_v35 = vld [vmem:[#allocation5 + $0x11f0] sm:$0xf]  ;;  %v10820_v23 = vld [vmem:[#allocation5 + $0x54c] sm:$0xf]  ;;  %v8126_v24 = vld [vmem:[#allocation5 + $0x584] sm:$0xf0] }
 0x18d   : > { %4571 = vmatpush.bf16.msra.mxu1 %v8305_v63  ;;  %v4345_v40 = vpop.f32.mrf.mxu3  ;;  %v4333_v47 = vadd.f32 %v4332_v41, %v4320_v26  ;;  %v8065_v63 = vor.u32 %v10812_v38, %v8064_v36  ;;  %v4321_v54 = vpop.f32.mrf.mxu1  ;;  %v8425_v26 = vor.u32 %v10902_v11, %v8424_v7  ;;  %v11232_v36 = vld [vmem:[#allocation5 + $0x1228] sm:$0xf0]  ;;  %v8849_v38 = vor.u32 %v11000_v27, %v8846_v28  ;;  %v10985_v41 = vld [vmem:[#allocation5 + $0xa74] sm:$0xf]  ;;  %v8666_v7 = vld [vmem:[#allocation5 + $0x9bc] sm:$0xf0] }
 0x18e   : > { %4584 = vmatpush.bf16.msra.mxu2 %v8785_v21  ;;  %v8545_v21 = vor.u32 %v10932_v39, %v8544_v55  ;;  %v7826_v55 = vld [vmem:[#allocation5 + $0x32c] sm:$0xf0]  ;;  %v10865_v39 = vld [vmem:[#allocation5 + $0x6b4] sm:$0xf]  ;;  %v9745_v44 = vor.u32 %v11232_v36, %v9744_v35  ;;  %v8246_v54 = vld [vmem:[#allocation5 + $0x674] sm:$0xf0]  ;;  %v8129_v28 = vor.u32 %v10820_v23, %v8126_v24 }
 0x18f   : > { %4597 = vmatpush.bf16.msra.mxu3 %v9265_v56  ;;  %v12089_v56 = vadd.f32 %v4345_v40, %v4333_v47  ;;  %v8306_v40 = vld [vmem:[#allocation5 + $0x6ec] sm:$0xf0]  ;;  %v10805_v36 = vld [vmem:[#allocation5 + $0x4d4] sm:$0xf] }
 0x190   : > { %4559 = vmatpush.bf16.msra.mxu0 %v7765_v61  ;;  %v8964_v61 = vld [vmem:[#allocation5 + $0xbd8] sm:$0xf]  ;;  %v8309_v47 = vor.u32 %v10865_v39, %v8306_v40  ;;  %v7586_v35 = vld [vmem:[#allocation5 + $0x14c] sm:$0xf0] }
 0x191   : > { %4572 = vmatpush.bf16.msra.mxu1 %v8245_v62  ;;  %v11037_v62 = vld [vmem:[#allocation5 + $0xc10] sm:$0xf0]  ;;  %v8546_v39 = vld [vmem:[#allocation5 + $0x8cc] sm:$0xf0] }
 0x192   : > { %4585 = vmatpush.bf16.msra.mxu2 %v8725_v0  ;;  %v7525_v0 = vor.u32 %v10677_v52, %v7524_v49  ;;  %v8965_v10 = vor.u32 %v11037_v62, %v8964_v61  ;;  %v8789_v49 = vor.u32 %v10985_v41, %v8786_v43  ;;  %v7766_v52 = vld [vmem:[#allocation5 + $0x2b4] sm:$0xf0]  ;;  %v8249_v61 = vor.u32 %v10850_v53, %v8246_v54  ;;  %v9624_v62 = vld [vmem:[#allocation5 + $0x1100] sm:$0xf]  ;;  %v10790_v54 = vld [vmem:[#allocation5 + $0x45c] sm:$0xf] }
 0x193   : > { %4598 = vmatpush.bf16.msra.mxu3 %v9205_v4  ;;  %v8485_v4 = vor.u32 %v10917_v60, %v8484_v59  ;;  %v7526_v53 = vld [vmem:[#allocation5 + $0xd4] sm:$0xf0] }
 0x194   : > { %4560 = vmatpush.bf16.msra.mxu0 %v7705_v13  ;;  %v11022_v13 = vld [vmem:[#allocation5 + $0xb98] sm:$0xf0] }
 0x195   : > { %4573 = vmatpush.bf16.msra.mxu1 %v8185_v14  ;;  %v4347_v14 = vpop.f32.mrf.mxu3 }
 0x196   : > { %4586 = vmatpush.bf16.msra.mxu2 %v8665_v15  ;;  %v4334_v15 = vpop.f32.mrf.mxu2 }
 0x197   : > { %4599 = vmatpush.bf16.msra.mxu3 %v9145_v22  ;;  %v7886_v22 = vld [vmem:[#allocation5 + $0x3a4] sm:$0xf0] }
 0x198   : > { %4561 = vmatpush.bf16.msra.mxu0 %v7645_v29  ;;  %v8905_v29 = vor.u32 %v11022_v13, %v8904_v12 }
 0x199   : > { %4574 = vmatpush.bf16.msra.mxu1 %v8125_v32  ;;  %v9805_v32 = vor.u32 %v11247_v17, %v9804_v16  ;;  %v9564_v16 = vld [vmem:[#allocation5 + $0x1088] sm:$0xf]  ;;  %v11187_v17 = vld [vmem:[#allocation5 + $0x10c0] sm:$0xf0] }
 0x19a   : > { %4587 = vmatpush.bf16.msra.mxu2 %v8605_v33  ;;  %v7889_v33 = vor.u32 %v10760_v18, %v7886_v22  ;;  %v10700_v18 = vld [vmem:[#allocation5 + $0x18c] sm:$0xf]  ;;  %v7646_v22 = vld [vmem:[#allocation5 + $0x1c4] sm:$0xf0]  ;;  %v9565_v27 = vor.u32 %v11187_v17, %v9564_v16 }
 0x19b   : > { %4600 = vmatpush.bf16.msra.mxu3 %v9085_v37  ;;  %v10745_v37 = vld [vmem:[#allocation5 + $0x2f4] sm:$0xf] }
 0x19c   : > { %4562 = vmatpush.bf16.msra.mxu0 %v7585_v48  ;;  %v7829_v46 = vor.u32 %v10745_v37, %v7826_v55  ;;  %v9684_v48 = vld [vmem:[#allocation5 + $0x1178] sm:$0xf]  ;;  %v8066_v37 = vld [vmem:[#allocation5 + $0x50c] sm:$0xf0]  ;;  %v10925_v55 = vld [vmem:[#allocation5 + $0x894] sm:$0xf] }
 0x19d   : > { %4575 = vmatpush.bf16.msra.mxu1 %v8065_v63  ;;  %v11217_v63 = vld [vmem:[#allocation5 + $0x11b0] sm:$0xf0] }
 0x19e   : > { %4588 = vmatpush.bf16.msra.mxu2 %v8545_v21  ;;  %v10730_v21 = vld [vmem:[#allocation5 + $0x27c] sm:$0xf]  ;;  %v9685_v59 = vor.u32 %v11217_v63, %v9684_v48  ;;  %v8069_v48 = vor.u32 %v10805_v36, %v8066_v37  ;;  %v9444_v63 = vld [vmem:[#allocation5 + $0xf98] sm:$0xf]  ;;  %v9746_v36 = vld [vmem:[#allocation5 + $0x122c] sm:$0xf0] }
 0x19f   : > { %4601 = vmatpush.bf16.msra.mxu3 %v9025_v57  ;;  %v10970_v57 = vld [vmem:[#allocation5 + $0x9fc] sm:$0xf]  ;;  %v7769_v60 = vor.u32 %v10730_v21, %v7766_v52  ;;  %v11157_v21 = vld [vmem:[#allocation5 + $0xfd0] sm:$0xf0]  ;;  %v8549_v52 = vor.u32 %v10925_v55, %v8546_v39  ;;  %v7832_v37 = vld [vmem:[#allocation5 + $0x2f8] sm:$0xf] }
 0x1a0   : > { %4563 = vmatpush.bf16.msra.mxu0 %v7525_v0  ;;  %v11202_v0 = vld [vmem:[#allocation5 + $0x1138] sm:$0xf0]  ;;  %v8729_v2 = vor.u32 %v10970_v57, %v8726_v58  ;;  %v8006_v57 = vld [vmem:[#allocation5 + $0x494] sm:$0xf0]  ;;  %v10753_v55 = vld [vmem:[#allocation5 + $0x330] sm:$0xf0] }
 0x1a1   : > { %4576 = vmatpush.bf16.msra.mxu1 %v8005_v3  ;;  %v7706_v3 = vld [vmem:[#allocation5 + $0x23c] sm:$0xf0]  ;;  %v9625_v11 = vor.u32 %v11202_v0, %v9624_v62  ;;  %v10910_v58 = vld [vmem:[#allocation5 + $0x81c] sm:$0xf]  ;;  %v8312_v39 = vld [vmem:[#allocation5 + $0x6b8] sm:$0xf] }
 0x1a2   : > { %4589 = vmatpush.bf16.msra.mxu2 %v8485_v4  ;;  %v10835_v4 = vld [vmem:[#allocation5 + $0x5c4] sm:$0xf]  ;;  %v7709_v14 = vor.u32 %v10715_v1, %v7706_v3  ;;  %v11142_v62 = vld [vmem:[#allocation5 + $0xf58] sm:$0xf0]  ;;  %v8009_v1 = vor.u32 %v10790_v54, %v8006_v57  ;;  %v7466_v3 = vld [vmem:[#allocation5 + $0x5c] sm:$0xf0] }
 0x1a3   : > { %4602 = vmatpush.bf16.msra.mxu3 %v8965_v10  ;;  %v8189_v15 = vor.u32 %v10835_v4, %v8186_v5  ;;  %v10775_v4 = vld [vmem:[#allocation5 + $0x3e4] sm:$0xf]  ;;  %v8252_v54 = vld [vmem:[#allocation5 + $0x640] sm:$0xf]  ;;  %v10858_v57 = vld [vmem:[#allocation5 + $0x678] sm:$0xf0] }
 0x1a4   : > { %4564 = vmatpush.bf16.msra.mxu0 %v7465_v20  ;;  %v4358_v10 = vpop.f32.mrf.mxu0  ;;  %v8669_v20 = vor.u32 %v10955_v6, %v8666_v7  ;;  %v7946_v6 = vld [vmem:[#allocation5 + $0x41c] sm:$0xf0]  ;;  %v10895_v7 = vld [vmem:[#allocation5 + $0x7a4] sm:$0xf] }
 0x1a5   : > { %4577 = vmatpush.bf16.msra.mxu1 %v7945_v25  ;;  %v12096_v12 = vadd.f32 %v4358_v10, %v12089_v56  ;;  %v4371_v13 = vpop.f32.mrf.mxu1  ;;  %v10940_v25 = vld [vmem:[#allocation5 + $0x90c] sm:$0xf]  ;;  %v7649_v56 = vor.u32 %v10700_v18, %v7646_v22  ;;  %v8426_v10 = vld [vmem:[#allocation5 + $0x7dc] sm:$0xf0]  ;;  %v9806_v18 = vld [vmem:[#allocation5 + $0x12a4] sm:$0xf0]  ;;  %v7949_v24 = vor.u32 %v10775_v4, %v7946_v6 }
 0x1a6   : > { %4590 = vmatpush.bf16.msra.mxu2 %v8425_v26  ;;  %v8606_v26 = vld [vmem:[#allocation5 + $0x944] sm:$0xf0]  ;;  %v10768_v22 = vld [vmem:[#allocation5 + $0x3a8] sm:$0xf0]  ;;  %v10723_v4 = vld [vmem:[#allocation5 + $0x240] sm:$0xf0] }
 0x1a7   : > { %4603 = vmatpush.bf16.msra.mxu3 %v8905_v29  ;;  %4565 = vmatmul.bf16.vlgmr.msra.gmra.mxu0 %v12016_v8  ;;  %v9504_v29 = vld [vmem:[#allocation5 + $0x1010] sm:$0xf]  ;;  %v10843_v6 = vld [vmem:[#allocation5 + $0x600] sm:$0xf0] }
 0x1a8   : > { %4609 = vmatpush.bf16.msrb.mxu0 %v9805_v32  ;;  %4578 = vmatmul.bf16.vlgmr.msra.gmra.mxu1 %v12027_v31  ;;  %v11172_v32 = vld [vmem:[#allocation5 + $0x1048] sm:$0xf0] }
 0x1a9   : > { %4622 = vmatpush.bf16.msrb.mxu1 %v7889_v33  ;;  %4591 = vmatmul.bf16.vlgmr.msra.gmra.mxu2 %v12023_v19  ;;  %v10685_v33 = vld [vmem:[#allocation5 + $0x114] sm:$0xf]  ;;  %v9505_v43 = vor.u32 %v11172_v32, %v9504_v29 }
 0x1aa   : > { %4635 = vmatpush.bf16.msrb.mxu2 %v8369_v34  ;;  %4604 = vmatmul.bf16.vlgmr.msra.gmra.mxu3 %v12018_v9  ;;  %v8609_v34 = vor.u32 %v10940_v25, %v8606_v26  ;;  %v8372_v25 = vld [vmem:[#allocation5 + $0x730] sm:$0xf]  ;;  %v10888_v26 = vld [vmem:[#allocation5 + $0x768] sm:$0xf0]  ;;  %v11105_v32 = vld [vmem:[#allocation5 + $0xe34] sm:$0xf] }
 0x1ab   : > { %4648 = vmatpush.bf16.msrb.mxu3 %v8849_v38 }
 0x1ac   : > { %4610 = vmatpush.bf16.msrb.mxu0 %v9745_v44  ;;  %v4360_v40 = vpop.f32.mrf.mxu0  ;;  %v4384_v41 = vpop.f32.mrf.mxu2 }
 0x1ad   : > { %4623 = vmatpush.bf16.msrb.mxu1 %v7829_v46  ;;  %v12098_v38 = vpop.f32.mrf.mxu3  ;;  %v4373_v44 = vpop.f32.mrf.mxu1  ;;  %v12100_v46 = vadd.f32 %v4384_v41, %v4371_v13  ;;  %v11120_v13 = vld [vmem:[#allocation5 + $0xeac] sm:$0xf]  ;;  %v10873_v40 = vld [vmem:[#allocation5 + $0x6f0] sm:$0xf0] }
 0x1ae   : > { %4636 = vmatpush.bf16.msrb.mxu2 %v8309_v47  ;;  %v7589_v47 = vor.u32 %v10685_v33, %v7586_v35  ;;  %v9266_v33 = vld [vmem:[#allocation5 + $0xe6c] sm:$0xf0]  ;;  %v8373_v35 = vor.u32 %v10888_v26, %v8372_v25  ;;  %v7833_v44 = vor.u32 %v10753_v55, %v7832_v37  ;;  %v10828_v25 = vld [vmem:[#allocation5 + $0x588] sm:$0xf0]  ;;  %v8072_v55 = vld [vmem:[#allocation5 + $0x4d8] sm:$0xf] }
 0x1af   : > { %4649 = vmatpush.bf16.msrb.mxu3 %v8789_v49  ;;  %v10670_v49 = vld [vmem:[#allocation5 + $0x9c] sm:$0xf]  ;;  %v9269_v41 = vor.u32 %v11105_v32, %v9266_v33  ;;  %v11165_v32 = vld [vmem:[#allocation5 + $0x1014] sm:$0xf] }
 0x1b0   : > { %4611 = vmatpush.bf16.msrb.mxu0 %v9685_v59  ;;  %v8486_v59 = vld [vmem:[#allocation5 + $0x854] sm:$0xf0]  ;;  %v7529_v0 = vor.u32 %v10670_v49, %v7526_v53  ;;  %v10738_v53 = vld [vmem:[#allocation5 + $0x2b8] sm:$0xf0] }
 0x1b1   : > { %4624 = vmatpush.bf16.msrb.mxu1 %v7769_v60  ;;  %v9445_v60 = vor.u32 %v11157_v21, %v9444_v63  ;;  %v8489_v5 = vor.u32 %v10910_v58, %v8486_v59  ;;  %v11210_v63 = vld [vmem:[#allocation5 + $0x117c] sm:$0xf]  ;;  %v8313_v21 = vor.u32 %v10873_v40, %v8312_v39  ;;  %v9686_v49 = vld [vmem:[#allocation5 + $0x11b4] sm:$0xf0]  ;;  %v10813_v39 = vld [vmem:[#allocation5 + $0x510] sm:$0xf0] }
 0x1b2   : > { %4637 = vmatpush.bf16.msrb.mxu2 %v8249_v61  ;;  %v9384_v61 = vld [vmem:[#allocation5 + $0xf20] sm:$0xf]  ;;  %v9689_v59 = vor.u32 %v11210_v63, %v9686_v49  ;;  %v11030_v63 = vld [vmem:[#allocation5 + $0xbdc] sm:$0xf] }
 0x1b3   : > { %4650 = vmatpush.bf16.msrb.mxu3 %v8729_v2  ;;  %v10655_v2 = vld [vmem:[#allocation5 + $0x24] sm:$0xf]  ;;  %v9385_v17 = vor.u32 %v11142_v62, %v9384_v61  ;;  %v9146_v62 = vld [vmem:[#allocation5 + $0xd7c] sm:$0xf0]  ;;  %v11150_v49 = vld [vmem:[#allocation5 + $0xf9c] sm:$0xf] }
 0x1b4   : > { %4612 = vmatpush.bf16.msrb.mxu0 %v9625_v11  ;;  %v4386_v16 = vpop.f32.mrf.mxu2  ;;  %v7469_v23 = vor.u32 %v10655_v2, %v7466_v3  ;;  %v11075_v61 = vld [vmem:[#allocation5 + $0xd44] sm:$0xf]  ;;  %v9626_v2 = vld [vmem:[#allocation5 + $0x113c] sm:$0xf0]  ;;  %v7712_v3 = vld [vmem:[#allocation5 + $0x208] sm:$0xf] }
 0x1b5   : > { %4625 = vmatpush.bf16.msrb.mxu1 %v7709_v14  ;;  %v4399_v11 = vpop.f32.mrf.mxu3  ;;  %v9326_v14 = vld [vmem:[#allocation5 + $0xee4] sm:$0xf0] }
 0x1b6   : > { %4638 = vmatpush.bf16.msrb.mxu2 %v8189_v15  ;;  %v11240_v15 = vld [vmem:[#allocation5 + $0x126c] sm:$0xf]  ;;  %v9086_v16 = vld [vmem:[#allocation5 + $0xd04] sm:$0xf0] }
 0x1b7   : > { %4651 = vmatpush.bf16.msrb.mxu3 %v8669_v20  ;;  %v7892_v20 = vld [vmem:[#allocation5 + $0x370] sm:$0xf] }
 0x1b8   : > { %4613 = vmatpush.bf16.msrb.mxu0 %v9565_v27  ;;  %v8429_v27 = vor.u32 %v10895_v7, %v8426_v10  ;;  %v7893_v29 = vor.u32 %v10768_v22, %v7892_v20  ;;  %v9149_v10 = vor.u32 %v11075_v61, %v9146_v62  ;;  %v9566_v20 = vld [vmem:[#allocation5 + $0x10c4] sm:$0xf0]  ;;  %v7652_v22 = vld [vmem:[#allocation5 + $0x190] sm:$0xf]  ;;  %v11015_v61 = vld [vmem:[#allocation5 + $0xb64] sm:$0xf] }
 0x1b9   : > { %4626 = vmatpush.bf16.msrb.mxu1 %v7649_v56  ;;  %v9329_v56 = vor.u32 %v11120_v13, %v9326_v14  ;;  %v7713_v14 = vor.u32 %v10723_v4, %v7712_v3  ;;  %v8906_v62 = vld [vmem:[#allocation5 + $0xb9c] sm:$0xf0]  ;;  %v7472_v4 = vld [vmem:[#allocation5 + $0x28] sm:$0xf] }
 0x1ba   : > { %4639 = vmatpush.bf16.msrb.mxu2 %v8129_v28  ;;  %v9809_v28 = vor.u32 %v11240_v15, %v9806_v18  ;;  %v11060_v15 = vld [vmem:[#allocation5 + $0xccc] sm:$0xf]  ;;  %v9386_v3 = vld [vmem:[#allocation5 + $0xf5c] sm:$0xf0] }
 0x1bb   : > { %4652 = vmatpush.bf16.msrb.mxu3 %v8609_v34  ;;  %v11225_v34 = vld [vmem:[#allocation5 + $0x11f4] sm:$0xf]  ;;  %v9089_v26 = vor.u32 %v11060_v15, %v9086_v16  ;;  %v8852_v15 = vld [vmem:[#allocation5 + $0xaf0] sm:$0xf]  ;;  %v11008_v16 = vld [vmem:[#allocation5 + $0xb28] sm:$0xf0] }
 0x1bc   : > { %4614 = vmatpush.bf16.msrb.mxu0 %v9505_v43  ;;  %v9749_v43 = vor.u32 %v11225_v34, %v9746_v36  ;;  %v9506_v34 = vld [vmem:[#allocation5 + $0x104c] sm:$0xf0]  ;;  %v10693_v36 = vld [vmem:[#allocation5 + $0x150] sm:$0xf0] }
 0x1bd   : > { %4627 = vmatpush.bf16.msrb.mxu1 %v7589_v47  ;;  %v11090_v47 = vld [vmem:[#allocation5 + $0xdbc] sm:$0xf] }
 0x1be   : > { %4640 = vmatpush.bf16.msrb.mxu2 %v8069_v48  ;;  %v9206_v48 = vld [vmem:[#allocation5 + $0xdf4] sm:$0xf0] }
 0x1bf   : > { %4653 = vmatpush.bf16.msrb.mxu3 %v8549_v52  ;;  %v7772_v52 = vld [vmem:[#allocation5 + $0x280] sm:$0xf]  ;;  %v9209_v58 = vor.u32 %v11090_v47, %v9206_v48  ;;  %v9509_v47 = vor.u32 %v11165_v32, %v9506_v34  ;;  %v8792_v34 = vld [vmem:[#allocation5 + $0xa78] sm:$0xf] }
 0x1c0   : > { %4615 = vmatpush.bf16.msrb.mxu0 %v9445_v60  ;;  %v7773_v60 = vor.u32 %v10738_v53, %v7772_v52  ;;  %v8073_v52 = vor.u32 %v10813_v39, %v8072_v55  ;;  %v9446_v53 = vld [vmem:[#allocation5 + $0xfd4] sm:$0xf0]  ;;  %v11113_v39 = vld [vmem:[#allocation5 + $0xe70] sm:$0xf0] }
 0x1c1   : > { %4628 = vmatpush.bf16.msrb.mxu1 %v7529_v0  ;;  %v11195_v0 = vld [vmem:[#allocation5 + $0x1104] sm:$0xf] }
 0x1c2   : > { %4641 = vmatpush.bf16.msrb.mxu2 %v8009_v1  ;;  %v8253_v1 = vor.u32 %v10858_v57, %v8252_v54  ;;  %v9629_v13 = vor.u32 %v11195_v0, %v9626_v2  ;;  %v7532_v54 = vld [vmem:[#allocation5 + $0xa0] sm:$0xf]  ;;  %v10678_v57 = vld [vmem:[#allocation5 + $0xd8] sm:$0xf0]  ;;  %v9449_v0 = vor.u32 %v11150_v49, %v9446_v53  ;;  %v11135_v2 = vld [vmem:[#allocation5 + $0xf24] sm:$0xf] }
 0x1c3   : > { %4654 = vmatpush.bf16.msrb.mxu3 %v8489_v5  ;;  %v8192_v5 = vld [vmem:[#allocation5 + $0x5c8] sm:$0xf]  ;;  %v8732_v49 = vld [vmem:[#allocation5 + $0xa00] sm:$0xf] }
 0x1c4   : > { %4616 = vmatpush.bf16.msrb.mxu0 %v9385_v17  ;;  %v12106_v7 = vpop.f32.mrf.mxu0  ;;  %v11180_v17 = vld [vmem:[#allocation5 + $0x108c] sm:$0xf]  ;;  %v8193_v18 = vor.u32 %v10843_v6, %v8192_v5  ;;  %v10663_v6 = vld [vmem:[#allocation5 + $0x60] sm:$0xf0]  ;;  %v9212_v53 = vld [vmem:[#allocation5 + $0xdc0] sm:$0xf] }
 0x1c5   : > { %4629 = vmatpush.bf16.msrb.mxu1 %v7469_v23  ;;  %v12108_v11 = vpop.f32.mrf.mxu1  ;;  %v10708_v23 = vld [vmem:[#allocation5 + $0x1c8] sm:$0xf0] }
 0x1c6   : > { %4642 = vmatpush.bf16.msrb.mxu2 %v7949_v24  ;;  %v8132_v24 = vld [vmem:[#allocation5 + $0x550] sm:$0xf] }
 0x1c7   : > { %4655 = vmatpush.bf16.msrb.mxu3 %v8429_v27  ;;  %4617 = vmatmul.bf16.vlgmr.msrb.gmra.mxu0 %v12031_v30  ;;  %v9569_v27 = vor.u32 %v11180_v17, %v9566_v20  ;;  %v8133_v33 = vor.u32 %v10828_v25, %v8132_v24  ;;  %v9332_v17 = vld [vmem:[#allocation5 + $0xeb0] sm:$0xf]  ;;  %v8909_v20 = vor.u32 %v11015_v61, %v8906_v62  ;;  %v11248_v24 = vld [vmem:[#allocation5 + $0x12a8] sm:$0xf0]  ;;  %v7774_v61 = vld [vmem:[#allocation5 + $0x2bc] sm:$0xf0] }
 0x1c8   : > { %4661 = vmatpush.bf16.msra.mxu0 %v9329_v56  ;;  %4630 = vmatmul.bf16.vlgmr.msrb.gmra.mxu1 %v12016_v8  ;;  %v7653_v56 = vor.u32 %v10708_v23, %v7652_v22  ;;  %v11128_v22 = vld [vmem:[#allocation5 + $0xee8] sm:$0xf0]  ;;  %v9812_v23 = vld [vmem:[#allocation5 + $0x1270] sm:$0xf]  ;;  %v9389_v25 = vor.u32 %v11135_v2, %v9386_v3  ;;  %v8672_v3 = vld [vmem:[#allocation5 + $0x988] sm:$0xf] }
 0x1c9   : > { %4674 = vmatpush.bf16.msra.mxu1 %v9809_v28  ;;  %4643 = vmatmul.bf16.vlgmr.msrb.gmra.mxu2 %v12027_v31  ;;  %v11045_v28 = vld [vmem:[#allocation5 + $0xc54] sm:$0xf]  ;;  %v9333_v32 = vor.u32 %v11128_v22, %v9332_v17 }
 0x1ca   : > { %4687 = vmatpush.bf16.msra.mxu2 %v7893_v29  ;;  %4656 = vmatmul.bf16.vlgmr.msrb.gmra.mxu3 %v12023_v19  ;;  %v9026_v29 = vld [vmem:[#allocation5 + $0xc8c] sm:$0xf0] }
 0x1cb   : > { %4700 = vmatpush.bf16.msra.mxu3 %v8373_v35  ;;  %v7592_v35 = vld [vmem:[#allocation5 + $0x118] sm:$0xf] }
 0x1cc   : > { %4662 = vmatpush.bf16.msra.mxu0 %v9269_v41  ;;  %v12110_v37 = vpop.f32.mrf.mxu2  ;;  %v4412_v41 = vpop.f32.mrf.mxu0  ;;  %v7593_v48 = vor.u32 %v10693_v36, %v7592_v35  ;;  %v10993_v35 = vld [vmem:[#allocation5 + $0xab0] sm:$0xf0]  ;;  %v9272_v36 = vld [vmem:[#allocation5 + $0xe38] sm:$0xf] }
 0x1cd   : > { %4675 = vmatpush.bf16.msra.mxu1 %v9749_v43  ;;  %v12112_v40 = vpop.f32.mrf.mxu3  ;;  %v9029_v43 = vor.u32 %v11045_v28, %v9026_v29  ;;  %v8853_v29 = vor.u32 %v11008_v16, %v8852_v15  ;;  %v9752_v41 = vld [vmem:[#allocation5 + $0x11f8] sm:$0xf]  ;;  %v10716_v15 = vld [vmem:[#allocation5 + $0x20c] sm:$0xf]  ;;  %v7714_v16 = vld [vmem:[#allocation5 + $0x244] sm:$0xf0] }
 0x1ce   : > { %4688 = vmatpush.bf16.msra.mxu2 %v7833_v44  ;;  %v4425_v44 = vpop.f32.mrf.mxu1 }
 0x1cf   : > { %4701 = vmatpush.bf16.msra.mxu3 %v8313_v21  ;;  %v8966_v21 = vld [vmem:[#allocation5 + $0xc14] sm:$0xf0]  ;;  %v10746_v44 = vld [vmem:[#allocation5 + $0x2fc] sm:$0xf] }
 0x1d0   : > { %4663 = vmatpush.bf16.msra.mxu0 %v9209_v58  ;;  %v8012_v58 = vld [vmem:[#allocation5 + $0x460] sm:$0xf] }
 0x1d1   : > { %4676 = vmatpush.bf16.msra.mxu1 %v9689_v59  ;;  %v10798_v59 = vld [vmem:[#allocation5 + $0x498] sm:$0xf0] }
 0x1d2   : > { %4689 = vmatpush.bf16.msra.mxu2 %v7773_v60  ;;  %v8969_v60 = vor.u32 %v11030_v63, %v8966_v21  ;;  %v8013_v5 = vor.u32 %v10798_v59, %v8012_v58  ;;  %v9273_v63 = vor.u32 %v11113_v39, %v9272_v36  ;;  %v9692_v58 = vld [vmem:[#allocation5 + $0x1180] sm:$0xf]  ;;  %v11218_v59 = vld [vmem:[#allocation5 + $0x11b8] sm:$0xf0]  ;;  %v10933_v39 = vld [vmem:[#allocation5 + $0x8d0] sm:$0xf0] }
 0x1d3   : > { %4702 = vmatpush.bf16.msra.mxu3 %v8253_v1  ;;  %v7533_v1 = vor.u32 %v10678_v57, %v7532_v54  ;;  %v11098_v57 = vld [vmem:[#allocation5 + $0xdf8] sm:$0xf0]  ;;  %v9693_v2 = vor.u32 %v11218_v59, %v9692_v58 }
 0x1d4   : > { %4664 = vmatpush.bf16.msra.mxu0 %v9149_v10  ;;  %v7952_v10 = vld [vmem:[#allocation5 + $0x3e8] sm:$0xf] }
 0x1d5   : > { %4677 = vmatpush.bf16.msra.mxu1 %v9629_v13  ;;  %v10783_v13 = vld [vmem:[#allocation5 + $0x420] sm:$0xf0] }
 0x1d6   : > { %4690 = vmatpush.bf16.msra.mxu2 %v7713_v14  ;;  %v4438_v14 = vpop.f32.mrf.mxu2  ;;  %v7953_v28 = vor.u32 %v10783_v13, %v7952_v10  ;;  %v11083_v10 = vld [vmem:[#allocation5 + $0xd80] sm:$0xf0]  ;;  %v9632_v13 = vld [vmem:[#allocation5 + $0x1108] sm:$0xf] }
 0x1d7   : > { %4703 = vmatpush.bf16.msra.mxu3 %v8193_v18  ;;  %v4451_v18 = vpop.f32.mrf.mxu3  ;;  %v11203_v14 = vld [vmem:[#allocation5 + $0x1140] sm:$0xf0] }
 0x1d8   : > { %4665 = vmatpush.bf16.msra.mxu0 %v9089_v26  ;;  %v7473_v26 = vor.u32 %v10663_v6, %v7472_v4  ;;  %v10963_v4 = vld [vmem:[#allocation5 + $0x9c0] sm:$0xf0] }
 0x1d9   : > { %4678 = vmatpush.bf16.msra.mxu1 %v9569_v27  ;;  %v10761_v27 = vld [vmem:[#allocation5 + $0x374] sm:$0xf]  ;;  %v8673_v17 = vor.u32 %v10963_v4, %v8672_v3  ;;  %v11158_v3 = vld [vmem:[#allocation5 + $0xfd8] sm:$0xf0]  ;;  %v10671_v4 = vld [vmem:[#allocation5 + $0xa4] sm:$0xf] }
 0x1da   : > { %4691 = vmatpush.bf16.msra.mxu2 %v7653_v56  ;;  %v7894_v56 = vld [vmem:[#allocation5 + $0x3ac] sm:$0xf0] }
 0x1db   : > { %4704 = vmatpush.bf16.msra.mxu3 %v8133_v33  ;;  %v9813_v33 = vor.u32 %v11248_v24, %v9812_v23  ;;  %v7897_v55 = vor.u32 %v10761_v27, %v7894_v56  ;;  %v10948_v23 = vld [vmem:[#allocation5 + $0x948] sm:$0xf0]  ;;  %v9092_v24 = vld [vmem:[#allocation5 + $0xcd0] sm:$0xf] }
 0x1dc   : > { %4666 = vmatpush.bf16.msra.mxu0 %v9029_v43  ;;  %v11233_v43 = vld [vmem:[#allocation5 + $0x1230] sm:$0xf0]  ;;  %v11068_v27 = vld [vmem:[#allocation5 + $0xd08] sm:$0xf0]  ;;  %v9572_v56 = vld [vmem:[#allocation5 + $0x1090] sm:$0xf] }
 0x1dd   : > { %4679 = vmatpush.bf16.msra.mxu1 %v9509_v47  ;;  %v7834_v47 = vld [vmem:[#allocation5 + $0x334] sm:$0xf0]  ;;  %v9753_v21 = vor.u32 %v11233_v43, %v9752_v41 }
 0x1de   : > { %4692 = vmatpush.bf16.msra.mxu2 %v7593_v48  ;;  %v8793_v48 = vor.u32 %v10993_v35, %v8792_v34  ;;  %v7837_v54 = vor.u32 %v10746_v44, %v7834_v47  ;;  %v9093_v35 = vor.u32 %v11068_v27, %v9092_v24  ;;  %v9032_v41 = vld [vmem:[#allocation5 + $0xc58] sm:$0xf]  ;;  %v11053_v47 = vld [vmem:[#allocation5 + $0xc90] sm:$0xf0] }
 0x1df   : > { %4705 = vmatpush.bf16.msra.mxu3 %v8073_v52  ;;  %v10978_v52 = vld [vmem:[#allocation5 + $0xa38] sm:$0xf0]  ;;  %v9033_v58 = vor.u32 %v11053_v47, %v9032_v41  ;;  %v10881_v24 = vld [vmem:[#allocation5 + $0x734] sm:$0xf] }
 0x1e0   : > { %4667 = vmatpush.bf16.msra.mxu0 %v8969_v60  ;;  %v10731_v60 = vld [vmem:[#allocation5 + $0x284] sm:$0xf]  ;;  %v8733_v62 = vor.u32 %v10978_v52, %v8732_v49  ;;  %v7594_v49 = vld [vmem:[#allocation5 + $0x154] sm:$0xf0] }
 0x1e1   : > { %4680 = vmatpush.bf16.msra.mxu1 %v9449_v0  ;;  %v4450_v0 = vadd.f32 %v12112_v40, %v12110_v37  ;;  %v7777_v6 = vor.u32 %v10731_v60, %v7774_v61  ;;  %v9633_v37 = vor.u32 %v11203_v14, %v9632_v13  ;;  %v8612_v40 = vld [vmem:[#allocation5 + $0x910] sm:$0xf]  ;;  %v8492_v60 = vld [vmem:[#allocation5 + $0x820] sm:$0xf]  ;;  %v10918_v61 = vld [vmem:[#allocation5 + $0x858] sm:$0xf0] }
 0x1e2   : > { %4693 = vmatpush.bf16.msra.mxu2 %v7533_v1  ;;  %v9213_v1 = vor.u32 %v11098_v57, %v9212_v53  ;;  %v8613_v34 = vor.u32 %v10948_v23, %v8612_v40  ;;  %v10903_v13 = vld [vmem:[#allocation5 + $0x7e0] sm:$0xf0]  ;;  %v10656_v40 = vld [vmem:[#allocation5 + $0x2c] sm:$0xf]  ;;  %v7474_v23 = vld [vmem:[#allocation5 + $0x64] sm:$0xf0] }
 0x1e3   : > { %4706 = vmatpush.bf16.msra.mxu3 %v8013_v5  ;;  %v9152_v5 = vld [vmem:[#allocation5 + $0xd48] sm:$0xf] }
 0x1e4   : > { %4668 = vmatpush.bf16.msra.mxu0 %v8909_v20  ;;  %v4462_v18 = vpop.f32.mrf.mxu0  ;;  %v9153_v22 = vor.u32 %v11083_v10, %v9152_v5  ;;  %v7534_v5 = vld [vmem:[#allocation5 + $0xdc] sm:$0xf0]  ;;  %v8432_v10 = vld [vmem:[#allocation5 + $0x7a8] sm:$0xf] }
 0x1e5   : > { %4681 = vmatpush.bf16.msra.mxu1 %v9389_v25  ;;  %v4475_v20 = vpop.f32.mrf.mxu1  ;;  %v4463_v25 = vadd.f32 %v4462_v18, %v4450_v0  ;;  %v9392_v18 = vld [vmem:[#allocation5 + $0xf28] sm:$0xf] }
 0x1e6   : > { %4694 = vmatpush.bf16.msra.mxu2 %v7473_v26  ;;  %v7717_v26 = vor.u32 %v10716_v15, %v7714_v16  ;;  %v8912_v16 = vld [vmem:[#allocation5 + $0xb68] sm:$0xf] }
 0x1e7   : > { %4707 = vmatpush.bf16.msra.mxu3 %v7953_v28  ;;  %4669 = vmatmul.bf16.vlgmr.msra.gmra.mxu0 %v12018_v9  ;;  %v11188_v28 = vld [vmem:[#allocation5 + $0x10c8] sm:$0xf0] }
 0x1e8   : > { %4713 = vmatpush.bf16.msrb.mxu0 %v8853_v29  ;;  %4682 = vmatmul.bf16.vlgmr.msra.gmra.mxu1 %v12031_v30  ;;  %v10701_v29 = vld [vmem:[#allocation5 + $0x194] sm:$0xf]  ;;  %v9573_v36 = vor.u32 %v11188_v28, %v9572_v56  ;;  %v8433_v56 = vor.u32 %v10903_v13, %v8432_v10  ;;  %v8854_v28 = vld [vmem:[#allocation5 + $0xb2c] sm:$0xf0]  ;;  %v11211_v10 = vld [vmem:[#allocation5 + $0x1184] sm:$0xf] }
 0x1e9   : > { %4726 = vmatpush.bf16.msrb.mxu1 %v9333_v32  ;;  %4695 = vmatmul.bf16.vlgmr.msra.gmra.mxu2 %v12016_v8  ;;  %v7654_v32 = vld [vmem:[#allocation5 + $0x1cc] sm:$0xf0]  ;;  %v9694_v13 = vld [vmem:[#allocation5 + $0x11bc] sm:$0xf0] }
 0x1ea   : > { %4739 = vmatpush.bf16.msrb.mxu2 %v9813_v33  ;;  %4708 = vmatmul.bf16.vlgmr.msra.gmra.mxu3 %v12027_v31  ;;  %v12120_v33 = vadd.f32 %v4475_v20, %v4463_v25  ;;  %v7657_v44 = vor.u32 %v10701_v29, %v7654_v32  ;;  %v8374_v25 = vld [vmem:[#allocation5 + $0x76c] sm:$0xf0]  ;;  %v11121_v29 = vld [vmem:[#allocation5 + $0xeb4] sm:$0xf] }
 0x1eb   : > { %4752 = vmatpush.bf16.msrb.mxu3 %v7897_v55  ;;  %v8552_v55 = vld [vmem:[#allocation5 + $0x898] sm:$0xf]  ;;  %v9334_v32 = vld [vmem:[#allocation5 + $0xeec] sm:$0xf0]  ;;  %v8377_v41 = vor.u32 %v10881_v24, %v8374_v25  ;;  %v11196_v24 = vld [vmem:[#allocation5 + $0x110c] sm:$0xf] }
 0x1ec   : > { %4714 = vmatpush.bf16.msrb.mxu0 %v8793_v48  ;;  %v12122_v43 = vpop.f32.mrf.mxu2  ;;  %v9512_v48 = vld [vmem:[#allocation5 + $0x1018] sm:$0xf]  ;;  %v8553_v53 = vor.u32 %v10933_v39, %v8552_v55  ;;  %v9814_v55 = vld [vmem:[#allocation5 + $0x12ac] sm:$0xf0]  ;;  %v7477_v39 = vor.u32 %v10656_v40, %v7474_v23  ;;  %v9337_v47 = vor.u32 %v11121_v29, %v9334_v32  ;;  %v11076_v40 = vld [vmem:[#allocation5 + $0xd4c] sm:$0xf] }
 0x1ed   : > { %4727 = vmatpush.bf16.msrb.mxu1 %v9273_v63  ;;  %v11173_v63 = vld [vmem:[#allocation5 + $0x1050] sm:$0xf0]  ;;  %v12124_v52 = vpop.f32.mrf.mxu3  ;;  %v4477_v57 = vpop.f32.mrf.mxu1  ;;  %v9154_v23 = vld [vmem:[#allocation5 + $0xd84] sm:$0xf0] }
 0x1ee   : > { %4740 = vmatpush.bf16.msrb.mxu2 %v9753_v21  ;;  %v10686_v21 = vld [vmem:[#allocation5 + $0x11c] sm:$0xf]  ;;  %v9513_v59 = vor.u32 %v11173_v63, %v9512_v48  ;;  %v8314_v63 = vld [vmem:[#allocation5 + $0x6f4] sm:$0xf0]  ;;  %v9634_v25 = vld [vmem:[#allocation5 + $0x1144] sm:$0xf0] }
 0x1ef   : > { %4753 = vmatpush.bf16.msrb.mxu3 %v7837_v54  ;;  %v4464_v54 = vpop.f32.mrf.mxu0  ;;  %v7597_v0 = vor.u32 %v10686_v21, %v7594_v49  ;;  %v10866_v48 = vld [vmem:[#allocation5 + $0x6bc] sm:$0xf]  ;;  %v9274_v57 = vld [vmem:[#allocation5 + $0xe74] sm:$0xf0]  ;;  %v10821_v32 = vld [vmem:[#allocation5 + $0x554] sm:$0xf] }
 0x1f0   : > { %4715 = vmatpush.bf16.msrb.mxu0 %v8733_v62  ;;  %v8972_v62 = vld [vmem:[#allocation5 + $0xbe0] sm:$0xf]  ;;  %v10986_v21 = vld [vmem:[#allocation5 + $0xa7c] sm:$0xf] }
 0x1f1   : > { %4728 = vmatpush.bf16.msrb.mxu1 %v9213_v1  ;;  %v11038_v1 = vld [vmem:[#allocation5 + $0xc18] sm:$0xf0] }
 0x1f2   : > { %4741 = vmatpush.bf16.msrb.mxu2 %v9693_v2  ;;  %v9452_v2 = vld [vmem:[#allocation5 + $0xfa0] sm:$0xf]  ;;  %v8973_v14 = vor.u32 %v11038_v1, %v8972_v62  ;;  %v11106_v54 = vld [vmem:[#allocation5 + $0xe3c] sm:$0xf] }
 0x1f3   : > { %4754 = vmatpush.bf16.msrb.mxu3 %v7777_v6  ;;  %v8493_v6 = vor.u32 %v10918_v61, %v8492_v60  ;;  %v9453_v15 = vor.u32 %v11158_v3, %v9452_v2  ;;  %v8317_v60 = vor.u32 %v10866_v48, %v8314_v63  ;;  %v9277_v62 = vor.u32 %v11106_v54, %v9274_v57  ;;  %v8254_v1 = vld [vmem:[#allocation5 + $0x67c] sm:$0xf0]  ;;  %v10971_v2 = vld [vmem:[#allocation5 + $0xa04] sm:$0xf]  ;;  %v9574_v48 = vld [vmem:[#allocation5 + $0x10cc] sm:$0xf0] }
 0x1f4   : > { %4716 = vmatpush.bf16.msrb.mxu0 %v8673_v17  ;;  %v11023_v17 = vld [vmem:[#allocation5 + $0xba0] sm:$0xf0]  ;;  %v4490_v20 = vpop.f32.mrf.mxu2  ;;  %v10806_v54 = vld [vmem:[#allocation5 + $0x4dc] sm:$0xf]  ;;  %v8074_v57 = vld [vmem:[#allocation5 + $0x514] sm:$0xf0] }
 0x1f5   : > { %4729 = vmatpush.bf16.msrb.mxu1 %v9153_v22  ;;  %v7537_v22 = vor.u32 %v10671_v4, %v7534_v5  ;;  %v4503_v27 = vpop.f32.mrf.mxu3  ;;  %v8734_v4 = vld [vmem:[#allocation5 + $0xa3c] sm:$0xf0]  ;;  %v11091_v5 = vld [vmem:[#allocation5 + $0xdc4] sm:$0xf]  ;;  %v10956_v20 = vld [vmem:[#allocation5 + $0x98c] sm:$0xf] }
 0x1f6   : > { %4742 = vmatpush.bf16.msrb.mxu2 %v9633_v37  ;;  %v11143_v37 = vld [vmem:[#allocation5 + $0xf60] sm:$0xf0] }
 0x1f7   : > { %4755 = vmatpush.bf16.msrb.mxu3 %v7717_v26  ;;  %v11001_v26 = vld [vmem:[#allocation5 + $0xaf4] sm:$0xf] }
 0x1f8   : > { %4717 = vmatpush.bf16.msrb.mxu0 %v8613_v34  ;;  %v8913_v34 = vor.u32 %v11023_v17, %v8912_v16  ;;  %v10836_v17 = vld [vmem:[#allocation5 + $0x5cc] sm:$0xf] }
 0x1f9   : > { %4730 = vmatpush.bf16.msrb.mxu1 %v9093_v35  ;;  %v9393_v35 = vor.u32 %v11143_v37, %v9392_v18  ;;  %v8194_v18 = vld [vmem:[#allocation5 + $0x604] sm:$0xf0] }
 0x1fa   : > { %4743 = vmatpush.bf16.msrb.mxu2 %v9573_v36  ;;  %v11241_v36 = vld [vmem:[#allocation5 + $0x1274] sm:$0xf]  ;;  %v8674_v37 = vld [vmem:[#allocation5 + $0x9c4] sm:$0xf0] }
 0x1fb   : > { %4756 = vmatpush.bf16.msrb.mxu3 %v7657_v44  ;;  %v8857_v44 = vor.u32 %v11001_v26, %v8854_v28  ;;  %v9817_v49 = vor.u32 %v11241_v36, %v9814_v55  ;;  %v8197_v26 = vor.u32 %v10836_v17, %v8194_v18  ;;  %v9157_v28 = vor.u32 %v11076_v40, %v9154_v23  ;;  %v8494_v17 = vld [vmem:[#allocation5 + $0x85c] sm:$0xf0]  ;;  %v11031_v18 = vld [vmem:[#allocation5 + $0xbe4] sm:$0xf]  ;;  %v10776_v23 = vld [vmem:[#allocation5 + $0x3ec] sm:$0xf] }
 0x1fc   : > { %4718 = vmatpush.bf16.msrb.mxu0 %v8553_v53  ;;  %v8794_v53 = vld [vmem:[#allocation5 + $0xab4] sm:$0xf0]  ;;  %v9637_v55 = vor.u32 %v11196_v24, %v9634_v25  ;;  %v7954_v24 = vld [vmem:[#allocation5 + $0x424] sm:$0xf0] }
 0x1fd   : > { %4731 = vmatpush.bf16.msrb.mxu1 %v9033_v58  ;;  %v11226_v58 = vld [vmem:[#allocation5 + $0x11fc] sm:$0xf]  ;;  %v8797_v61 = vor.u32 %v10986_v21, %v8794_v53 }
 0x1fe   : > { %4744 = vmatpush.bf16.msrb.mxu2 %v9513_v59  ;;  %v9754_v59 = vld [vmem:[#allocation5 + $0x1234] sm:$0xf0] }
 0x1ff   : > { %4757 = vmatpush.bf16.msrb.mxu3 %v7597_v0  ;;  %v10851_v0 = vld [vmem:[#allocation5 + $0x644] sm:$0xf]  ;;  %v9757_v3 = vor.u32 %v11226_v58, %v9754_v59  ;;  %v10926_v58 = vld [vmem:[#allocation5 + $0x89c] sm:$0xf] }
 0x200   : > { %4719 = vmatpush.bf16.msrb.mxu0 %v8493_v6  ;;  %v9214_v6 = vld [vmem:[#allocation5 + $0xdfc] sm:$0xf0] }
 0x201   : > { %4732 = vmatpush.bf16.msrb.mxu1 %v8973_v14  ;;  %v8257_v14 = vor.u32 %v10851_v0, %v8254_v1  ;;  %v9217_v16 = vor.u32 %v11091_v5, %v9214_v6  ;;  %v11166_v1 = vld [vmem:[#allocation5 + $0x101c] sm:$0xf] }
 0x202   : > { %4745 = vmatpush.bf16.msrb.mxu2 %v9453_v15  ;;  %v8737_v15 = vor.u32 %v10971_v2, %v8734_v4  ;;  %v9514_v2 = vld [vmem:[#allocation5 + $0x1054] sm:$0xf0] }
 0x203   : > { %4758 = vmatpush.bf16.msrb.mxu3 %v7537_v22  ;;  %v9697_v22 = vor.u32 %v11211_v10, %v9694_v13  ;;  %v10791_v10 = vld [vmem:[#allocation5 + $0x464] sm:$0xf]  ;;  %v8014_v13 = vld [vmem:[#allocation5 + $0x49c] sm:$0xf0] }
 0x204   : > { %4720 = vmatpush.bf16.msrb.mxu0 %v8433_v56  ;;  %v4514_v27 = vpop.f32.mrf.mxu0  ;;  %v8677_v56 = vor.u32 %v10956_v20, %v8674_v37  ;;  %v8974_v20 = vld [vmem:[#allocation5 + $0xc1c] sm:$0xf0]  ;;  %v8017_v40 = vor.u32 %v10791_v10, %v8014_v13  ;;  %v10994_v10 = vld [vmem:[#allocation5 + $0xab8] sm:$0xf0] }
 0x205   : > { %4733 = vmatpush.bf16.msrb.mxu1 %v8913_v34  ;;  %v4515_v29 = vadd.f32 %v4514_v27, %v12124_v52  ;;  %v8134_v34 = vld [vmem:[#allocation5 + $0x58c] sm:$0xf0]  ;;  %v4527_v36 = vpop.f32.mrf.mxu1  ;;  %v9454_v37 = vld [vmem:[#allocation5 + $0xfdc] sm:$0xf0]  ;;  %v10896_v27 = vld [vmem:[#allocation5 + $0x7ac] sm:$0xf] }
 0x206   : > { %4746 = vmatpush.bf16.msrb.mxu2 %v9393_v35  ;;  %v10941_v35 = vld [vmem:[#allocation5 + $0x914] sm:$0xf]  ;;  %v8137_v21 = vor.u32 %v10821_v32, %v8134_v34  ;;  %v8914_v34 = vld [vmem:[#allocation5 + $0xba4] sm:$0xf0]  ;;  %v9280_v13 = vld [vmem:[#allocation5 + $0xe40] sm:$0xf] }
 0x207   : > { %4759 = vmatpush.bf16.msrb.mxu3 %v7477_v39  ;;  %4721 = vmatmul.bf16.vlgmr.msrb.gmra.mxu0 %v12023_v19  ;;  %v8614_v39 = vld [vmem:[#allocation5 + $0x94c] sm:$0xf0]  ;;  %v12131_v63 = vadd.f32 %v4527_v36, %v4515_v29  ;;  %v9394_v36 = vld [vmem:[#allocation5 + $0xf64] sm:$0xf0] }
 0x208   : > { %4765 = vmatpush.bf16.msra.mxu0 %v8377_v41  ;;  %4734 = vmatmul.bf16.vlgmr.msrb.gmra.mxu1 %v12018_v9  ;;  %v11061_v41 = vld [vmem:[#allocation5 + $0xcd4] sm:$0xf] }
 0x209   : > { %4778 = vmatpush.bf16.msra.mxu1 %v8857_v44  ;;  %4747 = vmatmul.bf16.vlgmr.msrb.gmra.mxu2 %v12031_v30  ;;  %v9094_v44 = vld [vmem:[#allocation5 + $0xd0c] sm:$0xf0] }
 0x20a   : > { %4791 = vmatpush.bf16.msra.mxu2 %v9337_v47  ;;  %4760 = vmatmul.bf16.vlgmr.msrb.gmra.mxu3 %v12016_v8  ;;  %v11181_v47 = vld [vmem:[#allocation5 + $0x1094] sm:$0xf]  ;;  %v9097_v53 = vor.u32 %v11061_v41, %v9094_v44  ;;  %v8380_v44 = vld [vmem:[#allocation5 + $0x738] sm:$0xf] }
 0x20b   : > { %4804 = vmatpush.bf16.msra.mxu3 %v9817_v49  ;;  %v8617_v49 = vor.u32 %v10941_v35, %v8614_v39  ;;  %v9577_v59 = vor.u32 %v11181_v47, %v9574_v48  ;;  %v11136_v35 = vld [vmem:[#allocation5 + $0xf2c] sm:$0xf]  ;;  %v7900_v39 = vld [vmem:[#allocation5 + $0x378] sm:$0xf]  ;;  %v10769_v41 = vld [vmem:[#allocation5 + $0x3b0] sm:$0xf0]  ;;  %v7957_v47 = vor.u32 %v10776_v23, %v7954_v24 }
 0x20c   : > { %4766 = vmatpush.bf16.msra.mxu0 %v8317_v60  ;;  %v12133_v52 = vpop.f32.mrf.mxu2  ;;  %v8554_v60 = vld [vmem:[#allocation5 + $0x8d4] sm:$0xf0]  ;;  %v4516_v4 = vpop.f32.mrf.mxu0  ;;  %v10889_v48 = vld [vmem:[#allocation5 + $0x770] sm:$0xf0]  ;;  %v8740_v23 = vld [vmem:[#allocation5 + $0xa08] sm:$0xf] }
 0x20d   : > { %4779 = vmatpush.bf16.msra.mxu1 %v8797_v61  ;;  %v11046_v61 = vld [vmem:[#allocation5 + $0xc5c] sm:$0xf]  ;;  %v12135_v0 = vpop.f32.mrf.mxu3  ;;  %v8557_v5 = vor.u32 %v10926_v58, %v8554_v60  ;;  %v11129_v58 = vld [vmem:[#allocation5 + $0xef0] sm:$0xf0]  ;;  %v7901_v60 = vor.u32 %v10769_v41, %v7900_v39  ;;  %v10979_v24 = vld [vmem:[#allocation5 + $0xa40] sm:$0xf0] }
 0x20e   : > { %4792 = vmatpush.bf16.msra.mxu2 %v9277_v62  ;;  %v9034_v62 = vld [vmem:[#allocation5 + $0xc94] sm:$0xf0]  ;;  %v10964_v39 = vld [vmem:[#allocation5 + $0x9c8] sm:$0xf0]  ;;  %v9160_v41 = vld [vmem:[#allocation5 + $0xd50] sm:$0xf] }
 0x20f   : > { %4805 = vmatpush.bf16.msra.mxu3 %v9757_v3  ;;  %v8077_v3 = vor.u32 %v10806_v54, %v8074_v57  ;;  %v9037_v6 = vor.u32 %v11046_v61, %v9034_v62  ;;  %v9340_v57 = vld [vmem:[#allocation5 + $0xeb8] sm:$0xf]  ;;  %v8381_v61 = vor.u32 %v10889_v48, %v8380_v44  ;;  %v11084_v44 = vld [vmem:[#allocation5 + $0xd88] sm:$0xf0] }
 0x210   : > { %4767 = vmatpush.bf16.msra.mxu0 %v8257_v14  ;;  %v10911_v14 = vld [vmem:[#allocation5 + $0x824] sm:$0xf]  ;;  %v9341_v4 = vor.u32 %v11129_v58, %v9340_v57  ;;  %v8140_v57 = vld [vmem:[#allocation5 + $0x558] sm:$0xf] }
 0x211   : > { %4780 = vmatpush.bf16.msra.mxu1 %v8737_v15  ;;  %v4529_v15 = vpop.f32.mrf.mxu1  ;;  %v8497_v25 = vor.u32 %v10911_v14, %v8494_v17  ;;  %v11114_v14 = vld [vmem:[#allocation5 + $0xe78] sm:$0xf0] }
 0x212   : > { %4793 = vmatpush.bf16.msra.mxu2 %v9217_v16  ;;  %v9517_v16 = vor.u32 %v11166_v1, %v9514_v2  ;;  %v7840_v1 = vld [vmem:[#allocation5 + $0x300] sm:$0xf]  ;;  %v10754_v2 = vld [vmem:[#allocation5 + $0x338] sm:$0xf0] }
 0x213   : > { %4806 = vmatpush.bf16.msra.mxu3 %v9697_v22  ;;  %v11151_v22 = vld [vmem:[#allocation5 + $0xfa4] sm:$0xf]  ;;  %v7841_v15 = vor.u32 %v10754_v2, %v7840_v1  ;;  %v9100_v2 = vld [vmem:[#allocation5 + $0xcd8] sm:$0xf] }
 0x214   : > { %4768 = vmatpush.bf16.msra.mxu0 %v8197_v26  ;;  %v8977_v26 = vor.u32 %v11031_v18, %v8974_v20  ;;  %v4542_v29 = vpop.f32.mrf.mxu2  ;;  %v9457_v32 = vor.u32 %v11151_v22, %v9454_v37  ;;  %v7780_v18 = vld [vmem:[#allocation5 + $0x288] sm:$0xf]  ;;  %v10739_v20 = vld [vmem:[#allocation5 + $0x2c0] sm:$0xf0]  ;;  %v9281_v37 = vor.u32 %v11114_v14, %v9280_v13  ;;  %v10694_v13 = vld [vmem:[#allocation5 + $0x158] sm:$0xf0] }
 0x215   : > { %4781 = vmatpush.bf16.msra.mxu1 %v8677_v56  ;;  %v8434_v56 = vld [vmem:[#allocation5 + $0x7e4] sm:$0xf0]  ;;  %v7720_v29 = vld [vmem:[#allocation5 + $0x210] sm:$0xf]  ;;  %v8080_v14 = vld [vmem:[#allocation5 + $0x4e0] sm:$0xf] }
 0x216   : > { %4794 = vmatpush.bf16.msra.mxu2 %v9157_v28  ;;  %v11016_v28 = vld [vmem:[#allocation5 + $0xb6c] sm:$0xf]  ;;  %v8260_v22 = vld [vmem:[#allocation5 + $0x648] sm:$0xf] }
 0x217   : > { %4807 = vmatpush.bf16.msra.mxu3 %v9637_v55  ;;  %v4555_v55 = vpop.f32.mrf.mxu3  ;;  %v8917_v54 = vor.u32 %v11016_v28, %v8914_v34  ;;  %v8741_v28 = vor.u32 %v10979_v24, %v8740_v23  ;;  %v8200_v34 = vld [vmem:[#allocation5 + $0x5d0] sm:$0xf] }
 0x218   : > { %4769 = vmatpush.bf16.msra.mxu0 %v8137_v21  ;;  %v8860_v21 = vld [vmem:[#allocation5 + $0xaf8] sm:$0xf]  ;;  %v8680_v55 = vld [vmem:[#allocation5 + $0x990] sm:$0xf] }
 0x219   : > { %4782 = vmatpush.bf16.msra.mxu1 %v8617_v49  ;;  %v11009_v49 = vld [vmem:[#allocation5 + $0xb30] sm:$0xf0] }
 0x21a   : > { %4795 = vmatpush.bf16.msra.mxu2 %v9097_v53  ;;  %v8437_v53 = vor.u32 %v10896_v27, %v8434_v56  ;;  %v8861_v62 = vor.u32 %v11009_v49, %v8860_v21  ;;  %v7781_v27 = vor.u32 %v10739_v20, %v7780_v18  ;;  %v8681_v49 = vor.u32 %v10964_v39, %v8680_v55  ;;  %v10934_v18 = vld [vmem:[#allocation5 + $0x8d8] sm:$0xf0]  ;;  %v8980_v55 = vld [vmem:[#allocation5 + $0xbe8] sm:$0xf]  ;;  %v11039_v39 = vld [vmem:[#allocation5 + $0xc20] sm:$0xf0] }
 0x21b   : > { %4808 = vmatpush.bf16.msra.mxu3 %v9577_v59  ;;  %v9397_v59 = vor.u32 %v11136_v35, %v9394_v36  ;;  %v10844_v36 = vld [vmem:[#allocation5 + $0x608] sm:$0xf0] }
 0x21c   : > { %4770 = vmatpush.bf16.msra.mxu0 %v8077_v3  ;;  %v8320_v3 = vld [vmem:[#allocation5 + $0x6c0] sm:$0xf]  ;;  %v8201_v21 = vor.u32 %v10844_v36, %v8200_v34  ;;  %v10799_v34 = vld [vmem:[#allocation5 + $0x4a0] sm:$0xf0] }
 0x21d   : > { %4783 = vmatpush.bf16.msra.mxu1 %v8557_v5  ;;  %v10874_v5 = vld [vmem:[#allocation5 + $0x6f8] sm:$0xf0]  ;;  %v10919_v36 = vld [vmem:[#allocation5 + $0x860] sm:$0xf0] }
 0x21e   : > { %4796 = vmatpush.bf16.msra.mxu2 %v9037_v6  ;;  %v8800_v6 = vld [vmem:[#allocation5 + $0xa80] sm:$0xf] }
 0x21f   : > { %4809 = vmatpush.bf16.msra.mxu3 %v9517_v16  ;;  %v8321_v16 = vor.u32 %v10874_v5, %v8320_v3  ;;  %v8801_v17 = vor.u32 %v10994_v10, %v8800_v6  ;;  %v11069_v3 = vld [vmem:[#allocation5 + $0xd10] sm:$0xf0]  ;;  %v7600_v10 = vld [vmem:[#allocation5 + $0x120] sm:$0xf] }
 0x220   : > { %4771 = vmatpush.bf16.msra.mxu0 %v8017_v40  ;;  %v10859_v40 = vld [vmem:[#allocation5 + $0x680] sm:$0xf0]  ;;  %v7601_v24 = vor.u32 %v10694_v13, %v7600_v10  ;;  %v10882_v10 = vld [vmem:[#allocation5 + $0x73c] sm:$0xf]  ;;  %v8382_v13 = vld [vmem:[#allocation5 + $0x774] sm:$0xf0] }
 0x221   : > { %4784 = vmatpush.bf16.msra.mxu1 %v8497_v25  ;;  %v9220_v25 = vld [vmem:[#allocation5 + $0xdc8] sm:$0xf]  ;;  %v8261_v56 = vor.u32 %v10859_v40, %v8260_v22  ;;  %v11054_v40 = vld [vmem:[#allocation5 + $0xc98] sm:$0xf0] }
 0x222   : > { %4797 = vmatpush.bf16.msra.mxu2 %v8977_v26  ;;  %v11099_v26 = vld [vmem:[#allocation5 + $0xe00] sm:$0xf0] }
 0x223   : > { %4810 = vmatpush.bf16.msra.mxu3 %v9457_v32  ;;  %v10724_v32 = vld [vmem:[#allocation5 + $0x248] sm:$0xf0]  ;;  %v9221_v35 = vor.u32 %v11099_v26, %v9220_v25 }
 0x224   : > { %4772 = vmatpush.bf16.msra.mxu0 %v7957_v47  ;;  %v4566_v47 = vpop.f32.mrf.mxu0  ;;  %v7721_v48 = vor.u32 %v10724_v32, %v7720_v29 }
 0x225   : > { %4785 = vmatpush.bf16.msra.mxu1 %v8437_v53  ;;  %v7660_v53 = vld [vmem:[#allocation5 + $0x198] sm:$0xf]  ;;  %v4579_v58 = vpop.f32.mrf.mxu1 }
 0x226   : > { %4798 = vmatpush.bf16.msra.mxu2 %v8917_v54  ;;  %v10709_v54 = vld [vmem:[#allocation5 + $0x1d0] sm:$0xf0]  ;;  %v12141_v1 = vadd.f32 %v4579_v58, %v4566_v47  ;;  %v10664_v47 = vld [vmem:[#allocation5 + $0x68] sm:$0xf0] }
 0x227   : > { %4811 = vmatpush.bf16.msra.mxu3 %v9397_v59  ;;  %4773 = vmatmul.bf16.vlgmr.msra.gmra.mxu0 %v12027_v31  ;;  %v9161_v59 = vor.u32 %v11084_v44, %v9160_v41  ;;  %v7480_v44 = vld [vmem:[#allocation5 + $0x30] sm:$0xf]  ;;  %v10904_v58 = vld [vmem:[#allocation5 + $0x7e8] sm:$0xf0] }
 0x228   : > { %4817 = vmatpush.bf16.msrb.mxu0 %v7901_v60  ;;  %4786 = vmatmul.bf16.vlgmr.msra.gmra.mxu1 %v12023_v19  ;;  %v10829_v60 = vld [vmem:[#allocation5 + $0x590] sm:$0xf0] }
 0x229   : > { %4830 = vmatpush.bf16.msrb.mxu1 %v8381_v61  ;;  %4799 = vmatmul.bf16.vlgmr.msra.gmra.mxu2 %v12018_v9  ;;  %v8620_v61 = vld [vmem:[#allocation5 + $0x918] sm:$0xf]  ;;  %v8141_v5 = vor.u32 %v10829_v60, %v8140_v57  ;;  %v8981_v57 = vor.u32 %v11039_v39, %v8980_v55  ;;  %v11024_v60 = vld [vmem:[#allocation5 + $0xba8] sm:$0xf0] }
 0x22a   : > { %4843 = vmatpush.bf16.msrb.mxu2 %v8861_v62  ;;  %4812 = vmatmul.bf16.vlgmr.msra.gmra.mxu3 %v12031_v30  ;;  %v10949_v62 = vld [vmem:[#allocation5 + $0x950] sm:$0xf0] }
 0x22b   : > { %4856 = vmatpush.bf16.msrb.mxu3 %v9341_v4  ;;  %v7661_v4 = vor.u32 %v10709_v54, %v7660_v53  ;;  %v8621_v6 = vor.u32 %v10949_v62, %v8620_v61  ;;  %v10784_v53 = vld [vmem:[#allocation5 + $0x428] sm:$0xf0]  ;;  %v8440_v54 = vld [vmem:[#allocation5 + $0x7b0] sm:$0xf] }
 0x22c   : > { %4818 = vmatpush.bf16.msrb.mxu0 %v7841_v15  ;;  %v9101_v15 = vor.u32 %v11069_v3, %v9100_v2  ;;  %v12145_v22 = vpop.f32.mrf.mxu2  ;;  %v4568_v23 = vpop.f32.mrf.mxu0  ;;  %v9820_v2 = vld [vmem:[#allocation5 + $0x1278] sm:$0xf]  ;;  %v11249_v3 = vld [vmem:[#allocation5 + $0x12b0] sm:$0xf0] }
 0x22d   : > { %4831 = vmatpush.bf16.msrb.mxu1 %v8321_v16  ;;  %v10814_v16 = vld [vmem:[#allocation5 + $0x518] sm:$0xf0]  ;;  %v12143_v20 = vpop.f32.mrf.mxu3  ;;  %v4581_v29 = vpop.f32.mrf.mxu1  ;;  %v8385_v23 = vor.u32 %v10882_v10, %v8382_v13  ;;  %v8682_v10 = vld [vmem:[#allocation5 + $0x9cc] sm:$0xf0] }
 0x22e   : > { %4844 = vmatpush.bf16.msrb.mxu2 %v8801_v17  ;;  %v8560_v17 = vld [vmem:[#allocation5 + $0x8a0] sm:$0xf]  ;;  %v8081_v25 = vor.u32 %v10814_v16, %v8080_v14  ;;  %v11002_v16 = vld [vmem:[#allocation5 + $0xafc] sm:$0xf] }
 0x22f   : > { %4857 = vmatpush.bf16.msrb.mxu3 %v9281_v37  ;;  %v9040_v37 = vld [vmem:[#allocation5 + $0xc60] sm:$0xf]  ;;  %v8561_v26 = vor.u32 %v10934_v18, %v8560_v17  ;;  %v8862_v17 = vld [vmem:[#allocation5 + $0xb34] sm:$0xf0] }
 0x230   : > { %4819 = vmatpush.bf16.msrb.mxu0 %v7781_v27  ;;  %v7540_v27 = vld [vmem:[#allocation5 + $0xa8] sm:$0xf]  ;;  %v9041_v32 = vor.u32 %v11054_v40, %v9040_v37  ;;  %v9821_v37 = vor.u32 %v11249_v3, %v9820_v2  ;;  %v8322_v29 = vld [vmem:[#allocation5 + $0x6fc] sm:$0xf0]  ;;  %v7722_v3 = vld [vmem:[#allocation5 + $0x24c] sm:$0xf0] }
 0x231   : > { %4832 = vmatpush.bf16.msrb.mxu1 %v8261_v56  ;;  %v10679_v56 = vld [vmem:[#allocation5 + $0xe0] sm:$0xf0] }
 0x232   : > { %4845 = vmatpush.bf16.msrb.mxu2 %v8741_v28  ;;  %v8020_v28 = vld [vmem:[#allocation5 + $0x468] sm:$0xf]  ;;  %v7541_v41 = vor.u32 %v10679_v56, %v7540_v27  ;;  %v8865_v27 = vor.u32 %v11002_v16, %v8862_v17  ;;  %v7842_v56 = vld [vmem:[#allocation5 + $0x33c] sm:$0xf0] }
 0x233   : > { %4858 = vmatpush.bf16.msrb.mxu3 %v9221_v35  ;;  %v8500_v35 = vld [vmem:[#allocation5 + $0x828] sm:$0xf] }
 0x234   : > { %4820 = vmatpush.bf16.msrb.mxu0 %v7721_v48  ;;  %v8021_v48 = vor.u32 %v10799_v34, %v8020_v28  ;;  %v4594_v62 = vpop.f32.mrf.mxu2  ;;  %v10867_v28 = vld [vmem:[#allocation5 + $0x6c4] sm:$0xf]  ;;  %v8802_v34 = vld [vmem:[#allocation5 + $0xabc] sm:$0xf0] }
 0x235   : > { %4833 = vmatpush.bf16.msrb.mxu1 %v8201_v21  ;;  %v8501_v21 = vor.u32 %v10919_v36, %v8500_v35  ;;  %v4607_v61 = vpop.f32.mrf.mxu3  ;;  %v4593_v36 = vadd.f32 %v12145_v22, %v12141_v1  ;;  %v8325_v39 = vor.u32 %v10867_v28, %v8322_v29  ;;  %v10717_v62 = vld [vmem:[#allocation5 + $0x214] sm:$0xf] }
 0x236   : > { %4846 = vmatpush.bf16.msrb.mxu2 %v8681_v49  ;;  %v7960_v49 = vld [vmem:[#allocation5 + $0x3f0] sm:$0xf]  ;;  %v11204_v61 = vld [vmem:[#allocation5 + $0x1148] sm:$0xf0]  ;;  %v7725_v16 = vor.u32 %v10717_v62, %v7722_v3  ;;  %v7542_v62 = vld [vmem:[#allocation5 + $0xe4] sm:$0xf0] }
 0x237   : > { %4859 = vmatpush.bf16.msrb.mxu3 %v9161_v59  ;;  %v8920_v59 = vld [vmem:[#allocation5 + $0xb70] sm:$0xf]  ;;  %v7961_v14 = vor.u32 %v10784_v53, %v7960_v49  ;;  %v10852_v49 = vld [vmem:[#allocation5 + $0x64c] sm:$0xf]  ;;  %v8262_v53 = vld [vmem:[#allocation5 + $0x684] sm:$0xf0]  ;;  %v4606_v22 = vadd.f32 %v12143_v20, %v4593_v36 }
 0x238   : > { %4821 = vmatpush.bf16.msrb.mxu0 %v7661_v4  ;;  %v10762_v4 = vld [vmem:[#allocation5 + $0x37c] sm:$0xf]  ;;  %v8921_v18 = vor.u32 %v11024_v60, %v8920_v59  ;;  %v8265_v59 = vor.u32 %v10852_v49, %v8262_v53  ;;  %v9640_v60 = vld [vmem:[#allocation5 + $0x1110] sm:$0xf]  ;;  %v10687_v36 = vld [vmem:[#allocation5 + $0x124] sm:$0xf] }
 0x239   : > { %4834 = vmatpush.bf16.msrb.mxu1 %v8141_v5  ;;  %v7481_v5 = vor.u32 %v10664_v47, %v7480_v44  ;;  %v11219_v44 = vld [vmem:[#allocation5 + $0x11c0] sm:$0xf0]  ;;  %v10732_v47 = vld [vmem:[#allocation5 + $0x28c] sm:$0xf]  ;;  %v8022_v3 = vld [vmem:[#allocation5 + $0x4a4] sm:$0xf0] }
 0x23a   : > { %4847 = vmatpush.bf16.msrb.mxu2 %v8621_v6  ;;  %v7902_v6 = vld [vmem:[#allocation5 + $0x3b4] sm:$0xf0] }
 0x23b   : > { %4860 = vmatpush.bf16.msrb.mxu3 %v9101_v15  ;;  %v8441_v15 = vor.u32 %v10904_v58, %v8440_v54  ;;  %v7905_v40 = vor.u32 %v10762_v4, %v7902_v6  ;;  %v10972_v54 = vld [vmem:[#allocation5 + $0xa0c] sm:$0xf]  ;;  %v10837_v4 = vld [vmem:[#allocation5 + $0x5d4] sm:$0xf] }
 0x23c   : > { %4822 = vmatpush.bf16.msrb.mxu0 %v7601_v24  ;;  %v9760_v24 = vld [vmem:[#allocation5 + $0x1200] sm:$0xf]  ;;  %v10957_v6 = vld [vmem:[#allocation5 + $0x994] sm:$0xf] }
 0x23d   : > { %4835 = vmatpush.bf16.msrb.mxu1 %v8081_v25  ;;  %v11234_v25 = vld [vmem:[#allocation5 + $0x1238] sm:$0xf0] }
 0x23e   : > { %4848 = vmatpush.bf16.msrb.mxu2 %v8561_v26  ;;  %v10747_v26 = vld [vmem:[#allocation5 + $0x304] sm:$0xf]  ;;  %v9761_v35 = vor.u32 %v11234_v25, %v9760_v24  ;;  %v7662_v24 = vld [vmem:[#allocation5 + $0x1d4] sm:$0xf0]  ;;  %v10822_v25 = vld [vmem:[#allocation5 + $0x55c] sm:$0xf] }
 0x23f   : > { %4861 = vmatpush.bf16.msrb.mxu3 %v9041_v32  ;;  %v10987_v32 = vld [vmem:[#allocation5 + $0xa84] sm:$0xf]  ;;  %v7845_v55 = vor.u32 %v10747_v26, %v7842_v56  ;;  %v8142_v26 = vld [vmem:[#allocation5 + $0x594] sm:$0xf0] }
 0x240   : > { %4823 = vmatpush.bf16.msrb.mxu0 %v7541_v41  ;;  %v9700_v41 = vld [vmem:[#allocation5 + $0x1188] sm:$0xf]  ;;  %v8622_v56 = vld [vmem:[#allocation5 + $0x954] sm:$0xf0] }
 0x241   : > { %4836 = vmatpush.bf16.msrb.mxu1 %v8021_v48  ;;  %v8805_v48 = vor.u32 %v10987_v32, %v8802_v34  ;;  %v9701_v1 = vor.u32 %v11219_v44, %v9700_v41  ;;  %v8145_v32 = vor.u32 %v10822_v25, %v8142_v26  ;;  %v9520_v34 = vld [vmem:[#allocation5 + $0x1020] sm:$0xf]  ;;  %v10807_v41 = vld [vmem:[#allocation5 + $0x4e4] sm:$0xf]  ;;  %v8442_v25 = vld [vmem:[#allocation5 + $0x7ec] sm:$0xf0] }
 0x242   : > { %4849 = vmatpush.bf16.msrb.mxu2 %v8501_v21  ;;  %v7782_v21 = vld [vmem:[#allocation5 + $0x2c4] sm:$0xf0]  ;;  %v8082_v44 = vld [vmem:[#allocation5 + $0x51c] sm:$0xf0] }
 0x243   : > { %4862 = vmatpush.bf16.msrb.mxu3 %v8981_v57  ;;  %v8742_v57 = vld [vmem:[#allocation5 + $0xa44] sm:$0xf0]  ;;  %v7785_v58 = vor.u32 %v10732_v47, %v7782_v21  ;;  %v8562_v21 = vld [vmem:[#allocation5 + $0x8dc] sm:$0xf0] }
 0x244   : > { %4824 = vmatpush.bf16.msrb.mxu0 %v7481_v5  ;;  %v8745_v2 = vor.u32 %v10972_v54, %v8742_v57  ;;  %v8202_v5 = vld [vmem:[#allocation5 + $0x60c] sm:$0xf0]  ;;  %v4618_v13 = vpop.f32.mrf.mxu0 }
 0x245   : > { %4837 = vmatpush.bf16.msrb.mxu1 %v7961_v14  ;;  %v9641_v14 = vor.u32 %v11204_v61, %v9640_v60  ;;  %v12154_v20 = vadd.f32 %v4618_v13, %v4606_v22  ;;  %v8205_v17 = vor.u32 %v10837_v4, %v8202_v5  ;;  %v8085_v22 = vor.u32 %v10807_v41, %v8082_v44  ;;  %v10672_v60 = vld [vmem:[#allocation5 + $0xac] sm:$0xf]  ;;  %v8502_v5 = vld [vmem:[#allocation5 + $0x864] sm:$0xf0]  ;;  %v8388_v41 = vld [vmem:[#allocation5 + $0x740] sm:$0xf] }
 0x246   : > { %4850 = vmatpush.bf16.msrb.mxu2 %v8441_v15  ;;  %v12156_v15 = vpop.f32.mrf.mxu1  ;;  %v10912_v4 = vld [vmem:[#allocation5 + $0x82c] sm:$0xf]  ;;  %v10890_v44 = vld [vmem:[#allocation5 + $0x778] sm:$0xf0] }
 0x247   : > { %4863 = vmatpush.bf16.msrb.mxu3 %v8921_v18  ;;  %4825 = vmatmul.bf16.vlgmr.msrb.gmra.mxu0 %v12016_v8  ;;  %v9580_v18 = vld [vmem:[#allocation5 + $0x1098] sm:$0xf]  ;;  %v11144_v13 = vld [vmem:[#allocation5 + $0xf68] sm:$0xf0] }
 0x248   : > { %4869 = vmatpush.bf16.msra.mxu0 %v9821_v37  ;;  %4838 = vmatmul.bf16.vlgmr.msrb.gmra.mxu1 %v12027_v31  ;;  %v11189_v37 = vld [vmem:[#allocation5 + $0x10d0] sm:$0xf0] }
 0x249   : > { %4882 = vmatpush.bf16.msra.mxu1 %v7905_v40  ;;  %4851 = vmatmul.bf16.vlgmr.msrb.gmra.mxu2 %v12023_v19  ;;  %v10702_v40 = vld [vmem:[#allocation5 + $0x19c] sm:$0xf]  ;;  %v9581_v28 = vor.u32 %v11189_v37, %v9580_v18  ;;  %v7482_v18 = vld [vmem:[#allocation5 + $0x6c] sm:$0xf0]  ;;  %v10777_v37 = vld [vmem:[#allocation5 + $0x3f4] sm:$0xf] }
 0x24a   : > { %4895 = vmatpush.bf16.msra.mxu2 %v8385_v23  ;;  %4864 = vmatmul.bf16.vlgmr.msrb.gmra.mxu3 %v12018_v9  ;;  %v8685_v23 = vor.u32 %v10957_v6, %v8682_v10  ;;  %v7665_v29 = vor.u32 %v10702_v40, %v7662_v24  ;;  %v9400_v10 = vld [vmem:[#allocation5 + $0xf30] sm:$0xf]  ;;  %v8505_v40 = vor.u32 %v10912_v4, %v8502_v5  ;;  %v10897_v24 = vld [vmem:[#allocation5 + $0x7b4] sm:$0xf] }
 0x24b   : > { %4908 = vmatpush.bf16.msra.mxu3 %v8865_v27  ;;  %v10942_v27 = vld [vmem:[#allocation5 + $0x91c] sm:$0xf] }
 0x24c   : > { %4870 = vmatpush.bf16.msra.mxu0 %v9761_v35  ;;  %v11174_v35 = vld [vmem:[#allocation5 + $0x1058] sm:$0xf0]  ;;  %v4620_v49 = vpop.f32.mrf.mxu0  ;;  %v12160_v53 = vpop.f32.mrf.mxu2 }
 0x24d   : > { %4883 = vmatpush.bf16.msra.mxu1 %v7845_v55  ;;  %v8625_v55 = vor.u32 %v10942_v27, %v8622_v56  ;;  %v12158_v47 = vpop.f32.mrf.mxu3  ;;  %v9521_v54 = vor.u32 %v11174_v35, %v9520_v34  ;;  %v11122_v27 = vld [vmem:[#allocation5 + $0xebc] sm:$0xf]  ;;  %v9342_v56 = vld [vmem:[#allocation5 + $0xef4] sm:$0xf0]  ;;  %v7908_v35 = vld [vmem:[#allocation5 + $0x380] sm:$0xf] }
 0x24e   : > { %4896 = vmatpush.bf16.msra.mxu2 %v8325_v39  ;;  %v7602_v39 = vld [vmem:[#allocation5 + $0x15c] sm:$0xf0]  ;;  %v4633_v57 = vpop.f32.mrf.mxu1  ;;  %v9822_v34 = vld [vmem:[#allocation5 + $0x12b4] sm:$0xf0] }
 0x24f   : > { %4909 = vmatpush.bf16.msra.mxu3 %v8805_v48  ;;  %v10927_v48 = vld [vmem:[#allocation5 + $0x8a4] sm:$0xf] }
 0x250   : > { %4871 = vmatpush.bf16.msra.mxu0 %v9701_v1  ;;  %v7605_v1 = vor.u32 %v10687_v36, %v7602_v39  ;;  %v8565_v61 = vor.u32 %v10927_v48, %v8562_v21  ;;  %v10770_v36 = vld [vmem:[#allocation5 + $0x3b8] sm:$0xf0]  ;;  %v8445_v48 = vor.u32 %v10897_v24, %v8442_v25  ;;  %v9345_v21 = vor.u32 %v11122_v27, %v9342_v56  ;;  %v11107_v57 = vld [vmem:[#allocation5 + $0xe44] sm:$0xf]  ;;  %v9162_v27 = vld [vmem:[#allocation5 + $0xd8c] sm:$0xf0] }
 0x251   : > { %4884 = vmatpush.bf16.msra.mxu1 %v7785_v58  ;;  %v9460_v58 = vld [vmem:[#allocation5 + $0xfa8] sm:$0xf]  ;;  %v11197_v56 = vld [vmem:[#allocation5 + $0x1114] sm:$0xf] }
 0x252   : > { %4897 = vmatpush.bf16.msra.mxu2 %v8265_v59  ;;  %v11159_v59 = vld [vmem:[#allocation5 + $0xfe0] sm:$0xf0] }
 0x253   : > { %4910 = vmatpush.bf16.msra.mxu3 %v8745_v2  ;;  %v10792_v2 = vld [vmem:[#allocation5 + $0x46c] sm:$0xf]  ;;  %v9461_v6 = vor.u32 %v11159_v59, %v9460_v58  ;;  %v8389_v58 = vor.u32 %v10890_v44, %v8388_v41  ;;  %v9762_v59 = vld [vmem:[#allocation5 + $0x123c] sm:$0xf0] }
 0x254   : > { %4872 = vmatpush.bf16.msra.mxu0 %v9641_v14  ;;  %v7545_v14 = vor.u32 %v10672_v60, %v7542_v62  ;;  %v7848_v60 = vld [vmem:[#allocation5 + $0x308] sm:$0xf] }
 0x255   : > { %4885 = vmatpush.bf16.msra.mxu1 %v7725_v16  ;;  %v8025_v16 = vor.u32 %v10792_v2, %v8022_v3  ;;  %v4659_v26 = vpop.f32.mrf.mxu3  ;;  %v8328_v62 = vld [vmem:[#allocation5 + $0x6c8] sm:$0xf]  ;;  %v10875_v2 = vld [vmem:[#allocation5 + $0x700] sm:$0xf0] }
 0x256   : > { %4898 = vmatpush.bf16.msra.mxu2 %v8205_v17  ;;  %v10657_v17 = vld [vmem:[#allocation5 + $0x34] sm:$0xf] }
 0x257   : > { %4911 = vmatpush.bf16.msra.mxu3 %v8685_v23  ;;  %v7962_v23 = vld [vmem:[#allocation5 + $0x42c] sm:$0xf0]  ;;  %v11077_v26 = vld [vmem:[#allocation5 + $0xd54] sm:$0xf] }
 0x258   : > { %4873 = vmatpush.bf16.msra.mxu0 %v9581_v28  ;;  %v11242_v28 = vld [vmem:[#allocation5 + $0x127c] sm:$0xf]  ;;  %v7965_v39 = vor.u32 %v10777_v37, %v7962_v23  ;;  %v8268_v37 = vld [vmem:[#allocation5 + $0x650] sm:$0xf] }
 0x259   : > { %4886 = vmatpush.bf16.msra.mxu1 %v7665_v29  ;;  %v4646_v29 = vpop.f32.mrf.mxu2  ;;  %v9825_v49 = vor.u32 %v11242_v28, %v9822_v34  ;;  %v10725_v34 = vld [vmem:[#allocation5 + $0x250] sm:$0xf0] }
 0x25a   : > { %4899 = vmatpush.bf16.msra.mxu2 %v8145_v32  ;;  %v9401_v32 = vor.u32 %v11144_v13, %v9400_v10  ;;  %v9222_v10 = vld [vmem:[#allocation5 + $0xe04] sm:$0xf0]  ;;  %v11212_v13 = vld [vmem:[#allocation5 + $0x118c] sm:$0xf]  ;;  %v9642_v29 = vld [vmem:[#allocation5 + $0x114c] sm:$0xf0] }
 0x25b   : > { %4912 = vmatpush.bf16.msra.mxu3 %v8625_v55  ;;  %v7485_v55 = vor.u32 %v10657_v17, %v7482_v18  ;;  %v7788_v17 = vld [vmem:[#allocation5 + $0x290] sm:$0xf]  ;;  %v10740_v18 = vld [vmem:[#allocation5 + $0x2c8] sm:$0xf0]  ;;  %v9645_v44 = vor.u32 %v11197_v56, %v9642_v29  ;;  %v8982_v56 = vld [vmem:[#allocation5 + $0xc24] sm:$0xf0] }
 0x25c   : > { %4874 = vmatpush.bf16.msra.mxu0 %v9521_v54  ;;  %v7909_v54 = vor.u32 %v10770_v36, %v7908_v35  ;;  %v7789_v25 = vor.u32 %v10740_v18, %v7788_v17  ;;  %v8208_v35 = vld [vmem:[#allocation5 + $0x5d8] sm:$0xf]  ;;  %v10845_v36 = vld [vmem:[#allocation5 + $0x610] sm:$0xf0]  ;;  %v8088_v17 = vld [vmem:[#allocation5 + $0x4e8] sm:$0xf] }
 0x25d   : > { %4887 = vmatpush.bf16.msra.mxu1 %v7605_v1  ;;  %v9282_v1 = vld [vmem:[#allocation5 + $0xe7c] sm:$0xf0]  ;;  %v10815_v18 = vld [vmem:[#allocation5 + $0x520] sm:$0xf0] }
 0x25e   : > { %4900 = vmatpush.bf16.msra.mxu2 %v8085_v22  ;;  %v11227_v22 = vld [vmem:[#allocation5 + $0x1204] sm:$0xf]  ;;  %v9285_v3 = vor.u32 %v11107_v57, %v9282_v1  ;;  %v8209_v57 = vor.u32 %v10845_v36, %v8208_v35  ;;  %v9582_v1 = vld [vmem:[#allocation5 + $0x10d4] sm:$0xf0]  ;;  %v8089_v29 = vor.u32 %v10815_v18, %v8088_v17  ;;  %v10680_v35 = vld [vmem:[#allocation5 + $0xe8] sm:$0xf0] }
 0x25f   : > { %4913 = vmatpush.bf16.msra.mxu3 %v8565_v61  ;;  %v10755_v61 = vld [vmem:[#allocation5 + $0x340] sm:$0xf0]  ;;  %v9765_v4 = vor.u32 %v11227_v22, %v9762_v59  ;;  %v7668_v22 = vld [vmem:[#allocation5 + $0x1a0] sm:$0xf]  ;;  %v8028_v36 = vld [vmem:[#allocation5 + $0x470] sm:$0xf] }
 0x260   : > { %4875 = vmatpush.bf16.msra.mxu0 %v9461_v6  ;;  %v7849_v5 = vor.u32 %v10755_v61, %v7848_v60  ;;  %v11092_v6 = vld [vmem:[#allocation5 + $0xdcc] sm:$0xf]  ;;  %v8148_v59 = vld [vmem:[#allocation5 + $0x560] sm:$0xf]  ;;  %v10830_v60 = vld [vmem:[#allocation5 + $0x598] sm:$0xf0] }
 0x261   : > { %4888 = vmatpush.bf16.msra.mxu1 %v7545_v14  ;;  %v8329_v14 = vor.u32 %v10875_v2, %v8328_v62  ;;  %v9225_v23 = vor.u32 %v11092_v6, %v9222_v10  ;;  %v8149_v6 = vor.u32 %v10830_v60, %v8148_v59  ;;  %v9522_v10 = vld [vmem:[#allocation5 + $0x105c] sm:$0xf0]  ;;  %v10665_v60 = vld [vmem:[#allocation5 + $0x70] sm:$0xf0]  ;;  %v11250_v17 = vld [vmem:[#allocation5 + $0x12b8] sm:$0xf0] }
 0x262   : > { %4901 = vmatpush.bf16.msra.mxu2 %v8025_v16  ;;  %v9702_v16 = vld [vmem:[#allocation5 + $0x11c4] sm:$0xf0] }
 0x263   : > { %4914 = vmatpush.bf16.msra.mxu3 %v8505_v40  ;;  %v10860_v40 = vld [vmem:[#allocation5 + $0x688] sm:$0xf0]  ;;  %v9705_v24 = vor.u32 %v11212_v13, %v9702_v16  ;;  %v7608_v13 = vld [vmem:[#allocation5 + $0x128] sm:$0xf] }
 0x264   : > { %4876 = vmatpush.bf16.msra.mxu0 %v9401_v32  ;;  %v8269_v28 = vor.u32 %v10860_v40, %v8268_v37  ;;  %v7728_v32 = vld [vmem:[#allocation5 + $0x218] sm:$0xf] }
 0x265   : > { %4889 = vmatpush.bf16.msra.mxu1 %v7485_v55  ;;  %v12166_v55 = vpop.f32.mrf.mxu0  ;;  %v12168_v41 = vpop.f32.mrf.mxu1 }
 0x266   : > { %4902 = vmatpush.bf16.msra.mxu2 %v7965_v39  ;;  %v9165_v39 = vor.u32 %v11077_v26, %v9162_v27  ;;  %v11032_v27 = vld [vmem:[#allocation5 + $0xbec] sm:$0xf] }
 0x267   : > { %4915 = vmatpush.bf16.msra.mxu3 %v8445_v48  ;;  %4877 = vmatmul.bf16.vlgmr.msra.gmra.mxu0 %v12031_v30  ;;  %v7729_v48 = vor.u32 %v10725_v34, %v7728_v32  ;;  %v9462_v32 = vld [vmem:[#allocation5 + $0xfe4] sm:$0xf0]  ;;  %v7548_v34 = vld [vmem:[#allocation5 + $0xb0] sm:$0xf] }
 0x268   : > { %4921 = vmatpush.bf16.msrb.mxu0 %v9345_v21  ;;  %4890 = vmatmul.bf16.vlgmr.msra.gmra.mxu1 %v12016_v8  ;;  %v11062_v21 = vld [vmem:[#allocation5 + $0xcdc] sm:$0xf] }
 0x269   : > { %4934 = vmatpush.bf16.msrb.mxu1 %v9825_v49  ;;  %4903 = vmatmul.bf16.vlgmr.msra.gmra.mxu2 %v12027_v31  ;;  %v9102_v49 = vld [vmem:[#allocation5 + $0xd14] sm:$0xf0] }
 0x26a   : > { %4947 = vmatpush.bf16.msrb.mxu2 %v7909_v54  ;;  %4916 = vmatmul.bf16.vlgmr.msra.gmra.mxu3 %v12023_v19  ;;  %v11182_v54 = vld [vmem:[#allocation5 + $0x109c] sm:$0xf]  ;;  %v9105_v61 = vor.u32 %v11062_v21, %v9102_v49  ;;  %v8922_v21 = vld [vmem:[#allocation5 + $0xbac] sm:$0xf0] }
 0x26b   : > { %4960 = vmatpush.bf16.msrb.mxu3 %v8389_v58  ;;  %v10710_v58 = vld [vmem:[#allocation5 + $0x1d8] sm:$0xf0]  ;;  %v9585_v62 = vor.u32 %v11182_v54, %v9582_v1  ;;  %v7549_v54 = vor.u32 %v10680_v35, %v7548_v34  ;;  %v9402_v1 = vld [vmem:[#allocation5 + $0xf6c] sm:$0xf0] }
 0x26c   : > { %4922 = vmatpush.bf16.msrb.mxu0 %v9285_v3  ;;  %v7669_v2 = vor.u32 %v10710_v58, %v7668_v22  ;;  %v11047_v3 = vld [vmem:[#allocation5 + $0xc64] sm:$0xf]  ;;  %v12170_v16 = vpop.f32.mrf.mxu2  ;;  %v7488_v22 = vld [vmem:[#allocation5 + $0x38] sm:$0xf]  ;;  %v4398_v58 = vadd.f32 %v12098_v38, %v12100_v46 }
 0x26d   : > { %4935 = vmatpush.bf16.msrb.mxu1 %v9765_v4  ;;  %v9042_v4 = vld [vmem:[#allocation5 + $0xc9c] sm:$0xf0]  ;;  %v12172_v37 = vpop.f32.mrf.mxu3  ;;  %v4672_v40 = vpop.f32.mrf.mxu0 }
 0x26e   : > { %4948 = vmatpush.bf16.msrb.mxu2 %v7849_v5  ;;  %v11167_v5 = vld [vmem:[#allocation5 + $0x1024] sm:$0xf]  ;;  %v7489_v40 = vor.u32 %v10665_v60, %v7488_v22  ;;  %v4411_v38 = vadd.f32 %v12106_v7, %v4398_v58  ;;  %v10965_v22 = vld [vmem:[#allocation5 + $0x9d0] sm:$0xf0]  ;;  %v9168_v58 = vld [vmem:[#allocation5 + $0xd58] sm:$0xf] }
 0x26f   : > { %4961 = vmatpush.bf16.msrb.mxu3 %v8329_v14  ;;  %v10695_v14 = vld [vmem:[#allocation5 + $0x160] sm:$0xf0]  ;;  %v9648_v60 = vld [vmem:[#allocation5 + $0x1118] sm:$0xf] }
 0x270   : > { %4923 = vmatpush.bf16.msrb.mxu0 %v9225_v23  ;;  %v9045_v23 = vor.u32 %v11047_v3, %v9042_v4  ;;  %v7609_v26 = vor.u32 %v10695_v14, %v7608_v13  ;;  %v8868_v3 = vld [vmem:[#allocation5 + $0xb00] sm:$0xf]  ;;  %v11010_v4 = vld [vmem:[#allocation5 + $0xb38] sm:$0xf0]  ;;  %v4424_v34 = vadd.f32 %v12108_v11, %v4411_v38  ;;  %v9708_v11 = vld [vmem:[#allocation5 + $0x1190] sm:$0xf] }
 0x271   : > { %4936 = vmatpush.bf16.msrb.mxu1 %v9705_v24  ;;  %v4685_v24 = vpop.f32.mrf.mxu1  ;;  %v11130_v13 = vld [vmem:[#allocation5 + $0xef8] sm:$0xf0]  ;;  %v9828_v14 = vld [vmem:[#allocation5 + $0x1280] sm:$0xf] }
 0x272   : > { %4949 = vmatpush.bf16.msrb.mxu2 %v7789_v25  ;;  %v9525_v25 = vor.u32 %v11167_v5, %v9522_v10  ;;  %v9348_v5 = vld [vmem:[#allocation5 + $0xec0] sm:$0xf] }
 0x273   : > { %4962 = vmatpush.bf16.msrb.mxu3 %v8269_v28  ;;  %v11152_v28 = vld [vmem:[#allocation5 + $0xfac] sm:$0xf]  ;;  %v9349_v24 = vor.u32 %v11130_v13, %v9348_v5  ;;  %v10950_v5 = vld [vmem:[#allocation5 + $0x958] sm:$0xf0]  ;;  %v9588_v13 = vld [vmem:[#allocation5 + $0x10a0] sm:$0xf] }
 0x274   : > { %4924 = vmatpush.bf16.msrb.mxu0 %v9165_v39  ;;  %v10800_v39 = vld [vmem:[#allocation5 + $0x4a8] sm:$0xf0]  ;;  %v9465_v49 = vor.u32 %v11152_v28, %v9462_v32  ;;  %v11115_v28 = vld [vmem:[#allocation5 + $0xe80] sm:$0xf0] }
 0x275   : > { %4937 = vmatpush.bf16.msrb.mxu1 %v9645_v44  ;;  %v8985_v44 = vor.u32 %v11032_v27, %v8982_v56  ;;  %v8029_v59 = vor.u32 %v10800_v39, %v8028_v36  ;;  %v10995_v27 = vld [vmem:[#allocation5 + $0xac0] sm:$0xf0]  ;;  %v9288_v56 = vld [vmem:[#allocation5 + $0xe48] sm:$0xf]  ;;  %v8748_v36 = vld [vmem:[#allocation5 + $0xa10] sm:$0xf]  ;;  %v4489_v39 = vadd.f32 %v12122_v43, %v12120_v33 }
 0x276   : > { %4950 = vmatpush.bf16.msrb.mxu2 %v7729_v48  ;;  %v11017_v48 = vld [vmem:[#allocation5 + $0xb74] sm:$0xf]  ;;  %v11235_v32 = vld [vmem:[#allocation5 + $0x1240] sm:$0xf0]  ;;  %v9289_v35 = vor.u32 %v11115_v28, %v9288_v56  ;;  %v8688_v43 = vld [vmem:[#allocation5 + $0x998] sm:$0xf] }
 0x277   : > { %4963 = vmatpush.bf16.msrb.mxu3 %v8209_v57  ;;  %v11137_v57 = vld [vmem:[#allocation5 + $0xf34] sm:$0xf]  ;;  %v8925_v10 = vor.u32 %v11017_v48, %v8922_v21  ;;  %v10980_v48 = vld [vmem:[#allocation5 + $0xa48] sm:$0xf0]  ;;  %v9228_v21 = vld [vmem:[#allocation5 + $0xdd0] sm:$0xf] }
 0x278   : > { %4925 = vmatpush.bf16.msrb.mxu0 %v9105_v61  ;;  %v7968_v61 = vld [vmem:[#allocation5 + $0x3f8] sm:$0xf]  ;;  %v9405_v18 = vor.u32 %v11137_v57, %v9402_v1  ;;  %v8749_v57 = vor.u32 %v10980_v48, %v8748_v36  ;;  %v11175_v56 = vld [vmem:[#allocation5 + $0x1060] sm:$0xf0]  ;;  %v8988_v48 = vld [vmem:[#allocation5 + $0xbf0] sm:$0xf] }
 0x279   : > { %4938 = vmatpush.bf16.msrb.mxu1 %v9585_v62  ;;  %v10785_v62 = vld [vmem:[#allocation5 + $0x430] sm:$0xf0] }
 0x27a   : > { %4951 = vmatpush.bf16.msrb.mxu2 %v7669_v2  ;;  %v4698_v2 = vpop.f32.mrf.mxu2  ;;  %v7969_v46 = vor.u32 %v10785_v62, %v7968_v61  ;;  %v11205_v61 = vld [vmem:[#allocation5 + $0x1150] sm:$0xf0] }
 0x27b   : > { %4964 = vmatpush.bf16.msrb.mxu3 %v8149_v6  ;;  %v4711_v6 = vpop.f32.mrf.mxu3 }
 0x27c   : > { %4926 = vmatpush.bf16.msrb.mxu0 %v9045_v23  ;;  %v8869_v23 = vor.u32 %v11010_v4, %v8868_v3  ;;  %v8628_v3 = vld [vmem:[#allocation5 + $0x920] sm:$0xf]  ;;  %v9649_v4 = vor.u32 %v11205_v61, %v9648_v60 }
 0x27d   : > { %4939 = vmatpush.bf16.msrb.mxu1 %v9525_v25  ;;  %v9829_v25 = vor.u32 %v11250_v17, %v9828_v14  ;;  %v9108_v6 = vld [vmem:[#allocation5 + $0xce0] sm:$0xf]  ;;  %v11190_v14 = vld [vmem:[#allocation5 + $0x10d8] sm:$0xf0]  ;;  %v8629_v17 = vor.u32 %v10950_v5, %v8628_v3 }
 0x27e   : > { %4952 = vmatpush.bf16.msrb.mxu2 %v7609_v26  ;;  %v8808_v26 = vld [vmem:[#allocation5 + $0xa88] sm:$0xf] }
 0x27f   : > { %4965 = vmatpush.bf16.msrb.mxu3 %v8089_v29  ;;  %v9768_v29 = vld [vmem:[#allocation5 + $0x1208] sm:$0xf]  ;;  %v8809_v7 = vor.u32 %v10995_v27, %v8808_v26  ;;  %v11055_v26 = vld [vmem:[#allocation5 + $0xca0] sm:$0xf0] }
 0x280   : > { %4927 = vmatpush.bf16.msrb.mxu0 %v8985_v44  ;;  %v9769_v44 = vor.u32 %v11235_v32, %v9768_v29  ;;  %v9528_v27 = vld [vmem:[#allocation5 + $0x1028] sm:$0xf]  ;;  %v4645_v29 = vadd.f32 %v12160_v53, %v12156_v15  ;;  %v9468_v15 = vld [vmem:[#allocation5 + $0xfb0] sm:$0xf]  ;;  %v11160_v53 = vld [vmem:[#allocation5 + $0xfe8] sm:$0xf0] }
 0x281   : > { %4940 = vmatpush.bf16.msrb.mxu1 %v9465_v49  ;;  %v11100_v49 = vld [vmem:[#allocation5 + $0xe08] sm:$0xf0] }
 0x282   : > { %4953 = vmatpush.bf16.msrb.mxu2 %v7549_v54  ;;  %v11220_v54 = vld [vmem:[#allocation5 + $0x11c8] sm:$0xf0]  ;;  %v9229_v33 = vor.u32 %v11100_v49, %v9228_v21  ;;  %v4658_v49 = vadd.f32 %v12158_v47, %v4645_v29 }
 0x283   : > { %4966 = vmatpush.bf16.msrb.mxu3 %v8029_v59  ;;  %v9709_v1 = vor.u32 %v11220_v54, %v9708_v11  ;;  %v11085_v59 = vld [vmem:[#allocation5 + $0xd90] sm:$0xf0]  ;;  %v11040_v21 = vld [vmem:[#allocation5 + $0xc28] sm:$0xf0]  ;;  %v8448_v54 = vld [vmem:[#allocation5 + $0x7b8] sm:$0xf] }
 0x284   : > { %4928 = vmatpush.bf16.msrb.mxu0 %v8925_v10  ;;  %v9169_v2 = vor.u32 %v11085_v59, %v9168_v58  ;;  %v11070_v10 = vld [vmem:[#allocation5 + $0xd18] sm:$0xf0]  ;;  %v8989_v11 = vor.u32 %v11040_v21, %v8988_v48  ;;  %v11145_v58 = vld [vmem:[#allocation5 + $0xf70] sm:$0xf0]  ;;  %v4671_v59 = vadd.f32 %v12166_v55, %v4658_v49 }
 0x285   : > { %4941 = vmatpush.bf16.msrb.mxu1 %v9405_v18  ;;  %v12184_v62 = vpop.f32.mrf.mxu1  ;;  %v9109_v18 = vor.u32 %v11070_v10, %v9108_v6 }
 0x286   : > { %4954 = vmatpush.bf16.msrb.mxu2 %v7489_v40  ;;  %v8568_v40 = vld [vmem:[#allocation5 + $0x8a8] sm:$0xf] }
 0x287   : > { %4967 = vmatpush.bf16.msrb.mxu3 %v7969_v46  ;;  %4929 = vmatmul.bf16.vlgmr.msrb.gmra.mxu0 %v12018_v9  ;;  %v4541_v46 = vadd.f32 %v12133_v52, %v12131_v63  ;;  %v8508_v52 = vld [vmem:[#allocation5 + $0x830] sm:$0xf] }
 0x288   : > { %4973 = vmatpush.bf16.msra.mxu0 %v8869_v23  ;;  %4942 = vmatmul.bf16.vlgmr.msrb.gmra.mxu1 %v12031_v30  ;;  %v9589_v23 = vor.u32 %v11190_v14, %v9588_v13 }
 0x289   : > { %4986 = vmatpush.bf16.msra.mxu1 %v9349_v24  ;;  %4955 = vmatmul.bf16.vlgmr.msrb.gmra.mxu2 %v12016_v8  ;;  %v4722_v8 = vpop.f32.mrf.mxu0  ;;  %v10935_v24 = vld [vmem:[#allocation5 + $0x8e0] sm:$0xf0]  ;;  %v4554_v36 = vadd.f32 %v12135_v0, %v4541_v46  ;;  %v9469_v0 = vor.u32 %v11160_v53, %v9468_v15 }
 0x28a   : > { %4999 = vmatpush.bf16.msra.mxu2 %v9829_v25  ;;  %4968 = vmatmul.bf16.vlgmr.msrb.gmra.mxu3 %v12027_v31  ;;  %v8689_v31 = vor.u32 %v10965_v22, %v8688_v43  ;;  %v9048_v25 = vld [vmem:[#allocation5 + $0xc68] sm:$0xf]  ;;  %v8928_v43 = vld [vmem:[#allocation5 + $0xb78] sm:$0xf] }
 0x28b   : > { %5027 = vmatpush.xpose.msra.mxu3 %v4424_v34  ;;  %v9049_v63 = vor.u32 %v11055_v26, %v9048_v25  ;;  %v9408_v22 = vld [vmem:[#allocation5 + $0xf38] sm:$0xf] }
 0x28c   : > { %4974 = vmatpush.bf16.msra.mxu0 %v8809_v7  ;;  %v4748_v38 = vpop.f32.mrf.mxu2  ;;  %v4710_v7 = vadd.f32 %v12172_v37, %v12170_v16 }
 0x28d   : > { %4987 = vmatpush.bf16.msra.mxu1 %v9289_v35  ;;  %v4761_v28 = vpop.f32.mrf.mxu3  ;;  %v4737_v34 = vpop.f32.mrf.mxu1  ;;  %v8569_v35 = vor.u32 %v10935_v24, %v8568_v40 }
 0x28e   : > { %5000 = vmatpush.bf16.msra.mxu2 %v9769_v44  ;;  %v10920_v44 = vld [vmem:[#allocation5 + $0x868] sm:$0xf0]  ;;  %v4723_v16 = vadd.f32 %v4722_v8, %v4710_v7  ;;  %v9409_v8 = vor.u32 %v11145_v58, %v9408_v22  ;;  %v5112_v22 = vlaneseq }
 0x28f   : > { %5047 = vmatpush.xpose.msrb.mxu3 %v4489_v39  ;;  %v9529_v39 = vor.u32 %v11175_v56, %v9528_v27  ;;  %v8509_v37 = vor.u32 %v10920_v44, %v8508_v52 }
 0x290   : > { %4975 = vmatpush.bf16.msra.mxu0 %v8749_v57  ;;  %v4736_v47 = vadd.f32 %v12184_v62, %v4723_v16 }
 0x291   : > { %4988 = vmatpush.bf16.msra.mxu1 %v9229_v33  ;;  %v4724_v32 = vpop.f32.mrf.mxu0  ;;  %v10905_v33 = vld [vmem:[#allocation5 + $0x7f0] sm:$0xf0] }
 0x292   : > { %5001 = vmatpush.bf16.msra.mxu2 %v9709_v1  ;;  %v11025_v1 = vld [vmem:[#allocation5 + $0xbb0] sm:$0xf0]  ;;  %v8449_v60 = vor.u32 %v10905_v33, %v8448_v54 }
 0x293   : > { %v8929_v61 = vor.u32 %v11025_v1, %v8928_v43 }
 0x294   : > { %4976 = vmatpush.bf16.msra.mxu0 %v8689_v31  ;;  %v4750_v57 = vpop.f32.mrf.mxu2  ;;  %v4684_v31 = vadd.f32 %v12168_v41, %v4671_v59  ;;  %v12206_v59 = vshrl.u32 %v5112_v22, 7 }
 0x295   : > { %4989 = vmatpush.bf16.msra.mxu1 %v9169_v2  ;;  %v4749_v2 = vadd.f32 %v4748_v38, %v4736_v47  ;;  %v12208_v47 = vand.u32 127, %v5112_v22  ;;  %v11263_v22 = vld [vmem:[#allocation7 + $0x60] sm:$0xf0] }
 0x296   : > { %5002 = vmatpush.bf16.msra.mxu2 %v9649_v4  ;;  %vm5116_vm0 = vcmp.lt.s32.totalorder %v12206_v59, 4 }
 0x297   : > { %vm5117_vm1 = vcmp.lt.s32.totalorder %v12208_v47, 4  ;;  %vm7246_vm14 = vcmp.eq.s32.totalorder %v12206_v59, %v12208_v47 }
 0x298   : > { %4977 = vmatpush.bf16.msra.mxu0 %v8629_v17  ;;  %vm5118_vm2 = vmxor %vm5116_vm0, %vm5117_vm1 }
 0x299   : > { %4990 = vmatpush.bf16.msra.mxu1 %v9109_v18 }
 0x29a   : > { %5003 = vmatpush.bf16.msra.mxu2 %v9589_v23  ;;  %5028 = vmatmul.f32.vlgmr.msra.gmra.mxu3 %v12056_v42  ;;  %v4763_v42 = vpop.f32.mrf.mxu3 }
 0x29b   : > { %5067 = vmatpush.xpose.msra.mxu3 %v4554_v36 }
 0x29c   : > { %4978 = vmatpush.bf16.msra.mxu0 %v8569_v35 }
 0x29d   : > { %4991 = vmatpush.bf16.msra.mxu1 %v9049_v63 }
 0x29e   : > { %5004 = vmatpush.bf16.msra.mxu2 %v9529_v39 }
 0x2a0   : > { %4979 = vmatpush.bf16.msra.mxu0 %v8509_v37 }
 0x2a1   : > { %4992 = vmatpush.bf16.msra.mxu1 %v8989_v11 }
 0x2a2   : > { %5005 = vmatpush.bf16.msra.mxu2 %v9469_v0  ;;  %5048 = vmatmul.f32.vlgmr.msrb.gmra.mxu3 %v12065_v45 }
 0x2a3   : > { %5087 = vmatpush.xpose.msrb.mxu3 %v12154_v20 }
 0x2a4   : > { %4980 = vmatpush.bf16.msra.mxu0 %v8449_v60  ;;  %v4774_v55 = vpop.f32.mrf.mxu0 }
 0x2a5   : > { %4993 = vmatpush.bf16.msra.mxu1 %v8929_v61  ;;  %v4775_v45 = vadd.f32 %v4774_v55, %v4761_v28  ;;  %v4787_v62 = vpop.f32.mrf.mxu1 }
 0x2a6   : > { %5006 = vmatpush.bf16.msra.mxu2 %v9409_v8 }
 0x2a7   : > { %4981 = vmatmul.bf16.vlgmr.msra.gmra.mxu0 %v12023_v19  ;;  %v4788_v41 = vadd.f32 %v4787_v62, %v4775_v45 }
 0x2a8   : > { %5107 = vmatpush.xpose.msrb.mxu0 %v4684_v31  ;;  %4994 = vmatmul.bf16.vlgmr.msra.gmra.mxu1 %v12018_v9 }
 0x2a9   : > { %5150 = vmatpush.msrb.mxu1 %v4749_v2  ;;  %5007 = vmatmul.bf16.vlgmr.msra.gmra.mxu2 %v12031_v30 }
 0x2aa   : > { %5068 = vmatmul.f32.vlgmr.msra.gmra.mxu3 %v12074_v51 }
 0x2ac   : > { %v4800_v20 = vpop.f32.mrf.mxu2  ;;  %v4776_v6 = vpop.f32.mrf.mxu0 }
 0x2ad   : > { %v4801_v3 = vadd.f32 %v4800_v20, %v4788_v41  ;;  %v4813_v4 = vpop.f32.mrf.mxu3  ;;  %v4789_v10 = vpop.f32.mrf.mxu1 }
 0x2ae   : > { %v9977_v10 = vld [vmem:[#allocation7 + $0x118] sm:$0xf] }
 0x2af   : > { %v4814_v5 = vadd.f32 %v4813_v4, %v4801_v3 }
 0x2b1   : > { %5170 = vmatpush.msrb.mxu2 %v4814_v5 }
 0x2b2   : > { %5088 = vmatmul.f32.vlgmr.msrb.gmra.mxu3 %v12083_v50 }
 0x2b4   : > { %v4802_v9 = vpop.f32.mrf.mxu2 }
 0x2b5   : > { %v4815_v19 = vpop.f32.mrf.mxu3  ;;  %v11288_v9 = vld [vmem:[#allocation7 + $0x128] sm:$0xf0] }
 0x2b6   : > { %v9978_v19 = vor.u32 %v11288_v9, %v9977_v10  ;;  %v11403_v10 = vld [vmem:[#allocation7 + $0x4c0] sm:$0xf0] }
 0x2b7   : > { %5108 = vmatmul.f32.vlgmr.msrb.gmra.mxu0 %v12096_v12 }
 0x2b8   : > { %6532 = vmatpush.bf16.msra.mxu2 %v9978_v19 }
 0x2c4   : > { %v4826_v30 = vpop.f32.mrf.mxu0 }
 0x2c5   : > { %v4839_v13 = vpop.f32.mrf.mxu1 }
 0x2c6   : > { %v4840_v50 = vadd.f32 %v4839_v13, %v4826_v30  ;;  %v9957_v30 = vld [vmem:[#allocation7 + $0xf0] sm:$0xf]  ;;  %v11283_v13 = vld [vmem:[#allocation7 + $0x100] sm:$0xf0] }
 0x2cc   : > { %v4852_v14 = vpop.f32.mrf.mxu2  ;;  %v4828_v17 = vpop.f32.mrf.mxu0 }
 0x2cd   : > { %v4865_v51 = vpop.f32.mrf.mxu3  ;;  %v4841_v18 = vpop.f32.mrf.mxu1  ;;  %v4853_v46 = vadd.f32 %v4852_v14, %v4840_v50  ;;  %v9958_v14 = vor.u32 %v11283_v13, %v9957_v30  ;;  %v11328_v17 = vld [vmem:[#allocation7 + $0x268] sm:$0xf0]  ;;  %v9837_v13 = vld [vmem:[#allocation7] sm:$0xf] }
 0x2ce   : > { %v10297_v18 = vld [vmem:[#allocation7 + $0x398] sm:$0xf] }
 0x2cf   : > { %v4866_v23 = vadd.f32 %v4865_v51, %v4853_v46  ;;  %v10137_v51 = vld [vmem:[#allocation7 + $0x258] sm:$0xf]  ;;  %v9937_v46 = vld [vmem:[#allocation7 + $0xc8] sm:$0xf]  ;;  %6533 = vmatpush.bf16.msra.mxu2 %v9958_v14  ;;  %v11298_v14 = vld [vmem:[#allocation7 + $0x178] sm:$0xf0] }
 0x2d4   : > { %v4854_v38 = vpop.f32.mrf.mxu2 }
 0x2d5   : > { %v4867_v40 = vpop.f32.mrf.mxu3  ;;  %v10138_v38 = vor.u32 %v11328_v17, %v10137_v51  ;;  %v10017_v51 = vld [vmem:[#allocation7 + $0x168] sm:$0xf]  ;;  %v11253_v17 = vld [vmem:[#allocation7 + $0x10] sm:$0xf0] }
 0x2d6   : > { %v11368_v40 = vld [vmem:[#allocation7 + $0x3a8] sm:$0xf0] }
 0x2d7   : > { %v10298_v50 = vor.u32 %v11368_v40, %v10297_v18  ;;  %v10177_v18 = vld [vmem:[#allocation7 + $0x2a8] sm:$0xf]  ;;  %v11338_v40 = vld [vmem:[#allocation7 + $0x2b8] sm:$0xf0] }
 0x2e4   : > { %v4878_v24 = vpop.f32.mrf.mxu0 }
 0x2e5   : > { %v4879_v25 = vadd.f32 %v4878_v24, %v4866_v23  ;;  %v4891_v26 = vpop.f32.mrf.mxu1  ;;  %v11278_v23 = vld [vmem:[#allocation7 + $0xd8] sm:$0xf0]  ;;  %v10117_v24 = vld [vmem:[#allocation7 + $0x230] sm:$0xf] }
 0x2e7   : > { %5190 = vmatpush.msra.mxu3 %v4879_v25  ;;  %v11323_v25 = vld [vmem:[#allocation7 + $0x240] sm:$0xf0] }
 0x2e9   : > { %6545 = vmatpush.bf16.msrb.mxu3 %v10138_v38  ;;  %v11448_v38 = vld [vmem:[#allocation7 + $0x628] sm:$0xf0] }
 0x2ec   : > { %v4904_v12 = vpop.f32.mrf.mxu2  ;;  %v4880_v56 = vpop.f32.mrf.mxu0 }
 0x2ed   : > { %v4917_v27 = vpop.f32.mrf.mxu3  ;;  %v4893_v28 = vpop.f32.mrf.mxu1  ;;  %v4905_v34 = vadd.f32 %v4904_v12, %v4891_v26  ;;  %v10118_v26 = vor.u32 %v11323_v25, %v10117_v24  ;;  %v11363_v12 = vld [vmem:[#allocation7 + $0x380] sm:$0xf0]  ;;  %v9938_v56 = vor.u32 %v11278_v23, %v9937_v46  ;;  %v10417_v46 = vld [vmem:[#allocation7 + $0x488] sm:$0xf]  ;;  %v11398_v23 = vld [vmem:[#allocation7 + $0x498] sm:$0xf0]  ;;  %v10018_v24 = vor.u32 %v11298_v14, %v10017_v51 }
 0x2ee   : > { %v9838_v25 = vor.u32 %v11253_v17, %v9837_v13  ;;  %v10079_v13 = vld [vmem:[#allocation7 + $0x1f4] sm:$0xf0]  ;;  %v10337_v14 = vld [vmem:[#allocation7 + $0x3e8] sm:$0xf]  ;;  %v11378_v17 = vld [vmem:[#allocation7 + $0x3f8] sm:$0xf0] }
 0x2ef   : > { %v4918_v7 = vadd.f32 %v4917_v27, %v4905_v34  ;;  %v10277_v27 = vld [vmem:[#allocation7 + $0x370] sm:$0xf]  ;;  %v10097_v34 = vld [vmem:[#allocation7 + $0x208] sm:$0xf]  ;;  %6546 = vmatpush.bf16.msrb.mxu3 %v10118_v26  ;;  %6534 = vmatpush.bf16.msra.mxu2 %v9938_v56  ;;  %v10178_v26 = vor.u32 %v11338_v40, %v10177_v18  ;;  %v11293_v56 = vld [vmem:[#allocation7 + $0x150] sm:$0xf0] }
 0x2f0   : > { %v10278_v28 = vor.u32 %v11363_v12, %v10277_v27  ;;  %v10597_v27 = vld [vmem:[#allocation7 + $0x5f0] sm:$0xf]  ;;  %v9997_v12 = vld [vmem:[#allocation7 + $0x140] sm:$0xf] }
 0x2f4   : > { %v4906_v32 = vpop.f32.mrf.mxu2 }
 0x2f5   : > { %v4919_v29 = vpop.f32.mrf.mxu3  ;;  %v11273_v32 = vld [vmem:[#allocation7 + $0xb0] sm:$0xf0] }
 0x2f6   : > { %v9917_v29 = vld [vmem:[#allocation7 + $0xa0] sm:$0xf] }
 0x304   : > { %v4930_v35 = vpop.f32.mrf.mxu0 }
 0x305   : > { %v4931_v63 = vadd.f32 %v4930_v35, %v4918_v7  ;;  %v4943_v52 = vpop.f32.mrf.mxu1  ;;  %v11318_v7 = vld [vmem:[#allocation7 + $0x218] sm:$0xf0]  ;;  %v10257_v35 = vld [vmem:[#allocation7 + $0x348] sm:$0xf] }
 0x307   : > { %v4944_v36 = vadd.f32 %v4943_v52, %v4931_v63  ;;  %v11358_v63 = vld [vmem:[#allocation7 + $0x358] sm:$0xf0]  ;;  %v10098_v52 = vor.u32 %v11318_v7, %v10097_v34  ;;  %v9979_v7 = vld [vmem:[#allocation7 + $0x12c] sm:$0xf0] }
 0x308   : > { %v11286_v34 = vld [vmem:[#allocation7 + $0x11c] sm:$0xf] }
 0x309   : > { %5210 = vmatpush.msra.mxu0 %v4944_v36  ;;  %v10258_v36 = vor.u32 %v11358_v63, %v10257_v35  ;;  %6547 = vmatpush.bf16.msrb.mxu3 %v10098_v52  ;;  %v11443_v35 = vld [vmem:[#allocation7 + $0x600] sm:$0xf0]  ;;  %v11326_v63 = vld [vmem:[#allocation7 + $0x25c] sm:$0xf]  ;;  %v10139_v52 = vld [vmem:[#allocation7 + $0x26c] sm:$0xf0] }
 0x30b   : > { %6558 = vmatpush.bf16.msrb.mxu0 %v10298_v50 }
 0x30c   : > { %v4956_v39 = vpop.f32.mrf.mxu2  ;;  %v4932_v48 = vpop.f32.mrf.mxu0 }
 0x30d   : > { %v4969_v44 = vpop.f32.mrf.mxu3  ;;  %v4945_v21 = vpop.f32.mrf.mxu1  ;;  %v11313_v48 = vld [vmem:[#allocation7 + $0x1f0] sm:$0xf0] }
 0x30e   : > { %v4970_v16 = vadd.f32 %v4969_v44, %v4956_v39  ;;  %v10077_v39 = vld [vmem:[#allocation7 + $0x1e0] sm:$0xf]  ;;  %v9918_v44 = vor.u32 %v11273_v32, %v9917_v29  ;;  %v11333_v32 = vld [vmem:[#allocation7 + $0x290] sm:$0xf0] }
 0x30f   : > { %6559 = vmatpush.bf16.msrb.mxu0 %v10278_v28  ;;  %v10237_v21 = vld [vmem:[#allocation7 + $0x320] sm:$0xf] }
 0x310   : > { %6535 = vmatpush.bf16.msra.mxu2 %v9918_v44  ;;  %v10157_v28 = vld [vmem:[#allocation7 + $0x280] sm:$0xf] }
 0x311   : > { %v10397_v44 = vld [vmem:[#allocation7 + $0x460] sm:$0xf] }
 0x313   : > { %6560 = vmatpush.bf16.msrb.mxu0 %v10258_v36  ;;  %v10418_v36 = vor.u32 %v11398_v23, %v10417_v46  ;;  %v9899_v46 = vld [vmem:[#allocation7 + $0x8c] sm:$0xf0]  ;;  %v11423_v23 = vld [vmem:[#allocation7 + $0x560] sm:$0xf0] }
 0x314   : > { %v4958_v53 = vpop.f32.mrf.mxu2 }
 0x315   : > { %v4971_v15 = vpop.f32.mrf.mxu3  ;;  %v9897_v53 = vld [vmem:[#allocation7 + $0x78] sm:$0xf] }
 0x316   : > { %v11353_v15 = vld [vmem:[#allocation7 + $0x330] sm:$0xf0] }
 0x31d   : > { %v5029_v49 = vpop.f32.mrf.mxu3 }
 0x324   : > { %v4982_v37 = vpop.f32.mrf.mxu0 }
 0x325   : > { %v4995_v11 = vpop.f32.mrf.mxu1  ;;  %v5049_v54 = vpop.f32.mrf.mxu3  ;;  %v4983_v57 = vadd.f32 %v4982_v37, %v4970_v16  ;;  %v10078_v37 = vor.u32 %v11313_v48, %v10077_v39  ;;  %v9998_v39 = vor.u32 %v11293_v56, %v9997_v12  ;;  %v11393_v48 = vld [vmem:[#allocation7 + $0x470] sm:$0xf0] }
 0x326   : > { %v5050_v60 = vadd.f32 %v5049_v54, %v5029_v49  ;;  %v11268_v49 = vld [vmem:[#allocation7 + $0x88] sm:$0xf0]  ;;  %v10057_v54 = vld [vmem:[#allocation7 + $0x1b8] sm:$0xf]  ;;  %v11373_v12 = vld [vmem:[#allocation7 + $0x3d0] sm:$0xf0] }
 0x327   : > { %v4996_v0 = vadd.f32 %v4995_v11, %v4983_v57  ;;  %v10238_v11 = vor.u32 %v11353_v15, %v10237_v21  ;;  %v9898_v57 = vor.u32 %v11268_v49, %v9897_v53  ;;  %6548 = vmatpush.bf16.msrb.mxu3 %v10078_v37  ;;  %v10158_v21 = vor.u32 %v11333_v32, %v10157_v28  ;;  %v11281_v37 = vld [vmem:[#allocation7 + $0xf4] sm:$0xf]  ;;  %v11366_v28 = vld [vmem:[#allocation7 + $0x39c] sm:$0xf] }
 0x328   : > { %v9982_v15 = vor.u32 %v11286_v34, %v9979_v7  ;;  %v10598_v53 = vor.u32 %v11443_v35, %v10597_v27  ;;  %v10142_v49 = vor.u32 %v11326_v63, %v10139_v52  ;;  %v10317_v27 = vld [vmem:[#allocation7 + $0x3c0] sm:$0xf]  ;;  %v10497_v7 = vld [vmem:[#allocation7 + $0x528] sm:$0xf]  ;;  %v11418_v35 = vld [vmem:[#allocation7 + $0x538] sm:$0xf0] }
 0x329   : > { %6561 = vmatpush.bf16.msrb.mxu0 %v10238_v11  ;;  %6536 = vmatpush.bf16.msra.mxu2 %v9898_v57  ;;  %v9959_v11 = vld [vmem:[#allocation7 + $0x104] sm:$0xf0]  ;;  %v11321_v57 = vld [vmem:[#allocation7 + $0x234] sm:$0xf]  ;;  %v10318_v63 = vor.u32 %v11373_v12, %v10317_v27 }
 0x32a   : > { %v11401_v12 = vld [vmem:[#allocation7 + $0x4b4] sm:$0xf] }
 0x32c   : > { %v5008_v33 = vpop.f32.mrf.mxu2  ;;  %v4984_v1 = vpop.f32.mrf.mxu0 }
 0x32d   : > { %v5009_v43 = vadd.f32 %v5008_v33, %v4996_v0  ;;  %v4997_v58 = vpop.f32.mrf.mxu1  ;;  %v5069_v42 = vpop.f32.mrf.mxu3  ;;  %v11308_v0 = vld [vmem:[#allocation7 + $0x1c8] sm:$0xf0]  ;;  %v10217_v33 = vld [vmem:[#allocation7 + $0x2f8] sm:$0xf]  ;;  %v9877_v1 = vld [vmem:[#allocation7 + $0x50] sm:$0xf] }
 0x32e   : > { %v5070_v8 = vadd.f32 %v5069_v42, %v5050_v60  ;;  %v10457_v58 = vld [vmem:[#allocation7 + $0x4d8] sm:$0xf]  ;;  %v11408_v42 = vld [vmem:[#allocation7 + $0x4e8] sm:$0xf0]  ;;  %v10058_v60 = vor.u32 %v11308_v0, %v10057_v54  ;;  %v11438_v54 = vld [vmem:[#allocation7 + $0x5d8] sm:$0xf0] }
 0x32f   : > { %5230 = vmatpush.msra.mxu1 %v5009_v43  ;;  %v11348_v43 = vld [vmem:[#allocation7 + $0x308] sm:$0xf0]  ;;  %v10119_v0 = vld [vmem:[#allocation7 + $0x244] sm:$0xf0] }
 0x330   : > { %6549 = vmatpush.bf16.msrb.mxu3 %v10058_v60  ;;  %v10557_v60 = vld [vmem:[#allocation7 + $0x5a0] sm:$0xf] }
 0x334   : > { %v5010_v61 = vpop.f32.mrf.mxu2  ;;  %v5109_v55 = vpop.f32.mrf.mxu0 }
 0x335   : > { %v5089_v31 = vpop.f32.mrf.mxu3  ;;  %v10218_v61 = vor.u32 %v11348_v43, %v10217_v33  ;;  %v10398_v33 = vor.u32 %v11393_v48, %v10397_v44  ;;  %v10377_v43 = vld [vmem:[#allocation7 + $0x438] sm:$0xf]  ;;  %v10498_v44 = vor.u32 %v11418_v35, %v10497_v7  ;;  %v10619_v7 = vld [vmem:[#allocation7 + $0x62c] sm:$0xf0] }
 0x336   : > { %v5090_v2 = vadd.f32 %v5089_v31, %v5070_v8  ;;  %v9878_v8 = vor.u32 %v11263_v22, %v9877_v1  ;;  %v9857_v31 = vld [vmem:[#allocation7 + $0x28] sm:$0xf]  ;;  %v11388_v1 = vld [vmem:[#allocation7 + $0x448] sm:$0xf0]  ;;  %v9962_v22 = vor.u32 %v11281_v37, %v9959_v11  ;;  %v11346_v11 = vld [vmem:[#allocation7 + $0x2fc] sm:$0xf] }
 0x337   : > { %6562 = vmatpush.bf16.msrb.mxu0 %v10218_v61  ;;  %v11276_v61 = vld [vmem:[#allocation7 + $0xcc] sm:$0xf] }
 0x338   : > { %v5110_v45 = vadd.f32 %v5109_v55, %v5090_v2  ;;  %v10037_v2 = vld [vmem:[#allocation7 + $0x190] sm:$0xf]  ;;  %v11303_v55 = vld [vmem:[#allocation7 + $0x1a0] sm:$0xf0]  ;;  %6537 = vmatpush.bf16.msra.mxu2 %v9878_v8  ;;  %v9939_v8 = vld [vmem:[#allocation7 + $0xdc] sm:$0xf0] }
 0x339   : > { %v10038_v9 = vor.u32 %v11303_v55, %v10037_v2  ;;  %v11316_v2 = vld [vmem:[#allocation7 + $0x20c] sm:$0xf]  ;;  %v10099_v55 = vld [vmem:[#allocation7 + $0x21c] sm:$0xf0] }
 0x33a   : > { %v5119_v62 = vsel %vm5118_vm2, %v5110_v45, -1e+30  ;;  %v11258_v45 = vld [vmem:[#allocation7 + $0x38] sm:$0xf0] }
 0x33b   : > { %v5121_v41 = vsel %vm5120_vm3, %v5119_v62, -inf  ;;  %v9858_v19 = vor.u32 %v11258_v45, %v9857_v31  ;;  %6550 = vmatpush.bf16.msrb.mxu3 %v10038_v9  ;;  %v11433_v31 = vld [vmem:[#allocation7 + $0x5b0] sm:$0xf0]  ;;  %v10378_v45 = vor.u32 %v11388_v1, %v10377_v43  ;;  %v9919_v9 = vld [vmem:[#allocation7 + $0xb4] sm:$0xf0] }
 0x33c   : > { %5122 = vmax.xlane.f32.xlu0 %v5121_v41  ;;  %v11343_v41 = vld [vmem:[#allocation7 + $0x2e0] sm:$0xf0]  ;;  %v11336_v1 = vld [vmem:[#allocation7 + $0x2ac] sm:$0xf] }
 0x33d   : > { %6538 = vmatpush.bf16.msra.mxu2 %v9858_v19  ;;  %v11428_v19 = vld [vmem:[#allocation7 + $0x588] sm:$0xf0] }
 0x33f   : > { %6551 = vmatpush.bf16.msrb.mxu3 %v10018_v24  ;;  %v11306_v24 = vld [vmem:[#allocation7 + $0x1bc] sm:$0xf] }
 0x341   : > { %6539 = vmatpush.bf16.msra.mxu2 %v9838_v25  ;;  %v10059_v25 = vld [vmem:[#allocation7 + $0x1cc] sm:$0xf0] }
 0x342   : > { %v10062_v34 = vor.u32 %v11306_v24, %v10059_v25 }
 0x343   : > { %6552 = vmatpush.bf16.msrb.mxu3 %v9998_v39  ;;  %v10279_v39 = vld [vmem:[#allocation7 + $0x384] sm:$0xf0] }
 0x3af   : > { %v5123_v20 = vpop.xlane.xlu0 %5122 }
 0x3b0   : > { %v5124_v3 = vsub.f32 %v5119_v62, %v5123_v20  ;;  %v10197_v62 = vld [vmem:[#allocation7 + $0x2d0] sm:$0xf] }
 0x3b1   : > { %v10198_v30 = vor.u32 %v11343_v41, %v10197_v62  ;;  %v10357_v62 = vld [vmem:[#allocation7 + $0x410] sm:$0xf]  ;;  %v11383_v41 = vld [vmem:[#allocation7 + $0x420] sm:$0xf0] }
 0x3b2   : > { %v5125_v4 = vmul.f32 1.442695, %v5124_v3  ;;  %v10358_v51 = vor.u32 %v11383_v41, %v10357_v62  ;;  %v11331_v62 = vld [vmem:[#allocation7 + $0x284] sm:$0xf] }
 0x3b3   : > { %6563 = vmatpush.bf16.msrb.mxu0 %v10198_v30  ;;  %v11311_v30 = vld [vmem:[#allocation7 + $0x1e4] sm:$0xf] }
 0x3b4   : > { %11557 = vpow2.f32 %v5125_v4  ;;  %v10458_v4 = vor.u32 %v11408_v42, %v10457_v58  ;;  %v10122_v42 = vor.u32 %v11321_v57, %v10119_v0  ;;  %v11341_v0 = vld [vmem:[#allocation7 + $0x2d4] sm:$0xf] }
 0x3b7   : > { %6564 = vmatpush.bf16.msrb.mxu0 %v10178_v26  ;;  %v10338_v26 = vor.u32 %v11378_v17, %v10337_v14  ;;  %v11291_v17 = vld [vmem:[#allocation7 + $0x144] sm:$0xf] }
 0x3ba   : > { %v12213_v5 = vpop.eup %11557 }
 0x3bb   : > { %v5127_v6 = vsel %vm5120_vm3, %v12213_v5, 0.0  ;;  %6565 = vmatpush.bf16.msrb.mxu0 %v10158_v21  ;;  %v11356_v21 = vld [vmem:[#allocation7 + $0x34c] sm:$0xf] }
 0x3bc   : > { %5128 = vadd.xlane.f32.xlu0 %v5127_v6  ;;  %v10437_v6 = vld [vmem:[#allocation7 + $0x4b0] sm:$0xf] }
 0x3bd   : > { %v10438_v50 = vor.u32 %v11403_v10, %v10437_v6  ;;  %v10537_v6 = vld [vmem:[#allocation7 + $0x578] sm:$0xf]  ;;  %v11271_v10 = vld [vmem:[#allocation7 + $0xa4] sm:$0xf] }
 0x3be   : > { %v9922_v18 = vor.u32 %v11271_v10, %v9919_v9  ;;  %v10538_v40 = vor.u32 %v11428_v19, %v10537_v6  ;;  %v9859_v6 = vld [vmem:[#allocation7 + $0x3c] sm:$0xf0]  ;;  %v11296_v10 = vld [vmem:[#allocation7 + $0x16c] sm:$0xf] }
 0x3bf   : > { %v10019_v19 = vld [vmem:[#allocation7 + $0x17c] sm:$0xf0] }
 0x42f   : > { %v5129_v16 = vpop.xlane.xlu0 %5128 }
 0x430   : > { %11559 = vrcp.f32 %v5129_v16  ;;  %v10577_v16 = vld [vmem:[#allocation7 + $0x5c8] sm:$0xf] }
 0x431   : > { %v10578_v58 = vor.u32 %v11438_v54, %v10577_v16  ;;  %v10239_v16 = vld [vmem:[#allocation7 + $0x334] sm:$0xf0]  ;;  %v10219_v54 = vld [vmem:[#allocation7 + $0x30c] sm:$0xf0] }
 0x432   : > { %v10222_v57 = vor.u32 %v11346_v11, %v10219_v54  ;;  %v11441_v11 = vld [vmem:[#allocation7 + $0x5f4] sm:$0xf]  ;;  %v10599_v54 = vld [vmem:[#allocation7 + $0x604] sm:$0xf0] }
 0x436   : > { %v11560_v20 = vpop.eup %11559 }
 0x437   : > { %v5131_v3 = vmul.f32 %v11560_v20, %v12213_v5  ;;  %v10617_v5 = vld [vmem:[#allocation7 + $0x618] sm:$0xf]  ;;  %v9942_v20 = vor.u32 %v11276_v61, %v9939_v8  ;;  %v11301_v61 = vld [vmem:[#allocation7 + $0x194] sm:$0xf] }
 0x438   : > { %v10618_v29 = vor.u32 %v11448_v38, %v10617_v5  ;;  %v10082_v5 = vor.u32 %v11311_v30, %v10079_v13  ;;  %v10517_v38 = vld [vmem:[#allocation7 + $0x550] sm:$0xf]  ;;  %v10022_v30 = vor.u32 %v11296_v10, %v10019_v19  ;;  %v11251_v13 = vld [vmem:[#allocation7 + $0x4] sm:$0xf]  ;;  %v10065_v10 = vld [vmem:[#allocation7 + $0x1c0] sm:$0xf] }
 0x439   : > { %9830 = vmatmul.msk.f32.vlgmr.msrb.gmra.mxu1 %vm5120_vm3, %v5131_v3  ;;  %9831 = vmatmul.msk.f32.vlgmr.msrb.gmra.mxu2 %vm5120_vm3, %v5131_v3  ;;  %v10518_v32 = vor.u32 %v11423_v23, %v10517_v38  ;;  %v10459_v38 = vld [vmem:[#allocation7 + $0x4ec] sm:$0xf0] }
 0x43a   : > { %9832 = vmatmul.msk.f32.vlgmr.msra.gmra.mxu3 %vm5120_vm3, %v5131_v3  ;;  %9833 = vmatmul.msk.f32.vlgmr.msra.gmra.mxu0 %vm5120_vm3, %v5131_v3 }
 0x43b   : > { %6571 = vmatpush.bf16.msrb.mxu1 %v10458_v4  ;;  %6584 = vmatpush.bf16.msrb.mxu2 %v10618_v29  ;;  %v10102_v4 = vor.u32 %v11316_v2, %v10099_v55  ;;  %v10299_v29 = vld [vmem:[#allocation7 + $0x3ac] sm:$0xf0]  ;;  %v10477_v55 = vld [vmem:[#allocation7 + $0x500] sm:$0xf] }
 0x43c   : > { %6597 = vmatpush.bf16.msra.mxu3 %v9982_v15  ;;  %6610 = vmatpush.bf16.msra.mxu0 %v10142_v49  ;;  %v10302_v52 = vor.u32 %v11366_v28, %v10299_v29  ;;  %v10259_v15 = vld [vmem:[#allocation7 + $0x35c] sm:$0xf0]  ;;  %v11351_v49 = vld [vmem:[#allocation7 + $0x324] sm:$0xf]  ;;  %v10125_v29 = vld [vmem:[#allocation7 + $0x238] sm:$0xf] }
 0x43d   : > { %v10242_v37 = vor.u32 %v11351_v49, %v10239_v16 }
 0x43f   : > { %6572 = vmatpush.bf16.msrb.mxu1 %v10438_v50  ;;  %6585 = vmatpush.bf16.msrb.mxu2 %v10598_v53  ;;  %v11266_v50 = vld [vmem:[#allocation7 + $0x7c] sm:$0xf]  ;;  %v10262_v53 = vor.u32 %v11356_v21, %v10259_v15  ;;  %v10105_v15 = vld [vmem:[#allocation7 + $0x210] sm:$0xf] }
 0x440   : > { %6598 = vmatpush.bf16.msra.mxu3 %v9962_v22  ;;  %6611 = vmatpush.bf16.msra.mxu0 %v10122_v42  ;;  %v9902_v56 = vor.u32 %v11266_v50, %v9899_v46  ;;  %v10179_v22 = vld [vmem:[#allocation7 + $0x2bc] sm:$0xf0]  ;;  %v11261_v42 = vld [vmem:[#allocation7 + $0x54] sm:$0xf] }
 0x441   : > { %9834 = vmatmul.msk.f32.vlgmr.msra.gmra.mxu1 %vm5120_vm3, %v5131_v3  ;;  %v10558_v3 = vor.u32 %v11433_v31, %v10557_v60  ;;  %v9879_v60 = vld [vmem:[#allocation7 + $0x64] sm:$0xf0]  ;;  %v10145_v50 = vld [vmem:[#allocation7 + $0x260] sm:$0xf]  ;;  %v11329_v46 = vld [vmem:[#allocation7 + $0x270] sm:$0xf0] }
 0x442   : > { %v9882_v8 = vor.u32 %v11261_v42, %v9879_v60  ;;  %v10039_v31 = vld [vmem:[#allocation7 + $0x1a4] sm:$0xf0]  ;;  %v10146_v27 = vor.u32 %v11329_v46, %v10145_v50  ;;  %v10602_v42 = vor.u32 %v11441_v11, %v10599_v54  ;;  %v10045_v46 = vld [vmem:[#allocation7 + $0x198] sm:$0xf]  ;;  %v11294_v54 = vld [vmem:[#allocation7 + $0x158] sm:$0xf0] }
 0x443   : > { %6573 = vmatpush.bf16.msrb.mxu1 %v10418_v36  ;;  %6586 = vmatpush.bf16.msrb.mxu2 %v10578_v58  ;;  %v11361_v36 = vld [vmem:[#allocation7 + $0x374] sm:$0xf]  ;;  %v10182_v58 = vor.u32 %v11336_v1, %v10179_v22  ;;  %v10042_v2 = vor.u32 %v11301_v61, %v10039_v31  ;;  %v11391_v22 = vld [vmem:[#allocation7 + $0x464] sm:$0xf]  ;;  %v10085_v60 = vld [vmem:[#allocation7 + $0x1e8] sm:$0xf] }
 0x444   : > { %6599 = vmatpush.bf16.msra.mxu3 %v9942_v20  ;;  %6612 = vmatpush.bf16.msra.mxu0 %v10102_v4  ;;  %v10282_v48 = vor.u32 %v11361_v36, %v10279_v39  ;;  %v10159_v20 = vld [vmem:[#allocation7 + $0x294] sm:$0xf0]  ;;  %v11256_v4 = vld [vmem:[#allocation7 + $0x2c] sm:$0xf]  ;;  %v11314_v61 = vld [vmem:[#allocation7 + $0x1f8] sm:$0xf0] }
 0x445   : > { %v9862_v9 = vor.u32 %v11256_v4, %v9859_v6  ;;  %v11396_v39 = vld [vmem:[#allocation7 + $0x48c] sm:$0xf]  ;;  %v10005_v11 = vld [vmem:[#allocation7 + $0x148] sm:$0xf] }
 0x446   : > { %v11436_v31 = vld [vmem:[#allocation7 + $0x5cc] sm:$0xf] }
 0x447   : > { %6574 = vmatpush.bf16.msrb.mxu1 %v10398_v33  ;;  %6587 = vmatpush.bf16.msrb.mxu2 %v10558_v3  ;;  %v10199_v33 = vld [vmem:[#allocation7 + $0x2e4] sm:$0xf0]  ;;  %v10162_v3 = vor.u32 %v11331_v62, %v10159_v20  ;;  %v11279_v62 = vld [vmem:[#allocation7 + $0xe0] sm:$0xf0]  ;;  %v11386_v20 = vld [vmem:[#allocation7 + $0x43c] sm:$0xf] }
 0x448   : > { %6600 = vmatpush.bf16.msra.mxu3 %v9922_v18  ;;  %6613 = vmatpush.bf16.msra.mxu0 %v10082_v5  ;;  %v10202_v43 = vor.u32 %v11341_v0, %v10199_v33  ;;  %v9999_v18 = vld [vmem:[#allocation7 + $0x154] sm:$0xf0]  ;;  %v11406_v5 = vld [vmem:[#allocation7 + $0x4dc] sm:$0xf] }
 0x449   : > { %v10462_v24 = vor.u32 %v11406_v5, %v10459_v38  ;;  %v9965_v33 = vld [vmem:[#allocation7 + $0xf8] sm:$0xf]  ;;  %v11381_v5 = vld [vmem:[#allocation7 + $0x414] sm:$0xf]  ;;  %v10359_v38 = vld [vmem:[#allocation7 + $0x424] sm:$0xf0] }
 0x44b   : > { %6575 = vmatpush.bf16.msrb.mxu1 %v10378_v45  ;;  %6588 = vmatpush.bf16.msrb.mxu2 %v10538_v40  ;;  %v11413_v45 = vld [vmem:[#allocation7 + $0x510] sm:$0xf0]  ;;  %v10002_v40 = vor.u32 %v11291_v17, %v9999_v18  ;;  %v11274_v17 = vld [vmem:[#allocation7 + $0xb8] sm:$0xf0] }
 0x44c   : > { %6601 = vmatpush.bf16.msra.mxu3 %v9902_v56  ;;  %6614 = vmatpush.bf16.msra.mxu0 %v10062_v34  ;;  %v10478_v41 = vor.u32 %v11413_v45, %v10477_v55  ;;  %v10439_v56 = vld [vmem:[#allocation7 + $0x4c4] sm:$0xf0]  ;;  %v11446_v34 = vld [vmem:[#allocation7 + $0x61c] sm:$0xf]  ;;  %v9945_v45 = vld [vmem:[#allocation7 + $0xd0] sm:$0xf] }
 0x44d   : > { %v10442_v35 = vor.u32 %v11401_v12, %v10439_v56  ;;  %v10622_v21 = vor.u32 %v11446_v34, %v10619_v7  ;;  %v9946_v19 = vor.u32 %v11279_v62, %v9945_v45  ;;  %v10362_v12 = vor.u32 %v11381_v5, %v10359_v38  ;;  %v9905_v56 = vld [vmem:[#allocation7 + $0x80] sm:$0xf]  ;;  %v11376_v34 = vld [vmem:[#allocation7 + $0x3ec] sm:$0xf]  ;;  %v10285_v45 = vld [vmem:[#allocation7 + $0x378] sm:$0xf] }
 0x44e   : > { %v10339_v7 = vld [vmem:[#allocation7 + $0x3fc] sm:$0xf0] }
 0x44f   : > { %6576 = vmatpush.bf16.msrb.mxu1 %v10358_v51  ;;  %6589 = vmatpush.bf16.msrb.mxu2 %v10518_v32  ;;  %v9839_v51 = vld [vmem:[#allocation7 + $0x14] sm:$0xf0]  ;;  %v11324_v32 = vld [vmem:[#allocation7 + $0x248] sm:$0xf0] }
 0x450   : > { %6602 = vmatpush.bf16.msra.mxu3 %v9882_v8  ;;  %6615 = vmatpush.bf16.msra.mxu0 %v10042_v2  ;;  %v9842_v14 = vor.u32 %v11251_v13, %v9839_v51  ;;  %v10126_v36 = vor.u32 %v11324_v32, %v10125_v29  ;;  %v10579_v2 = vld [vmem:[#allocation7 + $0x5dc] sm:$0xf0]  ;;  %v10559_v13 = vld [vmem:[#allocation7 + $0x5b4] sm:$0xf0]  ;;  %v11269_v29 = vld [vmem:[#allocation7 + $0x90] sm:$0xf0] }
 0x451   : > { %v10582_v6 = vor.u32 %v11436_v31, %v10579_v2  ;;  %v11259_v31 = vld [vmem:[#allocation7 + $0x40] sm:$0xf0]  ;;  %v10006_v2 = vor.u32 %v11294_v54, %v10005_v11  ;;  %v10225_v54 = vld [vmem:[#allocation7 + $0x300] sm:$0xf] }
 0x453   : > { %6577 = vmatpush.bf16.msrb.mxu1 %v10338_v26  ;;  %6590 = vmatpush.bf16.msrb.mxu2 %v10498_v44  ;;  %v10419_v44 = vld [vmem:[#allocation7 + $0x49c] sm:$0xf0] }
 0x454   : > { %6603 = vmatpush.bf16.msra.mxu3 %v9862_v9  ;;  %6616 = vmatpush.bf16.msra.mxu0 %v10022_v30  ;;  %v10422_v0 = vor.u32 %v11396_v39, %v10419_v44  ;;  %v11309_v9 = vld [vmem:[#allocation7 + $0x1d0] sm:$0xf0]  ;;  %v11431_v30 = vld [vmem:[#allocation7 + $0x5a4] sm:$0xf]  ;;  %v10519_v44 = vld [vmem:[#allocation7 + $0x564] sm:$0xf0] }
 0x455   : > { %v10562_v50 = vor.u32 %v11431_v30, %v10559_v13  ;;  %v11421_v39 = vld [vmem:[#allocation7 + $0x554] sm:$0xf]  ;;  %v11254_v30 = vld [vmem:[#allocation7 + $0x18] sm:$0xf0]  ;;  %v10465_v13 = vld [vmem:[#allocation7 + $0x4e0] sm:$0xf] }
 0x457   : > { %6578 = vmatpush.bf16.msrb.mxu1 %v10318_v63  ;;  %6591 = vmatpush.bf16.msrb.mxu2 %v10478_v41  ;;  %v9985_v63 = vld [vmem:[#allocation7 + $0x120] sm:$0xf]  ;;  %v10086_v41 = vor.u32 %v11314_v61, %v10085_v60 }
 0x458   : > { %6604 = vmatpush.bf16.msra.mxu3 %v9842_v14  ;;  %6617 = vmatpush.bf16.msra.mxu0 %v10002_v40  ;;  %v9925_v14 = vld [vmem:[#allocation7 + $0xa8] sm:$0xf]  ;;  %v10066_v40 = vor.u32 %v11309_v9, %v10065_v10  ;;  %v10499_v60 = vld [vmem:[#allocation7 + $0x53c] sm:$0xf0]  ;;  %v11411_v10 = vld [vmem:[#allocation7 + $0x504] sm:$0xf] }
 0x459   : > { %v10479_v9 = vld [vmem:[#allocation7 + $0x514] sm:$0xf0] }
 0x45a   : > { %v10482_v38 = vor.u32 %v11411_v10, %v10479_v9  ;;  %v10545_v10 = vld [vmem:[#allocation7 + $0x580] sm:$0xf]  ;;  %v11429_v9 = vld [vmem:[#allocation7 + $0x590] sm:$0xf0] }
 0x45b   : > { %6623 = vmatpush.bf16.msra.mxu1 %v10302_v52  ;;  %v11289_v52 = vld [vmem:[#allocation7 + $0x130] sm:$0xf0] }
 0x45f   : > { %6624 = vmatpush.bf16.msra.mxu1 %v10282_v48 }
 0x463   : > { %6625 = vmatpush.bf16.msra.mxu1 %v10262_v53  ;;  %v11319_v53 = vld [vmem:[#allocation7 + $0x220] sm:$0xf0] }
 0x464   : > { %v10106_v1 = vor.u32 %v11319_v53, %v10105_v15  ;;  %v11264_v15 = vld [vmem:[#allocation7 + $0x68] sm:$0xf0]  ;;  %v11371_v53 = vld [vmem:[#allocation7 + $0x3c4] sm:$0xf] }
 0x467   : > { %6626 = vmatpush.bf16.msra.mxu1 %v10242_v37  ;;  %v9986_v37 = vor.u32 %v11289_v52, %v9985_v63  ;;  %v10025_v63 = vld [vmem:[#allocation7 + $0x170] sm:$0xf]  ;;  %v11299_v52 = vld [vmem:[#allocation7 + $0x180] sm:$0xf0] }
 0x46b   : > { %6627 = vmatpush.bf16.msra.mxu1 %v10222_v57 }
 0x46f   : > { %6628 = vmatpush.bf16.msra.mxu1 %v10202_v43  ;;  %v11284_v43 = vld [vmem:[#allocation7 + $0x108] sm:$0xf0] }
 0x470   : > { %v9966_v8 = vor.u32 %v11284_v43, %v9965_v33  ;;  %v10305_v33 = vld [vmem:[#allocation7 + $0x3a0] sm:$0xf]  ;;  %v11369_v43 = vld [vmem:[#allocation7 + $0x3b0] sm:$0xf0] }
 0x473   : > { %6629 = vmatpush.bf16.msra.mxu1 %v10182_v58  ;;  %v10399_v58 = vld [vmem:[#allocation7 + $0x474] sm:$0xf0] }
 0x474   : > { %v10402_v55 = vor.u32 %v11391_v22, %v10399_v58  ;;  %v9987_v58 = vld [vmem:[#allocation7 + $0x134] sm:$0xf0] }
 0x477   : > { %6630 = vmatpush.bf16.msra.mxu1 %v10162_v3  ;;  %v10379_v3 = vld [vmem:[#allocation7 + $0x44c] sm:$0xf0] }
 0x478   : > { %v10382_v51 = vor.u32 %v11386_v20, %v10379_v3  ;;  %v11364_v20 = vld [vmem:[#allocation7 + $0x388] sm:$0xf0]  ;;  %v11282_v3 = vld [vmem:[#allocation7 + $0xfc] sm:$0xf] }
 0x4b6   : > { %v5152_v23 = vpop.f32.mrf.mxu1 }
 0x4b7   : > { %v12223_v25 = vpack.c.bf16 %v5152_v23, %v5152_v23  ;;  %v5212_v26 = vpop.f32.mrf.mxu0  ;;  %v11304_v23 = vld [vmem:[#allocation7 + $0x1a8] sm:$0xf0] }
 0x4b8   : > { %v12225_v28 = vpack.c.bf16 %v5212_v26, %v5212_v26  ;;  %v11426_v26 = vld [vmem:[#allocation7 + $0x57c] sm:$0xf]  ;;  %v10046_v32 = vor.u32 %v11304_v23, %v10045_v46  ;;  %v11359_v46 = vld [vmem:[#allocation7 + $0x360] sm:$0xf0] }
 0x4b9   : > { %6540 = vmatmul.bf16.vlgmr.msra.gmra.mxu2 %v12223_v25 }
 0x4ba   : > { %6579 = vmatmul.bf16.vlgmr.msrb.gmra.mxu1 %v12225_v28  ;;  %6636 = vmatpush.bf16.msra.mxu2 %v10462_v24  ;;  %v9926_v24 = vor.u32 %v11274_v17, %v9925_v14  ;;  %v10286_v14 = vor.u32 %v11364_v20, %v10285_v45  ;;  %v10625_v17 = vld [vmem:[#allocation7 + $0x620] sm:$0xf] }
 0x4bb   : > { %6675 = vmatpush.bf16.msrb.mxu1 %v10146_v27  ;;  %v10539_v27 = vld [vmem:[#allocation7 + $0x58c] sm:$0xf0] }
 0x4bc   : > { %v5172_v48 = vpop.f32.mrf.mxu2 }
 0x4bd   : > { %v12229_v49 = vpack.c.bf16 %v5172_v48, %v5172_v48  ;;  %v5192_v16 = vpop.f32.mrf.mxu3  ;;  %v10342_v48 = vor.u32 %v11376_v34, %v10339_v7  ;;  %v10605_v34 = vld [vmem:[#allocation7 + $0x5f8] sm:$0xf]  ;;  %v11444_v7 = vld [vmem:[#allocation7 + $0x608] sm:$0xf0] }
 0x4be   : > { %v12231_v57 = vpack.c.bf16 %v5192_v16, %v5192_v16  ;;  %6637 = vmatpush.bf16.msra.mxu2 %v10442_v35  ;;  %v5232_v4 = vpop.f32.mrf.mxu1  ;;  %v10542_v35 = vor.u32 %v11426_v26, %v10539_v27  ;;  %v10026_v16 = vor.u32 %v11299_v52, %v10025_v63  ;;  %v11277_v26 = vld [vmem:[#allocation7 + $0xd4] sm:$0xf]  ;;  %v9947_v27 = vld [vmem:[#allocation7 + $0xe4] sm:$0xf0]  ;;  %v11354_v52 = vld [vmem:[#allocation7 + $0x338] sm:$0xf0] }
 0x4bf   : > { %6676 = vmatpush.bf16.msrb.mxu1 %v10126_v36  ;;  %6553 = vmatmul.bf16.vlgmr.msrb.gmra.mxu3 %v12229_v49  ;;  %v12235_v18 = vpack.c.bf16 %v5232_v4, %v5232_v4  ;;  %v9906_v36 = vor.u32 %v11269_v29, %v9905_v56  ;;  %v9967_v4 = vld [vmem:[#allocation7 + $0x10c] sm:$0xf0]  ;;  %v10445_v56 = vld [vmem:[#allocation7 + $0x4b8] sm:$0xf]  ;;  %v11404_v29 = vld [vmem:[#allocation7 + $0x4c8] sm:$0xf0] }
 0x4c0   : > { %6566 = vmatmul.bf16.vlgmr.msrb.gmra.mxu0 %v12231_v57  ;;  %6649 = vmatpush.bf16.msrb.mxu3 %v10622_v21  ;;  %v9885_v21 = vld [vmem:[#allocation7 + $0x58] sm:$0xf]  ;;  %v9970_v5 = vor.u32 %v11282_v3, %v9967_v4  ;;  %v10245_v63 = vld [vmem:[#allocation7 + $0x328] sm:$0xf]  ;;  %v10385_v3 = vld [vmem:[#allocation7 + $0x440] sm:$0xf] }
 0x4c1   : > { %6662 = vmatpush.bf16.msrb.mxu0 %v9986_v37  ;;  %v10319_v37 = vld [vmem:[#allocation7 + $0x3d4] sm:$0xf0]  ;;  %v9886_v22 = vor.u32 %v11264_v15, %v9885_v21  ;;  %v10425_v21 = vld [vmem:[#allocation7 + $0x490] sm:$0xf]  ;;  %v11399_v15 = vld [vmem:[#allocation7 + $0x4a0] sm:$0xf0] }
 0x4c2   : > { %6638 = vmatpush.bf16.msra.mxu2 %v10422_v0  ;;  %v10522_v0 = vor.u32 %v11421_v39, %v10519_v44  ;;  %v10322_v61 = vor.u32 %v11371_v53, %v10319_v37  ;;  %v11272_v39 = vld [vmem:[#allocation7 + $0xac] sm:$0xf]  ;;  %v9927_v44 = vld [vmem:[#allocation7 + $0xbc] sm:$0xf0]  ;;  %v10246_v53 = vor.u32 %v11354_v52, %v10245_v63  ;;  %v11439_v37 = vld [vmem:[#allocation7 + $0x5e0] sm:$0xf0] }
 0x4c3   : > { %6677 = vmatpush.bf16.msrb.mxu1 %v10106_v1  ;;  %v11287_v1 = vld [vmem:[#allocation7 + $0x124] sm:$0xf]  ;;  %v9930_v11 = vor.u32 %v11272_v39, %v9927_v44  ;;  %v11389_v4 = vld [vmem:[#allocation7 + $0x450] sm:$0xf0]  ;;  %v10627_v63 = vld [vmem:[#allocation7 + $0x634] sm:$0xf0] }
 0x4c4   : > { %6650 = vmatpush.bf16.msrb.mxu3 %v10602_v42  ;;  %v11416_v42 = vld [vmem:[#allocation7 + $0x52c] sm:$0xf]  ;;  %v9990_v62 = vor.u32 %v11287_v1, %v9987_v58  ;;  %v9907_v1 = vld [vmem:[#allocation7 + $0x94] sm:$0xf0]  ;;  %v10405_v58 = vld [vmem:[#allocation7 + $0x468] sm:$0xf] }
 0x4c5   : > { %6663 = vmatpush.bf16.msrb.mxu0 %v9966_v8  ;;  %v9865_v8 = vld [vmem:[#allocation7 + $0x30] sm:$0xf] }
 0x4c6   : > { %6639 = vmatpush.bf16.msra.mxu2 %v10402_v55  ;;  %v10306_v55 = vor.u32 %v11369_v43, %v10305_v33  ;;  %v10426_v33 = vor.u32 %v11399_v15, %v10425_v21  ;;  %v11267_v43 = vld [vmem:[#allocation7 + $0x84] sm:$0xf]  ;;  %v10345_v52 = vld [vmem:[#allocation7 + $0x3f0] sm:$0xf] }
 0x4c7   : > { %6678 = vmatpush.bf16.msrb.mxu1 %v10086_v41  ;;  %v10502_v41 = vor.u32 %v11416_v42, %v10499_v60  ;;  %v11394_v42 = vld [vmem:[#allocation7 + $0x478] sm:$0xf0]  ;;  %v10505_v44 = vld [vmem:[#allocation7 + $0x530] sm:$0xf] }
 0x4c8   : > { %6651 = vmatpush.bf16.msrb.mxu3 %v10582_v6  ;;  %v9866_v6 = vor.u32 %v11259_v31, %v9865_v8  ;;  %v11434_v8 = vld [vmem:[#allocation7 + $0x5b8] sm:$0xf0]  ;;  %v9910_v31 = vor.u32 %v11267_v43, %v9907_v1  ;;  %v10406_v45 = vor.u32 %v11394_v42, %v10405_v58  ;;  %v10325_v43 = vld [vmem:[#allocation7 + $0x3c8] sm:$0xf]  ;;  %v11367_v42 = vld [vmem:[#allocation7 + $0x3a4] sm:$0xf] }
 0x4c9   : > { %6664 = vmatpush.bf16.msrb.mxu0 %v9946_v19  ;;  %6592 = vmatmul.bf16.vlgmr.msrb.gmra.mxu2 %v12235_v18  ;;  %v9845_v19 = vld [vmem:[#allocation7 + $0x8] sm:$0xf]  ;;  %v11374_v1 = vld [vmem:[#allocation7 + $0x3d8] sm:$0xf0] }
 0x4ca   : > { %6631 = vmatmul.bf16.vlgmr.msra.gmra.mxu1 %v12231_v57  ;;  %6640 = vmatpush.bf16.msra.mxu2 %v10382_v51  ;;  %v11409_v51 = vld [vmem:[#allocation7 + $0x4f0] sm:$0xf0]  ;;  %v9846_v23 = vor.u32 %v11254_v30, %v9845_v19  ;;  %v10185_v30 = vld [vmem:[#allocation7 + $0x2b0] sm:$0xf]  ;;  %v11414_v58 = vld [vmem:[#allocation7 + $0x518] sm:$0xf0] }
 0x4cb   : > { %6679 = vmatpush.bf16.msrb.mxu1 %v10066_v40  ;;  %v11449_v40 = vld [vmem:[#allocation7 + $0x630] sm:$0xf0] }
 0x4cc   : > { %6652 = vmatpush.bf16.msrb.mxu3 %v10562_v50  ;;  %v10265_v50 = vld [vmem:[#allocation7 + $0x350] sm:$0xf] }
 0x4cd   : > { %6665 = vmatpush.bf16.msrb.mxu0 %v9926_v24  ;;  %v10466_v24 = vor.u32 %v11409_v51, %v10465_v13  ;;  %v11339_v13 = vld [vmem:[#allocation7 + $0x2c0] sm:$0xf0]  ;;  %v10386_v51 = vor.u32 %v11389_v4, %v10385_v3  ;;  %v11437_v3 = vld [vmem:[#allocation7 + $0x5d4] sm:$0xf]  ;;  %v10587_v4 = vld [vmem:[#allocation7 + $0x5e4] sm:$0xf0] }
 0x4ce   : > { %6641 = vmatpush.bf16.msra.mxu2 %v10362_v12  ;;  %v10626_v12 = vor.u32 %v11449_v40, %v10625_v17  ;;  %v9867_v17 = vld [vmem:[#allocation7 + $0x44] sm:$0xf0]  ;;  %v10546_v40 = vor.u32 %v11429_v9, %v10545_v10  ;;  %v11362_v10 = vld [vmem:[#allocation7 + $0x37c] sm:$0xf]  ;;  %v10287_v9 = vld [vmem:[#allocation7 + $0x38c] sm:$0xf0] }
 0x4cf   : > { %6680 = vmatpush.bf16.msrb.mxu1 %v10046_v32  ;;  %6605 = vmatmul.bf16.vlgmr.msra.gmra.mxu3 %v12223_v25  ;;  %v10266_v32 = vor.u32 %v11359_v46, %v10265_v50  ;;  %v10186_v50 = vor.u32 %v11339_v13, %v10185_v30  ;;  %v10525_v46 = vld [vmem:[#allocation7 + $0x558] sm:$0xf]  ;;  %v11402_v30 = vld [vmem:[#allocation7 + $0x4bc] sm:$0xf]  ;;  %v10447_v13 = vld [vmem:[#allocation7 + $0x4cc] sm:$0xf0] }
 0x4d0   : > { %6618 = vmatmul.bf16.vlgmr.msra.gmra.mxu0 %v12229_v49  ;;  %6653 = vmatpush.bf16.msrb.mxu3 %v10542_v35  ;;  %v9950_v35 = vor.u32 %v11277_v26, %v9947_v27  ;;  %v11334_v27 = vld [vmem:[#allocation7 + $0x298] sm:$0xf0] }
 0x4d1   : > { %6666 = vmatpush.bf16.msrb.mxu0 %v9906_v36  ;;  %v10446_v36 = vor.u32 %v11404_v29, %v10445_v56  ;;  %v9847_v56 = vld [vmem:[#allocation7 + $0x1c] sm:$0xf0] }
 0x4d2   : > { %6642 = vmatpush.bf16.msra.mxu2 %v10342_v48  ;;  %v10606_v48 = vor.u32 %v11444_v7, %v10605_v34  ;;  %v10147_v34 = vld [vmem:[#allocation7 + $0x274] sm:$0xf0]  ;;  %v11447_v7 = vld [vmem:[#allocation7 + $0x624] sm:$0xf] }
 0x4d3   : > { %6681 = vmatpush.bf16.msrb.mxu1 %v10026_v16  ;;  %v10585_v16 = vld [vmem:[#allocation7 + $0x5d0] sm:$0xf] }
 0x4d4   : > { %6654 = vmatpush.bf16.msrb.mxu3 %v10522_v0  ;;  %v11349_v0 = vld [vmem:[#allocation7 + $0x310] sm:$0xf0] }
 0x4d5   : > { %6667 = vmatpush.bf16.msrb.mxu0 %v9886_v22  ;;  %v10586_v22 = vor.u32 %v11439_v37, %v10585_v16  ;;  %v10226_v60 = vor.u32 %v11349_v0, %v10225_v54  ;;  %v10630_v16 = vor.u32 %v11447_v7, %v10627_v63  ;;  %v11442_v54 = vld [vmem:[#allocation7 + $0x5fc] sm:$0xf]  ;;  %v10607_v0 = vld [vmem:[#allocation7 + $0x60c] sm:$0xf0]  ;;  %v10547_v7 = vld [vmem:[#allocation7 + $0x594] sm:$0xf0] }
 0x4d6   : > { %6643 = vmatpush.bf16.msra.mxu2 %v10322_v61  ;;  %v10565_v61 = vld [vmem:[#allocation7 + $0x5a8] sm:$0xf]  ;;  %v11352_v63 = vld [vmem:[#allocation7 + $0x32c] sm:$0xf] }
 0x4d7   : > { %6682 = vmatpush.bf16.msrb.mxu1 %v10006_v2  ;;  %v10205_v2 = vld [vmem:[#allocation7 + $0x2d8] sm:$0xf]  ;;  %v10566_v20 = vor.u32 %v11434_v8, %v10565_v61  ;;  %v11407_v8 = vld [vmem:[#allocation7 + $0x4e4] sm:$0xf] }
 0x4d8   : > { %6655 = vmatpush.bf16.msrb.mxu3 %v10502_v41  ;;  %v9887_v41 = vld [vmem:[#allocation7 + $0x6c] sm:$0xf0] }
 0x4d9   : > { %6668 = vmatpush.bf16.msrb.mxu0 %v9866_v6  ;;  %6644 = vmatmul.bf16.vlgmr.msra.gmra.mxu2 %v12225_v28 }
 0x4da   : > { %6688 = vmatpush.bf16.msrb.mxu2 %v10306_v55  ;;  %6683 = vmatmul.bf16.vlgmr.msrb.gmra.mxu1 %v12229_v49  ;;  %v11344_v55 = vld [vmem:[#allocation7 + $0x2e8] sm:$0xf0] }
 0x4db   : > { %6727 = vmatpush.bf16.msra.mxu1 %v9990_v62  ;;  %v11262_v62 = vld [vmem:[#allocation7 + $0x5c] sm:$0xf]  ;;  %v10206_v6 = vor.u32 %v11344_v55, %v10205_v2  ;;  %v10610_v2 = vor.u32 %v11442_v54, %v10607_v0  ;;  %v10326_v55 = vor.u32 %v11374_v1, %v10325_v43  ;;  %v11347_v54 = vld [vmem:[#allocation7 + $0x304] sm:$0xf]  ;;  %v10227_v0 = vld [vmem:[#allocation7 + $0x314] sm:$0xf0] }
 0x4dc   : > { %6656 = vmatpush.bf16.msrb.mxu3 %v10482_v38  ;;  %v9890_v19 = vor.u32 %v11262_v62, %v9887_v41  ;;  %v11384_v38 = vld [vmem:[#allocation7 + $0x428] sm:$0xf0]  ;;  %v10107_v62 = vld [vmem:[#allocation7 + $0x224] sm:$0xf0]  ;;  %v11387_v43 = vld [vmem:[#allocation7 + $0x444] sm:$0xf] }
 0x4dd   : > { %6669 = vmatpush.bf16.msrb.mxu0 %v9846_v23  ;;  %v11424_v23 = vld [vmem:[#allocation7 + $0x568] sm:$0xf0]  ;;  %v10387_v1 = vld [vmem:[#allocation7 + $0x454] sm:$0xf0] }
 0x4de   : > { %6689 = vmatpush.bf16.msrb.mxu2 %v10286_v14  ;;  %v11257_v14 = vld [vmem:[#allocation7 + $0x34] sm:$0xf] }
 0x4df   : > { %6728 = vmatpush.bf16.msra.mxu1 %v9970_v5  ;;  %6657 = vmatmul.bf16.vlgmr.msrb.gmra.mxu3 %v12235_v18  ;;  %v10365_v5 = vld [vmem:[#allocation7 + $0x418] sm:$0xf]  ;;  %v9870_v26 = vor.u32 %v11257_v14, %v9867_v17  ;;  %v11312_v14 = vld [vmem:[#allocation7 + $0x1ec] sm:$0xf]  ;;  %v10087_v17 = vld [vmem:[#allocation7 + $0x1fc] sm:$0xf0] }
 0x4e0   : > { %6701 = vmatpush.bf16.msra.mxu3 %v10466_v24  ;;  %6670 = vmatmul.bf16.vlgmr.msrb.gmra.mxu0 %v12223_v25  ;;  %v10165_v24 = vld [vmem:[#allocation7 + $0x288] sm:$0xf]  ;;  %v10366_v29 = vor.u32 %v11384_v38, %v10365_v5  ;;  %v11432_v5 = vld [vmem:[#allocation7 + $0x5ac] sm:$0xf]  ;;  %v10567_v38 = vld [vmem:[#allocation7 + $0x5bc] sm:$0xf0] }
 0x4e1   : > { %6714 = vmatpush.bf16.msra.mxu0 %v10626_v12  ;;  %v11252_v12 = vld [vmem:[#allocation7 + $0xc] sm:$0xf]  ;;  %v10166_v39 = vor.u32 %v11334_v27, %v10165_v24  ;;  %v10090_v24 = vor.u32 %v11312_v14, %v10087_v17  ;;  %v10427_v27 = vld [vmem:[#allocation7 + $0x4a4] sm:$0xf0]  ;;  %v11410_v14 = vld [vmem:[#allocation7 + $0x4f8] sm:$0xf0] }
 0x4e2   : > { %6690 = vmatpush.bf16.msrb.mxu2 %v10266_v32  ;;  %v11327_v32 = vld [vmem:[#allocation7 + $0x264] sm:$0xf]  ;;  %v9850_v21 = vor.u32 %v11252_v12, %v9847_v56  ;;  %v10570_v12 = vor.u32 %v11432_v5, %v10567_v38  ;;  %v11337_v17 = vld [vmem:[#allocation7 + $0x2b4] sm:$0xf] }
 0x4e3   : > { %6729 = vmatpush.bf16.msra.mxu1 %v9950_v35  ;;  %v10526_v35 = vor.u32 %v11424_v23, %v10525_v46  ;;  %v10150_v15 = vor.u32 %v11327_v32, %v10147_v34  ;;  %v11357_v46 = vld [vmem:[#allocation7 + $0x354] sm:$0xf]  ;;  %v10267_v23 = vld [vmem:[#allocation7 + $0x364] sm:$0xf0]  ;;  %v11307_v56 = vld [vmem:[#allocation7 + $0x1c4] sm:$0xf] }
 0x4e4   : > { %6702 = vmatpush.bf16.msra.mxu3 %v10446_v36  ;;  %v11379_v36 = vld [vmem:[#allocation7 + $0x400] sm:$0xf0]  ;;  %v10270_v32 = vor.u32 %v11357_v46, %v10267_v23  ;;  %v11377_v38 = vld [vmem:[#allocation7 + $0x3f4] sm:$0xf] }
 0x4e5   : > { %6715 = vmatpush.bf16.msra.mxu0 %v10606_v48  ;;  %v11419_v48 = vld [vmem:[#allocation7 + $0x540] sm:$0xf0]  ;;  %v10346_v37 = vor.u32 %v11379_v36, %v10345_v52  ;;  %v10247_v52 = vld [vmem:[#allocation7 + $0x33c] sm:$0xf0] }
 0x4e6   : > { %6691 = vmatpush.bf16.msrb.mxu2 %v10246_v53  ;;  %v11322_v53 = vld [vmem:[#allocation7 + $0x23c] sm:$0xf]  ;;  %v11427_v34 = vld [vmem:[#allocation7 + $0x584] sm:$0xf] }
 0x4e7   : > { %6730 = vmatpush.bf16.msra.mxu1 %v9930_v11  ;;  %v10127_v11 = vld [vmem:[#allocation7 + $0x24c] sm:$0xf0] }
 0x4e8   : > { %6703 = vmatpush.bf16.msra.mxu3 %v10426_v33  ;;  %v10506_v33 = vor.u32 %v11419_v48, %v10505_v44  ;;  %v10130_v61 = vor.u32 %v11322_v53, %v10127_v11  ;;  %v10407_v44 = vld [vmem:[#allocation7 + $0x47c] sm:$0xf0]  ;;  %v10550_v48 = vor.u32 %v11427_v34, %v10547_v7  ;;  %v10250_v53 = vor.u32 %v11352_v63, %v10247_v52  ;;  %v11332_v34 = vld [vmem:[#allocation7 + $0x28c] sm:$0xf]  ;;  %v10153_v52 = vld [vmem:[#allocation7 + $0x268] sm:$0xf] }
 0x4e9   : > { %6716 = vmatpush.bf16.msra.mxu0 %v10586_v22  ;;  %v10485_v22 = vld [vmem:[#allocation7 + $0x508] sm:$0xf]  ;;  %v10167_v7 = vld [vmem:[#allocation7 + $0x29c] sm:$0xf0] }
 0x4ea   : > { %6692 = vmatpush.bf16.msrb.mxu2 %v10226_v60  ;;  %v10307_v60 = vld [vmem:[#allocation7 + $0x3b4] sm:$0xf0]  ;;  %v10486_v41 = vor.u32 %v11414_v58, %v10485_v22  ;;  %v11297_v58 = vld [vmem:[#allocation7 + $0x174] sm:$0xf]  ;;  %v10327_v63 = vld [vmem:[#allocation7 + $0x3dc] sm:$0xf0] }
 0x4eb   : > { %6731 = vmatpush.bf16.msra.mxu1 %v9910_v31  ;;  %v10467_v31 = vld [vmem:[#allocation7 + $0x4f4] sm:$0xf0] }
 0x4ec   : > { %6704 = vmatpush.bf16.msra.mxu3 %v10406_v45  ;;  %v11317_v45 = vld [vmem:[#allocation7 + $0x214] sm:$0xf] }
 0x4ed   : > { %6717 = vmatpush.bf16.msra.mxu0 %v10566_v20  ;;  %v10310_v20 = vor.u32 %v11367_v42, %v10307_v60  ;;  %v10027_v42 = vld [vmem:[#allocation7 + $0x184] sm:$0xf0]  ;;  %v10230_v60 = vor.u32 %v11347_v54, %v10227_v0  ;;  %v10433_v54 = vld [vmem:[#allocation7 + $0x498] sm:$0xf]  ;;  %v11400_v0 = vld [vmem:[#allocation7 + $0x4a8] sm:$0xf0] }
 0x4ee   : > { %6693 = vmatpush.bf16.msrb.mxu2 %v10206_v6  ;;  %v10470_v6 = vor.u32 %v11407_v8, %v10467_v31  ;;  %v10507_v8 = vld [vmem:[#allocation7 + $0x544] sm:$0xf0]  ;;  %v10390_v31 = vor.u32 %v11387_v43, %v10387_v1  ;;  %v10133_v43 = vld [vmem:[#allocation7 + $0x240] sm:$0xf]  ;;  %v11325_v1 = vld [vmem:[#allocation7 + $0x250] sm:$0xf0] }
 0x4ef   : > { %6732 = vmatpush.bf16.msra.mxu1 %v9890_v19  ;;  %v10110_v19 = vor.u32 %v11317_v45, %v10107_v62  ;;  %v10030_v45 = vor.u32 %v11297_v58, %v10027_v42  ;;  %v11382_v62 = vld [vmem:[#allocation7 + $0x41c] sm:$0xf]  ;;  %v10293_v58 = vld [vmem:[#allocation7 + $0x380] sm:$0xf]  ;;  %v11365_v42 = vld [vmem:[#allocation7 + $0x390] sm:$0xf0] }
 0x4f0   : > { %6705 = vmatpush.bf16.msra.mxu3 %v10386_v51  ;;  %v10590_v51 = vor.u32 %v11437_v3, %v10587_v4  ;;  %v10007_v4 = vld [vmem:[#allocation7 + $0x15c] sm:$0xf0] }
 0x4f1   : > { %6718 = vmatpush.bf16.msra.mxu0 %v10546_v40  ;;  %v10290_v40 = vor.u32 %v11362_v10, %v10287_v9  ;;  %v10487_v10 = vld [vmem:[#allocation7 + $0x51c] sm:$0xf0] }
 0x4f2   : > { %6694 = vmatpush.bf16.msrb.mxu2 %v10186_v50  ;;  %v10450_v50 = vor.u32 %v11402_v30, %v10447_v13  ;;  %v11290_v30 = vld [vmem:[#allocation7 + $0x138] sm:$0xf0]  ;;  %v10473_v13 = vld [vmem:[#allocation7 + $0x4e8] sm:$0xf] }
 0x4f3   : > { %6733 = vmatpush.bf16.msra.mxu1 %v9870_v26  ;;  %v11397_v26 = vld [vmem:[#allocation7 + $0x494] sm:$0xf] }
 0x4f4   : > { %6706 = vmatpush.bf16.msra.mxu3 %v10366_v29  ;;  %v10067_v29 = vld [vmem:[#allocation7 + $0x1d4] sm:$0xf0] }
 0x4f5   : > { %6719 = vmatpush.bf16.msra.mxu0 %v10526_v35  ;;  %v10430_v35 = vor.u32 %v11397_v26, %v10427_v27  ;;  %v10070_v36 = vor.u32 %v11307_v56, %v10067_v29  ;;  %v10474_v26 = vor.u32 %v11410_v14, %v10473_v13  ;;  %v10453_v56 = vld [vmem:[#allocation7 + $0x4c0] sm:$0xf]  ;;  %v11405_v29 = vld [vmem:[#allocation7 + $0x4d0] sm:$0xf0]  ;;  %v11390_v13 = vld [vmem:[#allocation7 + $0x458] sm:$0xf0] }
 0x4f6   : > { %6695 = vmatpush.bf16.msrb.mxu2 %v10166_v39  ;;  %v11392_v39 = vld [vmem:[#allocation7 + $0x46c] sm:$0xf]  ;;  %v10093_v14 = vld [vmem:[#allocation7 + $0x1f0] sm:$0xf] }
 0x4f7   : > { %6734 = vmatpush.bf16.msra.mxu1 %v9850_v21  ;;  %v11302_v21 = vld [vmem:[#allocation7 + $0x19c] sm:$0xf]  ;;  %v10410_v11 = vor.u32 %v11392_v39, %v10407_v44  ;;  %v10313_v44 = vld [vmem:[#allocation7 + $0x3a8] sm:$0xf] }
 0x4f8   : > { %6707 = vmatpush.bf16.msra.mxu3 %v10346_v37  ;;  %v10527_v37 = vld [vmem:[#allocation7 + $0x56c] sm:$0xf0] }
 0x4f9   : > { %6720 = vmatpush.bf16.msra.mxu0 %v10506_v33  ;;  %6696 = vmatmul.bf16.vlgmr.msrb.gmra.mxu2 %v12231_v57 }
 0x4fa   : > { %6740 = vmatpush.bf16.msra.mxu2 %v10150_v15  ;;  %6735 = vmatmul.bf16.vlgmr.msra.gmra.mxu1 %v12223_v25  ;;  %v10047_v15 = vld [vmem:[#allocation7 + $0x1ac] sm:$0xf0] }
 0x4fb   : > { %6779 = vmatpush.bf16.msrb.mxu1 %v10630_v16  ;;  %v11422_v16 = vld [vmem:[#allocation7 + $0x55c] sm:$0xf]  ;;  %v10050_v33 = vor.u32 %v11302_v21, %v10047_v15  ;;  %v10454_v21 = vor.u32 %v11405_v29, %v10453_v56  ;;  %v10170_v15 = vor.u32 %v11332_v34, %v10167_v7  ;;  %v10073_v56 = vld [vmem:[#allocation7 + $0x1c8] sm:$0xf] }
 0x4fc   : > { %6708 = vmatpush.bf16.msra.mxu3 %v10326_v55  ;;  %v10530_v22 = vor.u32 %v11422_v16, %v10527_v37  ;;  %v10207_v55 = vld [vmem:[#allocation7 + $0x2ec] sm:$0xf0]  ;;  %v11280_v16 = vld [vmem:[#allocation7 + $0xe8] sm:$0xf0]  ;;  %v11310_v29 = vld [vmem:[#allocation7 + $0x1d8] sm:$0xf0] }
 0x4fd   : > { %6721 = vmatpush.bf16.msra.mxu0 %v10486_v41  ;;  %v10367_v41 = vld [vmem:[#allocation7 + $0x42c] sm:$0xf0]  ;;  %v10233_v34 = vld [vmem:[#allocation7 + $0x308] sm:$0xf]  ;;  %v11350_v7 = vld [vmem:[#allocation7 + $0x318] sm:$0xf0] }
 0x4fe   : > { %6741 = vmatpush.bf16.msra.mxu2 %v10130_v61  ;;  %v11417_v61 = vld [vmem:[#allocation7 + $0x534] sm:$0xf] }
 0x4ff   : > { %6780 = vmatpush.bf16.msrb.mxu1 %v10610_v2  ;;  %6709 = vmatmul.bf16.vlgmr.msra.gmra.mxu3 %v12225_v28  ;;  %v11342_v2 = vld [vmem:[#allocation7 + $0x2dc] sm:$0xf]  ;;  %v10510_v3 = vor.u32 %v11417_v61, %v10507_v8  ;;  %v9933_v61 = vld [vmem:[#allocation7 + $0xb0] sm:$0xf]  ;;  %v11275_v8 = vld [vmem:[#allocation7 + $0xc0] sm:$0xf0] }
 0x500   : > { %6753 = vmatpush.bf16.msrb.mxu3 %v10310_v20  ;;  %6722 = vmatmul.bf16.vlgmr.msra.gmra.mxu0 %v12235_v18  ;;  %v11292_v20 = vld [vmem:[#allocation7 + $0x14c] sm:$0xf]  ;;  %v10210_v9 = vor.u32 %v11342_v2, %v10207_v55  ;;  %v10413_v2 = vld [vmem:[#allocation7 + $0x470] sm:$0xf]  ;;  %v11395_v55 = vld [vmem:[#allocation7 + $0x480] sm:$0xf0] }
 0x501   : > { %6766 = vmatpush.bf16.msrb.mxu0 %v10470_v6  ;;  %v11412_v6 = vld [vmem:[#allocation7 + $0x50c] sm:$0xf]  ;;  %v10010_v5 = vor.u32 %v11292_v20, %v10007_v4  ;;  %v9934_v20 = vor.u32 %v11275_v8, %v9933_v61 }
 0x502   : > { %6742 = vmatpush.bf16.msra.mxu2 %v10110_v19  ;;  %v9993_v19 = vld [vmem:[#allocation7 + $0x128] sm:$0xf]  ;;  %v10490_v46 = vor.u32 %v11412_v6, %v10487_v10  ;;  %v11360_v4 = vld [vmem:[#allocation7 + $0x368] sm:$0xf0]  ;;  %v10414_v6 = vor.u32 %v11395_v55, %v10413_v2 }
 0x503   : > { %6781 = vmatpush.bf16.msrb.mxu1 %v10590_v51  ;;  %v10370_v51 = vor.u32 %v11382_v62, %v10367_v41  ;;  %v9994_v23 = vor.u32 %v11290_v30, %v9993_v19  ;;  %v10113_v62 = vld [vmem:[#allocation7 + $0x218] sm:$0xf]  ;;  %v11320_v41 = vld [vmem:[#allocation7 + $0x228] sm:$0xf0]  ;;  %v9913_v10 = vld [vmem:[#allocation7 + $0x88] sm:$0xf] }
 0x504   : > { %6754 = vmatpush.bf16.msrb.mxu3 %v10290_v40  ;;  %v10187_v40 = vld [vmem:[#allocation7 + $0x2c4] sm:$0xf0]  ;;  %v10114_v19 = vor.u32 %v11320_v41, %v10113_v62  ;;  %v11300_v61 = vld [vmem:[#allocation7 + $0x188] sm:$0xf0]  ;;  %v10613_v41 = vld [vmem:[#allocation7 + $0x600] sm:$0xf] }
 0x505   : > { %6767 = vmatpush.bf16.msrb.mxu0 %v10450_v50  ;;  %v10347_v50 = vld [vmem:[#allocation7 + $0x404] sm:$0xf0]  ;;  %v10190_v27 = vor.u32 %v11337_v17, %v10187_v40  ;;  %v11315_v17 = vld [vmem:[#allocation7 + $0x200] sm:$0xf0]  ;;  %v11340_v2 = vld [vmem:[#allocation7 + $0x2c8] sm:$0xf0] }
 0x506   : > { %6743 = vmatpush.bf16.msra.mxu2 %v10090_v24  ;;  %v9973_v24 = vld [vmem:[#allocation7 + $0x100] sm:$0xf]  ;;  %v10393_v30 = vld [vmem:[#allocation7 + $0x448] sm:$0xf] }
 0x507   : > { %6782 = vmatpush.bf16.msrb.mxu1 %v10570_v12  ;;  %v11285_v12 = vld [vmem:[#allocation7 + $0x110] sm:$0xf0] }
 0x508   : > { %6755 = vmatpush.bf16.msrb.mxu3 %v10270_v32  ;;  %v10350_v32 = vor.u32 %v11377_v38, %v10347_v50  ;;  %v9974_v39 = vor.u32 %v11285_v12, %v9973_v24  ;;  %v11355_v38 = vld [vmem:[#allocation7 + $0x340] sm:$0xf0]  ;;  %v10394_v50 = vor.u32 %v11390_v13, %v10393_v30  ;;  %v10094_v24 = vor.u32 %v11315_v17, %v10093_v14  ;;  %v10593_v13 = vld [vmem:[#allocation7 + $0x5d8] sm:$0xf] }
 0x509   : > { %6768 = vmatpush.bf16.msrb.mxu0 %v10430_v35  ;;  %v11372_v35 = vld [vmem:[#allocation7 + $0x3cc] sm:$0xf] }
 0x50a   : > { %6744 = vmatpush.bf16.msra.mxu2 %v10070_v36  ;;  %v11330_v36 = vld [vmem:[#allocation7 + $0x278] sm:$0xf0]  ;;  %v10330_v37 = vor.u32 %v11372_v35, %v10327_v63  ;;  %v9873_v63 = vld [vmem:[#allocation7 + $0x38] sm:$0xf] }
 0x50b   : > { %6783 = vmatpush.bf16.msrb.mxu1 %v10550_v48  ;;  %v11370_v48 = vld [vmem:[#allocation7 + $0x3b8] sm:$0xf0] }
 0x50c   : > { %6756 = vmatpush.bf16.msrb.mxu3 %v10250_v53  ;;  %v9953_v53 = vld [vmem:[#allocation7 + $0xd8] sm:$0xf] }
 0x50d   : > { %6769 = vmatpush.bf16.msrb.mxu0 %v10410_v11  ;;  %v10154_v11 = vor.u32 %v11330_v36, %v10153_v52  ;;  %v11260_v52 = vld [vmem:[#allocation7 + $0x48] sm:$0xf0]  ;;  %v10074_v36 = vor.u32 %v11310_v29, %v10073_v56 }
 0x50e   : > { %6745 = vmatpush.bf16.msra.mxu2 %v10050_v33  ;;  %v10314_v33 = vor.u32 %v11370_v48, %v10313_v44  ;;  %v11380_v44 = vld [vmem:[#allocation7 + $0x408] sm:$0xf0]  ;;  %v10234_v48 = vor.u32 %v11350_v7, %v10233_v34 }
 0x50f   : > { %6784 = vmatpush.bf16.msrb.mxu1 %v10530_v22  ;;  %v9954_v22 = vor.u32 %v11280_v16, %v9953_v53  ;;  %v9874_v53 = vor.u32 %v11260_v52, %v9873_v63  ;;  %v10213_v16 = vld [vmem:[#allocation7 + $0x2e0] sm:$0xf]  ;;  %v11420_v34 = vld [vmem:[#allocation7 + $0x548] sm:$0xf0]  ;;  %v10493_v52 = vld [vmem:[#allocation7 + $0x510] sm:$0xf] }
 0x510   : > { %6757 = vmatpush.bf16.msrb.mxu3 %v10230_v60  ;;  %v10434_v60 = vor.u32 %v11400_v0, %v10433_v54  ;;  %v9853_v54 = vld [vmem:[#allocation7 + $0x10] sm:$0xf]  ;;  %v11255_v0 = vld [vmem:[#allocation7 + $0x20] sm:$0xf0] }
 0x511   : > { %6770 = vmatpush.bf16.msrb.mxu0 %v10390_v31  ;;  %v10134_v31 = vor.u32 %v11325_v1, %v10133_v43  ;;  %v11375_v1 = vld [vmem:[#allocation7 + $0x3e0] sm:$0xf0]  ;;  %v9854_v8 = vor.u32 %v11255_v0, %v9853_v54 }
 0x512   : > { %6746 = vmatpush.bf16.msra.mxu2 %v10030_v45  ;;  %v10294_v45 = vor.u32 %v11365_v42, %v10293_v58  ;;  %v11450_v58 = vld [vmem:[#allocation7 + $0x638] sm:$0xf0] }
 0x513   : > { %6785 = vmatpush.bf16.msrb.mxu1 %v10510_v3  ;;  %v10273_v3 = vld [vmem:[#allocation7 + $0x358] sm:$0xf] }
 0x514   : > { %6758 = vmatpush.bf16.msrb.mxu3 %v10210_v9  ;;  %v11270_v9 = vld [vmem:[#allocation7 + $0x98] sm:$0xf0] }
 0x515   : > { %6771 = vmatpush.bf16.msrb.mxu0 %v10370_v51  ;;  %v10274_v51 = vor.u32 %v11360_v4, %v10273_v3  ;;  %v9914_v40 = vor.u32 %v11270_v9, %v9913_v10  ;;  %v10013_v4 = vld [vmem:[#allocation7 + $0x150] sm:$0xf]  ;;  %v11335_v9 = vld [vmem:[#allocation7 + $0x2a0] sm:$0xf0] }
 0x516   : > { %6747 = vmatpush.bf16.msra.mxu2 %v10010_v5  ;;  %v10253_v5 = vld [vmem:[#allocation7 + $0x330] sm:$0xf] }
 0x517   : > { %6786 = vmatpush.bf16.msrb.mxu1 %v10490_v46  ;;  %v9893_v46 = vld [vmem:[#allocation7 + $0x60] sm:$0xf]  ;;  %v10254_v12 = vor.u32 %v11355_v38, %v10253_v5  ;;  %v10173_v10 = vld [vmem:[#allocation7 + $0x290] sm:$0xf]  ;;  %v11435_v5 = vld [vmem:[#allocation7 + $0x5c0] sm:$0xf0] }
 0x518   : > { %6759 = vmatpush.bf16.msrb.mxu3 %v10190_v27  ;;  %v11385_v27 = vld [vmem:[#allocation7 + $0x430] sm:$0xf0]  ;;  %v10174_v14 = vor.u32 %v11335_v9, %v10173_v10 }
 0x519   : > { %6772 = vmatpush.bf16.msrb.mxu0 %v10350_v32  ;;  %6748 = vmatmul.bf16.vlgmr.msra.gmra.mxu2 %v12229_v49 }
 0x51a   : > { %6792 = vmatpush.bf16.msrb.mxu2 %v9994_v23  ;;  %6787 = vmatmul.bf16.vlgmr.msrb.gmra.mxu1 %v12235_v18  ;;  %v11265_v23 = vld [vmem:[#allocation7 + $0x70] sm:$0xf0] }
 0x51b   : > { %6831 = vmatpush.bf16.msra.mxu1 %v10474_v26  ;;  %v10373_v26 = vld [vmem:[#allocation7 + $0x420] sm:$0xf]  ;;  %v9894_v32 = vor.u32 %v11265_v23, %v9893_v46  ;;  %v10553_v46 = vld [vmem:[#allocation7 + $0x588] sm:$0xf]  ;;  %v11430_v23 = vld [vmem:[#allocation7 + $0x598] sm:$0xf0] }
 0x51c   : > { %6760 = vmatpush.bf16.msrb.mxu3 %v10170_v15  ;;  %v10374_v35 = vor.u32 %v11385_v27, %v10373_v26  ;;  %v11305_v15 = vld [vmem:[#allocation7 + $0x1b0] sm:$0xf0] }
 0x51d   : > { %6773 = vmatpush.bf16.msrb.mxu0 %v10330_v37  ;;  %v11345_v37 = vld [vmem:[#allocation7 + $0x2f0] sm:$0xf0] }
 0x51e   : > { %6793 = vmatpush.bf16.msrb.mxu2 %v9974_v39  ;;  %v10353_v39 = vld [vmem:[#allocation7 + $0x3f8] sm:$0xf]  ;;  %v10214_v42 = vor.u32 %v11345_v37, %v10213_v16  ;;  %v11425_v26 = vld [vmem:[#allocation7 + $0x570] sm:$0xf0] }
 0x51f   : > { %6832 = vmatpush.bf16.msra.mxu1 %v10454_v21  ;;  %6761 = vmatmul.bf16.vlgmr.msrb.gmra.mxu3 %v12231_v57  ;;  %v10053_v21 = vld [vmem:[#allocation7 + $0x1a0] sm:$0xf] }
 0x520   : > { %6805 = vmatpush.bf16.msra.mxu3 %v10154_v11  ;;  %6774 = vmatmul.bf16.vlgmr.msrb.gmra.mxu0 %v12225_v28  ;;  %v10354_v11 = vor.u32 %v11380_v44, %v10353_v39  ;;  %v10054_v43 = vor.u32 %v11305_v15, %v10053_v21 }
 0x521   : > { %6818 = vmatpush.bf16.msra.mxu0 %v10314_v33  ;;  %v10333_v33 = vld [vmem:[#allocation7 + $0x3d0] sm:$0xf] }
 0x522   : > { %6794 = vmatpush.bf16.msrb.mxu2 %v9954_v22  ;;  %v10633_v22 = vld [vmem:[#allocation7 + $0x628] sm:$0xf]  ;;  %v10334_v55 = vor.u32 %v11375_v1, %v10333_v33 }
 0x523   : > { %6833 = vmatpush.bf16.msra.mxu1 %v10434_v60  ;;  %v10033_v60 = vld [vmem:[#allocation7 + $0x178] sm:$0xf] }
 0x524   : > { %6806 = vmatpush.bf16.msra.mxu3 %v10134_v31  ;;  %v10193_v31 = vld [vmem:[#allocation7 + $0x2b8] sm:$0xf]  ;;  %v10034_v62 = vor.u32 %v11300_v61, %v10033_v60 }
 0x525   : > { %6819 = vmatpush.bf16.msra.mxu0 %v10294_v45  ;;  %v10634_v45 = vor.u32 %v11450_v58, %v10633_v22  ;;  %v10194_v3 = vor.u32 %v11340_v2, %v10193_v31 }
 0x526   : > { %6795 = vmatpush.bf16.msrb.mxu2 %v9934_v20  ;;  %v11445_v20 = vld [vmem:[#allocation7 + $0x610] sm:$0xf0] }
 0x527   : > { %6834 = vmatpush.bf16.msra.mxu1 %v10414_v6  ;;  %v11295_v6 = vld [vmem:[#allocation7 + $0x160] sm:$0xf0] }
 0x528   : > { %6807 = vmatpush.bf16.msra.mxu3 %v10114_v19  ;;  %v10614_v19 = vor.u32 %v11445_v20, %v10613_v41  ;;  %v10014_v30 = vor.u32 %v11295_v6, %v10013_v4 }
 0x529   : > { %6820 = vmatpush.bf16.msra.mxu0 %v10274_v51  ;;  %v11440_v51 = vld [vmem:[#allocation7 + $0x5e8] sm:$0xf0] }
 0x52a   : > { %6796 = vmatpush.bf16.msrb.mxu2 %v9914_v40  ;;  %v10594_v17 = vor.u32 %v11440_v51, %v10593_v13  ;;  %v10573_v40 = vld [vmem:[#allocation7 + $0x5b0] sm:$0xf] }
 0x52b   : > { %6835 = vmatpush.bf16.msra.mxu1 %v10394_v50  ;;  %v10574_v38 = vor.u32 %v11435_v5, %v10573_v40 }
 0x52c   : > { %6808 = vmatpush.bf16.msra.mxu3 %v10094_v24  ;;  %v10554_v24 = vor.u32 %v11430_v23, %v10553_v46 }
 0x52d   : > { %6821 = vmatpush.bf16.msra.mxu0 %v10254_v12 }
 0x52e   : > { %6797 = vmatpush.bf16.msrb.mxu2 %v9894_v32  ;;  %v10513_v32 = vld [vmem:[#allocation7 + $0x538] sm:$0xf] }
 0x52f   : > { %6836 = vmatpush.bf16.msra.mxu1 %v10374_v35  ;;  %v10514_v35 = vor.u32 %v11420_v34, %v10513_v32 }
 0x530   : > { %6809 = vmatpush.bf16.msra.mxu3 %v10074_v36  ;;  %v11415_v36 = vld [vmem:[#allocation7 + $0x520] sm:$0xf0] }
 0x531   : > { %6822 = vmatpush.bf16.msra.mxu0 %v10234_v48  ;;  %v10494_v21 = vor.u32 %v11415_v36, %v10493_v52 }
 0x532   : > { %6798 = vmatpush.bf16.msrb.mxu2 %v9874_v53 }
 0x533   : > { %6837 = vmatpush.bf16.msra.mxu1 %v10354_v11 }
 0x534   : > { %6810 = vmatpush.bf16.msra.mxu3 %v10054_v43 }
 0x535   : > { %6823 = vmatpush.bf16.msra.mxu0 %v10214_v42 }
 0x536   : > { %6799 = vmatpush.bf16.msrb.mxu2 %v9854_v8 }
 0x537   : > { %6838 = vmatpush.bf16.msra.mxu1 %v10334_v55  ;;  %v6580_v50 = vpop.f32.mrf.mxu1 }
 0x538   : > { %6811 = vmatpush.bf16.msra.mxu3 %v10034_v62 }
 0x539   : > { %6824 = vmatpush.bf16.msra.mxu0 %v10194_v3  ;;  %6800 = vmatmul.bf16.vlgmr.msrb.gmra.mxu2 %v12223_v25  ;;  %v12257_v25 = vld [vmem:[#allocation8] sm:$0x1f] }
 0x53a   : > { %6844 = vmatpush.bf16.msra.mxu2 %v10634_v45  ;;  %6839 = vmatmul.bf16.vlgmr.msra.gmra.mxu1 %v12225_v28  ;;  %v10533_v28 = vld [vmem:[#allocation7 + $0x560] sm:$0xf]  ;;  %v5482_v12 = vperm.slane %v12257_v25, 0  ;;  %v5483_v33 = vperm.slane %v12257_v25, 1  ;;  %v5484_v31 = vperm.slane %v12257_v25, 2 }
 0x53b   : > { %v10534_v29 = vor.u32 %v11425_v26, %v10533_v28 }
 0x53c   : > { %6812 = vmatpush.bf16.msra.mxu3 %v10014_v30  ;;  %v6541_v27 = vpop.f32.mrf.mxu2 }
 0x53d   : > { %6825 = vmatpush.bf16.msra.mxu0 %v10174_v14  ;;  %v6567_v56 = vpop.f32.mrf.mxu0  ;;  %v6542_v7 = vadd.f32 %v6541_v27, %v5482_v12 }
 0x53e   : > { %6845 = vmatpush.bf16.msra.mxu2 %v10614_v19 }
 0x53f   : > { %6813 = vmatmul.bf16.vlgmr.msra.gmra.mxu3 %v12229_v49  ;;  %v6582_v49 = vpop.f32.mrf.mxu1 }
 0x540   : > { %6826 = vmatmul.bf16.vlgmr.msra.gmra.mxu0 %v12231_v57 }
 0x542   : > { %6846 = vmatpush.bf16.msra.mxu2 %v10594_v17  ;;  %v6554_v57 = vpop.f32.mrf.mxu3 }
 0x543   : > { %v6555_v63 = vadd.f32 %v6554_v57, %v6542_v7  ;;  %v5485_v57 = vperm.slane %v12257_v25, 3 }
 0x544   : > { %v6543_v39 = vpop.f32.mrf.mxu2 }
 0x545   : > { %v6568_v44 = vadd.f32 %v6567_v56, %v6555_v63  ;;  %v6569_v48 = vpop.f32.mrf.mxu0  ;;  %v5486_v39 = vperm.slane %v12257_v25, 4  ;;  %v11568_v25 = vld [vmem:[%s11996_s8 + $0x18] sm:$0xff] }
 0x546   : > { %6847 = vmatpush.bf16.msra.mxu2 %v10574_v38 }
 0x547   : > { %v6632_v15 = vpop.f32.mrf.mxu1  ;;  %v6581_v53 = vadd.f32 %v6580_v50, %v6568_v44 }
 0x54a   : > { %6848 = vmatpush.bf16.msra.mxu2 %v10554_v24  ;;  %v6556_v16 = vpop.f32.mrf.mxu3 }
 0x54b   : > { %v11565_v16 = vld [vmem:[%s11996_s8 + $0x8] sm:$0xff] }
 0x54c   : > { %v6593_v37 = vpop.f32.mrf.mxu2 }
 0x54d   : > { %v12260_v11 = vadd.f32 %v6593_v37, %v6581_v53  ;;  %v6619_v54 = vpop.f32.mrf.mxu0 }
 0x54e   : > { %6849 = vmatpush.bf16.msra.mxu2 %v10534_v29 }
 0x54f   : > { %v6634_v0 = vpop.f32.mrf.mxu1 }
 0x552   : > { %6850 = vmatpush.bf16.msra.mxu2 %v10514_v35  ;;  %v6606_v43 = vpop.f32.mrf.mxu3 }
 0x553   : > { %v6607_v1 = vadd.f32 %v6606_v43, %v5483_v33  ;;  %v11566_v33 = vld [vmem:[%s11996_s8] sm:$0xff] }
 0x554   : > { %v6595_v22 = vpop.f32.mrf.mxu2  ;;  %v12272_v43 = vadd.f32 %v11566_v33, %v12260_v11 }
 0x555   : > { %v6620_v58 = vadd.f32 %v6619_v54, %v6607_v1  ;;  %v6621_v42 = vpop.f32.mrf.mxu0  ;;  %v11567_v1 = vld [vmem:[%s11996_s8 + $0x10] sm:$0xff] }
 0x556   : > { %6851 = vmatpush.bf16.msra.mxu2 %v10494_v21 }
 0x557   : > { %v6684_v60 = vpop.f32.mrf.mxu1  ;;  %v6633_v61 = vadd.f32 %v6632_v15, %v6620_v58 }
 0x559   : > { %6852 = vmatmul.bf16.vlgmr.msra.gmra.mxu2 %v12235_v18 }
 0x55a   : > { %v6608_v8 = vpop.f32.mrf.mxu3 }
 0x55c   : > { %v6645_v2 = vpop.f32.mrf.mxu2 }
 0x55d   : > { %v6646_v55 = vadd.f32 %v6645_v2, %v6633_v61  ;;  %v6671_v45 = vpop.f32.mrf.mxu0 }
 0x55e   : > { %v6672_v62 = vadd.f32 %v6671_v45, %v5484_v31 }
 0x55f   : > { %v6686_v41 = vpop.f32.mrf.mxu1 }
 0x560   : > { %v6685_v20 = vadd.f32 %v6684_v60, %v6672_v62  ;;  %v6876_v62 = vmul.f32 %v12272_v43, %v12272_v43 }
 0x562   : > { %v6658_v18 = vpop.f32.mrf.mxu3 }
 0x563   : > { %v6659_v3 = vadd.f32 %v6658_v18, %v6646_v55  ;;  %v11569_v55 = vld [vmem:[%s11996_s8 + $0x20] sm:$0xff] }
 0x564   : > { %v6647_v4 = vpop.f32.mrf.mxu2 }
 0x565   : > { %v6673_v6 = vpop.f32.mrf.mxu0  ;;  %v12268_v37 = vadd.f32 %v11565_v16, %v6659_v3 }
 0x567   : > { %v6862_v60 = vadd.f32 %v12268_v37, %v12272_v43  ;;  %v6877_v2 = vmul.f32 %v12268_v37, %v12268_v37 }
 0x569   : > { %v6881_v3 = vadd.f32 %v6877_v2, %v6876_v62 }
 0x56a   : > { %v6660_v10 = vpop.f32.mrf.mxu3 }
 0x577   : > { %v6736_v9 = vpop.f32.mrf.mxu1 }
 0x578   : > { %v6737_v52 = vadd.f32 %v6736_v9, %v5485_v57 }
 0x57c   : > { %v6697_v19 = vpop.f32.mrf.mxu2 }
 0x57d   : > { %v6698_v30 = vadd.f32 %v6697_v19, %v6685_v20  ;;  %v6723_v13 = vpop.f32.mrf.mxu0 }
 0x57f   : > { %v6738_v51 = vpop.f32.mrf.mxu1 }
 0x582   : > { %v6710_v14 = vpop.f32.mrf.mxu3 }
 0x583   : > { %v6711_v17 = vadd.f32 %v6710_v14, %v6698_v30  ;;  %v11839_v30 = vmov 640.0  }
 0x584   : > { %v6699_v40 = vpop.f32.mrf.mxu2  ;;  %11561 = vrcp.f32 %v11839_v30 }
 0x585   : > { %v6724_v5 = vadd.f32 %v6723_v13, %v6711_v17  ;;  %v6725_v38 = vpop.f32.mrf.mxu0 }
 0x587   : > { %v12275_v22 = vadd.f32 %v11567_v1, %v6724_v5 }
 0x589   : > { %v6863_v31 = vadd.f32 %v6862_v60, %v12275_v22  ;;  %v6878_v20 = vmul.f32 %v12275_v22, %v12275_v22 }
 0x58a   : > { %v6712_v50 = vpop.f32.mrf.mxu3  ;;  %v11562_v13 = vpop.eup %11561 }
 0x58b   : > { %v6882_v10 = vadd.f32 %v6881_v3, %v6878_v20  ;;  %v6869_v51 = vmul.f32 640.0, %v11562_v13  ;;  %vm6873_vm4 = vweird.f32 %v11562_v13 }
 0x58d   : > { %v6870_v14 = vsub.f32 1.0, %v6869_v51 }
 0x58f   : > { %v6871_v17 = vmul.f32 %v11562_v13, %v6870_v14 }
 0x591   : > { %v6872_v40 = vadd.f32 %v11562_v13, %v6871_v17 }
 0x593   : > { %v6874_v38 = vsel %vm6873_vm4, %v11562_v13, %v6872_v40 }
 0x597   : > { %v6788_v46 = vpop.f32.mrf.mxu1 }
 0x59c   : > { %v6749_v23 = vpop.f32.mrf.mxu2 }
 0x59d   : > { %v6775_v24 = vpop.f32.mrf.mxu0  ;;  %v6750_v36 = vadd.f32 %v6749_v23, %v6737_v52 }
 0x59f   : > { %v6790_v28 = vpop.f32.mrf.mxu1 }
 0x5a2   : > { %v6762_v26 = vpop.f32.mrf.mxu3 }
 0x5a3   : > { %v6763_v48 = vadd.f32 %v6762_v26, %v6750_v36 }
 0x5a4   : > { %v6751_v27 = vpop.f32.mrf.mxu2 }
 0x5a5   : > { %v6777_v12 = vpop.f32.mrf.mxu0  ;;  %v6776_v15 = vadd.f32 %v6775_v24, %v6763_v48  ;;  %v6949_v48 = vand.u32 1, %v12206_v59 }
 0x5a7   : > { %v6789_v54 = vadd.f32 %v6788_v46, %v6776_v15  ;;  %vm6957_vm8 = vcmp.eq.s32.totalorder %v6949_v48, %v12208_v47 }
 0x5a9   : > { %v12278_v42 = vadd.f32 %v11568_v25, %v6789_v54 }
 0x5aa   : > { %v6764_v56 = vpop.f32.mrf.mxu3 }
 0x5ab   : > { %v6864_v45 = vadd.f32 %v6863_v31, %v12278_v42  ;;  %v6879_v18 = vmul.f32 %v12278_v42, %v12278_v42 }
 0x5ad   : > { %v6883_v9 = vadd.f32 %v6882_v10, %v6879_v18 }
 0x5b7   : > { %v6840_v29 = vpop.f32.mrf.mxu1 }
 0x5bc   : > { %v6801_v49 = vpop.f32.mrf.mxu2 }
 0x5bd   : > { %v6827_v32 = vpop.f32.mrf.mxu0  ;;  %v6802_v21 = vadd.f32 %v6801_v49, %v5486_v39 }
 0x5bf   : > { %v6842_v34 = vpop.f32.mrf.mxu1 }
 0x5c2   : > { %v6814_v7 = vpop.f32.mrf.mxu3 }
 0x5c3   : > { %v6815_v53 = vadd.f32 %v6814_v7, %v6802_v21  ;;  %v6928_v7 = vld [vmem:[#allocation11] sm:$0x1f] }
 0x5c4   : > { %v6803_v35 = vpop.f32.mrf.mxu2  ;;  %v6930_v21 = vperm.slane %v6928_v7, 0  ;;  %v6931_v15 = vperm.slane %v6928_v7, 1 }
 0x5c5   : > { %v6829_v63 = vpop.f32.mrf.mxu0  ;;  %v6828_v0 = vadd.f32 %v6827_v32, %v6815_v53  ;;  %v6932_v53 = vperm.slane %v6928_v7, 2 }
 0x5c7   : > { %v6841_v58 = vadd.f32 %v6840_v29, %v6828_v0  ;;  %v6911_v29 = vld [vmem:[#allocation10] sm:$0x1f]  ;;  %v6933_v0 = vperm.slane %v6928_v7, 3 }
 0x5c8   : > { %v6913_v34 = vperm.slane %v6911_v29, 0  ;;  %v6914_v57 = vperm.slane %v6911_v29, 1  ;;  %v6915_v52 = vperm.slane %v6911_v29, 2  ;;  %v6916_v36 = vperm.slane %v6911_v29, 3 }
 0x5ca   : > { %v6816_v44 = vpop.f32.mrf.mxu3 }
 0x5dc   : > { %v6853_v61 = vpop.f32.mrf.mxu2 }
 0x5dd   : > { %v6854_v8 = vadd.f32 %v6853_v61, %v6841_v58  ;;  %v6934_v61 = vperm.slane %v6928_v7, 4 }
 0x5df   : > { %v12286_v11 = vadd.f32 %v11569_v55, %v6854_v8 }
 0x5e1   : > { %v6865_v41 = vadd.f32 %v6864_v45, %v12286_v11  ;;  %v6880_v6 = vmul.f32 %v12286_v11, %v12286_v11 }
 0x5e3   : > { %6866 = vadd.xlane.f32.xlu1 %v6865_v41  ;;  %v6884_v19 = vadd.f32 %v6883_v9, %v6880_v6 }
 0x5e4   : > { %v6855_v4 = vpop.f32.mrf.mxu2 }
 0x5eb   : > { %6885 = vadd.xlane.f32.xlu1 %v6884_v19 }
 0x656   : > { %v6867_v5 = vpop.xlane.xlu1 %6866 }
 0x657   : > { %v6875_v50 = vmul.f32 %v6874_v38, %v6867_v5 }
 0x659   : > { %v6888_v23 = vmul.f32 %v6875_v50, %v6875_v50  ;;  %v6890_v35 = vsub.f32 %v12272_v43, %v6875_v50  ;;  %v6891_v63 = vsub.f32 %v12268_v37, %v6875_v50  ;;  %v6892_v44 = vsub.f32 %v12275_v22, %v6875_v50 }
 0x65a   : > { %v6893_v16 = vsub.f32 %v12278_v42, %v6875_v50  ;;  %v6894_v33 = vsub.f32 %v12286_v11, %v6875_v50  ;;  %v6917_v43 = vperm.slane %v6911_v29, 4  ;;  %v11840_v11 = vmov 0.0  }
 0x65b   : > { %v6958_v18 = vsel %vm6957_vm8, 0.5, %v11840_v11 }
 0x65e   : > { %v6886_v46 = vpop.xlane.xlu1 %6885 }
 0x65f   : > { %v6887_v24 = vmul.f32 %v6886_v46, %v6874_v38 }
 0x661   : > { %v6889_v28 = vsub.f32 %v6887_v24, %v6888_v23 }
 0x663   : > { %v6895_v26 = vadd.f32 1e-05, %v6889_v28 }
 0x665   : > { %11563 = vrsqrt.f32 %v6895_v26  ;;  %vm6902_vm6 = vweird.f32 %v6895_v26 }
 0x66b   : > { %v11564_v27 = vpop.eup %11563 }
 0x66c   : > { %v6897_v12 = vmul.f32 %v11564_v27, %v6895_v26  ;;  %vm6903_vm5 = vweird.f32 %v11564_v27  ;;  %v7106_v26 = vand.u32 1, %v12208_v47 }
 0x66d   : > { %vm6904_vm7 = vmor %vm6902_vm6, %vm6903_vm5 }
 0x66e   : > { %v6898_v56 = vmul.f32 %v11564_v27, %v6897_v12  ;;  %vm7114_vm11 = vcmp.eq.s32.totalorder %v7106_v26, %v12206_v59 }
 0x670   : > { %v6899_v49 = vmul.f32 0.5, %v6898_v56 }
 0x672   : > { %v6900_v32 = vsub.f32 1.5, %v6899_v49 }
 0x674   : > { %v6901_v39 = vmul.f32 %v11564_v27, %v6900_v32 }
 0x676   : > { %v6905_v54 = vsel %vm6904_vm7, %v11564_v27, %v6901_v39  ;;  %v7115_v27 = vsel %vm7114_vm11, 0.5, %v11840_v11 }
 0x677   : > { %v6906_v37 = vmul.f32 %v6905_v54, %v6890_v35  ;;  %v6907_v1 = vmul.f32 %v6905_v54, %v6891_v63  ;;  %v6908_v58 = vmul.f32 %v6905_v54, %v6892_v44  ;;  %v6909_v25 = vmul.f32 %v6905_v54, %v6893_v16 }
 0x678   : > { %v6910_v60 = vmul.f32 %v6905_v54, %v6894_v33 }
 0x679   : > { %v6923_v22 = vmul.f32 %v6913_v34, %v6906_v37  ;;  %v6924_v8 = vmul.f32 %v6914_v57, %v6907_v1  ;;  %v6925_v31 = vmul.f32 %v6915_v52, %v6908_v58  ;;  %v6926_v2 = vmul.f32 %v6916_v36, %v6909_v25 }
 0x67a   : > { %v6927_v55 = vmul.f32 %v6917_v43, %v6910_v60 }
 0x67b   : > { %v6940_v45 = vadd.f32 %v6930_v21, %v6923_v22  ;;  %v6941_v42 = vadd.f32 %v6931_v15, %v6924_v8  ;;  %v6942_v62 = vadd.f32 %v6932_v53, %v6925_v31  ;;  %v6943_v41 = vadd.f32 %v6933_v0, %v6926_v2 }
 0x67c   : > { %v6944_v20 = vadd.f32 %v6934_v61, %v6927_v55  ;;  %v7247_v22 = vsel %vm7246_vm14, 1.0, %v11840_v11 }
 0x67d   : > { %6989 = vmatpush.xpose.msrb.mxu3 %v6940_v45  ;;  %7009 = vmatpush.xpose.msrb.mxu0 %v6941_v42  ;;  %v6964_v3 = vrot.slane %v6940_v45, 4  ;;  %v6965_v4 = vrot.slane %v6941_v42, 4  ;;  %v6966_v6 = vrot.slane %v6942_v62, 4  ;;  %v7256_v10 = vmul.f32 %v6940_v45, %v6940_v45 }
 0x67e   : > { %7029 = vmatpush.xpose.msrb.mxu1 %v6942_v62  ;;  %v7257_v9 = vmul.f32 %v6941_v42, %v6941_v42  ;;  %v7258_v19 = vmul.f32 %v6942_v62, %v6942_v62  ;;  %v7259_v30 = vmul.f32 %v6943_v41, %v6943_v41  ;;  %v7260_v17 = vmul.f32 %v6944_v20, %v6944_v20 }
 0x67f   : > { %v7262_v13 = vsel %vm7261_vm10, %v7256_v10, 0.0  ;;  %v6967_v46 = vrot.slane %v6943_v41, 4  ;;  %v6968_v23 = vrot.slane %v6944_v20, 4 }
 0x680   : > { %6990 = vmatmul.f32.vlgmr.msrb.gmra.mxu3 %v6964_v3  ;;  %7010 = vmatmul.f32.vlgmr.msrb.gmra.mxu0 %v6965_v4  ;;  %v7263_v51 = vsel %vm7261_vm10, %v7257_v9, 0.0  ;;  %v7265_v40 = vsel %vm7261_vm10, %v7258_v19, 0.0  ;;  %v7267_v38 = vsel %vm7261_vm10, %v7259_v30, 0.0  ;;  %v7269_v24 = vsel %vm7261_vm10, %v7260_v17, 0.0 }
 0x681   : > { %7049 = vmatpush.xpose.msra.mxu3 %v6943_v41  ;;  %7069 = vmatpush.xpose.msra.mxu0 %v6944_v20  ;;  %v7264_v14 = vadd.f32 %v7263_v51, %v7262_v13 }
 0x682   : > { %10635 = vmatpush.msk.msra.mxu1 %vm7078_vm9, %v6958_v18 }
 0x683   : > { %7030 = vmatmul.f32.vlgmr.msrb.gmra.mxu1 %v6966_v6  ;;  %v7266_v5 = vadd.f32 %v7265_v40, %v7264_v14 }
 0x684   : > { %10641 = vmatpush.msk.msrb.mxu1 %vm7078_vm9, %v6942_v62 }
 0x685   : > { %10637 = vmatpush.msk.msrb.mxu3 %vm7078_vm9, %v6940_v45  ;;  %10639 = vmatpush.msk.msrb.mxu0 %vm7078_vm9, %v6941_v42  ;;  %v7268_v50 = vadd.f32 %v7267_v38, %v7266_v5 }
 0x687   : > { %v7270_v28 = vadd.f32 %v7269_v24, %v7268_v50 }
 0x688   : > { %7050 = vmatmul.f32.vlgmr.msra.gmra.mxu3 %v6967_v46  ;;  %7070 = vmatmul.f32.vlgmr.msra.gmra.mxu0 %v6968_v23 }
 0x689   : > { %10643 = vmatpush.msk.msra.mxu3 %vm7078_vm9, %v6943_v41  ;;  %10645 = vmatpush.msk.msra.mxu0 %vm7078_vm9, %v6944_v20 }
 0x690   : > { %10638 = vmatmul.msk.f32.vlgmr.msrb.gmra.mxu3 %vm7074_vm12, %v7115_v27  ;;  %10640 = vmatmul.msk.f32.vlgmr.msrb.gmra.mxu0 %vm7074_vm12, %v7115_v27 }
 0x698   : > { %10644 = vmatmul.msk.f32.vlgmr.msra.gmra.mxu3 %vm7074_vm12, %v7115_v27  ;;  %10646 = vmatmul.msk.f32.vlgmr.msra.gmra.mxu0 %vm7074_vm12, %v7115_v27 }
 0x6fd   : > { %v7011_v12 = vpop.f32.mrf.mxu0 }
 0x700   : > { %v7031_v49 = vpop.f32.mrf.mxu1 }
 0x703   : > { %v6991_v56 = vpop.f32.mrf.mxu3 }
 0x704   : > { %v7012_v29 = vadd.f32 %v7011_v12, %v6991_v56 }
 0x705   : > { %v7071_v57 = vpop.f32.mrf.mxu0 }
 0x706   : > { %v7032_v32 = vadd.f32 %v7031_v49, %v7012_v29 }
 0x70b   : > { %v7051_v34 = vpop.f32.mrf.mxu3 }
 0x70c   : > { %v7052_v7 = vadd.f32 %v7051_v34, %v7032_v32 }
 0x70d   : > { %v7166_v52 = vpop.f32.mrf.mxu0 }
 0x70e   : > { %v7072_v35 = vadd.f32 %v7071_v57, %v7052_v7  ;;  %v7230_v44 = vmul.f32 %v7166_v52, %v7166_v52 }
 0x710   : > { %10636 = vmatmul.msk.f32.vlgmr.msra.gmra.mxu1 %vm7074_vm12, %v7072_v35  ;;  %v7236_v53 = vsel %vm7234_vm13, %v7230_v44, 0.0 }
 0x713   : > { %v7146_v63 = vpop.f32.mrf.mxu3 }
 0x714   : > { %v7229_v39 = vmul.f32 %v7146_v63, %v7146_v63 }
 0x715   : > { %v7226_v21 = vpop.f32.mrf.mxu0 }
 0x716   : > { %v7235_v15 = vsel %vm7234_vm13, %v7229_v39, 0.0  ;;  %v7233_v33 = vmul.f32 %v7226_v21, %v7226_v21 }
 0x717   : > { %v7237_v43 = vadd.f32 %v7236_v53, %v7235_v15 }
 0x718   : > { %10642 = vmatmul.msk.f32.vlgmr.msrb.gmra.mxu1 %vm7074_vm12, %v7115_v27  ;;  %v7242_v25 = vsel %vm7234_vm13, %v7233_v33, 0.0 }
 0x71b   : > { %v7206_v48 = vpop.f32.mrf.mxu3 }
 0x71c   : > { %v7232_v16 = vmul.f32 %v7206_v48, %v7206_v48 }
 0x71e   : > { %v7240_v1 = vsel %vm7234_vm13, %v7232_v16, 0.0 }
 0x78d   : > { %v7099_v36 = vpop.f32.mrf.mxu1 }
 0x78e   : > { %v7273_v59 = vmul.f32 2.0, %v7099_v36 }
 0x795   : > { %v7186_v54 = vpop.f32.mrf.mxu1 }
 0x796   : > { %v7231_v0 = vmul.f32 %v7186_v54, %v7186_v54 }
 0x798   : > { %v7238_v37 = vsel %vm7234_vm13, %v7231_v0, 0.0 }
 0x799   : > { %v7239_v58 = vadd.f32 %v7238_v37, %v7237_v43 }
 0x79b   : > { %v7241_v60 = vadd.f32 %v7240_v1, %v7239_v58 }
 0x79d   : > { %v7243_v61 = vadd.f32 %v7242_v25, %v7241_v60 }
 0x79f   : > { %7244 = vadd.xlane.f32.xlu2 %v7243_v61 }
 0x7a7   : > { %7271 = vadd.xlane.f32.xlu2 %v7270_v28 }
 0x812   : > { %v7245_v8 = vpop.xlane.xlu2 %7244 }
 0x813   : > { %v7248_v31 = vmul.f32 %v7247_v22, %v7245_v8 }
 0x815   : > { %v7249_v2 = vsel %vm7234_vm13, %v7248_v31, 0.0 }
 0x816   : > { %v7250_v55 = vrot.slane %v7249_v2, 4 }
 0x818   : > { %v7251_v45 = vadd.f32 %v7250_v55, %v7249_v2 }
 0x81a   : > { %v7252_v42 = vrot.slane %v7251_v45, 2  ;;  %v7272_v62 = vpop.xlane.xlu2 %7271 }
 0x81b   : > { %v7275_v20 = vrot.slane %v7272_v62, 4 }
 0x81c   : > { %v7253_v41 = vadd.f32 %v7252_v42, %v7251_v45 }
 0x81d   : > { %v7277_v18 = vsub.f32 %v7273_v59, %v7275_v20 }
 0x81e   : > { %v7254_v47 = vrot.slane %v7253_v41, 1 }
 0x820   : > { %v7255_v11 = vadd.f32 %v7254_v47, %v7253_v41 }
 0x822   : > { %v7278_v3 = vsub.f32 %v7277_v18, %v7255_v11 }
 0x824   : > { %7279 = vst [vmem:[%s346_s12] sm:$0xf] %v7278_v3 }
 0x825   : > { %11777 = shalt.err (!%p11774_p8)
}
 0x826   : > { %11476 = dma.vmem_to_hbm [thread:$0]  (%p11961_p13), %s7294_s13, 64, %s7296_s14, %s7281_s28  }
 0x827 PF: > { %p11513_p9 = scmp.ge.s32.totalorder %s11828_s24, 2  ;;  %s7307_s26 = sand.u32 1, %s11816_s21  }
 0x828   : > { %s7308_s2 = scalar_lea.sflag [#allocation4], %s7307_s26 }
 0x829   : > { %p11499_p10 = pnand %p11513_p9, %p11967_p4 }
 0x82b   : > { %p11500_p11 = pneg %p11499_p10 }
 0x82d   : > { %11811 = dma.done.wait (%p11500_p11), %s7308_s2, 64  }
 0x82e   : > { %11813 = vsyncadd (%p11500_p11), %s7308_s2, 4294967232  ;;  %p22_p0 = scmp.ge.s32.totalorder %s11941_s17, 5   ;;  %s12387_s21 = smov %s11820_s22 }
 0x82f   : > { %s12388_s22 = smov %s11824_s23  ;;  %s12389_s23 = smov %s11953_s20 }
 0x830   : > { %s12390_s24 = smov %s11941_s17  ;;  %24 = sbr.rel (!%p22_p0) target bundleno = 12 (0xc), region = 109 }
 0x835   :  { %7314 = vsyncpa [#allocation3], 1 }
 0x836   :  { %7316 = vsyncpa [#allocation3 + $0x1], 1 }
 0x837   :  { %7317 = vsyncpa [#allocation6], 1 }
 0x838   :  { %7318 = vsyncpa [#allocation9], 1 }
 0x839   :  { %7319 = vsyncpa [#allocation12], 1 }
 0x83a   :  { %7320 = vsyncpa [#allocation4], 1 }
 0x83b   :  { %7322 = vsyncpa [#allocation4 + $0x1], 1 }

</bundles_post_ra>
